<compile_context>
chip_gen: v7x
topology: tpu7x:2x2x1
jax: 0.10.0
libtpu: 0.0.40
codegen_flags: <defaults>
</compile_context>

<pallas_src>
import functools

import jax
import jax.numpy as jnp
from jax import lax
from jax.experimental import pallas as pl
from jax.experimental.pallas import tpu as pltpu


def _round_up(x, m):
    return (x + m - 1) // m * m


_VMEM_CAP_CACHE = [None]


def _vmem_cap_bytes():
    """Physical per-core VMEM (chip-aware), with a conservative fallback."""
    if _VMEM_CAP_CACHE[0] is not None:
        return _VMEM_CAP_CACHE[0]
    cap = 64 * 1024 * 1024          # v7x per-core size; safe lower bound
    try:
        info = pltpu.get_tpu_info()
        c = int(getattr(info, "vmem_capacity_bytes", 0) or 0)
        if c > 0:
            cap = c
    except Exception:
        pass
    _VMEM_CAP_CACHE[0] = cap
    return cap


# --------------------------------------------------------------------------
# Fused norm block:  Conv(3x3) matmul (bf16 MXU, f32 acc)  ->  InstanceNorm
# (affine=False, eps=1e-5, biased var)  ->  LeakyReLU(0.2).
#
#   x_ref   : (TP, Kp) bf16  patch tile (streamed over the P axis)
#   w_ref   : (Kp, Cp) bf16  weight (resident)
#   o_ref   : (Pp, Cp) bf16  output block, resident across the P-tile axis,
#                            written only on the last P tile.
#   y_ref   : (Pp, Cp) f32   VMEM scratch holding the pre-norm activations
#   sum_ref : (1,  Cp) f32   running per-channel sum
# --------------------------------------------------------------------------
def _fused_conv_in_lrelu_kernel(x_ref, w_ref, o_ref, y_ref, sum_ref,
                                *, TP, P, inv_p, eps, neg_slope):
    pt = pl.program_id(1)
    n_pt = pl.num_programs(1)

    @pl.when(pt == 0)
    def _init():
        sum_ref[...] = jnp.zeros(sum_ref.shape, sum_ref.dtype)

    # MXU matmul for this P tile; keep the result resident in VMEM scratch.
    y = jnp.dot(x_ref[...], w_ref[...], preferred_element_type=jnp.float32)
    off = pl.multiple_of(pt * TP, TP)
    y_ref[pl.ds(off, TP), :] = y
    sum_ref[...] += jnp.sum(y, axis=0, keepdims=True)

    @pl.when(pt == n_pt - 1)
    def _finalize():
        mean = sum_ref[...] * inv_p                              # (1, Cp)

        # Centered variance sweep over the VMEM-resident y (avoids the
        # E[y^2]-E[y]^2 cancellation flagged in the review).  Rows >= P are
        # zero-padded patch rows -> masked out of the statistics.
        def var_body(i, acc):
            roff = pl.multiple_of(i * TP, TP)
            d = y_ref[pl.ds(roff, TP), :] - mean
            row = roff + lax.broadcasted_iota(jnp.int32, (TP, 1), 0)
            d = jnp.where(row < P, d, 0.0)
            return acc + jnp.sum(d * d, axis=0, keepdims=True)

        ssq = lax.fori_loop(0, n_pt, var_body,
                            jnp.zeros(sum_ref.shape, sum_ref.dtype))
        scale = lax.rsqrt(ssq * inv_p + eps)                     # EUP rsqrt

        # Normalize + LeakyReLU sweep, writing the resident output block.
        def norm_body(i, carry):
            roff = pl.multiple_of(i * TP, TP)
            t = (y_ref[pl.ds(roff, TP), :] - mean) * scale
            o_ref[pl.ds(roff, TP), :] = jnp.where(
                t >= 0, t, neg_slope * t).astype(o_ref.dtype)
            return carry

        lax.fori_loop(0, n_pt, norm_body, 0)


# --------------------------------------------------------------------------
# Final Cout=1 layer: VPU multiply-reduce + bias, narrow f32 output.
#   x_ref: (TP, Kp) bf16   w_ref: (1, Kp) f32   b_ref: (1, 1) f32
#   o_ref: (TP, 1) f32
# --------------------------------------------------------------------------
def _conv1x_out_kernel(x_ref, w_ref, b_ref, o_ref):
    x = x_ref[...].astype(jnp.float32)
    y = jnp.sum(x * w_ref[...], axis=-1, keepdims=True)     # (TP, 1)
    o_ref[...] = (y + b_ref[...]).astype(o_ref.dtype)


# --------------------------------------------------------------------------
# One block: Conv2d(k=3, stride, pad=1) [+ InstanceNorm2d + LeakyReLU(0.2)]
#   x_nhwc : (B, H, W, Cin)     w : (Cout, Cin, 3, 3)     b : (Cout,)
# --------------------------------------------------------------------------
def conv_block(x_nhwc, w, b, stride, has_norm_act):
    B, H, W, Cin = x_nhwc.shape
    Cout = w.shape[0]
    Hout = (H - 1) // stride + 1
    Wout = (W - 1) // stride + 1
    P = Hout * Wout
    K = 9 * Cin

    cap = _vmem_cap_bytes()

    # K only sublane-aligned (no 9 -> 128 inflation on the Cin=1 layer).
    Kp = _round_up(K, 8)
    # Lane-dense output channels for the norm layers (incl. the MXU N dim).
    Cp = _round_up(Cout, 128)

    # P-tile rows: multiple of 8; larger cap on chips with 128 MiB VMEM.
    tp_cap = 1024 if cap >= (96 << 20) else 512
    TP = min(tp_cap, _round_up(P, 8))
    Pp = _round_up(P, TP)
    n_pt = Pp // TP

    # ---- im2col (XLA glue): pad=1, 9 taps in (ky, kx, cin) order, bf16. ----
    # TODO(synk): still materializes ~9x the activation bytes on stride-1
    # layers; in-kernel tap/halo formulation not implemented.
    xp = jnp.pad(x_nhwc, ((0, 0), (1, 1), (1, 1), (0, 0)))
    cols = [xp[:, ky:ky + stride * Hout:stride,
                  kx:kx + stride * Wout:stride, :]
            for ky in range(3) for kx in range(3)]
    patches = jnp.concatenate(cols, axis=-1).reshape(B, P, K)
    patches = patches.astype(jnp.bfloat16)
    if Pp > P or Kp > K:
        patches = jnp.pad(patches, ((0, 0), (0, Pp - P), (0, Kp - K)))

    # Weight (Cout,Cin,3,3) -> (3,3,Cin,Cout) -> (K,Cout)  [matches tap order]
    w2 = jnp.transpose(w, (2, 3, 1, 0)).reshape(K, Cout)

    x_spec = pl.BlockSpec((None, TP, Kp), lambda bb, pp: (bb, pp, 0))

    if has_norm_act:
        # Conv bias dropped on purpose: InstanceNorm2d(affine=False) cancels
        # it exactly and keeps zero-padded patch rows neutral in the stats.
        w2p = jnp.pad(w2, ((0, Kp - K), (0, Cp - Cout))).astype(jnp.bfloat16)

        # VMEM plan: f32 pre-norm scratch (resident) + double-buffered bf16
        # output block + double-buffered patch tile + weight block (x2).
        vmem_need = (Pp * Cp * 4            # y_full scratch
                     + 2 * Pp * Cp * 2      # output block (2 buffers)
                     + 2 * TP * Kp * 2      # patch tile (2 buffers)
                     + 2 * Kp * Cp * 2      # weight block (2 buffers)
                     + 8 * Cp * 4)          # stats / small
        vmem_limit = int(min(max(vmem_need + (4 << 20), 32 << 20),
                             int(cap * 0.9)))

        out = pl.pallas_call(
            functools.partial(_fused_conv_in_lrelu_kernel, TP=TP, P=P,
                              inv_p=1.0 / P, eps=1e-5, neg_slope=0.2),
            grid=(B, n_pt),
            in_specs=[x_spec,
                      pl.BlockSpec((Kp, Cp), lambda bb, pp: (0, 0))],
            out_specs=pl.BlockSpec((None, Pp, Cp), lambda bb, pp: (bb, 0, 0)),
            out_shape=jax.ShapeDtypeStruct((B, Pp, Cp), jnp.bfloat16),
            scratch_shapes=[pltpu.VMEM((Pp, Cp), jnp.float32),
                            pltpu.VMEM((1, Cp), jnp.float32)],
            compiler_params=pltpu.CompilerParams(
                dimension_semantics=("parallel", "arbitrary"),
                vmem_limit_bytes=vmem_limit),
        )(patches, w2p)
    else:
        # Final Cout=1 layer: VPU reduce, narrow output (no 128x padded store).
        w_row = jnp.pad(w2.reshape(1, K),
                        ((0, 0), (0, Kp - K))).astype(jnp.float32)
        b11 = b.reshape(1, 1).astype(jnp.float32)
        vmem_need = 2 * TP * Kp * 2 + 2 * Kp * 4 + 2 * TP * 4
        vmem_limit = int(min(max(vmem_need + (4 << 20), 32 << 20),
                             int(cap * 0.9)))

        out = pl.pallas_call(
            _conv1x_out_kernel,
            grid=(B, n_pt),
            in_specs=[x_spec,
                      pl.BlockSpec((1, Kp), lambda bb, pp: (0, 0)),
                      pl.BlockSpec((1, 1), lambda bb, pp: (0, 0))],
            out_specs=pl.BlockSpec((None, TP, 1), lambda bb, pp: (bb, pp, 0)),
            out_shape=jax.ShapeDtypeStruct((B, Pp, 1), jnp.float32),
            compiler_params=pltpu.CompilerParams(
                dimension_semantics=("parallel", "parallel"),
                vmem_limit_bytes=vmem_limit),
        )(patches, w_row, b11)

    return out[:, :P, :Cout].reshape(B, Hout, Wout, Cout)


# --------------------------------------------------------------------------
# Discriminator: parameter construction + forward
# --------------------------------------------------------------------------
def make_layer_cfg(input_nc=1, ndf=64):
    # (in_ch, out_ch, stride, has_norm_and_act); tuple-of-tuples => hashable.
    return (
        (input_nc, ndf, 2, True),
        (ndf, ndf, 1, True),
        (ndf, ndf * 2, 2, True),
        (ndf * 2, ndf * 2, 1, True),
        (ndf * 2, ndf * 4, 2, True),
        (ndf * 4, ndf * 4, 1, True),
        (ndf * 4, ndf * 8, 2, True),
        (ndf * 8, ndf * 8, 1, True),
        (ndf * 8, ndf * 8, 2, True),
        (ndf * 8, ndf * 8, 1, True),
        (ndf * 8, 1, 1, False),          # final conv, no norm / act
    )


def init_params(key, cfg):
    params = []
    for (cin, cout, _, _) in cfg:
        key, kw, kb = jax.random.split(key, 3)
        w = 0.05 * jax.random.normal(kw, (cout, cin, 3, 3), jnp.float32)
        b = 0.05 * jax.random.normal(kb, (cout,), jnp.float32)
        params.append((w, b))
    return params


def discriminator_forward(x_nchw, params, cfg):
    # NCHW -> NHWC, bf16 activations between layers (matmul acc stays f32).
    x = jnp.transpose(x_nchw, (0, 2, 3, 1)).astype(jnp.bfloat16)
    for (w, b), (_, _, stride, has_na) in zip(params, cfg):
        x = conv_block(x, w, b, stride, has_norm_act=has_na)
    # NHWC -> NCHW (final layer already produced f32)
    return jnp.transpose(x, (0, 3, 1, 2)).astype(jnp.float32)


# --------------------------------------------------------------------------
# Pure-JAX f32 reference (for correctness check)
# --------------------------------------------------------------------------
def reference_forward(x_nchw, params, cfg):
    x = x_nchw.astype(jnp.float32)
    for (w, b), (_, _, stride, has_na) in zip(params, cfg):
        y = lax.conv_general_dilated(
            x, w, window_strides=(stride, stride), padding=((1, 1), (1, 1)),
            dimension_numbers=("NCHW", "OIHW", "NCHW"))
        y = y + b.reshape(1, -1, 1, 1)
        if has_na:
            mean = jnp.mean(y, axis=(2, 3), keepdims=True)
            var = jnp.mean((y - mean) ** 2, axis=(2, 3), keepdims=True)
            y = (y - mean) * lax.rsqrt(var + 1e-5)
            y = jnp.where(y >= 0, y, 0.2 * y)
        x = y
    return x


if __name__ == "__main__":
    # Small but non-degenerate: B=2, input_nc=1, 64x64, ndf=8.  The first two
    # layers use 2 P-tiles, exercising the fused accumulate/finalize path.
    key = jax.random.PRNGKey(0)
    key, kx = jax.random.split(key)
    x = jax.random.normal(kx, (2, 1, 64, 64), jnp.float32)

    cfg = make_layer_cfg(input_nc=1, ndf=8)
    params = init_params(key, cfg)

    fwd = jax.jit(discriminator_forward, static_argnums=(2,))
    out = jax.block_until_ready(fwd(x, params, cfg))

    ref = jax.block_until_ready(reference_forward(x, params, cfg))
    assert out.shape == ref.shape == (2, 1, 2, 2), out.shape

    # bf16 MXU inputs + bf16 inter-layer activations across 11 layers =>
    # compare with a relative L2 tolerance instead of elementwise 1e-3.
    num = jnp.sqrt(jnp.sum((out - ref) ** 2))
    den = jnp.sqrt(jnp.sum(ref ** 2)) + 1e-8
    rel = float(num / den)
    assert rel < 1e-1, (rel, out, ref)

    print("KERNEL_OK")
</pallas_src>

<mosaic_0001>
module attributes {stable_mosaic.version = 11 : i64} {
  func.func @_fused_conv_in_lrelu_kernel(%arg0: i32, %arg1: i32, %arg2: memref<1x512x16xbf16, #tpu.memory_space<vmem>>, %arg3: memref<16x128xbf16, #tpu.memory_space<vmem>>, %arg4: memref<1x1024x128xbf16, #tpu.memory_space<vmem>>, %arg5: memref<1024x128xf32, #tpu.memory_space<vmem>>, %arg6: memref<1x128xf32, #tpu.memory_space<vmem>>) attributes {dimension_semantics = [#tpu.dimension_semantics<parallel>, #tpu.dimension_semantics<arbitrary>], iteration_bounds = array<i64: 2, 2>, scalar_prefetch = 0 : i64, scratch_operands = 2 : i64, tpu.core_type = #tpu.core_type<tc>, window_params = [{transform_indices = @transform_0, window_bounds = array<i64: 1, 512, 16>}, {pipeline_mode = #tpu.pipeline_mode<synchronous>, transform_indices = @transform_1, window_bounds = array<i64: 16, 128>}, {transform_indices = @transform_2, window_bounds = array<i64: 1, 1024, 128>}]} {
    %c0_i32 = arith.constant 0 : i32
    %0 = arith.cmpi eq, %arg1, %c0_i32 : i32
    %1 = arith.extui %0 : i1 to i32
    %c0_i32_0 = arith.constant 0 : i32
    %2 = arith.cmpi ne, %1, %c0_i32_0 : i32
    scf.if %2 {
      %cst_12 = arith.constant 0.000000e+00 : f32
      %19 = vector.broadcast %cst_12 : f32 to vector<1x128xf32>
      %c0_13 = arith.constant 0 : index
      %c0_14 = arith.constant 0 : index
      %20 = vector.load %arg6[%c0_13, %c0_14] : memref<1x128xf32, #tpu.memory_space<vmem>>, vector<1x128xf32>
      tpu.vector_store %arg6[%c0_13, %c0_14], %19 {strides = array<i32>} : memref<1x128xf32, #tpu.memory_space<vmem>>, vector<1x128xf32>,
    } else {
    }
    %c0 = arith.constant 0 : index
    %c0_1 = arith.constant 0 : index
    %c0_2 = arith.constant 0 : index
    %3 = vector.load %arg2[%c0, %c0_1, %c0_2] : memref<1x512x16xbf16, #tpu.memory_space<vmem>>, vector<1x512x16xbf16>
    %4 = vector.shape_cast %3 : vector<1x512x16xbf16> to vector<512x16xbf16>
    %c0_3 = arith.constant 0 : index
    %c0_4 = arith.constant 0 : index
    %5 = vector.load %arg3[%c0_3, %c0_4] : memref<16x128xbf16, #tpu.memory_space<vmem>>, vector<16x128xbf16>
    %cst = arith.constant dense<0.000000e+00> : vector<512x128xf32>
    %6 = tpu.matmul %4, %5, %cst {dimension_numbers = #tpu.dot_dimension_numbers<[1], [0], [0], [1], [0, 0, 1, 1], [], []>} : vector<512x16xbf16>, vector<16x128xbf16>, vector<512x128xf32> -> vector<512x128xf32>
    %c512_i32 = arith.constant 512 : i32
    %7 = arith.muli %arg1, %c512_i32 : i32
    %8 = tpu.assume_multiple %7, 512 : i32
    %9 = arith.index_cast %8 : i32 to index
    %c0_5 = arith.constant 0 : index
    %10 = vector.load %arg5[%9, %c0_5] : memref<1024x128xf32, #tpu.memory_space<vmem>>, vector<512x128xf32>
    tpu.vector_store %arg5[%9, %c0_5], %6 {strides = array<i32>} : memref<1024x128xf32, #tpu.memory_space<vmem>>, vector<512x128xf32>,
    %c0_6 = arith.constant 0 : index
    %c0_7 = arith.constant 0 : index
    %11 = vector.load %arg6[%c0_6, %c0_7] : memref<1x128xf32, #tpu.memory_space<vmem>>, vector<1x128xf32>
    %cst_8 = arith.constant dense<0.000000e+00> : vector<128xf32>
    %12 = vector.multi_reduction <add>, %6, %cst_8 [0] : vector<512x128xf32> to vector<128xf32>
    %13 = vector.shape_cast %12 : vector<128xf32> to vector<1x128xf32>
    %14 = arith.addf %11, %13 : vector<1x128xf32>
    %c0_9 = arith.constant 0 : index
    %c0_10 = arith.constant 0 : index
    %15 = vector.load %arg6[%c0_9, %c0_10] : memref<1x128xf32, #tpu.memory_space<vmem>>, vector<1x128xf32>
    tpu.vector_store %arg6[%c0_9, %c0_10], %14 {strides = array<i32>} : memref<1x128xf32, #tpu.memory_space<vmem>>, vector<1x128xf32>,
    %c1_i32 = arith.constant 1 : i32
    %16 = arith.cmpi eq, %arg1, %c1_i32 : i32
    %17 = arith.extui %16 : i1 to i32
    %c0_i32_11 = arith.constant 0 : i32
    %18 = arith.cmpi ne, %17, %c0_i32_11 : i32
    scf.if %18 {
      %c0_12 = arith.constant 0 : index
      %c0_13 = arith.constant 0 : index
      %19 = vector.load %arg6[%c0_12, %c0_13] : memref<1x128xf32, #tpu.memory_space<vmem>>, vector<1x128xf32>
      %cst_14 = arith.constant 9.765625E-4 : f32
      %20 = vector.broadcast %cst_14 : f32 to vector<1x128xf32>
      %21 = arith.mulf %19, %20 : vector<1x128xf32>
      %cst_15 = arith.constant 0.000000e+00 : f32
      %22 = vector.broadcast %cst_15 : f32 to vector<1x128xf32>
      %c0_i32_16 = arith.constant 0 : i32
      %c2_i32 = arith.constant 2 : i32
      %23 = arith.addi %c0_i32_16, %c2_i32 : i32
      %c1_i32_17 = arith.constant 1 : i32
      %24 = scf.for %arg7 = %c0_i32_16 to %23 step %c1_i32_17 iter_args(%arg8 = %22) -> (vector<1x128xf32>)  : i32 {
        %c512_i32_25 = arith.constant 512 : i32
        %31 = arith.muli %arg7, %c512_i32_25 : i32
        %32 = tpu.assume_multiple %31, 512 : i32
        %33 = arith.index_cast %32 : i32 to index
        %c0_26 = arith.constant 0 : index
        %34 = vector.load %arg5[%33, %c0_26] : memref<1024x128xf32, #tpu.memory_space<vmem>>, vector<512x128xf32>
        %35 = vector.broadcast %21 : vector<1x128xf32> to vector<512x128xf32>
        %36 = arith.subf %34, %35 : vector<512x128xf32>
        %37 = tpu.iota {dimensions = array<i32: 0>} : vector<512x1xi32>
        %38 = vector.broadcast %32 : i32 to vector<512x1xi32>
        %39 = arith.addi %38, %37 : vector<512x1xi32>
        %c1024_i32 = arith.constant 1024 : i32
        %40 = vector.broadcast %c1024_i32 : i32 to vector<512x1xi32>
        %41 = arith.cmpi slt, %39, %40 : vector<512x1xi32>
        %cst_27 = arith.constant 0.000000e+00 : f32
        %42 = vector.shape_cast %41 : vector<512x1xi1> to vector<512x1xi1>
        %43 = vector.broadcast %42 : vector<512x1xi1> to vector<512x128xi1>
        %44 = vector.broadcast %cst_27 : f32 to vector<512x128xf32>
        %45 = arith.select %43, %36, %44 : vector<512x128xi1>, vector<512x128xf32>
        %46 = arith.mulf %45, %45 : vector<512x128xf32>
        %cst_28 = arith.constant dense<0.000000e+00> : vector<128xf32>
        %47 = vector.multi_reduction <add>, %46, %cst_28 [0] : vector<512x128xf32> to vector<128xf32>
        %48 = vector.shape_cast %47 : vector<128xf32> to vector<1x128xf32>
        %49 = arith.addf %arg8, %48 : vector<1x128xf32>
        scf.yield %49 : vector<1x128xf32>
      }
      %c2_i32_18 = arith.constant 2 : i32
      %cst_19 = arith.constant 9.765625E-4 : f32
      %25 = vector.broadcast %cst_19 : f32 to vector<1x128xf32>
      %26 = arith.mulf %24, %25 : vector<1x128xf32>
      %cst_20 = arith.constant 9.99999974E-6 : f32
      %27 = vector.broadcast %cst_20 : f32 to vector<1x128xf32>
      %28 = arith.addf %26, %27 : vector<1x128xf32>
      %29 = math.rsqrt %28 : vector<1x128xf32>
      %c0_i32_21 = arith.constant 0 : i32
      %c2_i32_22 = arith.constant 2 : i32
      %30 = arith.addi %c0_i32_21, %c2_i32_22 : i32
      %c1_i32_23 = arith.constant 1 : i32
      scf.for %arg7 = %c0_i32_21 to %30 step %c1_i32_23  : i32 {
        %c512_i32_25 = arith.constant 512 : i32
        %31 = arith.muli %arg7, %c512_i32_25 : i32
        %32 = tpu.assume_multiple %31, 512 : i32
        %33 = arith.index_cast %32 : i32 to index
        %c0_26 = arith.constant 0 : index
        %34 = vector.load %arg5[%33, %c0_26] : memref<1024x128xf32, #tpu.memory_space<vmem>>, vector<512x128xf32>
        %35 = vector.broadcast %21 : vector<1x128xf32> to vector<512x128xf32>
        %36 = arith.subf %34, %35 : vector<512x128xf32>
        %37 = vector.broadcast %29 : vector<1x128xf32> to vector<512x128xf32>
        %38 = arith.mulf %36, %37 : vector<512x128xf32>
        %cst_27 = arith.constant 0.000000e+00 : f32
        %39 = vector.broadcast %cst_27 : f32 to vector<512x128xf32>
        %40 = arith.cmpf oge, %38, %39 : vector<512x128xf32>
        %cst_28 = arith.constant 2.000000e-01 : f32
        %41 = vector.broadcast %cst_28 : f32 to vector<512x128xf32>
        %42 = arith.mulf %41, %38 : vector<512x128xf32>
        %43 = arith.select %40, %38, %42 : vector<512x128xi1>, vector<512x128xf32>
        %44 = arith.truncf %43 : vector<512x128xf32> to vector<512x128xbf16>
        %c0_29 = arith.constant 0 : index
        %45 = arith.index_cast %32 : i32 to index
        %c0_30 = arith.constant 0 : index
        %46 = vector.load %arg4[%c0_29, %45, %c0_30] : memref<1x1024x128xbf16, #tpu.memory_space<vmem>>, vector<1x512x128xbf16>
        %47 = vector.shape_cast %46 : vector<1x512x128xbf16> to vector<512x128xbf16>
        %48 = vector.shape_cast %44 : vector<512x128xbf16> to vector<1x512x128xbf16>
        tpu.vector_store %arg4[%c0_29, %45, %c0_30], %48 {strides = array<i32>} : memref<1x1024x128xbf16, #tpu.memory_space<vmem>>, vector<1x512x128xbf16>,
      }
      %c2_i32_24 = arith.constant 2 : i32
    } else {
    }
    return
  }
  func.func @transform_0(%arg0: i32, %arg1: i32) -> (i32, i32, i32) {
    %c0_i32 = arith.constant 0 : i32
    %c0_i32_0 = arith.constant 0 : i32
    return %arg0, %arg1, %c0_i32 : i32, i32, i32
  }
  func.func @transform_1(%arg0: i32, %arg1: i32) -> (i32, i32) {
    %c0_i32 = arith.constant 0 : i32
    %c0_i32_0 = arith.constant 0 : i32
    %c0_i32_1 = arith.constant 0 : i32
    return %c0_i32, %c0_i32_0 : i32, i32
  }
  func.func @transform_2(%arg0: i32, %arg1: i32) -> (i32, i32, i32) {
    %c0_i32 = arith.constant 0 : i32
    %c0_i32_0 = arith.constant 0 : i32
    %c0_i32_1 = arith.constant 0 : i32
    return %arg0, %c0_i32, %c0_i32_0 : i32, i32, i32
  }
}

module attributes {stable_mosaic.version = 11 : i64} {
  func.func @_fused_conv_in_lrelu_kernel(%arg0: i32, %arg1: i32, %arg2: memref<1x512x72xbf16, #tpu.memory_space<vmem>>, %arg3: memref<72x128xbf16, #tpu.memory_space<vmem>>, %arg4: memref<1x1024x128xbf16, #tpu.memory_space<vmem>>, %arg5: memref<1024x128xf32, #tpu.memory_space<vmem>>, %arg6: memref<1x128xf32, #tpu.memory_space<vmem>>) attributes {dimension_semantics = [#tpu.dimension_semantics<parallel>, #tpu.dimension_semantics<arbitrary>], iteration_bounds = array<i64: 2, 2>, scalar_prefetch = 0 : i64, scratch_operands = 2 : i64, tpu.core_type = #tpu.core_type<tc>, window_params = [{transform_indices = @transform_0, window_bounds = array<i64: 1, 512, 72>}, {pipeline_mode = #tpu.pipeline_mode<synchronous>, transform_indices = @transform_1, window_bounds = array<i64: 72, 128>}, {transform_indices = @transform_2, window_bounds = array<i64: 1, 1024, 128>}]} {
    %c0_i32 = arith.constant 0 : i32
    %0 = arith.cmpi eq, %arg1, %c0_i32 : i32
    %1 = arith.extui %0 : i1 to i32
    %c0_i32_0 = arith.constant 0 : i32
    %2 = arith.cmpi ne, %1, %c0_i32_0 : i32
    scf.if %2 {
      %cst_12 = arith.constant 0.000000e+00 : f32
      %19 = vector.broadcast %cst_12 : f32 to vector<1x128xf32>
      %c0_13 = arith.constant 0 : index
      %c0_14 = arith.constant 0 : index
      %20 = vector.load %arg6[%c0_13, %c0_14] : memref<1x128xf32, #tpu.memory_space<vmem>>, vector<1x128xf32>
      tpu.vector_store %arg6[%c0_13, %c0_14], %19 {strides = array<i32>} : memref<1x128xf32, #tpu.memory_space<vmem>>, vector<1x128xf32>,
    } else {
    }
    %c0 = arith.constant 0 : index
    %c0_1 = arith.constant 0 : index
    %c0_2 = arith.constant 0 : index
    %3 = vector.load %arg2[%c0, %c0_1, %c0_2] : memref<1x512x72xbf16, #tpu.memory_space<vmem>>, vector<1x512x72xbf16>
    %4 = vector.shape_cast %3 : vector<1x512x72xbf16> to vector<512x72xbf16>
    %c0_3 = arith.constant 0 : index
    %c0_4 = arith.constant 0 : index
    %5 = vector.load %arg3[%c0_3, %c0_4] : memref<72x128xbf16, #tpu.memory_space<vmem>>, vector<72x128xbf16>
    %cst = arith.constant dense<0.000000e+00> : vector<512x128xf32>
    %6 = tpu.matmul %4, %5, %cst {dimension_numbers = #tpu.dot_dimension_numbers<[1], [0], [0], [1], [0, 0, 1, 1], [], []>} : vector<512x72xbf16>, vector<72x128xbf16>, vector<512x128xf32> -> vector<512x128xf32>
    %c512_i32 = arith.constant 512 : i32
    %7 = arith.muli %arg1, %c512_i32 : i32
    %8 = tpu.assume_multiple %7, 512 : i32
    %9 = arith.index_cast %8 : i32 to index
    %c0_5 = arith.constant 0 : index
    %10 = vector.load %arg5[%9, %c0_5] : memref<1024x128xf32, #tpu.memory_space<vmem>>, vector<512x128xf32>
    tpu.vector_store %arg5[%9, %c0_5], %6 {strides = array<i32>} : memref<1024x128xf32, #tpu.memory_space<vmem>>, vector<512x128xf32>,
    %c0_6 = arith.constant 0 : index
    %c0_7 = arith.constant 0 : index
    %11 = vector.load %arg6[%c0_6, %c0_7] : memref<1x128xf32, #tpu.memory_space<vmem>>, vector<1x128xf32>
    %cst_8 = arith.constant dense<0.000000e+00> : vector<128xf32>
    %12 = vector.multi_reduction <add>, %6, %cst_8 [0] : vector<512x128xf32> to vector<128xf32>
    %13 = vector.shape_cast %12 : vector<128xf32> to vector<1x128xf32>
    %14 = arith.addf %11, %13 : vector<1x128xf32>
    %c0_9 = arith.constant 0 : index
    %c0_10 = arith.constant 0 : index
    %15 = vector.load %arg6[%c0_9, %c0_10] : memref<1x128xf32, #tpu.memory_space<vmem>>, vector<1x128xf32>
    tpu.vector_store %arg6[%c0_9, %c0_10], %14 {strides = array<i32>} : memref<1x128xf32, #tpu.memory_space<vmem>>, vector<1x128xf32>,
    %c1_i32 = arith.constant 1 : i32
    %16 = arith.cmpi eq, %arg1, %c1_i32 : i32
    %17 = arith.extui %16 : i1 to i32
    %c0_i32_11 = arith.constant 0 : i32
    %18 = arith.cmpi ne, %17, %c0_i32_11 : i32
    scf.if %18 {
      %c0_12 = arith.constant 0 : index
      %c0_13 = arith.constant 0 : index
      %19 = vector.load %arg6[%c0_12, %c0_13] : memref<1x128xf32, #tpu.memory_space<vmem>>, vector<1x128xf32>
      %cst_14 = arith.constant 9.765625E-4 : f32
      %20 = vector.broadcast %cst_14 : f32 to vector<1x128xf32>
      %21 = arith.mulf %19, %20 : vector<1x128xf32>
      %cst_15 = arith.constant 0.000000e+00 : f32
      %22 = vector.broadcast %cst_15 : f32 to vector<1x128xf32>
      %c0_i32_16 = arith.constant 0 : i32
      %c2_i32 = arith.constant 2 : i32
      %23 = arith.addi %c0_i32_16, %c2_i32 : i32
      %c1_i32_17 = arith.constant 1 : i32
      %24 = scf.for %arg7 = %c0_i32_16 to %23 step %c1_i32_17 iter_args(%arg8 = %22) -> (vector<1x128xf32>)  : i32 {
        %c512_i32_25 = arith.constant 512 : i32
        %31 = arith.muli %arg7, %c512_i32_25 : i32
        %32 = tpu.assume_multiple %31, 512 : i32
        %33 = arith.index_cast %32 : i32 to index
        %c0_26 = arith.constant 0 : index
        %34 = vector.load %arg5[%33, %c0_26] : memref<1024x128xf32, #tpu.memory_space<vmem>>, vector<512x128xf32>
        %35 = vector.broadcast %21 : vector<1x128xf32> to vector<512x128xf32>
        %36 = arith.subf %34, %35 : vector<512x128xf32>
        %37 = tpu.iota {dimensions = array<i32: 0>} : vector<512x1xi32>
        %38 = vector.broadcast %32 : i32 to vector<512x1xi32>
        %39 = arith.addi %38, %37 : vector<512x1xi32>
        %c1024_i32 = arith.constant 1024 : i32
        %40 = vector.broadcast %c1024_i32 : i32 to vector<512x1xi32>
        %41 = arith.cmpi slt, %39, %40 : vector<512x1xi32>
        %cst_27 = arith.constant 0.000000e+00 : f32
        %42 = vector.shape_cast %41 : vector<512x1xi1> to vector<512x1xi1>
        %43 = vector.broadcast %42 : vector<512x1xi1> to vector<512x128xi1>
        %44 = vector.broadcast %cst_27 : f32 to vector<512x128xf32>
        %45 = arith.select %43, %36, %44 : vector<512x128xi1>, vector<512x128xf32>
        %46 = arith.mulf %45, %45 : vector<512x128xf32>
        %cst_28 = arith.constant dense<0.000000e+00> : vector<128xf32>
        %47 = vector.multi_reduction <add>, %46, %cst_28 [0] : vector<512x128xf32> to vector<128xf32>
        %48 = vector.shape_cast %47 : vector<128xf32> to vector<1x128xf32>
        %49 = arith.addf %arg8, %48 : vector<1x128xf32>
        scf.yield %49 : vector<1x128xf32>
      }
      %c2_i32_18 = arith.constant 2 : i32
      %cst_19 = arith.constant 9.765625E-4 : f32
      %25 = vector.broadcast %cst_19 : f32 to vector<1x128xf32>
      %26 = arith.mulf %24, %25 : vector<1x128xf32>
      %cst_20 = arith.constant 9.99999974E-6 : f32
      %27 = vector.broadcast %cst_20 : f32 to vector<1x128xf32>
      %28 = arith.addf %26, %27 : vector<1x128xf32>
      %29 = math.rsqrt %28 : vector<1x128xf32>
      %c0_i32_21 = arith.constant 0 : i32
      %c2_i32_22 = arith.constant 2 : i32
      %30 = arith.addi %c0_i32_21, %c2_i32_22 : i32
      %c1_i32_23 = arith.constant 1 : i32
      scf.for %arg7 = %c0_i32_21 to %30 step %c1_i32_23  : i32 {
        %c512_i32_25 = arith.constant 512 : i32
        %31 = arith.muli %arg7, %c512_i32_25 : i32
        %32 = tpu.assume_multiple %31, 512 : i32
        %33 = arith.index_cast %32 : i32 to index
        %c0_26 = arith.constant 0 : index
        %34 = vector.load %arg5[%33, %c0_26] : memref<1024x128xf32, #tpu.memory_space<vmem>>, vector<512x128xf32>
        %35 = vector.broadcast %21 : vector<1x128xf32> to vector<512x128xf32>
        %36 = arith.subf %34, %35 : vector<512x128xf32>
        %37 = vector.broadcast %29 : vector<1x128xf32> to vector<512x128xf32>
        %38 = arith.mulf %36, %37 : vector<512x128xf32>
        %cst_27 = arith.constant 0.000000e+00 : f32
        %39 = vector.broadcast %cst_27 : f32 to vector<512x128xf32>
        %40 = arith.cmpf oge, %38, %39 : vector<512x128xf32>
        %cst_28 = arith.constant 2.000000e-01 : f32
        %41 = vector.broadcast %cst_28 : f32 to vector<512x128xf32>
        %42 = arith.mulf %41, %38 : vector<512x128xf32>
        %43 = arith.select %40, %38, %42 : vector<512x128xi1>, vector<512x128xf32>
        %44 = arith.truncf %43 : vector<512x128xf32> to vector<512x128xbf16>
        %c0_29 = arith.constant 0 : index
        %45 = arith.index_cast %32 : i32 to index
        %c0_30 = arith.constant 0 : index
        %46 = vector.load %arg4[%c0_29, %45, %c0_30] : memref<1x1024x128xbf16, #tpu.memory_space<vmem>>, vector<1x512x128xbf16>
        %47 = vector.shape_cast %46 : vector<1x512x128xbf16> to vector<512x128xbf16>
        %48 = vector.shape_cast %44 : vector<512x128xbf16> to vector<1x512x128xbf16>
        tpu.vector_store %arg4[%c0_29, %45, %c0_30], %48 {strides = array<i32>} : memref<1x1024x128xbf16, #tpu.memory_space<vmem>>, vector<1x512x128xbf16>,
      }
      %c2_i32_24 = arith.constant 2 : i32
    } else {
    }
    return
  }
  func.func @transform_0(%arg0: i32, %arg1: i32) -> (i32, i32, i32) {
    %c0_i32 = arith.constant 0 : i32
    %c0_i32_0 = arith.constant 0 : i32
    return %arg0, %arg1, %c0_i32 : i32, i32, i32
  }
  func.func @transform_1(%arg0: i32, %arg1: i32) -> (i32, i32) {
    %c0_i32 = arith.constant 0 : i32
    %c0_i32_0 = arith.constant 0 : i32
    %c0_i32_1 = arith.constant 0 : i32
    return %c0_i32, %c0_i32_0 : i32, i32
  }
  func.func @transform_2(%arg0: i32, %arg1: i32) -> (i32, i32, i32) {
    %c0_i32 = arith.constant 0 : i32
    %c0_i32_0 = arith.constant 0 : i32
    %c0_i32_1 = arith.constant 0 : i32
    return %arg0, %c0_i32, %c0_i32_0 : i32, i32, i32
  }
}

module attributes {stable_mosaic.version = 11 : i64} {
  func.func @_fused_conv_in_lrelu_kernel(%arg0: i32, %arg1: i32, %arg2: memref<1x256x72xbf16, #tpu.memory_space<vmem>>, %arg3: memref<72x128xbf16, #tpu.memory_space<vmem>>, %arg4: memref<1x256x128xbf16, #tpu.memory_space<vmem>>, %arg5: memref<256x128xf32, #tpu.memory_space<vmem>>, %arg6: memref<1x128xf32, #tpu.memory_space<vmem>>) attributes {dimension_semantics = [#tpu.dimension_semantics<parallel>, #tpu.dimension_semantics<arbitrary>], iteration_bounds = array<i64: 2, 1>, scalar_prefetch = 0 : i64, scratch_operands = 2 : i64, tpu.core_type = #tpu.core_type<tc>, window_params = [{transform_indices = @transform_0, window_bounds = array<i64: 1, 256, 72>}, {pipeline_mode = #tpu.pipeline_mode<synchronous>, transform_indices = @transform_1, window_bounds = array<i64: 72, 128>}, {transform_indices = @transform_2, window_bounds = array<i64: 1, 256, 128>}]} {
    %c0_i32 = arith.constant 0 : i32
    %0 = arith.cmpi eq, %arg1, %c0_i32 : i32
    %1 = arith.extui %0 : i1 to i32
    %c0_i32_0 = arith.constant 0 : i32
    %2 = arith.cmpi ne, %1, %c0_i32_0 : i32
    scf.if %2 {
      %cst_13 = arith.constant 0.000000e+00 : f32
      %19 = vector.broadcast %cst_13 : f32 to vector<1x128xf32>
      %c0_14 = arith.constant 0 : index
      %c0_15 = arith.constant 0 : index
      %20 = vector.load %arg6[%c0_14, %c0_15] : memref<1x128xf32, #tpu.memory_space<vmem>>, vector<1x128xf32>
      tpu.vector_store %arg6[%c0_14, %c0_15], %19 {strides = array<i32>} : memref<1x128xf32, #tpu.memory_space<vmem>>, vector<1x128xf32>,
    } else {
    }
    %c0 = arith.constant 0 : index
    %c0_1 = arith.constant 0 : index
    %c0_2 = arith.constant 0 : index
    %3 = vector.load %arg2[%c0, %c0_1, %c0_2] : memref<1x256x72xbf16, #tpu.memory_space<vmem>>, vector<1x256x72xbf16>
    %4 = vector.shape_cast %3 : vector<1x256x72xbf16> to vector<256x72xbf16>
    %c0_3 = arith.constant 0 : index
    %c0_4 = arith.constant 0 : index
    %5 = vector.load %arg3[%c0_3, %c0_4] : memref<72x128xbf16, #tpu.memory_space<vmem>>, vector<72x128xbf16>
    %cst = arith.constant dense<0.000000e+00> : vector<256x128xf32>
    %6 = tpu.matmul %4, %5, %cst {dimension_numbers = #tpu.dot_dimension_numbers<[1], [0], [0], [1], [0, 0, 1, 1], [], []>} : vector<256x72xbf16>, vector<72x128xbf16>, vector<256x128xf32> -> vector<256x128xf32>
    %c256_i32 = arith.constant 256 : i32
    %7 = arith.muli %arg1, %c256_i32 : i32
    %8 = tpu.assume_multiple %7, 256 : i32
    %9 = arith.index_cast %8 : i32 to index
    %c0_5 = arith.constant 0 : index
    %10 = vector.load %arg5[%9, %c0_5] : memref<256x128xf32, #tpu.memory_space<vmem>>, vector<256x128xf32>
    tpu.vector_store %arg5[%9, %c0_5], %6 {strides = array<i32>} : memref<256x128xf32, #tpu.memory_space<vmem>>, vector<256x128xf32>,
    %c0_6 = arith.constant 0 : index
    %c0_7 = arith.constant 0 : index
    %11 = vector.load %arg6[%c0_6, %c0_7] : memref<1x128xf32, #tpu.memory_space<vmem>>, vector<1x128xf32>
    %cst_8 = arith.constant dense<0.000000e+00> : vector<128xf32>
    %12 = vector.multi_reduction <add>, %6, %cst_8 [0] : vector<256x128xf32> to vector<128xf32>
    %13 = vector.shape_cast %12 : vector<128xf32> to vector<1x128xf32>
    %14 = arith.addf %11, %13 : vector<1x128xf32>
    %c0_9 = arith.constant 0 : index
    %c0_10 = arith.constant 0 : index
    %15 = vector.load %arg6[%c0_9, %c0_10] : memref<1x128xf32, #tpu.memory_space<vmem>>, vector<1x128xf32>
    tpu.vector_store %arg6[%c0_9, %c0_10], %14 {strides = array<i32>} : memref<1x128xf32, #tpu.memory_space<vmem>>, vector<1x128xf32>,
    %c0_i32_11 = arith.constant 0 : i32
    %16 = arith.cmpi eq, %arg1, %c0_i32_11 : i32
    %17 = arith.extui %16 : i1 to i32
    %c0_i32_12 = arith.constant 0 : i32
    %18 = arith.cmpi ne, %17, %c0_i32_12 : i32
    scf.if %18 {
      %c0_13 = arith.constant 0 : index
      %c0_14 = arith.constant 0 : index
      %19 = vector.load %arg6[%c0_13, %c0_14] : memref<1x128xf32, #tpu.memory_space<vmem>>, vector<1x128xf32>
      %cst_15 = arith.constant 3.906250e-03 : f32
      %20 = vector.broadcast %cst_15 : f32 to vector<1x128xf32>
      %21 = arith.mulf %19, %20 : vector<1x128xf32>
      %cst_16 = arith.constant 0.000000e+00 : f32
      %22 = vector.broadcast %cst_16 : f32 to vector<1x128xf32>
      %c0_i32_17 = arith.constant 0 : i32
      %c256_i32_18 = arith.constant 256 : i32
      %23 = arith.muli %c0_i32_17, %c256_i32_18 : i32
      %24 = tpu.assume_multiple %23, 256 : i32
      %25 = arith.index_cast %24 : i32 to index
      %c0_19 = arith.constant 0 : index
      %26 = vector.load %arg5[%25, %c0_19] : memref<256x128xf32, #tpu.memory_space<vmem>>, vector<256x128xf32>
      %27 = vector.broadcast %21 : vector<1x128xf32> to vector<256x128xf32>
      %28 = arith.subf %26, %27 : vector<256x128xf32>
      %29 = tpu.iota {dimensions = array<i32: 0>} : vector<256x1xi32>
      %30 = vector.broadcast %24 : i32 to vector<256x1xi32>
      %31 = arith.addi %30, %29 : vector<256x1xi32>
      %c256_i32_20 = arith.constant 256 : i32
      %32 = vector.broadcast %c256_i32_20 : i32 to vector<256x1xi32>
      %33 = arith.cmpi slt, %31, %32 : vector<256x1xi32>
      %cst_21 = arith.constant 0.000000e+00 : f32
      %34 = vector.shape_cast %33 : vector<256x1xi1> to vector<256x1xi1>
      %35 = vector.broadcast %34 : vector<256x1xi1> to vector<256x128xi1>
      %36 = vector.broadcast %cst_21 : f32 to vector<256x128xf32>
      %37 = arith.select %35, %28, %36 : vector<256x128xi1>, vector<256x128xf32>
      %38 = arith.mulf %37, %37 : vector<256x128xf32>
      %cst_22 = arith.constant dense<0.000000e+00> : vector<128xf32>
      %39 = vector.multi_reduction <add>, %38, %cst_22 [0] : vector<256x128xf32> to vector<128xf32>
      %40 = vector.shape_cast %39 : vector<128xf32> to vector<1x128xf32>
      %41 = arith.addf %22, %40 : vector<1x128xf32>
      %c1_i32 = arith.constant 1 : i32
      %cst_23 = arith.constant 3.906250e-03 : f32
      %42 = vector.broadcast %cst_23 : f32 to vector<1x128xf32>
      %43 = arith.mulf %41, %42 : vector<1x128xf32>
      %cst_24 = arith.constant 9.99999974E-6 : f32
      %44 = vector.broadcast %cst_24 : f32 to vector<1x128xf32>
      %45 = arith.addf %43, %44 : vector<1x128xf32>
      %46 = math.rsqrt %45 : vector<1x128xf32>
      %c0_i32_25 = arith.constant 0 : i32
      %c256_i32_26 = arith.constant 256 : i32
      %47 = arith.muli %c0_i32_25, %c256_i32_26 : i32
      %48 = tpu.assume_multiple %47, 256 : i32
      %49 = arith.index_cast %48 : i32 to index
      %c0_27 = arith.constant 0 : index
      %50 = vector.load %arg5[%49, %c0_27] : memref<256x128xf32, #tpu.memory_space<vmem>>, vector<256x128xf32>
      %51 = vector.broadcast %21 : vector<1x128xf32> to vector<256x128xf32>
      %52 = arith.subf %50, %51 : vector<256x128xf32>
      %53 = vector.broadcast %46 : vector<1x128xf32> to vector<256x128xf32>
      %54 = arith.mulf %52, %53 : vector<256x128xf32>
      %cst_28 = arith.constant 0.000000e+00 : f32
      %55 = vector.broadcast %cst_28 : f32 to vector<256x128xf32>
      %56 = arith.cmpf oge, %54, %55 : vector<256x128xf32>
      %cst_29 = arith.constant 2.000000e-01 : f32
      %57 = vector.broadcast %cst_29 : f32 to vector<256x128xf32>
      %58 = arith.mulf %57, %54 : vector<256x128xf32>
      %59 = arith.select %56, %54, %58 : vector<256x128xi1>, vector<256x128xf32>
      %60 = arith.truncf %59 : vector<256x128xf32> to vector<256x128xbf16>
      %c0_30 = arith.constant 0 : index
      %61 = arith.index_cast %48 : i32 to index
      %c0_31 = arith.constant 0 : index
      %62 = vector.load %arg4[%c0_30, %61, %c0_31] : memref<1x256x128xbf16, #tpu.memory_space<vmem>>, vector<1x256x128xbf16>
      %63 = vector.shape_cast %62 : vector<1x256x128xbf16> to vector<256x128xbf16>
      %64 = vector.shape_cast %60 : vector<256x128xbf16> to vector<1x256x128xbf16>
      tpu.vector_store %arg4[%c0_30, %61, %c0_31], %64 {strides = array<i32>} : memref<1x256x128xbf16, #tpu.memory_space<vmem>>, vector<1x256x128xbf16>,
      %c1_i32_32 = arith.constant 1 : i32
    } else {
    }
    return
  }
  func.func @transform_0(%arg0: i32, %arg1: i32) -> (i32, i32, i32) {
    %c0_i32 = arith.constant 0 : i32
    %c0_i32_0 = arith.constant 0 : i32
    return %arg0, %arg1, %c0_i32 : i32, i32, i32
  }
  func.func @transform_1(%arg0: i32, %arg1: i32) -> (i32, i32) {
    %c0_i32 = arith.constant 0 : i32
    %c0_i32_0 = arith.constant 0 : i32
    %c0_i32_1 = arith.constant 0 : i32
    return %c0_i32, %c0_i32_0 : i32, i32
  }
  func.func @transform_2(%arg0: i32, %arg1: i32) -> (i32, i32, i32) {
    %c0_i32 = arith.constant 0 : i32
    %c0_i32_0 = arith.constant 0 : i32
    %c0_i32_1 = arith.constant 0 : i32
    return %arg0, %c0_i32, %c0_i32_0 : i32, i32, i32
  }
}

module attributes {stable_mosaic.version = 11 : i64} {
  func.func @_fused_conv_in_lrelu_kernel(%arg0: i32, %arg1: i32, %arg2: memref<1x256x144xbf16, #tpu.memory_space<vmem>>, %arg3: memref<144x128xbf16, #tpu.memory_space<vmem>>, %arg4: memref<1x256x128xbf16, #tpu.memory_space<vmem>>, %arg5: memref<256x128xf32, #tpu.memory_space<vmem>>, %arg6: memref<1x128xf32, #tpu.memory_space<vmem>>) attributes {dimension_semantics = [#tpu.dimension_semantics<parallel>, #tpu.dimension_semantics<arbitrary>], iteration_bounds = array<i64: 2, 1>, scalar_prefetch = 0 : i64, scratch_operands = 2 : i64, tpu.core_type = #tpu.core_type<tc>, window_params = [{transform_indices = @transform_0, window_bounds = array<i64: 1, 256, 144>}, {pipeline_mode = #tpu.pipeline_mode<synchronous>, transform_indices = @transform_1, window_bounds = array<i64: 144, 128>}, {transform_indices = @transform_2, window_bounds = array<i64: 1, 256, 128>}]} {
    %c0_i32 = arith.constant 0 : i32
    %0 = arith.cmpi eq, %arg1, %c0_i32 : i32
    %1 = arith.extui %0 : i1 to i32
    %c0_i32_0 = arith.constant 0 : i32
    %2 = arith.cmpi ne, %1, %c0_i32_0 : i32
    scf.if %2 {
      %cst_13 = arith.constant 0.000000e+00 : f32
      %19 = vector.broadcast %cst_13 : f32 to vector<1x128xf32>
      %c0_14 = arith.constant 0 : index
      %c0_15 = arith.constant 0 : index
      %20 = vector.load %arg6[%c0_14, %c0_15] : memref<1x128xf32, #tpu.memory_space<vmem>>, vector<1x128xf32>
      tpu.vector_store %arg6[%c0_14, %c0_15], %19 {strides = array<i32>} : memref<1x128xf32, #tpu.memory_space<vmem>>, vector<1x128xf32>,
    } else {
    }
    %c0 = arith.constant 0 : index
    %c0_1 = arith.constant 0 : index
    %c0_2 = arith.constant 0 : index
    %3 = vector.load %arg2[%c0, %c0_1, %c0_2] : memref<1x256x144xbf16, #tpu.memory_space<vmem>>, vector<1x256x144xbf16>
    %4 = vector.shape_cast %3 : vector<1x256x144xbf16> to vector<256x144xbf16>
    %c0_3 = arith.constant 0 : index
    %c0_4 = arith.constant 0 : index
    %5 = vector.load %arg3[%c0_3, %c0_4] : memref<144x128xbf16, #tpu.memory_space<vmem>>, vector<144x128xbf16>
    %cst = arith.constant dense<0.000000e+00> : vector<256x128xf32>
    %6 = tpu.matmul %4, %5, %cst {dimension_numbers = #tpu.dot_dimension_numbers<[1], [0], [0], [1], [0, 0, 1, 1], [], []>} : vector<256x144xbf16>, vector<144x128xbf16>, vector<256x128xf32> -> vector<256x128xf32>
    %c256_i32 = arith.constant 256 : i32
    %7 = arith.muli %arg1, %c256_i32 : i32
    %8 = tpu.assume_multiple %7, 256 : i32
    %9 = arith.index_cast %8 : i32 to index
    %c0_5 = arith.constant 0 : index
    %10 = vector.load %arg5[%9, %c0_5] : memref<256x128xf32, #tpu.memory_space<vmem>>, vector<256x128xf32>
    tpu.vector_store %arg5[%9, %c0_5], %6 {strides = array<i32>} : memref<256x128xf32, #tpu.memory_space<vmem>>, vector<256x128xf32>,
    %c0_6 = arith.constant 0 : index
    %c0_7 = arith.constant 0 : index
    %11 = vector.load %arg6[%c0_6, %c0_7] : memref<1x128xf32, #tpu.memory_space<vmem>>, vector<1x128xf32>
    %cst_8 = arith.constant dense<0.000000e+00> : vector<128xf32>
    %12 = vector.multi_reduction <add>, %6, %cst_8 [0] : vector<256x128xf32> to vector<128xf32>
    %13 = vector.shape_cast %12 : vector<128xf32> to vector<1x128xf32>
    %14 = arith.addf %11, %13 : vector<1x128xf32>
    %c0_9 = arith.constant 0 : index
    %c0_10 = arith.constant 0 : index
    %15 = vector.load %arg6[%c0_9, %c0_10] : memref<1x128xf32, #tpu.memory_space<vmem>>, vector<1x128xf32>
    tpu.vector_store %arg6[%c0_9, %c0_10], %14 {strides = array<i32>} : memref<1x128xf32, #tpu.memory_space<vmem>>, vector<1x128xf32>,
    %c0_i32_11 = arith.constant 0 : i32
    %16 = arith.cmpi eq, %arg1, %c0_i32_11 : i32
    %17 = arith.extui %16 : i1 to i32
    %c0_i32_12 = arith.constant 0 : i32
    %18 = arith.cmpi ne, %17, %c0_i32_12 : i32
    scf.if %18 {
      %c0_13 = arith.constant 0 : index
      %c0_14 = arith.constant 0 : index
      %19 = vector.load %arg6[%c0_13, %c0_14] : memref<1x128xf32, #tpu.memory_space<vmem>>, vector<1x128xf32>
      %cst_15 = arith.constant 3.906250e-03 : f32
      %20 = vector.broadcast %cst_15 : f32 to vector<1x128xf32>
      %21 = arith.mulf %19, %20 : vector<1x128xf32>
      %cst_16 = arith.constant 0.000000e+00 : f32
      %22 = vector.broadcast %cst_16 : f32 to vector<1x128xf32>
      %c0_i32_17 = arith.constant 0 : i32
      %c256_i32_18 = arith.constant 256 : i32
      %23 = arith.muli %c0_i32_17, %c256_i32_18 : i32
      %24 = tpu.assume_multiple %23, 256 : i32
      %25 = arith.index_cast %24 : i32 to index
      %c0_19 = arith.constant 0 : index
      %26 = vector.load %arg5[%25, %c0_19] : memref<256x128xf32, #tpu.memory_space<vmem>>, vector<256x128xf32>
      %27 = vector.broadcast %21 : vector<1x128xf32> to vector<256x128xf32>
      %28 = arith.subf %26, %27 : vector<256x128xf32>
      %29 = tpu.iota {dimensions = array<i32: 0>} : vector<256x1xi32>
      %30 = vector.broadcast %24 : i32 to vector<256x1xi32>
      %31 = arith.addi %30, %29 : vector<256x1xi32>
      %c256_i32_20 = arith.constant 256 : i32
      %32 = vector.broadcast %c256_i32_20 : i32 to vector<256x1xi32>
      %33 = arith.cmpi slt, %31, %32 : vector<256x1xi32>
      %cst_21 = arith.constant 0.000000e+00 : f32
      %34 = vector.shape_cast %33 : vector<256x1xi1> to vector<256x1xi1>
      %35 = vector.broadcast %34 : vector<256x1xi1> to vector<256x128xi1>
      %36 = vector.broadcast %cst_21 : f32 to vector<256x128xf32>
      %37 = arith.select %35, %28, %36 : vector<256x128xi1>, vector<256x128xf32>
      %38 = arith.mulf %37, %37 : vector<256x128xf32>
      %cst_22 = arith.constant dense<0.000000e+00> : vector<128xf32>
      %39 = vector.multi_reduction <add>, %38, %cst_22 [0] : vector<256x128xf32> to vector<128xf32>
      %40 = vector.shape_cast %39 : vector<128xf32> to vector<1x128xf32>
      %41 = arith.addf %22, %40 : vector<1x128xf32>
      %c1_i32 = arith.constant 1 : i32
      %cst_23 = arith.constant 3.906250e-03 : f32
      %42 = vector.broadcast %cst_23 : f32 to vector<1x128xf32>
      %43 = arith.mulf %41, %42 : vector<1x128xf32>
      %cst_24 = arith.constant 9.99999974E-6 : f32
      %44 = vector.broadcast %cst_24 : f32 to vector<1x128xf32>
      %45 = arith.addf %43, %44 : vector<1x128xf32>
      %46 = math.rsqrt %45 : vector<1x128xf32>
      %c0_i32_25 = arith.constant 0 : i32
      %c256_i32_26 = arith.constant 256 : i32
      %47 = arith.muli %c0_i32_25, %c256_i32_26 : i32
      %48 = tpu.assume_multiple %47, 256 : i32
      %49 = arith.index_cast %48 : i32 to index
      %c0_27 = arith.constant 0 : index
      %50 = vector.load %arg5[%49, %c0_27] : memref<256x128xf32, #tpu.memory_space<vmem>>, vector<256x128xf32>
      %51 = vector.broadcast %21 : vector<1x128xf32> to vector<256x128xf32>
      %52 = arith.subf %50, %51 : vector<256x128xf32>
      %53 = vector.broadcast %46 : vector<1x128xf32> to vector<256x128xf32>
      %54 = arith.mulf %52, %53 : vector<256x128xf32>
      %cst_28 = arith.constant 0.000000e+00 : f32
      %55 = vector.broadcast %cst_28 : f32 to vector<256x128xf32>
      %56 = arith.cmpf oge, %54, %55 : vector<256x128xf32>
      %cst_29 = arith.constant 2.000000e-01 : f32
      %57 = vector.broadcast %cst_29 : f32 to vector<256x128xf32>
      %58 = arith.mulf %57, %54 : vector<256x128xf32>
      %59 = arith.select %56, %54, %58 : vector<256x128xi1>, vector<256x128xf32>
      %60 = arith.truncf %59 : vector<256x128xf32> to vector<256x128xbf16>
      %c0_30 = arith.constant 0 : index
      %61 = arith.index_cast %48 : i32 to index
      %c0_31 = arith.constant 0 : index
      %62 = vector.load %arg4[%c0_30, %61, %c0_31] : memref<1x256x128xbf16, #tpu.memory_space<vmem>>, vector<1x256x128xbf16>
      %63 = vector.shape_cast %62 : vector<1x256x128xbf16> to vector<256x128xbf16>
      %64 = vector.shape_cast %60 : vector<256x128xbf16> to vector<1x256x128xbf16>
      tpu.vector_store %arg4[%c0_30, %61, %c0_31], %64 {strides = array<i32>} : memref<1x256x128xbf16, #tpu.memory_space<vmem>>, vector<1x256x128xbf16>,
      %c1_i32_32 = arith.constant 1 : i32
    } else {
    }
    return
  }
  func.func @transform_0(%arg0: i32, %arg1: i32) -> (i32, i32, i32) {
    %c0_i32 = arith.constant 0 : i32
    %c0_i32_0 = arith.constant 0 : i32
    return %arg0, %arg1, %c0_i32 : i32, i32, i32
  }
  func.func @transform_1(%arg0: i32, %arg1: i32) -> (i32, i32) {
    %c0_i32 = arith.constant 0 : i32
    %c0_i32_0 = arith.constant 0 : i32
    %c0_i32_1 = arith.constant 0 : i32
    return %c0_i32, %c0_i32_0 : i32, i32
  }
  func.func @transform_2(%arg0: i32, %arg1: i32) -> (i32, i32, i32) {
    %c0_i32 = arith.constant 0 : i32
    %c0_i32_0 = arith.constant 0 : i32
    %c0_i32_1 = arith.constant 0 : i32
    return %arg0, %c0_i32, %c0_i32_0 : i32, i32, i32
  }
}

module attributes {stable_mosaic.version = 11 : i64} {
  func.func @_fused_conv_in_lrelu_kernel(%arg0: i32, %arg1: i32, %arg2: memref<1x64x144xbf16, #tpu.memory_space<vmem>>, %arg3: memref<144x128xbf16, #tpu.memory_space<vmem>>, %arg4: memref<1x64x128xbf16, #tpu.memory_space<vmem>>, %arg5: memref<64x128xf32, #tpu.memory_space<vmem>>, %arg6: memref<1x128xf32, #tpu.memory_space<vmem>>) attributes {dimension_semantics = [#tpu.dimension_semantics<parallel>, #tpu.dimension_semantics<arbitrary>], iteration_bounds = array<i64: 2, 1>, scalar_prefetch = 0 : i64, scratch_operands = 2 : i64, tpu.core_type = #tpu.core_type<tc>, window_params = [{transform_indices = @transform_0, window_bounds = array<i64: 1, 64, 144>}, {pipeline_mode = #tpu.pipeline_mode<synchronous>, transform_indices = @transform_1, window_bounds = array<i64: 144, 128>}, {transform_indices = @transform_2, window_bounds = array<i64: 1, 64, 128>}]} {
    %c0_i32 = arith.constant 0 : i32
    %0 = arith.cmpi eq, %arg1, %c0_i32 : i32
    %1 = arith.extui %0 : i1 to i32
    %c0_i32_0 = arith.constant 0 : i32
    %2 = arith.cmpi ne, %1, %c0_i32_0 : i32
    scf.if %2 {
      %cst_13 = arith.constant 0.000000e+00 : f32
      %19 = vector.broadcast %cst_13 : f32 to vector<1x128xf32>
      %c0_14 = arith.constant 0 : index
      %c0_15 = arith.constant 0 : index
      %20 = vector.load %arg6[%c0_14, %c0_15] : memref<1x128xf32, #tpu.memory_space<vmem>>, vector<1x128xf32>
      tpu.vector_store %arg6[%c0_14, %c0_15], %19 {strides = array<i32>} : memref<1x128xf32, #tpu.memory_space<vmem>>, vector<1x128xf32>,
    } else {
    }
    %c0 = arith.constant 0 : index
    %c0_1 = arith.constant 0 : index
    %c0_2 = arith.constant 0 : index
    %3 = vector.load %arg2[%c0, %c0_1, %c0_2] : memref<1x64x144xbf16, #tpu.memory_space<vmem>>, vector<1x64x144xbf16>
    %4 = vector.shape_cast %3 : vector<1x64x144xbf16> to vector<64x144xbf16>
    %c0_3 = arith.constant 0 : index
    %c0_4 = arith.constant 0 : index
    %5 = vector.load %arg3[%c0_3, %c0_4] : memref<144x128xbf16, #tpu.memory_space<vmem>>, vector<144x128xbf16>
    %cst = arith.constant dense<0.000000e+00> : vector<64x128xf32>
    %6 = tpu.matmul %4, %5, %cst {dimension_numbers = #tpu.dot_dimension_numbers<[1], [0], [0], [1], [0, 0, 1, 1], [], []>} : vector<64x144xbf16>, vector<144x128xbf16>, vector<64x128xf32> -> vector<64x128xf32>
    %c64_i32 = arith.constant 64 : i32
    %7 = arith.muli %arg1, %c64_i32 : i32
    %8 = tpu.assume_multiple %7, 64 : i32
    %9 = arith.index_cast %8 : i32 to index
    %c0_5 = arith.constant 0 : index
    %10 = vector.load %arg5[%9, %c0_5] : memref<64x128xf32, #tpu.memory_space<vmem>>, vector<64x128xf32>
    tpu.vector_store %arg5[%9, %c0_5], %6 {strides = array<i32>} : memref<64x128xf32, #tpu.memory_space<vmem>>, vector<64x128xf32>,
    %c0_6 = arith.constant 0 : index
    %c0_7 = arith.constant 0 : index
    %11 = vector.load %arg6[%c0_6, %c0_7] : memref<1x128xf32, #tpu.memory_space<vmem>>, vector<1x128xf32>
    %cst_8 = arith.constant dense<0.000000e+00> : vector<128xf32>
    %12 = vector.multi_reduction <add>, %6, %cst_8 [0] : vector<64x128xf32> to vector<128xf32>
    %13 = vector.shape_cast %12 : vector<128xf32> to vector<1x128xf32>
    %14 = arith.addf %11, %13 : vector<1x128xf32>
    %c0_9 = arith.constant 0 : index
    %c0_10 = arith.constant 0 : index
    %15 = vector.load %arg6[%c0_9, %c0_10] : memref<1x128xf32, #tpu.memory_space<vmem>>, vector<1x128xf32>
    tpu.vector_store %arg6[%c0_9, %c0_10], %14 {strides = array<i32>} : memref<1x128xf32, #tpu.memory_space<vmem>>, vector<1x128xf32>,
    %c0_i32_11 = arith.constant 0 : i32
    %16 = arith.cmpi eq, %arg1, %c0_i32_11 : i32
    %17 = arith.extui %16 : i1 to i32
    %c0_i32_12 = arith.constant 0 : i32
    %18 = arith.cmpi ne, %17, %c0_i32_12 : i32
    scf.if %18 {
      %c0_13 = arith.constant 0 : index
      %c0_14 = arith.constant 0 : index
      %19 = vector.load %arg6[%c0_13, %c0_14] : memref<1x128xf32, #tpu.memory_space<vmem>>, vector<1x128xf32>
      %cst_15 = arith.constant 1.562500e-02 : f32
      %20 = vector.broadcast %cst_15 : f32 to vector<1x128xf32>
      %21 = arith.mulf %19, %20 : vector<1x128xf32>
      %cst_16 = arith.constant 0.000000e+00 : f32
      %22 = vector.broadcast %cst_16 : f32 to vector<1x128xf32>
      %c0_i32_17 = arith.constant 0 : i32
      %c64_i32_18 = arith.constant 64 : i32
      %23 = arith.muli %c0_i32_17, %c64_i32_18 : i32
      %24 = tpu.assume_multiple %23, 64 : i32
      %25 = arith.index_cast %24 : i32 to index
      %c0_19 = arith.constant 0 : index
      %26 = vector.load %arg5[%25, %c0_19] : memref<64x128xf32, #tpu.memory_space<vmem>>, vector<64x128xf32>
      %27 = vector.broadcast %21 : vector<1x128xf32> to vector<64x128xf32>
      %28 = arith.subf %26, %27 : vector<64x128xf32>
      %29 = tpu.iota {dimensions = array<i32: 0>} : vector<64x1xi32>
      %30 = vector.broadcast %24 : i32 to vector<64x1xi32>
      %31 = arith.addi %30, %29 : vector<64x1xi32>
      %c64_i32_20 = arith.constant 64 : i32
      %32 = vector.broadcast %c64_i32_20 : i32 to vector<64x1xi32>
      %33 = arith.cmpi slt, %31, %32 : vector<64x1xi32>
      %cst_21 = arith.constant 0.000000e+00 : f32
      %34 = vector.shape_cast %33 : vector<64x1xi1> to vector<64x1xi1>
      %35 = vector.broadcast %34 : vector<64x1xi1> to vector<64x128xi1>
      %36 = vector.broadcast %cst_21 : f32 to vector<64x128xf32>
      %37 = arith.select %35, %28, %36 : vector<64x128xi1>, vector<64x128xf32>
      %38 = arith.mulf %37, %37 : vector<64x128xf32>
      %cst_22 = arith.constant dense<0.000000e+00> : vector<128xf32>
      %39 = vector.multi_reduction <add>, %38, %cst_22 [0] : vector<64x128xf32> to vector<128xf32>
      %40 = vector.shape_cast %39 : vector<128xf32> to vector<1x128xf32>
      %41 = arith.addf %22, %40 : vector<1x128xf32>
      %c1_i32 = arith.constant 1 : i32
      %cst_23 = arith.constant 1.562500e-02 : f32
      %42 = vector.broadcast %cst_23 : f32 to vector<1x128xf32>
      %43 = arith.mulf %41, %42 : vector<1x128xf32>
      %cst_24 = arith.constant 9.99999974E-6 : f32
      %44 = vector.broadcast %cst_24 : f32 to vector<1x128xf32>
      %45 = arith.addf %43, %44 : vector<1x128xf32>
      %46 = math.rsqrt %45 : vector<1x128xf32>
      %c0_i32_25 = arith.constant 0 : i32
      %c64_i32_26 = arith.constant 64 : i32
      %47 = arith.muli %c0_i32_25, %c64_i32_26 : i32
      %48 = tpu.assume_multiple %47, 64 : i32
      %49 = arith.index_cast %48 : i32 to index
      %c0_27 = arith.constant 0 : index
      %50 = vector.load %arg5[%49, %c0_27] : memref<64x128xf32, #tpu.memory_space<vmem>>, vector<64x128xf32>
      %51 = vector.broadcast %21 : vector<1x128xf32> to vector<64x128xf32>
      %52 = arith.subf %50, %51 : vector<64x128xf32>
      %53 = vector.broadcast %46 : vector<1x128xf32> to vector<64x128xf32>
      %54 = arith.mulf %52, %53 : vector<64x128xf32>
      %cst_28 = arith.constant 0.000000e+00 : f32
      %55 = vector.broadcast %cst_28 : f32 to vector<64x128xf32>
      %56 = arith.cmpf oge, %54, %55 : vector<64x128xf32>
      %cst_29 = arith.constant 2.000000e-01 : f32
      %57 = vector.broadcast %cst_29 : f32 to vector<64x128xf32>
      %58 = arith.mulf %57, %54 : vector<64x128xf32>
      %59 = arith.select %56, %54, %58 : vector<64x128xi1>, vector<64x128xf32>
      %60 = arith.truncf %59 : vector<64x128xf32> to vector<64x128xbf16>
      %c0_30 = arith.constant 0 : index
      %61 = arith.index_cast %48 : i32 to index
      %c0_31 = arith.constant 0 : index
      %62 = vector.load %arg4[%c0_30, %61, %c0_31] : memref<1x64x128xbf16, #tpu.memory_space<vmem>>, vector<1x64x128xbf16>
      %63 = vector.shape_cast %62 : vector<1x64x128xbf16> to vector<64x128xbf16>
      %64 = vector.shape_cast %60 : vector<64x128xbf16> to vector<1x64x128xbf16>
      tpu.vector_store %arg4[%c0_30, %61, %c0_31], %64 {strides = array<i32>} : memref<1x64x128xbf16, #tpu.memory_space<vmem>>, vector<1x64x128xbf16>,
      %c1_i32_32 = arith.constant 1 : i32
    } else {
    }
    return
  }
  func.func @transform_0(%arg0: i32, %arg1: i32) -> (i32, i32, i32) {
    %c0_i32 = arith.constant 0 : i32
    %c0_i32_0 = arith.constant 0 : i32
    return %arg0, %arg1, %c0_i32 : i32, i32, i32
  }
  func.func @transform_1(%arg0: i32, %arg1: i32) -> (i32, i32) {
    %c0_i32 = arith.constant 0 : i32
    %c0_i32_0 = arith.constant 0 : i32
    %c0_i32_1 = arith.constant 0 : i32
    return %c0_i32, %c0_i32_0 : i32, i32
  }
  func.func @transform_2(%arg0: i32, %arg1: i32) -> (i32, i32, i32) {
    %c0_i32 = arith.constant 0 : i32
    %c0_i32_0 = arith.constant 0 : i32
    %c0_i32_1 = arith.constant 0 : i32
    return %arg0, %c0_i32, %c0_i32_0 : i32, i32, i32
  }
}

module attributes {stable_mosaic.version = 11 : i64} {
  func.func @_fused_conv_in_lrelu_kernel(%arg0: i32, %arg1: i32, %arg2: memref<1x64x288xbf16, #tpu.memory_space<vmem>>, %arg3: memref<288x128xbf16, #tpu.memory_space<vmem>>, %arg4: memref<1x64x128xbf16, #tpu.memory_space<vmem>>, %arg5: memref<64x128xf32, #tpu.memory_space<vmem>>, %arg6: memref<1x128xf32, #tpu.memory_space<vmem>>) attributes {dimension_semantics = [#tpu.dimension_semantics<parallel>, #tpu.dimension_semantics<arbitrary>], iteration_bounds = array<i64: 2, 1>, scalar_prefetch = 0 : i64, scratch_operands = 2 : i64, tpu.core_type = #tpu.core_type<tc>, window_params = [{transform_indices = @transform_0, window_bounds = array<i64: 1, 64, 288>}, {pipeline_mode = #tpu.pipeline_mode<synchronous>, transform_indices = @transform_1, window_bounds = array<i64: 288, 128>}, {transform_indices = @transform_2, window_bounds = array<i64: 1, 64, 128>}]} {
    %c0_i32 = arith.constant 0 : i32
    %0 = arith.cmpi eq, %arg1, %c0_i32 : i32
    %1 = arith.extui %0 : i1 to i32
    %c0_i32_0 = arith.constant 0 : i32
    %2 = arith.cmpi ne, %1, %c0_i32_0 : i32
    scf.if %2 {
      %cst_13 = arith.constant 0.000000e+00 : f32
      %19 = vector.broadcast %cst_13 : f32 to vector<1x128xf32>
      %c0_14 = arith.constant 0 : index
      %c0_15 = arith.constant 0 : index
      %20 = vector.load %arg6[%c0_14, %c0_15] : memref<1x128xf32, #tpu.memory_space<vmem>>, vector<1x128xf32>
      tpu.vector_store %arg6[%c0_14, %c0_15], %19 {strides = array<i32>} : memref<1x128xf32, #tpu.memory_space<vmem>>, vector<1x128xf32>,
    } else {
    }
    %c0 = arith.constant 0 : index
    %c0_1 = arith.constant 0 : index
    %c0_2 = arith.constant 0 : index
    %3 = vector.load %arg2[%c0, %c0_1, %c0_2] : memref<1x64x288xbf16, #tpu.memory_space<vmem>>, vector<1x64x288xbf16>
    %4 = vector.shape_cast %3 : vector<1x64x288xbf16> to vector<64x288xbf16>
    %c0_3 = arith.constant 0 : index
    %c0_4 = arith.constant 0 : index
    %5 = vector.load %arg3[%c0_3, %c0_4] : memref<288x128xbf16, #tpu.memory_space<vmem>>, vector<288x128xbf16>
    %cst = arith.constant dense<0.000000e+00> : vector<64x128xf32>
    %6 = tpu.matmul %4, %5, %cst {dimension_numbers = #tpu.dot_dimension_numbers<[1], [0], [0], [1], [0, 0, 1, 1], [], []>} : vector<64x288xbf16>, vector<288x128xbf16>, vector<64x128xf32> -> vector<64x128xf32>
    %c64_i32 = arith.constant 64 : i32
    %7 = arith.muli %arg1, %c64_i32 : i32
    %8 = tpu.assume_multiple %7, 64 : i32
    %9 = arith.index_cast %8 : i32 to index
    %c0_5 = arith.constant 0 : index
    %10 = vector.load %arg5[%9, %c0_5] : memref<64x128xf32, #tpu.memory_space<vmem>>, vector<64x128xf32>
    tpu.vector_store %arg5[%9, %c0_5], %6 {strides = array<i32>} : memref<64x128xf32, #tpu.memory_space<vmem>>, vector<64x128xf32>,
    %c0_6 = arith.constant 0 : index
    %c0_7 = arith.constant 0 : index
    %11 = vector.load %arg6[%c0_6, %c0_7] : memref<1x128xf32, #tpu.memory_space<vmem>>, vector<1x128xf32>
    %cst_8 = arith.constant dense<0.000000e+00> : vector<128xf32>
    %12 = vector.multi_reduction <add>, %6, %cst_8 [0] : vector<64x128xf32> to vector<128xf32>
    %13 = vector.shape_cast %12 : vector<128xf32> to vector<1x128xf32>
    %14 = arith.addf %11, %13 : vector<1x128xf32>
    %c0_9 = arith.constant 0 : index
    %c0_10 = arith.constant 0 : index
    %15 = vector.load %arg6[%c0_9, %c0_10] : memref<1x128xf32, #tpu.memory_space<vmem>>, vector<1x128xf32>
    tpu.vector_store %arg6[%c0_9, %c0_10], %14 {strides = array<i32>} : memref<1x128xf32, #tpu.memory_space<vmem>>, vector<1x128xf32>,
    %c0_i32_11 = arith.constant 0 : i32
    %16 = arith.cmpi eq, %arg1, %c0_i32_11 : i32
    %17 = arith.extui %16 : i1 to i32
    %c0_i32_12 = arith.constant 0 : i32
    %18 = arith.cmpi ne, %17, %c0_i32_12 : i32
    scf.if %18 {
      %c0_13 = arith.constant 0 : index
      %c0_14 = arith.constant 0 : index
      %19 = vector.load %arg6[%c0_13, %c0_14] : memref<1x128xf32, #tpu.memory_space<vmem>>, vector<1x128xf32>
      %cst_15 = arith.constant 1.562500e-02 : f32
      %20 = vector.broadcast %cst_15 : f32 to vector<1x128xf32>
      %21 = arith.mulf %19, %20 : vector<1x128xf32>
      %cst_16 = arith.constant 0.000000e+00 : f32
      %22 = vector.broadcast %cst_16 : f32 to vector<1x128xf32>
      %c0_i32_17 = arith.constant 0 : i32
      %c64_i32_18 = arith.constant 64 : i32
      %23 = arith.muli %c0_i32_17, %c64_i32_18 : i32
      %24 = tpu.assume_multiple %23, 64 : i32
      %25 = arith.index_cast %24 : i32 to index
      %c0_19 = arith.constant 0 : index
      %26 = vector.load %arg5[%25, %c0_19] : memref<64x128xf32, #tpu.memory_space<vmem>>, vector<64x128xf32>
      %27 = vector.broadcast %21 : vector<1x128xf32> to vector<64x128xf32>
      %28 = arith.subf %26, %27 : vector<64x128xf32>
      %29 = tpu.iota {dimensions = array<i32: 0>} : vector<64x1xi32>
      %30 = vector.broadcast %24 : i32 to vector<64x1xi32>
      %31 = arith.addi %30, %29 : vector<64x1xi32>
      %c64_i32_20 = arith.constant 64 : i32
      %32 = vector.broadcast %c64_i32_20 : i32 to vector<64x1xi32>
      %33 = arith.cmpi slt, %31, %32 : vector<64x1xi32>
      %cst_21 = arith.constant 0.000000e+00 : f32
      %34 = vector.shape_cast %33 : vector<64x1xi1> to vector<64x1xi1>
      %35 = vector.broadcast %34 : vector<64x1xi1> to vector<64x128xi1>
      %36 = vector.broadcast %cst_21 : f32 to vector<64x128xf32>
      %37 = arith.select %35, %28, %36 : vector<64x128xi1>, vector<64x128xf32>
      %38 = arith.mulf %37, %37 : vector<64x128xf32>
      %cst_22 = arith.constant dense<0.000000e+00> : vector<128xf32>
      %39 = vector.multi_reduction <add>, %38, %cst_22 [0] : vector<64x128xf32> to vector<128xf32>
      %40 = vector.shape_cast %39 : vector<128xf32> to vector<1x128xf32>
      %41 = arith.addf %22, %40 : vector<1x128xf32>
      %c1_i32 = arith.constant 1 : i32
      %cst_23 = arith.constant 1.562500e-02 : f32
      %42 = vector.broadcast %cst_23 : f32 to vector<1x128xf32>
      %43 = arith.mulf %41, %42 : vector<1x128xf32>
      %cst_24 = arith.constant 9.99999974E-6 : f32
      %44 = vector.broadcast %cst_24 : f32 to vector<1x128xf32>
      %45 = arith.addf %43, %44 : vector<1x128xf32>
      %46 = math.rsqrt %45 : vector<1x128xf32>
      %c0_i32_25 = arith.constant 0 : i32
      %c64_i32_26 = arith.constant 64 : i32
      %47 = arith.muli %c0_i32_25, %c64_i32_26 : i32
      %48 = tpu.assume_multiple %47, 64 : i32
      %49 = arith.index_cast %48 : i32 to index
      %c0_27 = arith.constant 0 : index
      %50 = vector.load %arg5[%49, %c0_27] : memref<64x128xf32, #tpu.memory_space<vmem>>, vector<64x128xf32>
      %51 = vector.broadcast %21 : vector<1x128xf32> to vector<64x128xf32>
      %52 = arith.subf %50, %51 : vector<64x128xf32>
      %53 = vector.broadcast %46 : vector<1x128xf32> to vector<64x128xf32>
      %54 = arith.mulf %52, %53 : vector<64x128xf32>
      %cst_28 = arith.constant 0.000000e+00 : f32
      %55 = vector.broadcast %cst_28 : f32 to vector<64x128xf32>
      %56 = arith.cmpf oge, %54, %55 : vector<64x128xf32>
      %cst_29 = arith.constant 2.000000e-01 : f32
      %57 = vector.broadcast %cst_29 : f32 to vector<64x128xf32>
      %58 = arith.mulf %57, %54 : vector<64x128xf32>
      %59 = arith.select %56, %54, %58 : vector<64x128xi1>, vector<64x128xf32>
      %60 = arith.truncf %59 : vector<64x128xf32> to vector<64x128xbf16>
      %c0_30 = arith.constant 0 : index
      %61 = arith.index_cast %48 : i32 to index
      %c0_31 = arith.constant 0 : index
      %62 = vector.load %arg4[%c0_30, %61, %c0_31] : memref<1x64x128xbf16, #tpu.memory_space<vmem>>, vector<1x64x128xbf16>
      %63 = vector.shape_cast %62 : vector<1x64x128xbf16> to vector<64x128xbf16>
      %64 = vector.shape_cast %60 : vector<64x128xbf16> to vector<1x64x128xbf16>
      tpu.vector_store %arg4[%c0_30, %61, %c0_31], %64 {strides = array<i32>} : memref<1x64x128xbf16, #tpu.memory_space<vmem>>, vector<1x64x128xbf16>,
      %c1_i32_32 = arith.constant 1 : i32
    } else {
    }
    return
  }
  func.func @transform_0(%arg0: i32, %arg1: i32) -> (i32, i32, i32) {
    %c0_i32 = arith.constant 0 : i32
    %c0_i32_0 = arith.constant 0 : i32
    return %arg0, %arg1, %c0_i32 : i32, i32, i32
  }
  func.func @transform_1(%arg0: i32, %arg1: i32) -> (i32, i32) {
    %c0_i32 = arith.constant 0 : i32
    %c0_i32_0 = arith.constant 0 : i32
    %c0_i32_1 = arith.constant 0 : i32
    return %c0_i32, %c0_i32_0 : i32, i32
  }
  func.func @transform_2(%arg0: i32, %arg1: i32) -> (i32, i32, i32) {
    %c0_i32 = arith.constant 0 : i32
    %c0_i32_0 = arith.constant 0 : i32
    %c0_i32_1 = arith.constant 0 : i32
    return %arg0, %c0_i32, %c0_i32_0 : i32, i32, i32
  }
}

module attributes {stable_mosaic.version = 11 : i64} {
  func.func @_fused_conv_in_lrelu_kernel(%arg0: i32, %arg1: i32, %arg2: memref<1x16x288xbf16, #tpu.memory_space<vmem>>, %arg3: memref<288x128xbf16, #tpu.memory_space<vmem>>, %arg4: memref<1x16x128xbf16, #tpu.memory_space<vmem>>, %arg5: memref<16x128xf32, #tpu.memory_space<vmem>>, %arg6: memref<1x128xf32, #tpu.memory_space<vmem>>) attributes {dimension_semantics = [#tpu.dimension_semantics<parallel>, #tpu.dimension_semantics<arbitrary>], iteration_bounds = array<i64: 2, 1>, scalar_prefetch = 0 : i64, scratch_operands = 2 : i64, tpu.core_type = #tpu.core_type<tc>, window_params = [{transform_indices = @transform_0, window_bounds = array<i64: 1, 16, 288>}, {pipeline_mode = #tpu.pipeline_mode<synchronous>, transform_indices = @transform_1, window_bounds = array<i64: 288, 128>}, {transform_indices = @transform_2, window_bounds = array<i64: 1, 16, 128>}]} {
    %c0_i32 = arith.constant 0 : i32
    %0 = arith.cmpi eq, %arg1, %c0_i32 : i32
    %1 = arith.extui %0 : i1 to i32
    %c0_i32_0 = arith.constant 0 : i32
    %2 = arith.cmpi ne, %1, %c0_i32_0 : i32
    scf.if %2 {
      %cst_13 = arith.constant 0.000000e+00 : f32
      %19 = vector.broadcast %cst_13 : f32 to vector<1x128xf32>
      %c0_14 = arith.constant 0 : index
      %c0_15 = arith.constant 0 : index
      %20 = vector.load %arg6[%c0_14, %c0_15] : memref<1x128xf32, #tpu.memory_space<vmem>>, vector<1x128xf32>
      tpu.vector_store %arg6[%c0_14, %c0_15], %19 {strides = array<i32>} : memref<1x128xf32, #tpu.memory_space<vmem>>, vector<1x128xf32>,
    } else {
    }
    %c0 = arith.constant 0 : index
    %c0_1 = arith.constant 0 : index
    %c0_2 = arith.constant 0 : index
    %3 = vector.load %arg2[%c0, %c0_1, %c0_2] : memref<1x16x288xbf16, #tpu.memory_space<vmem>>, vector<1x16x288xbf16>
    %4 = vector.shape_cast %3 : vector<1x16x288xbf16> to vector<16x288xbf16>
    %c0_3 = arith.constant 0 : index
    %c0_4 = arith.constant 0 : index
    %5 = vector.load %arg3[%c0_3, %c0_4] : memref<288x128xbf16, #tpu.memory_space<vmem>>, vector<288x128xbf16>
    %cst = arith.constant dense<0.000000e+00> : vector<16x128xf32>
    %6 = tpu.matmul %4, %5, %cst {dimension_numbers = #tpu.dot_dimension_numbers<[1], [0], [0], [1], [0, 0, 1, 1], [], []>} : vector<16x288xbf16>, vector<288x128xbf16>, vector<16x128xf32> -> vector<16x128xf32>
    %c16_i32 = arith.constant 16 : i32
    %7 = arith.muli %arg1, %c16_i32 : i32
    %8 = tpu.assume_multiple %7, 16 : i32
    %9 = arith.index_cast %8 : i32 to index
    %c0_5 = arith.constant 0 : index
    %10 = vector.load %arg5[%9, %c0_5] : memref<16x128xf32, #tpu.memory_space<vmem>>, vector<16x128xf32>
    tpu.vector_store %arg5[%9, %c0_5], %6 {strides = array<i32>} : memref<16x128xf32, #tpu.memory_space<vmem>>, vector<16x128xf32>,
    %c0_6 = arith.constant 0 : index
    %c0_7 = arith.constant 0 : index
    %11 = vector.load %arg6[%c0_6, %c0_7] : memref<1x128xf32, #tpu.memory_space<vmem>>, vector<1x128xf32>
    %cst_8 = arith.constant dense<0.000000e+00> : vector<128xf32>
    %12 = vector.multi_reduction <add>, %6, %cst_8 [0] : vector<16x128xf32> to vector<128xf32>
    %13 = vector.shape_cast %12 : vector<128xf32> to vector<1x128xf32>
    %14 = arith.addf %11, %13 : vector<1x128xf32>
    %c0_9 = arith.constant 0 : index
    %c0_10 = arith.constant 0 : index
    %15 = vector.load %arg6[%c0_9, %c0_10] : memref<1x128xf32, #tpu.memory_space<vmem>>, vector<1x128xf32>
    tpu.vector_store %arg6[%c0_9, %c0_10], %14 {strides = array<i32>} : memref<1x128xf32, #tpu.memory_space<vmem>>, vector<1x128xf32>,
    %c0_i32_11 = arith.constant 0 : i32
    %16 = arith.cmpi eq, %arg1, %c0_i32_11 : i32
    %17 = arith.extui %16 : i1 to i32
    %c0_i32_12 = arith.constant 0 : i32
    %18 = arith.cmpi ne, %17, %c0_i32_12 : i32
    scf.if %18 {
      %c0_13 = arith.constant 0 : index
      %c0_14 = arith.constant 0 : index
      %19 = vector.load %arg6[%c0_13, %c0_14] : memref<1x128xf32, #tpu.memory_space<vmem>>, vector<1x128xf32>
      %cst_15 = arith.constant 6.250000e-02 : f32
      %20 = vector.broadcast %cst_15 : f32 to vector<1x128xf32>
      %21 = arith.mulf %19, %20 : vector<1x128xf32>
      %cst_16 = arith.constant 0.000000e+00 : f32
      %22 = vector.broadcast %cst_16 : f32 to vector<1x128xf32>
      %c0_i32_17 = arith.constant 0 : i32
      %c16_i32_18 = arith.constant 16 : i32
      %23 = arith.muli %c0_i32_17, %c16_i32_18 : i32
      %24 = tpu.assume_multiple %23, 16 : i32
      %25 = arith.index_cast %24 : i32 to index
      %c0_19 = arith.constant 0 : index
      %26 = vector.load %arg5[%25, %c0_19] : memref<16x128xf32, #tpu.memory_space<vmem>>, vector<16x128xf32>
      %27 = vector.broadcast %21 : vector<1x128xf32> to vector<16x128xf32>
      %28 = arith.subf %26, %27 : vector<16x128xf32>
      %29 = tpu.iota {dimensions = array<i32: 0>} : vector<16x1xi32>
      %30 = vector.broadcast %24 : i32 to vector<16x1xi32>
      %31 = arith.addi %30, %29 : vector<16x1xi32>
      %c16_i32_20 = arith.constant 16 : i32
      %32 = vector.broadcast %c16_i32_20 : i32 to vector<16x1xi32>
      %33 = arith.cmpi slt, %31, %32 : vector<16x1xi32>
      %cst_21 = arith.constant 0.000000e+00 : f32
      %34 = vector.shape_cast %33 : vector<16x1xi1> to vector<16x1xi1>
      %35 = vector.broadcast %34 : vector<16x1xi1> to vector<16x128xi1>
      %36 = vector.broadcast %cst_21 : f32 to vector<16x128xf32>
      %37 = arith.select %35, %28, %36 : vector<16x128xi1>, vector<16x128xf32>
      %38 = arith.mulf %37, %37 : vector<16x128xf32>
      %cst_22 = arith.constant dense<0.000000e+00> : vector<128xf32>
      %39 = vector.multi_reduction <add>, %38, %cst_22 [0] : vector<16x128xf32> to vector<128xf32>
      %40 = vector.shape_cast %39 : vector<128xf32> to vector<1x128xf32>
      %41 = arith.addf %22, %40 : vector<1x128xf32>
      %c1_i32 = arith.constant 1 : i32
      %cst_23 = arith.constant 6.250000e-02 : f32
      %42 = vector.broadcast %cst_23 : f32 to vector<1x128xf32>
      %43 = arith.mulf %41, %42 : vector<1x128xf32>
      %cst_24 = arith.constant 9.99999974E-6 : f32
      %44 = vector.broadcast %cst_24 : f32 to vector<1x128xf32>
      %45 = arith.addf %43, %44 : vector<1x128xf32>
      %46 = math.rsqrt %45 : vector<1x128xf32>
      %c0_i32_25 = arith.constant 0 : i32
      %c16_i32_26 = arith.constant 16 : i32
      %47 = arith.muli %c0_i32_25, %c16_i32_26 : i32
      %48 = tpu.assume_multiple %47, 16 : i32
      %49 = arith.index_cast %48 : i32 to index
      %c0_27 = arith.constant 0 : index
      %50 = vector.load %arg5[%49, %c0_27] : memref<16x128xf32, #tpu.memory_space<vmem>>, vector<16x128xf32>
      %51 = vector.broadcast %21 : vector<1x128xf32> to vector<16x128xf32>
      %52 = arith.subf %50, %51 : vector<16x128xf32>
      %53 = vector.broadcast %46 : vector<1x128xf32> to vector<16x128xf32>
      %54 = arith.mulf %52, %53 : vector<16x128xf32>
      %cst_28 = arith.constant 0.000000e+00 : f32
      %55 = vector.broadcast %cst_28 : f32 to vector<16x128xf32>
      %56 = arith.cmpf oge, %54, %55 : vector<16x128xf32>
      %cst_29 = arith.constant 2.000000e-01 : f32
      %57 = vector.broadcast %cst_29 : f32 to vector<16x128xf32>
      %58 = arith.mulf %57, %54 : vector<16x128xf32>
      %59 = arith.select %56, %54, %58 : vector<16x128xi1>, vector<16x128xf32>
      %60 = arith.truncf %59 : vector<16x128xf32> to vector<16x128xbf16>
      %c0_30 = arith.constant 0 : index
      %61 = arith.index_cast %48 : i32 to index
      %c0_31 = arith.constant 0 : index
      %62 = vector.load %arg4[%c0_30, %61, %c0_31] : memref<1x16x128xbf16, #tpu.memory_space<vmem>>, vector<1x16x128xbf16>
      %63 = vector.shape_cast %62 : vector<1x16x128xbf16> to vector<16x128xbf16>
      %64 = vector.shape_cast %60 : vector<16x128xbf16> to vector<1x16x128xbf16>
      tpu.vector_store %arg4[%c0_30, %61, %c0_31], %64 {strides = array<i32>} : memref<1x16x128xbf16, #tpu.memory_space<vmem>>, vector<1x16x128xbf16>,
      %c1_i32_32 = arith.constant 1 : i32
    } else {
    }
    return
  }
  func.func @transform_0(%arg0: i32, %arg1: i32) -> (i32, i32, i32) {
    %c0_i32 = arith.constant 0 : i32
    %c0_i32_0 = arith.constant 0 : i32
    return %arg0, %arg1, %c0_i32 : i32, i32, i32
  }
  func.func @transform_1(%arg0: i32, %arg1: i32) -> (i32, i32) {
    %c0_i32 = arith.constant 0 : i32
    %c0_i32_0 = arith.constant 0 : i32
    %c0_i32_1 = arith.constant 0 : i32
    return %c0_i32, %c0_i32_0 : i32, i32
  }
  func.func @transform_2(%arg0: i32, %arg1: i32) -> (i32, i32, i32) {
    %c0_i32 = arith.constant 0 : i32
    %c0_i32_0 = arith.constant 0 : i32
    %c0_i32_1 = arith.constant 0 : i32
    return %arg0, %c0_i32, %c0_i32_0 : i32, i32, i32
  }
}

module attributes {stable_mosaic.version = 11 : i64} {
  func.func @_fused_conv_in_lrelu_kernel(%arg0: i32, %arg1: i32, %arg2: memref<1x16x576xbf16, #tpu.memory_space<vmem>>, %arg3: memref<576x128xbf16, #tpu.memory_space<vmem>>, %arg4: memref<1x16x128xbf16, #tpu.memory_space<vmem>>, %arg5: memref<16x128xf32, #tpu.memory_space<vmem>>, %arg6: memref<1x128xf32, #tpu.memory_space<vmem>>) attributes {dimension_semantics = [#tpu.dimension_semantics<parallel>, #tpu.dimension_semantics<arbitrary>], iteration_bounds = array<i64: 2, 1>, scalar_prefetch = 0 : i64, scratch_operands = 2 : i64, tpu.core_type = #tpu.core_type<tc>, window_params = [{transform_indices = @transform_0, window_bounds = array<i64: 1, 16, 576>}, {pipeline_mode = #tpu.pipeline_mode<synchronous>, transform_indices = @transform_1, window_bounds = array<i64: 576, 128>}, {transform_indices = @transform_2, window_bounds = array<i64: 1, 16, 128>}]} {
    %c0_i32 = arith.constant 0 : i32
    %0 = arith.cmpi eq, %arg1, %c0_i32 : i32
    %1 = arith.extui %0 : i1 to i32
    %c0_i32_0 = arith.constant 0 : i32
    %2 = arith.cmpi ne, %1, %c0_i32_0 : i32
    scf.if %2 {
      %cst_13 = arith.constant 0.000000e+00 : f32
      %19 = vector.broadcast %cst_13 : f32 to vector<1x128xf32>
      %c0_14 = arith.constant 0 : index
      %c0_15 = arith.constant 0 : index
      %20 = vector.load %arg6[%c0_14, %c0_15] : memref<1x128xf32, #tpu.memory_space<vmem>>, vector<1x128xf32>
      tpu.vector_store %arg6[%c0_14, %c0_15], %19 {strides = array<i32>} : memref<1x128xf32, #tpu.memory_space<vmem>>, vector<1x128xf32>,
    } else {
    }
    %c0 = arith.constant 0 : index
    %c0_1 = arith.constant 0 : index
    %c0_2 = arith.constant 0 : index
    %3 = vector.load %arg2[%c0, %c0_1, %c0_2] : memref<1x16x576xbf16, #tpu.memory_space<vmem>>, vector<1x16x576xbf16>
    %4 = vector.shape_cast %3 : vector<1x16x576xbf16> to vector<16x576xbf16>
    %c0_3 = arith.constant 0 : index
    %c0_4 = arith.constant 0 : index
    %5 = vector.load %arg3[%c0_3, %c0_4] : memref<576x128xbf16, #tpu.memory_space<vmem>>, vector<576x128xbf16>
    %cst = arith.constant dense<0.000000e+00> : vector<16x128xf32>
    %6 = tpu.matmul %4, %5, %cst {dimension_numbers = #tpu.dot_dimension_numbers<[1], [0], [0], [1], [0, 0, 1, 1], [], []>} : vector<16x576xbf16>, vector<576x128xbf16>, vector<16x128xf32> -> vector<16x128xf32>
    %c16_i32 = arith.constant 16 : i32
    %7 = arith.muli %arg1, %c16_i32 : i32
    %8 = tpu.assume_multiple %7, 16 : i32
    %9 = arith.index_cast %8 : i32 to index
    %c0_5 = arith.constant 0 : index
    %10 = vector.load %arg5[%9, %c0_5] : memref<16x128xf32, #tpu.memory_space<vmem>>, vector<16x128xf32>
    tpu.vector_store %arg5[%9, %c0_5], %6 {strides = array<i32>} : memref<16x128xf32, #tpu.memory_space<vmem>>, vector<16x128xf32>,
    %c0_6 = arith.constant 0 : index
    %c0_7 = arith.constant 0 : index
    %11 = vector.load %arg6[%c0_6, %c0_7] : memref<1x128xf32, #tpu.memory_space<vmem>>, vector<1x128xf32>
    %cst_8 = arith.constant dense<0.000000e+00> : vector<128xf32>
    %12 = vector.multi_reduction <add>, %6, %cst_8 [0] : vector<16x128xf32> to vector<128xf32>
    %13 = vector.shape_cast %12 : vector<128xf32> to vector<1x128xf32>
    %14 = arith.addf %11, %13 : vector<1x128xf32>
    %c0_9 = arith.constant 0 : index
    %c0_10 = arith.constant 0 : index
    %15 = vector.load %arg6[%c0_9, %c0_10] : memref<1x128xf32, #tpu.memory_space<vmem>>, vector<1x128xf32>
    tpu.vector_store %arg6[%c0_9, %c0_10], %14 {strides = array<i32>} : memref<1x128xf32, #tpu.memory_space<vmem>>, vector<1x128xf32>,
    %c0_i32_11 = arith.constant 0 : i32
    %16 = arith.cmpi eq, %arg1, %c0_i32_11 : i32
    %17 = arith.extui %16 : i1 to i32
    %c0_i32_12 = arith.constant 0 : i32
    %18 = arith.cmpi ne, %17, %c0_i32_12 : i32
    scf.if %18 {
      %c0_13 = arith.constant 0 : index
      %c0_14 = arith.constant 0 : index
      %19 = vector.load %arg6[%c0_13, %c0_14] : memref<1x128xf32, #tpu.memory_space<vmem>>, vector<1x128xf32>
      %cst_15 = arith.constant 6.250000e-02 : f32
      %20 = vector.broadcast %cst_15 : f32 to vector<1x128xf32>
      %21 = arith.mulf %19, %20 : vector<1x128xf32>
      %cst_16 = arith.constant 0.000000e+00 : f32
      %22 = vector.broadcast %cst_16 : f32 to vector<1x128xf32>
      %c0_i32_17 = arith.constant 0 : i32
      %c16_i32_18 = arith.constant 16 : i32
      %23 = arith.muli %c0_i32_17, %c16_i32_18 : i32
      %24 = tpu.assume_multiple %23, 16 : i32
      %25 = arith.index_cast %24 : i32 to index
      %c0_19 = arith.constant 0 : index
      %26 = vector.load %arg5[%25, %c0_19] : memref<16x128xf32, #tpu.memory_space<vmem>>, vector<16x128xf32>
      %27 = vector.broadcast %21 : vector<1x128xf32> to vector<16x128xf32>
      %28 = arith.subf %26, %27 : vector<16x128xf32>
      %29 = tpu.iota {dimensions = array<i32: 0>} : vector<16x1xi32>
      %30 = vector.broadcast %24 : i32 to vector<16x1xi32>
      %31 = arith.addi %30, %29 : vector<16x1xi32>
      %c16_i32_20 = arith.constant 16 : i32
      %32 = vector.broadcast %c16_i32_20 : i32 to vector<16x1xi32>
      %33 = arith.cmpi slt, %31, %32 : vector<16x1xi32>
      %cst_21 = arith.constant 0.000000e+00 : f32
      %34 = vector.shape_cast %33 : vector<16x1xi1> to vector<16x1xi1>
      %35 = vector.broadcast %34 : vector<16x1xi1> to vector<16x128xi1>
      %36 = vector.broadcast %cst_21 : f32 to vector<16x128xf32>
      %37 = arith.select %35, %28, %36 : vector<16x128xi1>, vector<16x128xf32>
      %38 = arith.mulf %37, %37 : vector<16x128xf32>
      %cst_22 = arith.constant dense<0.000000e+00> : vector<128xf32>
      %39 = vector.multi_reduction <add>, %38, %cst_22 [0] : vector<16x128xf32> to vector<128xf32>
      %40 = vector.shape_cast %39 : vector<128xf32> to vector<1x128xf32>
      %41 = arith.addf %22, %40 : vector<1x128xf32>
      %c1_i32 = arith.constant 1 : i32
      %cst_23 = arith.constant 6.250000e-02 : f32
      %42 = vector.broadcast %cst_23 : f32 to vector<1x128xf32>
      %43 = arith.mulf %41, %42 : vector<1x128xf32>
      %cst_24 = arith.constant 9.99999974E-6 : f32
      %44 = vector.broadcast %cst_24 : f32 to vector<1x128xf32>
      %45 = arith.addf %43, %44 : vector<1x128xf32>
      %46 = math.rsqrt %45 : vector<1x128xf32>
      %c0_i32_25 = arith.constant 0 : i32
      %c16_i32_26 = arith.constant 16 : i32
      %47 = arith.muli %c0_i32_25, %c16_i32_26 : i32
      %48 = tpu.assume_multiple %47, 16 : i32
      %49 = arith.index_cast %48 : i32 to index
      %c0_27 = arith.constant 0 : index
      %50 = vector.load %arg5[%49, %c0_27] : memref<16x128xf32, #tpu.memory_space<vmem>>, vector<16x128xf32>
      %51 = vector.broadcast %21 : vector<1x128xf32> to vector<16x128xf32>
      %52 = arith.subf %50, %51 : vector<16x128xf32>
      %53 = vector.broadcast %46 : vector<1x128xf32> to vector<16x128xf32>
      %54 = arith.mulf %52, %53 : vector<16x128xf32>
      %cst_28 = arith.constant 0.000000e+00 : f32
      %55 = vector.broadcast %cst_28 : f32 to vector<16x128xf32>
      %56 = arith.cmpf oge, %54, %55 : vector<16x128xf32>
      %cst_29 = arith.constant 2.000000e-01 : f32
      %57 = vector.broadcast %cst_29 : f32 to vector<16x128xf32>
      %58 = arith.mulf %57, %54 : vector<16x128xf32>
      %59 = arith.select %56, %54, %58 : vector<16x128xi1>, vector<16x128xf32>
      %60 = arith.truncf %59 : vector<16x128xf32> to vector<16x128xbf16>
      %c0_30 = arith.constant 0 : index
      %61 = arith.index_cast %48 : i32 to index
      %c0_31 = arith.constant 0 : index
      %62 = vector.load %arg4[%c0_30, %61, %c0_31] : memref<1x16x128xbf16, #tpu.memory_space<vmem>>, vector<1x16x128xbf16>
      %63 = vector.shape_cast %62 : vector<1x16x128xbf16> to vector<16x128xbf16>
      %64 = vector.shape_cast %60 : vector<16x128xbf16> to vector<1x16x128xbf16>
      tpu.vector_store %arg4[%c0_30, %61, %c0_31], %64 {strides = array<i32>} : memref<1x16x128xbf16, #tpu.memory_space<vmem>>, vector<1x16x128xbf16>,
      %c1_i32_32 = arith.constant 1 : i32
    } else {
    }
    return
  }
  func.func @transform_0(%arg0: i32, %arg1: i32) -> (i32, i32, i32) {
    %c0_i32 = arith.constant 0 : i32
    %c0_i32_0 = arith.constant 0 : i32
    return %arg0, %arg1, %c0_i32 : i32, i32, i32
  }
  func.func @transform_1(%arg0: i32, %arg1: i32) -> (i32, i32) {
    %c0_i32 = arith.constant 0 : i32
    %c0_i32_0 = arith.constant 0 : i32
    %c0_i32_1 = arith.constant 0 : i32
    return %c0_i32, %c0_i32_0 : i32, i32
  }
  func.func @transform_2(%arg0: i32, %arg1: i32) -> (i32, i32, i32) {
    %c0_i32 = arith.constant 0 : i32
    %c0_i32_0 = arith.constant 0 : i32
    %c0_i32_1 = arith.constant 0 : i32
    return %arg0, %c0_i32, %c0_i32_0 : i32, i32, i32
  }
}

module attributes {stable_mosaic.version = 11 : i64} {
  func.func @_fused_conv_in_lrelu_kernel(%arg0: i32, %arg1: i32, %arg2: memref<1x8x576xbf16, #tpu.memory_space<vmem>>, %arg3: memref<576x128xbf16, #tpu.memory_space<vmem>>, %arg4: memref<1x8x128xbf16, #tpu.memory_space<vmem>>, %arg5: memref<8x128xf32, #tpu.memory_space<vmem>>, %arg6: memref<1x128xf32, #tpu.memory_space<vmem>>) attributes {dimension_semantics = [#tpu.dimension_semantics<parallel>, #tpu.dimension_semantics<arbitrary>], iteration_bounds = array<i64: 2, 1>, scalar_prefetch = 0 : i64, scratch_operands = 2 : i64, tpu.core_type = #tpu.core_type<tc>, window_params = [{transform_indices = @transform_0, window_bounds = array<i64: 1, 8, 576>}, {pipeline_mode = #tpu.pipeline_mode<synchronous>, transform_indices = @transform_1, window_bounds = array<i64: 576, 128>}, {transform_indices = @transform_2, window_bounds = array<i64: 1, 8, 128>}]} {
    %c0_i32 = arith.constant 0 : i32
    %0 = arith.cmpi eq, %arg1, %c0_i32 : i32
    %1 = arith.extui %0 : i1 to i32
    %c0_i32_0 = arith.constant 0 : i32
    %2 = arith.cmpi ne, %1, %c0_i32_0 : i32
    scf.if %2 {
      %cst_13 = arith.constant 0.000000e+00 : f32
      %19 = vector.broadcast %cst_13 : f32 to vector<1x128xf32>
      %c0_14 = arith.constant 0 : index
      %c0_15 = arith.constant 0 : index
      %20 = vector.load %arg6[%c0_14, %c0_15] : memref<1x128xf32, #tpu.memory_space<vmem>>, vector<1x128xf32>
      tpu.vector_store %arg6[%c0_14, %c0_15], %19 {strides = array<i32>} : memref<1x128xf32, #tpu.memory_space<vmem>>, vector<1x128xf32>,
    } else {
    }
    %c0 = arith.constant 0 : index
    %c0_1 = arith.constant 0 : index
    %c0_2 = arith.constant 0 : index
    %3 = vector.load %arg2[%c0, %c0_1, %c0_2] : memref<1x8x576xbf16, #tpu.memory_space<vmem>>, vector<1x8x576xbf16>
    %4 = vector.shape_cast %3 : vector<1x8x576xbf16> to vector<8x576xbf16>
    %c0_3 = arith.constant 0 : index
    %c0_4 = arith.constant 0 : index
    %5 = vector.load %arg3[%c0_3, %c0_4] : memref<576x128xbf16, #tpu.memory_space<vmem>>, vector<576x128xbf16>
    %cst = arith.constant dense<0.000000e+00> : vector<8x128xf32>
    %6 = tpu.matmul %4, %5, %cst {dimension_numbers = #tpu.dot_dimension_numbers<[1], [0], [0], [1], [0, 0, 1, 1], [], []>} : vector<8x576xbf16>, vector<576x128xbf16>, vector<8x128xf32> -> vector<8x128xf32>
    %c8_i32 = arith.constant 8 : i32
    %7 = arith.muli %arg1, %c8_i32 : i32
    %8 = tpu.assume_multiple %7, 8 : i32
    %9 = arith.index_cast %8 : i32 to index
    %c0_5 = arith.constant 0 : index
    %10 = vector.load %arg5[%9, %c0_5] : memref<8x128xf32, #tpu.memory_space<vmem>>, vector<8x128xf32>
    tpu.vector_store %arg5[%9, %c0_5], %6 {strides = array<i32>} : memref<8x128xf32, #tpu.memory_space<vmem>>, vector<8x128xf32>,
    %c0_6 = arith.constant 0 : index
    %c0_7 = arith.constant 0 : index
    %11 = vector.load %arg6[%c0_6, %c0_7] : memref<1x128xf32, #tpu.memory_space<vmem>>, vector<1x128xf32>
    %cst_8 = arith.constant dense<0.000000e+00> : vector<128xf32>
    %12 = vector.multi_reduction <add>, %6, %cst_8 [0] : vector<8x128xf32> to vector<128xf32>
    %13 = vector.shape_cast %12 : vector<128xf32> to vector<1x128xf32>
    %14 = arith.addf %11, %13 : vector<1x128xf32>
    %c0_9 = arith.constant 0 : index
    %c0_10 = arith.constant 0 : index
    %15 = vector.load %arg6[%c0_9, %c0_10] : memref<1x128xf32, #tpu.memory_space<vmem>>, vector<1x128xf32>
    tpu.vector_store %arg6[%c0_9, %c0_10], %14 {strides = array<i32>} : memref<1x128xf32, #tpu.memory_space<vmem>>, vector<1x128xf32>,
    %c0_i32_11 = arith.constant 0 : i32
    %16 = arith.cmpi eq, %arg1, %c0_i32_11 : i32
    %17 = arith.extui %16 : i1 to i32
    %c0_i32_12 = arith.constant 0 : i32
    %18 = arith.cmpi ne, %17, %c0_i32_12 : i32
    scf.if %18 {
      %c0_13 = arith.constant 0 : index
      %c0_14 = arith.constant 0 : index
      %19 = vector.load %arg6[%c0_13, %c0_14] : memref<1x128xf32, #tpu.memory_space<vmem>>, vector<1x128xf32>
      %cst_15 = arith.constant 2.500000e-01 : f32
      %20 = vector.broadcast %cst_15 : f32 to vector<1x128xf32>
      %21 = arith.mulf %19, %20 : vector<1x128xf32>
      %cst_16 = arith.constant 0.000000e+00 : f32
      %22 = vector.broadcast %cst_16 : f32 to vector<1x128xf32>
      %c0_i32_17 = arith.constant 0 : i32
      %c8_i32_18 = arith.constant 8 : i32
      %23 = arith.muli %c0_i32_17, %c8_i32_18 : i32
      %24 = tpu.assume_multiple %23, 8 : i32
      %25 = arith.index_cast %24 : i32 to index
      %c0_19 = arith.constant 0 : index
      %26 = vector.load %arg5[%25, %c0_19] : memref<8x128xf32, #tpu.memory_space<vmem>>, vector<8x128xf32>
      %27 = vector.broadcast %21 : vector<1x128xf32> to vector<8x128xf32>
      %28 = arith.subf %26, %27 : vector<8x128xf32>
      %29 = tpu.iota {dimensions = array<i32: 0>} : vector<8x1xi32>
      %30 = vector.broadcast %24 : i32 to vector<8x1xi32>
      %31 = arith.addi %30, %29 : vector<8x1xi32>
      %c4_i32 = arith.constant 4 : i32
      %32 = vector.broadcast %c4_i32 : i32 to vector<8x1xi32>
      %33 = arith.cmpi slt, %31, %32 : vector<8x1xi32>
      %cst_20 = arith.constant 0.000000e+00 : f32
      %34 = vector.shape_cast %33 : vector<8x1xi1> to vector<8x1xi1>
      %35 = vector.broadcast %34 : vector<8x1xi1> to vector<8x128xi1>
      %36 = vector.broadcast %cst_20 : f32 to vector<8x128xf32>
      %37 = arith.select %35, %28, %36 : vector<8x128xi1>, vector<8x128xf32>
      %38 = arith.mulf %37, %37 : vector<8x128xf32>
      %cst_21 = arith.constant dense<0.000000e+00> : vector<128xf32>
      %39 = vector.multi_reduction <add>, %38, %cst_21 [0] : vector<8x128xf32> to vector<128xf32>
      %40 = vector.shape_cast %39 : vector<128xf32> to vector<1x128xf32>
      %41 = arith.addf %22, %40 : vector<1x128xf32>
      %c1_i32 = arith.constant 1 : i32
      %cst_22 = arith.constant 2.500000e-01 : f32
      %42 = vector.broadcast %cst_22 : f32 to vector<1x128xf32>
      %43 = arith.mulf %41, %42 : vector<1x128xf32>
      %cst_23 = arith.constant 9.99999974E-6 : f32
      %44 = vector.broadcast %cst_23 : f32 to vector<1x128xf32>
      %45 = arith.addf %43, %44 : vector<1x128xf32>
      %46 = math.rsqrt %45 : vector<1x128xf32>
      %c0_i32_24 = arith.constant 0 : i32
      %c8_i32_25 = arith.constant 8 : i32
      %47 = arith.muli %c0_i32_24, %c8_i32_25 : i32
      %48 = tpu.assume_multiple %47, 8 : i32
      %49 = arith.index_cast %48 : i32 to index
      %c0_26 = arith.constant 0 : index
      %50 = vector.load %arg5[%49, %c0_26] : memref<8x128xf32, #tpu.memory_space<vmem>>, vector<8x128xf32>
      %51 = vector.broadcast %21 : vector<1x128xf32> to vector<8x128xf32>
      %52 = arith.subf %50, %51 : vector<8x128xf32>
      %53 = vector.broadcast %46 : vector<1x128xf32> to vector<8x128xf32>
      %54 = arith.mulf %52, %53 : vector<8x128xf32>
      %cst_27 = arith.constant 0.000000e+00 : f32
      %55 = vector.broadcast %cst_27 : f32 to vector<8x128xf32>
      %56 = arith.cmpf oge, %54, %55 : vector<8x128xf32>
      %cst_28 = arith.constant 2.000000e-01 : f32
      %57 = vector.broadcast %cst_28 : f32 to vector<8x128xf32>
      %58 = arith.mulf %57, %54 : vector<8x128xf32>
      %59 = arith.select %56, %54, %58 : vector<8x128xi1>, vector<8x128xf32>
      %60 = arith.truncf %59 : vector<8x128xf32> to vector<8x128xbf16>
      %c0_29 = arith.constant 0 : index
      %61 = arith.index_cast %48 : i32 to index
      %c0_30 = arith.constant 0 : index
      %62 = vector.load %arg4[%c0_29, %61, %c0_30] : memref<1x8x128xbf16, #tpu.memory_space<vmem>>, vector<1x8x128xbf16>
      %63 = vector.shape_cast %62 : vector<1x8x128xbf16> to vector<8x128xbf16>
      %64 = vector.shape_cast %60 : vector<8x128xbf16> to vector<1x8x128xbf16>
      tpu.vector_store %arg4[%c0_29, %61, %c0_30], %64 {strides = array<i32>} : memref<1x8x128xbf16, #tpu.memory_space<vmem>>, vector<1x8x128xbf16>,
      %c1_i32_31 = arith.constant 1 : i32
    } else {
    }
    return
  }
  func.func @transform_0(%arg0: i32, %arg1: i32) -> (i32, i32, i32) {
    %c0_i32 = arith.constant 0 : i32
    %c0_i32_0 = arith.constant 0 : i32
    return %arg0, %arg1, %c0_i32 : i32, i32, i32
  }
  func.func @transform_1(%arg0: i32, %arg1: i32) -> (i32, i32) {
    %c0_i32 = arith.constant 0 : i32
    %c0_i32_0 = arith.constant 0 : i32
    %c0_i32_1 = arith.constant 0 : i32
    return %c0_i32, %c0_i32_0 : i32, i32
  }
  func.func @transform_2(%arg0: i32, %arg1: i32) -> (i32, i32, i32) {
    %c0_i32 = arith.constant 0 : i32
    %c0_i32_0 = arith.constant 0 : i32
    %c0_i32_1 = arith.constant 0 : i32
    return %arg0, %c0_i32, %c0_i32_0 : i32, i32, i32
  }
}

module attributes {stable_mosaic.version = 11 : i64} {
  func.func @_conv1x_out_kernel(%arg0: i32, %arg1: i32, %arg2: memref<1x8x576xbf16, #tpu.memory_space<vmem>>, %arg3: memref<1x576xf32, #tpu.memory_space<vmem>>, %arg4: memref<1x1xf32, #tpu.memory_space<vmem>>, %arg5: memref<1x8x1xf32, #tpu.memory_space<vmem>>) attributes {dimension_semantics = [#tpu.dimension_semantics<parallel>, #tpu.dimension_semantics<parallel>], iteration_bounds = array<i64: 2, 1>, scalar_prefetch = 0 : i64, scratch_operands = 0 : i64, tpu.core_type = #tpu.core_type<tc>, window_params = [{transform_indices = @transform_0, window_bounds = array<i64: 1, 8, 576>}, {pipeline_mode = #tpu.pipeline_mode<synchronous>, transform_indices = @transform_1, window_bounds = array<i64: 1, 576>}, {pipeline_mode = #tpu.pipeline_mode<synchronous>, transform_indices = @transform_2, window_bounds = array<i64: 1, 1>}, {transform_indices = @transform_3, window_bounds = array<i64: 1, 8, 1>}]} {
    %c0 = arith.constant 0 : index
    %c0_0 = arith.constant 0 : index
    %c0_1 = arith.constant 0 : index
    %0 = vector.load %arg2[%c0, %c0_0, %c0_1] : memref<1x8x576xbf16, #tpu.memory_space<vmem>>, vector<1x8x576xbf16>
    %1 = vector.shape_cast %0 : vector<1x8x576xbf16> to vector<8x576xbf16>
    %2 = arith.extf %1 : vector<8x576xbf16> to vector<8x576xf32>
    %c0_2 = arith.constant 0 : index
    %c0_3 = arith.constant 0 : index
    %3 = vector.load %arg3[%c0_2, %c0_3] : memref<1x576xf32, #tpu.memory_space<vmem>>, vector<1x576xf32>
    %4 = vector.broadcast %3 : vector<1x576xf32> to vector<8x576xf32>
    %5 = arith.mulf %2, %4 : vector<8x576xf32>
    %cst = arith.constant dense<0.000000e+00> : vector<8xf32>
    %6 = vector.multi_reduction <add>, %5, %cst [1] : vector<8x576xf32> to vector<8xf32>
    %7 = vector.shape_cast %6 : vector<8xf32> to vector<8x1xf32>
    %c0_4 = arith.constant 0 : index
    %c0_5 = arith.constant 0 : index
    %8 = vector.load %arg4[%c0_4, %c0_5] : memref<1x1xf32, #tpu.memory_space<vmem>>, vector<1x1xf32>
    %9 = vector.broadcast %8 : vector<1x1xf32> to vector<8x1xf32>
    %10 = arith.addf %7, %9 : vector<8x1xf32>
    %c0_6 = arith.constant 0 : index
    %c0_7 = arith.constant 0 : index
    %c0_8 = arith.constant 0 : index
    %11 = vector.load %arg5[%c0_6, %c0_7, %c0_8] : memref<1x8x1xf32, #tpu.memory_space<vmem>>, vector<1x8x1xf32>
    %12 = vector.shape_cast %11 : vector<1x8x1xf32> to vector<8x1xf32>
    %13 = vector.shape_cast %10 : vector<8x1xf32> to vector<1x8x1xf32>
    tpu.vector_store %arg5[%c0_6, %c0_7, %c0_8], %13 {strides = array<i32>} : memref<1x8x1xf32, #tpu.memory_space<vmem>>, vector<1x8x1xf32>,
    return
  }
  func.func @transform_0(%arg0: i32, %arg1: i32) -> (i32, i32, i32) {
    %c0_i32 = arith.constant 0 : i32
    %c0_i32_0 = arith.constant 0 : i32
    return %arg0, %arg1, %c0_i32 : i32, i32, i32
  }
  func.func @transform_1(%arg0: i32, %arg1: i32) -> (i32, i32) {
    %c0_i32 = arith.constant 0 : i32
    %c0_i32_0 = arith.constant 0 : i32
    %c0_i32_1 = arith.constant 0 : i32
    return %c0_i32, %c0_i32_0 : i32, i32
  }
  func.func @transform_2(%arg0: i32, %arg1: i32) -> (i32, i32) {
    %c0_i32 = arith.constant 0 : i32
    %c0_i32_0 = arith.constant 0 : i32
    %c0_i32_1 = arith.constant 0 : i32
    return %c0_i32, %c0_i32_0 : i32, i32
  }
  func.func @transform_3(%arg0: i32, %arg1: i32) -> (i32, i32, i32) {
    %c0_i32 = arith.constant 0 : i32
    %c0_i32_0 = arith.constant 0 : i32
    return %arg0, %arg1, %c0_i32 : i32, i32, i32
  }
}

</mosaic_0001>

<bundles_post_ra>
// kernel: discriminator_forward.11
= control target key start
LH: loop header
LB: loop body
LE: loop exit
PB: predicated region body
PF: predicated region fallthrough
CT: control target
= control target key end

     0   :  { %s3105_s9 = smov 0   ;;  %s3107_s10 = smov 0   ;;  %s4380_s0 = inlined_call_operand.vmem [shape: bf16[2,1024,16], index: 0, kind: input, shape index: {}]   ;;  %s4381_s1 = inlined_call_operand.vmem [shape: bf16[16,128], index: 1, kind: input, shape index: {}]   ;;  %s4382_s2 = inlined_call_operand.vmem [shape: bf16[2,1024,128], index: 2, kind: output, shape index: {}]  }
   0x1   :  { %s3109_s11 = smov 0   ;;  %s3111_s12 = smov 0  }
   0x2   :  { %s3113_s13 = smov 0  }
   0x3 LB: > { %s21_s14 = sadd.s32 1, %s3067_s11  ;;  %s24_s15 = sadd.s32 1, %s3071_s12  ;;  %s3075_s13 = sphi %s3113_s13, %s12_s13   ;;  %s3071_s12 = sphi %s3111_s12, %s4461_s12   ;;  %s3067_s11 = sphi %s3109_s11, %s4460_s11   ;;  %s3063_s10 = sphi %s3107_s10, %s4459_s10   ;;  %s3059_s9 = sphi %s3105_s9, %s4458_s9  }
   0x4   : > { %p22_p0 = scmp.ge.s32.totalorder %s21_s14, 2  ;;  %p2425_p1 = scmp.ge.s32.totalorder %s3075_s13, 1 }
   0x5   : > { %p131_p2 = scmp.lt.s32.totalorder %s3075_s13, 5 }
   0x6   : > { %s4463_s14 = smov (%p22_p0, %s21_s14), 0  ;;  %s4465_s15 = smov (!%p22_p0, %s24_s15), %s3071_s12 }
   0x7   : > { %p132_p3 = pnand %p2425_p1, %p131_p2  ;;  %p26_p4 = scmp.ge.s32.totalorder %s4465_s15, 2 }
   0x8   : > { %s2426_s16 = sshll.u32 (!%p132_p3), %s3059_s9, 6  ;;  %p158_p5 = scmp.lt.s32.totalorder (!%p132_p3), %s3063_s10, 1 }
   0x9   : > { %s4467_s15 = smov (%p26_p4, %s4465_s15), 0  ;;  %135 = sbr.rel (%p132_p3) target bundleno = 704 (0x2c0), region = 28 }
   0xa   : > { %p160_p6 = scmp.lt.s32.totalorder (!%p132_p3), %s2426_s16, 127  ;;  %p2431_p7 = scmp.ne.s32.totalorder (!%p132_p3), %s3059_s9, 0 }
  0x10   : > { %s4469_s10 = smov (!%p158_p5, %s3063_s10), 1  ;;  %s4471_s16 = smov (!%p160_p6, %s2426_s16), 127 }
  0x11   : > { %s2427_s17 = sshll.u32 %s4469_s10, 7  ;;  %s2568_s18 = sshll.u32 %s4469_s10, 9  ;;  %v3089_v0 = vmov (!%p2431_p7), 0.0  }
  0x12   : > { %s163_s19 = sadd.s32 %s2427_s17, %s4471_s16  ;;  %s3141_s22 = scalar_lea.vmem %s4382_s2, %s2568_s18  ;;  %177 = vst [vmem:[#allocation3] sm:$0x1] (!%p2431_p7), %v3089_v0 }
  0x13   : > { %s2428_s23 = sshll.u32 %s163_s19, 2  ;;  %176 = sbr.rel (%p2431_p7) target bundleno = 26 (0x1a), region = 32 }
  0x14   : > { %s3146_s26 = scalar_lea.vmem %s4380_s0, %s2428_s23 }
  0x1a PF: > { %v2990_v1 = vld [vmem:[%s4381_s1] sm:$0xff]   ;;  %vm410_vm0 = vcmask 130048   ;;  %v2992_v3 = vld [vmem:[%s3146_s26 + $0x8] sm:$0xff]   ;;  %v2993_v4 = vld [vmem:[%s3146_s26 + $0x10] sm:$0xff]   ;;  %s2497_s29 = sshll.u32 %s3059_s9, 9  ;;  %p2498_p8 = scmp.ne.s32.totalorder %s3059_s9, 1 }
  0x1b   : > { %v2991_v2 = vld [vmem:[%s3146_s26] sm:$0xff]   ;;  %2857 = vmatprep.subr.bf16.mxu0 %v2990_v1  ;;  %2923 = vmatprep.subr.bf16.mxu1 %v2990_v1  ;;  %v2994_v5 = vld [vmem:[%s3146_s26 + $0x18] sm:$0xff]   ;;  %v2996_v7 = vld [vmem:[%s3146_s26 + $0x28] sm:$0xff]   ;;  %s3217_s30 = scalar_lea.vmem [#allocation2], %s2497_s29 }
  0x1c   : > { %2858 = vmatpush3.bf16.msra.mxu0 %v2990_v1  ;;  %2859 = vmatprep.mubr.msk.bf16.mxu0 %vm410_vm0, %v2991_v2  ;;  %v2995_v6 = vld [vmem:[%s3146_s26 + $0x20] sm:$0xff]   ;;  %v2997_v8 = vld [vmem:[%s3146_s26 + $0x30] sm:$0xff]   ;;  %v3008_v10 = vld [vmem:[%s3146_s26 + $0x88] sm:$0xff]  }
  0x1d   : > { %2924 = vmatpush3.bf16.msra.mxu1 %v2990_v1  ;;  %v3007_v9 = vld [vmem:[%s3146_s26 + $0x80] sm:$0xff]   ;;  %v3009_v11 = vld [vmem:[%s3146_s26 + $0x90] sm:$0xff]   ;;  %v3010_v12 = vld [vmem:[%s3146_s26 + $0x98] sm:$0xff]  }
  0x1e   : > { %2891 = vmatprep.mubr.msk.bf16.mxu1 %vm410_vm0, %v3007_v9  ;;  %v3011_v13 = vld [vmem:[%s3146_s26 + $0xa0] sm:$0xff]   ;;  %v2998_v14 = vld [vmem:[%s3146_s26 + $0x38] sm:$0xff]   ;;  %v3012_v16 = vld [vmem:[%s3146_s26 + $0xa8] sm:$0xff]  }
  0x1f   : > { %2860 = vmatmul.mubr.msk.bf16.vlgmr.msra.gmra.mrb[0].mxu0 %vm410_vm0, %v2992_v3  ;;  %v2999_v15 = vld [vmem:[%s3146_s26 + $0x40] sm:$0xff]   ;;  %v3013_v17 = vld [vmem:[%s3146_s26 + $0xb0] sm:$0xff]   ;;  %v3000_v18 = vld [vmem:[%s3146_s26 + $0x48] sm:$0xff]  }
  0x20   : > { %2863 = vmatprep.mubr.msk.bf16.mxu0 %vm410_vm0, %v2993_v4  ;;  %2892 = vmatmul.mubr.msk.bf16.vlgmr.msra.gmra.mrb[0].mxu1 %vm410_vm0, %v3008_v10  ;;  %v3001_v19 = vld [vmem:[%s3146_s26 + $0x50] sm:$0xff]   ;;  %v3014_v20 = vld [vmem:[%s3146_s26 + $0xb8] sm:$0xff]   ;;  %v3015_v21 = vld [vmem:[%s3146_s26 + $0xc0] sm:$0xff]  }
  0x21   : > { %2895 = vmatprep.mubr.msk.bf16.mxu1 %vm410_vm0, %v3009_v11  ;;  %v3002_v22 = vld [vmem:[%s3146_s26 + $0x58] sm:$0xff]   ;;  %v3003_v23 = vld [vmem:[%s3146_s26 + $0x60] sm:$0xff]   ;;  %v3016_v24 = vld [vmem:[%s3146_s26 + $0xc8] sm:$0xff]  }
  0x22   : > { %v3017_v25 = vld [vmem:[%s3146_s26 + $0xd0] sm:$0xff]   ;;  %v3004_v26 = vld [vmem:[%s3146_s26 + $0x68] sm:$0xff]   ;;  %v3018_v28 = vld [vmem:[%s3146_s26 + $0xd8] sm:$0xff]  }
  0x23   : > { %v3005_v27 = vld [vmem:[%s3146_s26 + $0x70] sm:$0xff]   ;;  %v3019_v29 = vld [vmem:[%s3146_s26 + $0xe0] sm:$0xff]   ;;  %v3006_v30 = vld [vmem:[%s3146_s26 + $0x78] sm:$0xff]  }
  0x24   : > { %v3020_v31 = vld [vmem:[%s3146_s26 + $0xe8] sm:$0xff]   ;;  %v3021_v32 = vld [vmem:[%s3146_s26 + $0xf0] sm:$0xff]   ;;  %v3022_v33 = vld [vmem:[%s3146_s26 + $0xf8] sm:$0xff]  }
  0x27   : > { %2864 = vmatmul.mubr.msk.bf16.gmra.mrb[4].mxu0 %vm410_vm0, %v2994_v5 }
  0x28   : > { %2867 = vmatprep.mubr.msk.bf16.mxu0 %vm410_vm0, %v2995_v6  ;;  %2896 = vmatmul.mubr.msk.bf16.gmra.mrb[4].mxu1 %vm410_vm0, %v3010_v12 }
  0x29   : > { %2899 = vmatprep.mubr.msk.bf16.mxu1 %vm410_vm0, %v3011_v13 }
  0x2f   : > { %2868 = vmatmul.mubr.msk.bf16.gmra.mrb[8].mxu0 %vm410_vm0, %v2996_v7 }
  0x30   : > { %2871 = vmatprep.mubr.msk.bf16.mxu0 %vm410_vm0, %v2997_v8  ;;  %2900 = vmatmul.mubr.msk.bf16.gmra.mrb[8].mxu1 %vm410_vm0, %v3012_v16 }
  0x31   : > { %2903 = vmatprep.mubr.msk.bf16.mxu1 %vm410_vm0, %v3013_v17 }
  0x37   : > { %2872 = vmatmul.mubr.msk.bf16.gmra.mrb[12].mxu0 %vm410_vm0, %v2998_v14 }
  0x38   : > { %2875 = vmatprep.mubr.msk.bf16.mxu0 %vm410_vm0, %v2999_v15  ;;  %2904 = vmatmul.mubr.msk.bf16.gmra.mrb[12].mxu1 %vm410_vm0, %v3014_v20 }
  0x39   : > { %2907 = vmatprep.mubr.msk.bf16.mxu1 %vm410_vm0, %v3015_v21 }
  0x3f   : > { %2876 = vmatmul.mubr.msk.bf16.gmra.mrb[16].mxu0 %vm410_vm0, %v3000_v18 }
  0x40   : > { %2879 = vmatprep.mubr.msk.bf16.mxu0 %vm410_vm0, %v3001_v19  ;;  %2908 = vmatmul.mubr.msk.bf16.gmra.mrb[16].mxu1 %vm410_vm0, %v3016_v24 }
  0x41   : > { %2911 = vmatprep.mubr.msk.bf16.mxu1 %vm410_vm0, %v3017_v25 }
  0x47   : > { %2880 = vmatmul.mubr.msk.bf16.gmra.mrb[20].mxu0 %vm410_vm0, %v3002_v22 }
  0x48   : > { %2883 = vmatprep.mubr.msk.bf16.mxu0 %vm410_vm0, %v3003_v23  ;;  %2912 = vmatmul.mubr.msk.bf16.gmra.mrb[20].mxu1 %vm410_vm0, %v3018_v28 }
  0x49   : > { %2915 = vmatprep.mubr.msk.bf16.mxu1 %vm410_vm0, %v3019_v29 }
  0x4f   : > { %2884 = vmatmul.mubr.msk.bf16.gmra.mrb[24].mxu0 %vm410_vm0, %v3004_v26 }
  0x50   : > { %2887 = vmatprep.mubr.msk.bf16.mxu0 %vm410_vm0, %v3005_v27  ;;  %2916 = vmatmul.mubr.msk.bf16.gmra.mrb[24].mxu1 %vm410_vm0, %v3020_v31 }
  0x51   : > { %2919 = vmatprep.mubr.msk.bf16.mxu1 %vm410_vm0, %v3021_v32 }
  0x57   : > { %2888 = vmatmul.mubr.msk.bf16.gmra.mrb[28].mxu0 %vm410_vm0, %v3006_v30 }
  0x58   : > { %2920 = vmatmul.mubr.msk.bf16.gmra.mrb[28].mxu1 %vm410_vm0, %v3022_v33 }
  0xf2   : > { %v2861_v34 = vpop.f32.mrb[0].mxu0 }
  0xf3   : > { %800 = vst [vmem:[%s3217_s30 + $0x10] sm:$0xff] %v2861_v34  ;;  %v541_v35 = vpop.f32.mrb[1].mxu0  ;;  %v3227_v48 = vpop.f32.mrb[0].mxu1 }
  0xf4   : > { %798 = vst [vmem:[%s3217_s30] sm:$0xff] %v541_v35  ;;  %v2862_v36 = vpop.f32.mrb[2].mxu0  ;;  %832 = vst [vmem:[%s3217_s30 + $0x110] sm:$0xff] %v3227_v48  ;;  %v3231_v49 = vpop.f32.mrb[1].mxu1 }
  0xf5   : > { %801 = vst [vmem:[%s3217_s30 + $0x18] sm:$0xff] %v2862_v36  ;;  %v544_v37 = vpop.f32.mrb[3].mxu0  ;;  %830 = vst [vmem:[%s3217_s30 + $0x100] sm:$0xff] %v3231_v49  ;;  %v3235_v52 = vpop.f32.mrb[2].mxu1 }
  0xf6   : > { %799 = vst [vmem:[%s3217_s30 + $0x8] sm:$0xff] %v544_v37  ;;  %v863_v38 = vadd.f32 %v544_v37, %v541_v35  ;;  %833 = vst [vmem:[%s3217_s30 + $0x118] sm:$0xff] %v3235_v52  ;;  %v3240_v54 = vpop.f32.mrb[3].mxu1 }
  0xf7   : > { %831 = vst [vmem:[%s3217_s30 + $0x108] sm:$0xff] %v3240_v54 }
  0xf8   : > { %v864_v39 = vadd.f32 %v2861_v34, %v863_v38 }
  0xfa   : > { %v2865_v40 = vpop.f32.mrb[4].mxu0  ;;  %v865_v41 = vadd.f32 %v2862_v36, %v864_v39 }
  0xfb   : > { %804 = vst [vmem:[%s3217_s30 + $0x30] sm:$0xff] %v2865_v40  ;;  %v557_v42 = vpop.f32.mrb[5].mxu0  ;;  %v3247_v60 = vpop.f32.mrb[4].mxu1 }
  0xfc   : > { %802 = vst [vmem:[%s3217_s30 + $0x20] sm:$0xff] %v557_v42  ;;  %v866_v43 = vadd.f32 %v865_v41, %v557_v42  ;;  %v2866_v44 = vpop.f32.mrb[6].mxu0  ;;  %836 = vst [vmem:[%s3217_s30 + $0x130] sm:$0xff] %v3247_v60  ;;  %v3251_v61 = vpop.f32.mrb[5].mxu1 }
  0xfd   : > { %805 = vst [vmem:[%s3217_s30 + $0x38] sm:$0xff] %v2866_v44  ;;  %v560_v45 = vpop.f32.mrb[7].mxu0  ;;  %834 = vst [vmem:[%s3217_s30 + $0x120] sm:$0xff] %v3251_v61  ;;  %v3255_v0 = vpop.f32.mrb[6].mxu1 }
  0xfe   : > { %803 = vst [vmem:[%s3217_s30 + $0x28] sm:$0xff] %v560_v45  ;;  %v867_v46 = vadd.f32 %v866_v43, %v560_v45  ;;  %837 = vst [vmem:[%s3217_s30 + $0x138] sm:$0xff] %v3255_v0  ;;  %v3260_v2 = vpop.f32.mrb[7].mxu1 }
  0xff   : > { %835 = vst [vmem:[%s3217_s30 + $0x128] sm:$0xff] %v3260_v2 }
 0x100   : > { %v868_v47 = vadd.f32 %v2865_v40, %v867_v46 }
 0x102   : > { %v2869_v50 = vpop.f32.mrb[8].mxu0  ;;  %v869_v51 = vadd.f32 %v2866_v44, %v868_v47 }
 0x103   : > { %808 = vst [vmem:[%s3217_s30 + $0x50] sm:$0xff] %v2869_v50  ;;  %v573_v53 = vpop.f32.mrb[9].mxu0  ;;  %v3267_v8 = vpop.f32.mrb[8].mxu1 }
 0x104   : > { %806 = vst [vmem:[%s3217_s30 + $0x40] sm:$0xff] %v573_v53  ;;  %v870_v55 = vadd.f32 %v869_v51, %v573_v53  ;;  %v2870_v56 = vpop.f32.mrb[10].mxu0  ;;  %840 = vst [vmem:[%s3217_s30 + $0x150] sm:$0xff] %v3267_v8  ;;  %v3271_v9 = vpop.f32.mrb[9].mxu1 }
 0x105   : > { %809 = vst [vmem:[%s3217_s30 + $0x58] sm:$0xff] %v2870_v56  ;;  %v576_v57 = vpop.f32.mrb[11].mxu0  ;;  %838 = vst [vmem:[%s3217_s30 + $0x140] sm:$0xff] %v3271_v9  ;;  %v3275_v12 = vpop.f32.mrb[10].mxu1 }
 0x106   : > { %807 = vst [vmem:[%s3217_s30 + $0x48] sm:$0xff] %v576_v57  ;;  %v871_v58 = vadd.f32 %v870_v55, %v576_v57  ;;  %841 = vst [vmem:[%s3217_s30 + $0x158] sm:$0xff] %v3275_v12  ;;  %v3280_v14 = vpop.f32.mrb[11].mxu1 }
 0x107   : > { %839 = vst [vmem:[%s3217_s30 + $0x148] sm:$0xff] %v3280_v14 }
 0x108   : > { %v872_v59 = vadd.f32 %v2869_v50, %v871_v58 }
 0x10a   : > { %v2873_v62 = vpop.f32.mrb[12].mxu0  ;;  %v873_v63 = vadd.f32 %v2870_v56, %v872_v59 }
 0x10b   : > { %812 = vst [vmem:[%s3217_s30 + $0x70] sm:$0xff] %v2873_v62  ;;  %v589_v1 = vpop.f32.mrb[13].mxu0  ;;  %v3287_v20 = vpop.f32.mrb[12].mxu1 }
 0x10c   : > { %810 = vst [vmem:[%s3217_s30 + $0x60] sm:$0xff] %v589_v1  ;;  %v874_v3 = vadd.f32 %v873_v63, %v589_v1  ;;  %v2874_v4 = vpop.f32.mrb[14].mxu0  ;;  %844 = vst [vmem:[%s3217_s30 + $0x170] sm:$0xff] %v3287_v20  ;;  %v3291_v21 = vpop.f32.mrb[13].mxu1 }
 0x10d   : > { %813 = vst [vmem:[%s3217_s30 + $0x78] sm:$0xff] %v2874_v4  ;;  %v592_v5 = vpop.f32.mrb[15].mxu0  ;;  %842 = vst [vmem:[%s3217_s30 + $0x160] sm:$0xff] %v3291_v21  ;;  %v3295_v24 = vpop.f32.mrb[14].mxu1 }
 0x10e   : > { %811 = vst [vmem:[%s3217_s30 + $0x68] sm:$0xff] %v592_v5  ;;  %v875_v6 = vadd.f32 %v874_v3, %v592_v5  ;;  %845 = vst [vmem:[%s3217_s30 + $0x178] sm:$0xff] %v3295_v24  ;;  %v3300_v26 = vpop.f32.mrb[15].mxu1 }
 0x10f   : > { %843 = vst [vmem:[%s3217_s30 + $0x168] sm:$0xff] %v3300_v26 }
 0x110   : > { %v876_v7 = vadd.f32 %v2873_v62, %v875_v6 }
 0x112   : > { %v2877_v10 = vpop.f32.mrb[16].mxu0  ;;  %v877_v11 = vadd.f32 %v2874_v4, %v876_v7 }
 0x113   : > { %816 = vst [vmem:[%s3217_s30 + $0x90] sm:$0xff] %v2877_v10  ;;  %v605_v13 = vpop.f32.mrb[17].mxu0  ;;  %v3307_v32 = vpop.f32.mrb[16].mxu1 }
 0x114   : > { %814 = vst [vmem:[%s3217_s30 + $0x80] sm:$0xff] %v605_v13  ;;  %v878_v15 = vadd.f32 %v877_v11, %v605_v13  ;;  %v2878_v16 = vpop.f32.mrb[18].mxu0  ;;  %848 = vst [vmem:[%s3217_s30 + $0x190] sm:$0xff] %v3307_v32  ;;  %v3311_v33 = vpop.f32.mrb[17].mxu1 }
 0x115   : > { %817 = vst [vmem:[%s3217_s30 + $0x98] sm:$0xff] %v2878_v16  ;;  %v608_v17 = vpop.f32.mrb[19].mxu0  ;;  %846 = vst [vmem:[%s3217_s30 + $0x180] sm:$0xff] %v3311_v33  ;;  %v3315_v36 = vpop.f32.mrb[18].mxu1 }
 0x116   : > { %815 = vst [vmem:[%s3217_s30 + $0x88] sm:$0xff] %v608_v17  ;;  %v879_v18 = vadd.f32 %v878_v15, %v608_v17  ;;  %849 = vst [vmem:[%s3217_s30 + $0x198] sm:$0xff] %v3315_v36  ;;  %v3320_v38 = vpop.f32.mrb[19].mxu1 }
 0x117   : > { %847 = vst [vmem:[%s3217_s30 + $0x188] sm:$0xff] %v3320_v38 }
 0x118   : > { %v880_v19 = vadd.f32 %v2877_v10, %v879_v18 }
 0x11a   : > { %v2881_v22 = vpop.f32.mrb[20].mxu0  ;;  %v881_v23 = vadd.f32 %v2878_v16, %v880_v19 }
 0x11b   : > { %820 = vst [vmem:[%s3217_s30 + $0xb0] sm:$0xff] %v2881_v22  ;;  %v621_v25 = vpop.f32.mrb[21].mxu0  ;;  %v2913_v44 = vpop.f32.mrb[20].mxu1 }
 0x11c   : > { %818 = vst [vmem:[%s3217_s30 + $0xa0] sm:$0xff] %v621_v25  ;;  %v882_v27 = vadd.f32 %v881_v23, %v621_v25  ;;  %v2882_v28 = vpop.f32.mrb[22].mxu0  ;;  %852 = vst [vmem:[%s3217_s30 + $0x1b0] sm:$0xff] %v2913_v44  ;;  %v749_v45 = vpop.f32.mrb[21].mxu1 }
 0x11d   : > { %821 = vst [vmem:[%s3217_s30 + $0xb8] sm:$0xff] %v2882_v28  ;;  %v624_v29 = vpop.f32.mrb[23].mxu0  ;;  %850 = vst [vmem:[%s3217_s30 + $0x1a0] sm:$0xff] %v749_v45  ;;  %v2914_v50 = vpop.f32.mrb[22].mxu1 }
 0x11e   : > { %819 = vst [vmem:[%s3217_s30 + $0xa8] sm:$0xff] %v624_v29  ;;  %v883_v30 = vadd.f32 %v882_v27, %v624_v29  ;;  %853 = vst [vmem:[%s3217_s30 + $0x1b8] sm:$0xff] %v2914_v50  ;;  %v752_v53 = vpop.f32.mrb[23].mxu1 }
 0x11f   : > { %851 = vst [vmem:[%s3217_s30 + $0x1a8] sm:$0xff] %v752_v53 }
 0x120   : > { %v884_v31 = vadd.f32 %v2881_v22, %v883_v30 }
 0x122   : > { %v2885_v34 = vpop.f32.mrb[24].mxu0  ;;  %v885_v35 = vadd.f32 %v2882_v28, %v884_v31 }
 0x123   : > { %824 = vst [vmem:[%s3217_s30 + $0xd0] sm:$0xff] %v2885_v34  ;;  %v637_v37 = vpop.f32.mrb[25].mxu0  ;;  %v2917_v62 = vpop.f32.mrb[24].mxu1 }
 0x124   : > { %822 = vst [vmem:[%s3217_s30 + $0xc0] sm:$0xff] %v637_v37  ;;  %v886_v39 = vadd.f32 %v885_v35, %v637_v37  ;;  %v2886_v40 = vpop.f32.mrb[26].mxu0  ;;  %856 = vst [vmem:[%s3217_s30 + $0x1d0] sm:$0xff] %v2917_v62  ;;  %v765_v63 = vpop.f32.mrb[25].mxu1 }
 0x125   : > { %825 = vst [vmem:[%s3217_s30 + $0xd8] sm:$0xff] %v2886_v40  ;;  %v640_v41 = vpop.f32.mrb[27].mxu0  ;;  %854 = vst [vmem:[%s3217_s30 + $0x1c0] sm:$0xff] %v765_v63  ;;  %v2918_v3 = vpop.f32.mrb[26].mxu1 }
 0x126   : > { %823 = vst [vmem:[%s3217_s30 + $0xc8] sm:$0xff] %v640_v41  ;;  %v887_v42 = vadd.f32 %v886_v39, %v640_v41  ;;  %857 = vst [vmem:[%s3217_s30 + $0x1d8] sm:$0xff] %v2918_v3  ;;  %v768_v4 = vpop.f32.mrb[27].mxu1 }
 0x127   : > { %855 = vst [vmem:[%s3217_s30 + $0x1c8] sm:$0xff] %v768_v4 }
 0x128   : > { %v888_v43 = vadd.f32 %v2885_v34, %v887_v42 }
 0x12a   : > { %v2889_v46 = vpop.f32.mrb[28].mxu0  ;;  %v889_v47 = vadd.f32 %v2886_v40, %v888_v43 }
 0x12b   : > { %828 = vst [vmem:[%s3217_s30 + $0xf0] sm:$0xff] %v2889_v46  ;;  %v653_v51 = vpop.f32.mrb[29].mxu0  ;;  %v2921_v10 = vpop.f32.mrb[28].mxu1 }
 0x12c   : > { %826 = vst [vmem:[%s3217_s30 + $0xe0] sm:$0xff] %v653_v51  ;;  %v890_v55 = vadd.f32 %v889_v47, %v653_v51  ;;  %v2890_v56 = vpop.f32.mrb[30].mxu0  ;;  %860 = vst [vmem:[%s3217_s30 + $0x1f0] sm:$0xff] %v2921_v10  ;;  %v781_v11 = vpop.f32.mrb[29].mxu1 }
 0x12d   : > { %829 = vst [vmem:[%s3217_s30 + $0xf8] sm:$0xff] %v2890_v56  ;;  %v656_v57 = vpop.f32.mrb[31].mxu0  ;;  %858 = vst [vmem:[%s3217_s30 + $0x1e0] sm:$0xff] %v781_v11  ;;  %v2922_v15 = vpop.f32.mrb[30].mxu1 }
 0x12e   : > { %827 = vst [vmem:[%s3217_s30 + $0xe8] sm:$0xff] %v656_v57  ;;  %v891_v58 = vadd.f32 %v890_v55, %v656_v57  ;;  %861 = vst [vmem:[%s3217_s30 + $0x1f8] sm:$0xff] %v2922_v15  ;;  %v784_v16 = vpop.f32.mrb[31].mxu1 }
 0x12f   : > { %859 = vst [vmem:[%s3217_s30 + $0x1e8] sm:$0xff] %v784_v16 }
 0x130   : > { %v892_v59 = vadd.f32 %v2889_v46, %v891_v58 }
 0x132   : > { %v893_v1 = vadd.f32 %v2890_v56, %v892_v59 }
 0x134   : > { %v894_v5 = vadd.f32 %v893_v1, %v3231_v49 }
 0x136   : > { %v895_v6 = vadd.f32 %v894_v5, %v3240_v54 }
 0x138   : > { %v896_v7 = vadd.f32 %v3227_v48, %v895_v6 }
 0x13a   : > { %v897_v13 = vadd.f32 %v3235_v52, %v896_v7 }
 0x13c   : > { %v898_v17 = vadd.f32 %v897_v13, %v3251_v61 }
 0x13e   : > { %v899_v18 = vadd.f32 %v898_v17, %v3260_v2 }
 0x140   : > { %v900_v49 = vadd.f32 %v3247_v60, %v899_v18 }
 0x142   : > { %v901_v54 = vadd.f32 %v3255_v0, %v900_v49 }
 0x144   : > { %v902_v48 = vadd.f32 %v901_v54, %v3271_v9 }
 0x146   : > { %v903_v19 = vadd.f32 %v902_v48, %v3280_v14 }
 0x148   : > { %v904_v22 = vadd.f32 %v3267_v8, %v903_v19 }
 0x14a   : > { %v905_v52 = vadd.f32 %v3275_v12, %v904_v22 }
 0x14c   : > { %v906_v23 = vadd.f32 %v905_v52, %v3291_v21 }
 0x14e   : > { %v907_v25 = vadd.f32 %v906_v23, %v3300_v26 }
 0x150   : > { %v908_v61 = vadd.f32 %v3287_v20, %v907_v25 }
 0x152   : > { %v909_v2 = vadd.f32 %v3295_v24, %v908_v61 }
 0x154   : > { %v910_v60 = vadd.f32 %v909_v2, %v3311_v33 }
 0x156   : > { %v911_v0 = vadd.f32 %v910_v60, %v3320_v38 }
 0x158   : > { %v912_v9 = vadd.f32 %v3307_v32, %v911_v0  ;;  %v862_v32 = vld [vmem:[#allocation3] sm:$0x1] }
 0x15a   : > { %v913_v14 = vadd.f32 %v3315_v36, %v912_v9 }
 0x15c   : > { %v914_v27 = vadd.f32 %v913_v14, %v749_v45 }
 0x15e   : > { %v915_v8 = vadd.f32 %v914_v27, %v752_v53 }
 0x160   : > { %v916_v28 = vadd.f32 %v2913_v44, %v915_v8 }
 0x162   : > { %v917_v12 = vadd.f32 %v2914_v50, %v916_v28 }
 0x164   : > { %v918_v29 = vadd.f32 %v917_v12, %v765_v63 }
 0x166   : > { %v919_v21 = vadd.f32 %v918_v29, %v768_v4 }
 0x168   : > { %v920_v30 = vadd.f32 %v2917_v62, %v919_v21 }
 0x16a   : > { %v921_v26 = vadd.f32 %v2918_v3, %v920_v30 }
 0x16c   : > { %v922_v31 = vadd.f32 %v921_v26, %v781_v11 }
 0x16e   : > { %v923_v20 = vadd.f32 %v922_v31, %v784_v16 }
 0x170   : > { %v924_v34 = vadd.f32 %v2921_v10, %v923_v20 }
 0x172   : > { %v925_v24 = vadd.f32 %v2922_v15, %v924_v34 }
 0x174   : > { %v926_v35 = vrot.slane %v925_v24, 4 }
 0x176   : > { %v927_v33 = vadd.f32 %v926_v35, %v925_v24 }
 0x178   : > { %v928_v37 = vrot.slane %v927_v33, 2 }
 0x17a   : > { %v929_v38 = vadd.f32 %v928_v37, %v927_v33 }
 0x17c   : > { %v930_v39 = vrot.slane %v929_v38, 1  ;;  %937 = sbr.rel (%p2498_p8) target bundleno = 704 (0x2c0), region = 36 }
 0x17e   : > { %v931_v40 = vadd.f32 %v930_v39, %v929_v38 }
 0x180   : > { %v932_v36 = vadd.f32 %v931_v40, %v862_v32 }
 0x182   : > { %933 = vst [vmem:[#allocation3] sm:$0x1] %v932_v36 }
 0x183   : > { %v3366_v43 = vmov 0.0   ;;  %s3368_s3 = smov 0  }
 0x189   : > { %v938_v41 = vld [vmem:[#allocation3] sm:$0x1] }
 0x18a   : > { %v3364_v42 = vmul.f32 0.0009765625, %v938_v41 }
 0x18c   : > { %4391 = vst [vmem:[#allocation4_spill] sm:$0xff] %v3364_v42 }
 0x18d LB: >> { %4392 = vst [vmem:[#allocation5_spill] sm:$0xff] %v3079_v43  ;;  %v1014_v44 = vlaneseq  ;;  %s2499_s4 = sshll.u32 %s3083_s3, 9  ;;  %s945_s3 = sadd.s32 1, %s3083_s3   ;;  %s3083_s3 = sphi %s3368_s3, %s945_s3   ;;  %v3079_v43 = vphi %v3366_v43, %v4457_v43  }
 0x18e   : >> { %s3385_s5 = scalar_lea.vmem [#allocation2], %s2499_s4  ;;  %v3544_v35 = vstv %s2499_s4  ;;  %p942_p9 = scmp.ge.s32.totalorder %s945_s3, 2  }
 0x18f   : >> { %v3376_v45 = vshrl.u32 %v1014_v44, 7  ;;  %v3388_v50 = vld [vmem:[%s3385_s5 + $0x108] sm:$0xff]  ;;  %v3391_v51 = vld [vmem:[%s3385_s5 + $0x110] sm:$0xff]  ;;  %v3394_v53 = vld [vmem:[%s3385_s5 + $0x118] sm:$0xff]  ;;  %s4123_s6 = smov (%p942_p9), 0  }
 0x190   : >> { %v3397_v55 = vld [vmem:[%s3385_s5 + $0x120] sm:$0xff]  ;;  %v3400_v56 = vld [vmem:[%s3385_s5 + $0x128] sm:$0xff]  ;;  %v3403_v57 = vld [vmem:[%s3385_s5 + $0x130] sm:$0xff] }
 0x191   : >> { %v1016_v46 = vsub.s32 0, %v3376_v45  ;;  %v3412_v63 = vld [vmem:[%s3385_s5 + $0x138] sm:$0xff]  ;;  %v3415_v1 = vld [vmem:[%s3385_s5 + $0x140] sm:$0xff]  ;;  %v3418_v3 = vld [vmem:[%s3385_s5 + $0x148] sm:$0xff]  ;;  %v1117_v40 = vadd.s32 264, %v3376_v45  ;;  %v1118_v36 = vadd.s32 272, %v3376_v45 }
 0x192   : >> { %v3427_v7 = vld [vmem:[%s3385_s5 + $0x150] sm:$0xff]  ;;  %v3430_v10 = vld [vmem:[%s3385_s5 + $0x158] sm:$0xff]  ;;  %v3433_v11 = vld [vmem:[%s3385_s5 + $0x160] sm:$0xff]  ;;  %v1119_v24 = vadd.s32 280, %v3376_v45  ;;  %v1120_v44 = vadd.s32 288, %v3376_v45  ;;  %v1121_v26 = vadd.s32 296, %v3376_v45 }
 0x193   : >> { %v4393_v42 = vld [vmem:[#allocation4_spill] sm:$0xff]  ;;  %v3445_v18 = vld [vmem:[%s3385_s5 + $0x170] sm:$0xff]  ;;  %v3448_v49 = vld [vmem:[%s3385_s5 + $0x178] sm:$0xff]  ;;  %v1123_v33 = vadd.s32 312, %v3376_v45  ;;  %v1124_v30 = vadd.s32 320, %v3376_v45  ;;  %v1125_v32 = vadd.s32 328, %v3376_v45 }
 0x194   : >> { %v3381_v47 = vrot.slane %v4393_v42, %v1016_v46  ;;  %v3442_v17 = vld [vmem:[%s3385_s5 + $0x168] sm:$0xff]  ;;  %v3457_v22 = vld [vmem:[%s3385_s5 + $0x180] sm:$0xff]  ;;  %v3463_v23 = vld [vmem:[%s3385_s5 + $0x190] sm:$0xff]  ;;  %v1122_v46 = vadd.s32 304, %v3376_v45  ;;  %v1126_v21 = vadd.s32 336, %v3376_v45  ;;  %v1127_v8 = vadd.s32 344, %v3376_v45 }
 0x195   : >> { %v3460_v52 = vld [vmem:[%s3385_s5 + $0x188] sm:$0xff]  ;;  %v3472_v60 = vld [vmem:[%s3385_s5 + $0x198] sm:$0xff]  ;;  %v3475_v0 = vld [vmem:[%s3385_s5 + $0x1a0] sm:$0xff]  ;;  %v1128_v27 = vadd.s32 352, %v3376_v45  ;;  %v1129_v14 = vadd.s32 360, %v3376_v45  ;;  %v1130_v2 = vadd.s32 368, %v3376_v45 }
 0x196   : >> { %v3478_v9 = vld [vmem:[%s3385_s5 + $0x1a8] sm:$0xff]  ;;  %v3487_v28 = vld [vmem:[%s3385_s5 + $0x1b0] sm:$0xff]  ;;  %v3490_v12 = vld [vmem:[%s3385_s5 + $0x1b8] sm:$0xff]  ;;  %v1131_v61 = vadd.s32 376, %v3376_v45  ;;  %v1132_v25 = vadd.s32 384, %v3376_v45  ;;  %v1133_v19 = vadd.s32 392, %v3376_v45 }
 0x197   : >> { %v3493_v29 = vld [vmem:[%s3385_s5 + $0x1c0] sm:$0xff]  ;;  %v3502_v31 = vld [vmem:[%s3385_s5 + $0x1c8] sm:$0xff]  ;;  %v3505_v20 = vld [vmem:[%s3385_s5 + $0x1d0] sm:$0xff]  ;;  %v1134_v48 = vadd.s32 400, %v3376_v45  ;;  %v1135_v54 = vadd.s32 408, %v3376_v45  ;;  %v1136_v16 = vadd.s32 416, %v3376_v45 }
 0x198   : >> { %4394 = vst [vmem:[#allocation6_spill] sm:$0xff] %v3493_v29  ;;  %4395 = vst [vmem:[#allocation7_spill] sm:$0xff] %v3502_v31  ;;  %v3508_v34 = vld [vmem:[%s3385_s5 + $0x1d8] sm:$0xff]  ;;  %v3517_v37 = vld [vmem:[%s3385_s5 + $0x1e0] sm:$0xff]  ;;  %v1137_v15 = vadd.s32 424, %v3376_v45  ;;  %v1138_v13 = vadd.s32 432, %v3376_v45  ;;  %v3593_v31 = vadd.s32 %v3544_v35, %v1122_v46  ;;  %v3596_v29 = vadd.s32 %v3544_v35, %v1123_v33 }
 0x199   : >> { %4396 = vst [vmem:[#allocation8_spill] sm:$0xff] %v3505_v20  ;;  %4397 = vst [vmem:[#allocation9_spill] sm:$0xff] %v3508_v34  ;;  %v3520_v38 = vld [vmem:[%s3385_s5 + $0x1e8] sm:$0xff]  ;;  %v3523_v39 = vld [vmem:[%s3385_s5 + $0x1f0] sm:$0xff]  ;;  %v1139_v6 = vadd.s32 440, %v3376_v45  ;;  %v1140_v5 = vadd.s32 448, %v3376_v45  ;;  %v3587_v34 = vadd.s32 %v3544_v35, %v1120_v44  ;;  %v3590_v20 = vadd.s32 %v3544_v35, %v1121_v26 }
 0x19a   : >> { %4398 = vst [vmem:[#allocation10_spill] sm:$0xff] %v3517_v37  ;;  %4399 = vst [vmem:[#allocation11_spill] sm:$0xff] %v3520_v38  ;;  %v3532_v41 = vld [vmem:[%s3385_s5 + $0x1f8] sm:$0xff]  ;;  %v1141_v4 = vadd.s32 456, %v3376_v45  ;;  %v1142_v62 = vadd.s32 464, %v3376_v45  ;;  %v1143_v59 = vadd.s32 472, %v3376_v45  ;;  %v3581_v38 = vadd.s32 %v3544_v35, %v1118_v36 }
 0x19b   : >> { %4400 = vst [vmem:[#allocation12_spill] sm:$0xff] %v3523_v39  ;;  %4401 = vst [vmem:[#allocation13_spill] sm:$0xff] %v3532_v41  ;;  %v1144_v58 = vadd.s32 480, %v3376_v45  ;;  %v1145_v42 = vadd.s32 488, %v3376_v45  ;;  %v1146_v43 = vadd.s32 496, %v3376_v45  ;;  %v1147_v41 = vadd.s32 504, %v3376_v45 }
 0x19c   : >> { %v3578_v39 = vadd.s32 %v3544_v35, %v1117_v40  ;;  %v3584_v37 = vadd.s32 %v3544_v35, %v1119_v24  ;;  %v3599_v40 = vadd.s32 %v3544_v35, %v1124_v30  ;;  %v3602_v36 = vadd.s32 %v3544_v35, %v1125_v32 }
 0x19d   : >> { %v3605_v24 = vadd.s32 %v3544_v35, %v1126_v21  ;;  %v3608_v44 = vadd.s32 %v3544_v35, %v1127_v8  ;;  %v3611_v26 = vadd.s32 %v3544_v35, %v1128_v27  ;;  %v3614_v46 = vadd.s32 %v3544_v35, %v1129_v14 }
 0x19e   : >> { %v3617_v33 = vadd.s32 %v3544_v35, %v1130_v2  ;;  %v3620_v30 = vadd.s32 %v3544_v35, %v1131_v61  ;;  %v3623_v32 = vadd.s32 %v3544_v35, %v1132_v25  ;;  %v3626_v21 = vadd.s32 %v3544_v35, %v1133_v19 }
 0x19f   : >> { %v3629_v8 = vadd.s32 %v3544_v35, %v1134_v48  ;;  %v3632_v27 = vadd.s32 %v3544_v35, %v1135_v54  ;;  %v3635_v14 = vadd.s32 %v3544_v35, %v1136_v16  ;;  %v3638_v2 = vadd.s32 %v3544_v35, %v1137_v15 }
 0x1a0   : >> { %v3641_v61 = vadd.s32 %v3544_v35, %v1138_v13  ;;  %v3644_v25 = vadd.s32 %v3544_v35, %v1139_v6  ;;  %v3647_v19 = vadd.s32 %v3544_v35, %v1140_v5  ;;  %v3650_v48 = vadd.s32 %v3544_v35, %v1141_v4 }
 0x1a1   : >> { %v3653_v54 = vadd.s32 %v3544_v35, %v1142_v62  ;;  %v3656_v16 = vadd.s32 %v3544_v35, %v1143_v59  ;;  %v3659_v15 = vadd.s32 %v3544_v35, %v1144_v58  ;;  %v3662_v13 = vadd.s32 %v3544_v35, %v1145_v42 }
 0x1a2   : >> { %v3665_v6 = vadd.s32 %v3544_v35, %v1146_v43  ;;  %v3668_v5 = vadd.s32 %v3544_v35, %v1147_v41  ;;  %v3671_v4 = vadd.s32 8, %v3376_v45  ;;  %vm1246_vm1 = vcmp.lt.s32.totalorder %v3578_v39, 1024 }
 0x1a3   : >> { %vm1247_vm2 = vcmp.lt.s32.totalorder %v3581_v38, 1024  ;;  %vm1248_vm3 = vcmp.lt.s32.totalorder %v3584_v37, 1024  ;;  %vm1249_vm4 = vcmp.lt.s32.totalorder %v3587_v34, 1024  ;;  %vm1250_vm5 = vcmp.lt.s32.totalorder %v3590_v20, 1024 }
 0x1a4   : >> { %vm1251_vm6 = vcmp.lt.s32.totalorder %v3593_v31, 1024  ;;  %vm1267_vm12 = vcmp.lt.s32.totalorder %v3641_v61, 1024  ;;  %vm1268_vm13 = vcmp.lt.s32.totalorder %v3644_v25, 1024  ;;  %vm1269_vm14 = vcmp.lt.s32.totalorder %v3647_v19, 1024 }
 0x1a5   : >> { %vm1270_vm15 = vcmp.lt.s32.totalorder %v3650_v48, 1024  ;;  %vm1271_vm0 = vcmp.lt.s32.totalorder %v3653_v54, 1024  ;;  %vm1272_vm7 = vcmp.lt.s32.totalorder %v3656_v16, 1024  ;;  %vm1273_vm8 = vcmp.lt.s32.totalorder %v3659_v15, 1024  ;;  %v4452_v16 = vld [vmem:[#allocation12_spill] sm:$0xff]  ;;  %v4454_v15 = vld [vmem:[#allocation13_spill] sm:$0xff] }
 0x1a6   : >> { %vm1274_vm9 = vcmp.lt.s32.totalorder %v3662_v13, 1024  ;;  %vm1275_vm10 = vcmp.lt.s32.totalorder %v3665_v6, 1024  ;;  %vm1276_vm11 = vcmp.lt.s32.totalorder %v3668_v5, 1024  ;;  %v4402_v42 = vsub.f32 %v3388_v50, %v3381_v47  ;;  %v950_v13 = vld [vmem:[%s3385_s5 + $0x8] sm:$0xff] }
 0x1a7   : >> { %v4403_v58 = vsub.f32 %v3391_v51, %v3381_v47  ;;  %v4404_v62 = vsub.f32 %v3394_v53, %v3381_v47  ;;  %v4405_v50 = vsub.f32 %v3397_v55, %v3381_v47  ;;  %v4406_v51 = vsub.f32 %v3400_v56, %v3381_v47 }
 0x1a8   : >> { %v3709_v43 = vsel %vm1246_vm1, %v4402_v42, 0.0  ;;  %v4407_v53 = vsub.f32 %v3403_v57, %v3381_v47  ;;  %v4408_v55 = vsub.f32 %v3412_v63, %v3381_v47  ;;  %vm4409_vm1 = vcmp.lt.s32.totalorder %v3596_v29, 1024 }
 0x1a9   : >> { %v3716_v59 = vsel %vm1247_vm2, %v4403_v58, 0.0  ;;  %v3723_v41 = vsel %vm1248_vm3, %v4404_v62, 0.0  ;;  %v3730_v39 = vsel %vm1249_vm4, %v4405_v50, 0.0  ;;  %v3737_v38 = vsel %vm1250_vm5, %v4406_v51, 0.0  ;;  %v4446_v50 = vld [vmem:[#allocation9_spill] sm:$0xff] }
 0x1aa   : >> { %v3744_v37 = vsel %vm1251_vm6, %v4407_v53, 0.0  ;;  %v3751_v34 = vsel %vm4409_vm1, %v4408_v55, 0.0  ;;  %v4410_v56 = vsub.f32 %v3415_v1, %v3381_v47  ;;  %vm4411_vm2 = vcmp.lt.s32.totalorder %v3599_v40, 1024  ;;  %v4448_v53 = vld [vmem:[#allocation10_spill] sm:$0xff] }
 0x1ab   : >> { %v4412_v57 = vsub.f32 %v3418_v3, %v3381_v47  ;;  %vm4413_vm3 = vcmp.lt.s32.totalorder %v3602_v36, 1024  ;;  %v4414_v63 = vsub.f32 %v3427_v7, %v3381_v47  ;;  %vm4415_vm4 = vcmp.lt.s32.totalorder %v3605_v24, 1024 }
 0x1ac   : >> { %v3758_v20 = vsel %vm4411_vm2, %v4410_v56, 0.0  ;;  %v4416_v1 = vsub.f32 %v3430_v10, %v3381_v47  ;;  %vm4417_vm5 = vcmp.lt.s32.totalorder %v3608_v44, 1024  ;;  %v4418_v3 = vsub.f32 %v3433_v11, %v3381_v47  ;;  %v4450_v56 = vld [vmem:[#allocation11_spill] sm:$0xff] }
 0x1ad   : >> { %v3765_v31 = vsel %vm4413_vm3, %v4412_v57, 0.0  ;;  %v3772_v29 = vsel %vm4415_vm4, %v4414_v63, 0.0  ;;  %vm4419_vm6 = vcmp.lt.s32.totalorder %v3611_v26, 1024  ;;  %v4420_v7 = vsub.f32 %v3442_v17, %v3381_v47 }
 0x1ae   : >> { %v3779_v40 = vsel %vm4417_vm5, %v4416_v1, 0.0  ;;  %v3786_v36 = vsel %vm4419_vm6, %v4418_v3, 0.0  ;;  %vm4421_vm1 = vcmp.lt.s32.totalorder %v3614_v46, 1024  ;;  %v4422_v10 = vsub.f32 %v3445_v18, %v3381_v47 }
 0x1af   : >> { %v3793_v24 = vsel %vm4421_vm1, %v4420_v7, 0.0  ;;  %vm4423_vm2 = vcmp.lt.s32.totalorder %v3617_v33, 1024  ;;  %v4424_v11 = vsub.f32 %v3448_v49, %v3381_v47  ;;  %vm4425_vm3 = vcmp.lt.s32.totalorder %v3620_v30, 1024 }
 0x1b0   : >> { %v3800_v44 = vsel %vm4423_vm2, %v4422_v10, 0.0  ;;  %v4426_v17 = vsub.f32 %v3457_v22, %v3381_v47  ;;  %vm4427_vm4 = vcmp.lt.s32.totalorder %v3623_v32, 1024  ;;  %v4428_v18 = vsub.f32 %v3460_v52, %v3381_v47 }
 0x1b1   : >> { %v3807_v26 = vsel %vm4425_vm3, %v4424_v11, 0.0  ;;  %vm4429_vm5 = vcmp.lt.s32.totalorder %v3626_v21, 1024  ;;  %v4430_v49 = vsub.f32 %v3463_v23, %v3381_v47  ;;  %vm4431_vm6 = vcmp.lt.s32.totalorder %v3629_v8, 1024  ;;  %v949_v11 = vld [vmem:[%s3385_s5] sm:$0xff] }
 0x1b2   : >> { %v3814_v46 = vsel %vm4427_vm4, %v4426_v17, 0.0  ;;  %v3821_v33 = vsel %vm4429_vm5, %v4428_v18, 0.0  ;;  %v4432_v22 = vsub.f32 %v3472_v60, %v3381_v47  ;;  %vm4433_vm1 = vcmp.lt.s32.totalorder %v3632_v27, 1024 }
 0x1b3   : >> { %v3828_v30 = vsel %vm4431_vm6, %v4430_v49, 0.0  ;;  %v4434_v52 = vsub.f32 %v3475_v0, %v3381_v47  ;;  %vm4435_vm2 = vcmp.lt.s32.totalorder %v3635_v14, 1024  ;;  %v4436_v23 = vsub.f32 %v3478_v9, %v3381_v47  ;;  %v4440_v9 = vld [vmem:[#allocation6_spill] sm:$0xff] }
 0x1b4   : >> { %v3835_v32 = vsel %vm4433_vm1, %v4432_v22, 0.0  ;;  %vm4437_vm3 = vcmp.lt.s32.totalorder %v3638_v2, 1024  ;;  %v4438_v60 = vsub.f32 %v3487_v28, %v3381_v47  ;;  %v4439_v0 = vsub.f32 %v3490_v12, %v3381_v47  ;;  %v4442_v28 = vld [vmem:[#allocation7_spill] sm:$0xff]  ;;  %v4444_v12 = vld [vmem:[#allocation8_spill] sm:$0xff]  ;;  %v951_v49 = vld [vmem:[%s3385_s5 + $0x10] sm:$0xff] }
 0x1b5   : >> { %v3842_v21 = vsel %vm4435_vm2, %v4434_v52, 0.0  ;;  %v3849_v8 = vsel %vm4437_vm3, %v4436_v23, 0.0  ;;  %v4441_v2 = vsub.f32 %v4440_v9, %v3381_v47  ;;  %v4443_v61 = vsub.f32 %v4442_v28, %v3381_v47 }
 0x1b6   : >> { %v3856_v27 = vsel %vm1267_vm12, %v4438_v60, 0.0  ;;  %v3863_v14 = vsel %vm1268_vm13, %v4439_v0, 0.0  ;;  %v4445_v25 = vsub.f32 %v4444_v12, %v3381_v47  ;;  %v4447_v51 = vsub.f32 %v4446_v50, %v3381_v47  ;;  %v952_v60 = vld [vmem:[%s3385_s5 + $0x18] sm:$0xff] }
 0x1b7   : >> { %v3870_v42 = vsel %vm1269_vm14, %v4441_v2, 0.0  ;;  %v3877_v58 = vsel %vm1270_vm15, %v4443_v61, 0.0  ;;  %v4449_v55 = vsub.f32 %v4448_v53, %v3381_v47  ;;  %v4451_v54 = vsub.f32 %v4450_v56, %v3381_v47  ;;  %v953_v2 = vld [vmem:[%s3385_s5 + $0x20] sm:$0xff] }
 0x1b8   : >> { %v3884_v62 = vsel %vm1271_vm0, %v4445_v25, 0.0  ;;  %v3891_v19 = vsel %vm1272_vm7, %v4447_v51, 0.0  ;;  %v1086_v63 = vadd.s32 16, %v3376_v45  ;;  %v4453_v1 = vsub.f32 %v4452_v16, %v3381_v47  ;;  %v954_v51 = vld [vmem:[%s3385_s5 + $0x28] sm:$0xff]  ;;  %v955_v16 = vld [vmem:[%s3385_s5 + $0x30] sm:$0xff] }
 0x1b9   : >> { %v3898_v48 = vsel %vm1273_vm8, %v4449_v55, 0.0  ;;  %v3905_v57 = vsel %vm1274_vm9, %v4451_v54, 0.0  ;;  %v4455_v7 = vsub.f32 %v4454_v15, %v3381_v47  ;;  %v1087_v17 = vadd.s32 24, %v3376_v45 }
 0x1ba   : >> { %v3913_v3 = vsel %vm1275_vm10, %v4453_v1, 0.0  ;;  %v1149_v18 = vadd.s32 %v3544_v35, %v3376_v45  ;;  %v1150_v6 = vadd.s32 %v3544_v35, %v3671_v4  ;;  %v1088_v22 = vadd.s32 32, %v3376_v45 }
 0x1bb   : >> { %v3920_v10 = vsel %vm1276_vm11, %v4455_v7, 0.0  ;;  %v1151_v52 = vadd.s32 %v3544_v35, %v1086_v63  ;;  %v1019_v5 = vsub.f32 %v949_v11, %v3381_v47  ;;  %v1020_v23 = vsub.f32 %v950_v13, %v3381_v47 }
 0x1bc   : >> { %v1089_v0 = vadd.s32 40, %v3376_v45  ;;  %v1152_v9 = vadd.s32 %v3544_v35, %v1087_v17  ;;  %vm1213_vm7 = vcmp.lt.s32.totalorder %v1149_v18, 1024  ;;  %vm1214_vm8 = vcmp.lt.s32.totalorder %v1150_v6, 1024  ;;  %v956_v17 = vld [vmem:[%s3385_s5 + $0x38] sm:$0xff] }
 0x1bd   : >> { %v1021_v4 = vsub.f32 %v951_v49, %v3381_v47  ;;  %v1090_v28 = vadd.s32 48, %v3376_v45  ;;  %v1153_v61 = vadd.s32 %v3544_v35, %v1088_v22  ;;  %vm1215_vm9 = vcmp.lt.s32.totalorder %v1151_v52, 1024 }
 0x1be   : >> { %v1022_v12 = vsub.f32 %v952_v60, %v3381_v47  ;;  %v1405_v25 = vsel %vm1213_vm7, %v1019_v5, 0.0  ;;  %v1406_v50 = vsel %vm1214_vm8, %v1020_v23, 0.0  ;;  %v1091_v53 = vadd.s32 56, %v3376_v45  ;;  %v957_v23 = vld [vmem:[%s3385_s5 + $0x40] sm:$0xff] }
 0x1bf   : >> { %v1154_v55 = vadd.s32 %v3544_v35, %v1089_v0  ;;  %vm1216_vm10 = vcmp.lt.s32.totalorder %v1152_v9, 1024  ;;  %v1023_v56 = vsub.f32 %v953_v2, %v3381_v47  ;;  %v1092_v54 = vadd.s32 64, %v3376_v45 }
 0x1c0   : >> { %v1407_v63 = vsel %vm1215_vm9, %v1021_v4, 0.0  ;;  %v1155_v1 = vadd.s32 %v3544_v35, %v1090_v28  ;;  %vm1217_vm11 = vcmp.lt.s32.totalorder %v1153_v61, 1024  ;;  %v1469_v15 = vmul.f32 %v1405_v25, %v1405_v25  ;;  %v958_v61 = vld [vmem:[%s3385_s5 + $0x48] sm:$0xff] }
 0x1c1   : >> { %v1470_v7 = vmul.f32 %v1406_v50, %v1406_v50  ;;  %v1024_v11 = vsub.f32 %v954_v51, %v3381_v47  ;;  %v1408_v13 = vsel %vm1216_vm10, %v1022_v12, 0.0  ;;  %v1093_v18 = vadd.s32 72, %v3376_v45 }
 0x1c2   : >> { %v1156_v6 = vadd.s32 %v3544_v35, %v1091_v53  ;;  %vm1218_vm12 = vcmp.lt.s32.totalorder %v1154_v55, 1024  ;;  %v1471_v49 = vmul.f32 %v1407_v63, %v1407_v63  ;;  %v1025_v22 = vsub.f32 %v955_v16, %v3381_v47 }
 0x1c3   : >> { %v1094_v52 = vadd.s32 80, %v3376_v45  ;;  %v1409_v5 = vsel %vm1217_vm11, %v1023_v56, 0.0  ;;  %v1157_v60 = vadd.s32 %v3544_v35, %v1092_v54  ;;  %vm1219_vm13 = vcmp.lt.s32.totalorder %v1155_v1, 1024  ;;  %v959_v56 = vld [vmem:[%s3385_s5 + $0x50] sm:$0xff] }
 0x1c4   : >> { %v1472_v0 = vmul.f32 %v1408_v13, %v1408_v13  ;;  %v1533_v9 = vadd.f32 %v1470_v7, %v1469_v15  ;;  %v1026_v4 = vsub.f32 %v956_v17, %v3381_v47  ;;  %v1095_v2 = vadd.s32 88, %v3376_v45 }
 0x1c5   : >> { %v1410_v28 = vsel %vm1218_vm12, %v1024_v11, 0.0  ;;  %v1158_v12 = vadd.s32 %v3544_v35, %v1093_v18  ;;  %vm1220_vm14 = vcmp.lt.s32.totalorder %v1156_v6, 1024  ;;  %v1473_v25 = vmul.f32 %v1409_v5, %v1409_v5  ;;  %v960_v11 = vld [vmem:[%s3385_s5 + $0x58] sm:$0xff] }
 0x1c6   : >> { %v1534_v50 = vadd.f32 %v1533_v9, %v1471_v49  ;;  %v1027_v51 = vsub.f32 %v957_v23, %v3381_v47  ;;  %v1096_v53 = vadd.s32 96, %v3376_v45  ;;  %v1411_v55 = vsel %vm1219_vm13, %v1025_v22, 0.0 }
 0x1c7   : >> { %v1159_v54 = vadd.s32 %v3544_v35, %v1094_v52  ;;  %vm1221_vm15 = vcmp.lt.s32.totalorder %v1157_v60, 1024  ;;  %v1474_v63 = vmul.f32 %v1410_v28, %v1410_v28  ;;  %v1028_v1 = vsub.f32 %v958_v61, %v3381_v47  ;;  %v961_v52 = vld [vmem:[%s3385_s5 + $0x60] sm:$0xff] }
 0x1c8   : >> { %v1535_v16 = vadd.f32 %v1534_v50, %v1472_v0  ;;  %v1097_v15 = vadd.s32 104, %v3376_v45  ;;  %v1412_v7 = vsel %vm1220_vm14, %v1026_v4, 0.0  ;;  %v1160_v13 = vadd.s32 %v3544_v35, %v1095_v2  ;;  %v962_v2 = vld [vmem:[%s3385_s5 + $0x68] sm:$0xff] }
 0x1c9   : >> { %vm1222_vm0 = vcmp.lt.s32.totalorder %v1158_v12, 1024  ;;  %v1475_v17 = vmul.f32 %v1411_v55, %v1411_v55  ;;  %v1029_v6 = vsub.f32 %v959_v56, %v3381_v47  ;;  %v1098_v49 = vadd.s32 112, %v3376_v45 }
 0x1ca   : >> { %v1536_v18 = vadd.f32 %v1535_v16, %v1473_v25  ;;  %v1413_v22 = vsel %vm1221_vm15, %v1027_v51, 0.0  ;;  %v1161_v5 = vadd.s32 %v3544_v35, %v1096_v53  ;;  %vm1223_vm4 = vcmp.lt.s32.totalorder %v1159_v54, 1024  ;;  %v963_v53 = vld [vmem:[%s3385_s5 + $0x70] sm:$0xff] }
 0x1cb   : >> { %v1476_v23 = vmul.f32 %v1412_v7, %v1412_v7  ;;  %v1030_v0 = vsub.f32 %v960_v11, %v3381_v47  ;;  %v1099_v9 = vadd.s32 120, %v3376_v45  ;;  %v1414_v4 = vsel %vm1222_vm0, %v1028_v1, 0.0 }
 0x1cc   : >> { %v1537_v60 = vadd.f32 %v1536_v18, %v1474_v63  ;;  %v1162_v28 = vadd.s32 %v3544_v35, %v1097_v15  ;;  %vm1224_vm5 = vcmp.lt.s32.totalorder %v1160_v13, 1024  ;;  %v1477_v61 = vmul.f32 %v1413_v22, %v1413_v22  ;;  %v964_v15 = vld [vmem:[%s3385_s5 + $0x78] sm:$0xff] }
 0x1cd   : >> { %v1031_v25 = vsub.f32 %v961_v52, %v3381_v47  ;;  %v1100_v50 = vadd.s32 128, %v3376_v45  ;;  %v1415_v51 = vsel %vm1223_vm4, %v1029_v6, 0.0  ;;  %v1163_v55 = vadd.s32 %v3544_v35, %v1098_v49  ;;  %v965_v49 = vld [vmem:[%s3385_s5 + $0x80] sm:$0xff] }
 0x1ce   : >> { %v1538_v12 = vadd.f32 %v1537_v60, %v1475_v17  ;;  %vm1225_vm6 = vcmp.lt.s32.totalorder %v1161_v5, 1024  ;;  %v1478_v56 = vmul.f32 %v1414_v4, %v1414_v4  ;;  %v1032_v63 = vsub.f32 %v962_v2, %v3381_v47 }
 0x1cf   : >> { %v1101_v16 = vadd.s32 136, %v3376_v45  ;;  %v1416_v1 = vsel %vm1224_vm5, %v1030_v0, 0.0  ;;  %v1164_v7 = vadd.s32 %v3544_v35, %v1099_v9  ;;  %vm1226_vm1 = vcmp.lt.s32.totalorder %v1162_v28, 1024  ;;  %v966_v9 = vld [vmem:[%s3385_s5 + $0x88] sm:$0xff] }
 0x1d0   : >> { %v1539_v54 = vadd.f32 %v1538_v12, %v1476_v23  ;;  %v1479_v11 = vmul.f32 %v1415_v51, %v1415_v51  ;;  %v1033_v17 = vsub.f32 %v963_v53, %v3381_v47  ;;  %v1102_v18 = vadd.s32 144, %v3376_v45 }
 0x1d1   : >> { %v1417_v6 = vsel %vm1225_vm6, %v1031_v25, 0.0  ;;  %v1165_v22 = vadd.s32 %v3544_v35, %v1100_v50  ;;  %vm1227_vm2 = vcmp.lt.s32.totalorder %v1163_v55, 1024  ;;  %v1480_v52 = vmul.f32 %v1416_v1, %v1416_v1  ;;  %v967_v50 = vld [vmem:[%s3385_s5 + $0x90] sm:$0xff] }
 0x1d2   : >> { %v1540_v13 = vadd.f32 %v1539_v54, %v1477_v61  ;;  %v1034_v23 = vsub.f32 %v964_v15, %v3381_v47  ;;  %v1103_v60 = vadd.s32 152, %v3376_v45  ;;  %v1418_v0 = vsel %vm1226_vm1, %v1032_v63, 0.0 }
 0x1d3   : >> { %v1166_v4 = vadd.s32 %v3544_v35, %v1101_v16  ;;  %vm1228_vm3 = vcmp.lt.s32.totalorder %v1164_v7, 1024  ;;  %v1481_v2 = vmul.f32 %v1417_v6, %v1417_v6  ;;  %v1035_v61 = vsub.f32 %v965_v49, %v3381_v47  ;;  %v968_v16 = vld [vmem:[%s3385_s5 + $0x98] sm:$0xff] }
 0x1d4   : >> { %v1541_v5 = vadd.f32 %v1540_v13, %v1478_v56  ;;  %v1104_v12 = vadd.s32 160, %v3376_v45  ;;  %v1419_v25 = vsel %vm1227_vm2, %v1033_v17, 0.0  ;;  %v1167_v51 = vadd.s32 %v3544_v35, %v1102_v18  ;;  %v969_v18 = vld [vmem:[%s3385_s5 + $0xa0] sm:$0xff] }
 0x1d5   : >> { %vm1229_vm7 = vcmp.lt.s32.totalorder %v1165_v22, 1024  ;;  %v1482_v53 = vmul.f32 %v1418_v0, %v1418_v0  ;;  %v1036_v56 = vsub.f32 %v966_v9, %v3381_v47  ;;  %v1105_v54 = vadd.s32 168, %v3376_v45 }
 0x1d6   : >> { %v1542_v28 = vadd.f32 %v1541_v5, %v1479_v11  ;;  %v1420_v63 = vsel %vm1228_vm3, %v1034_v23, 0.0  ;;  %v1168_v1 = vadd.s32 %v3544_v35, %v1103_v60  ;;  %vm1230_vm8 = vcmp.lt.s32.totalorder %v1166_v4, 1024  ;;  %v970_v60 = vld [vmem:[%s3385_s5 + $0xa8] sm:$0xff] }
 0x1d7   : >> { %v1483_v15 = vmul.f32 %v1419_v25, %v1419_v25  ;;  %v1037_v11 = vsub.f32 %v967_v50, %v3381_v47  ;;  %v1106_v13 = vadd.s32 176, %v3376_v45  ;;  %v1421_v17 = vsel %vm1229_vm7, %v1035_v61, 0.0 }
 0x1d8   : >> { %v1543_v55 = vadd.f32 %v1542_v28, %v1480_v52  ;;  %v1169_v6 = vadd.s32 %v3544_v35, %v1104_v12  ;;  %vm1231_vm9 = vcmp.lt.s32.totalorder %v1167_v51, 1024  ;;  %v1484_v49 = vmul.f32 %v1420_v63, %v1420_v63  ;;  %v971_v12 = vld [vmem:[%s3385_s5 + $0xb0] sm:$0xff] }
 0x1d9   : >> { %v1038_v52 = vsub.f32 %v968_v16, %v3381_v47  ;;  %v1107_v5 = vadd.s32 184, %v3376_v45  ;;  %v1422_v23 = vsel %vm1230_vm8, %v1036_v56, 0.0  ;;  %v1170_v0 = vadd.s32 %v3544_v35, %v1105_v54  ;;  %v972_v54 = vld [vmem:[%s3385_s5 + $0xb8] sm:$0xff] }
 0x1da   : >> { %v1544_v7 = vadd.f32 %v1543_v55, %v1481_v2  ;;  %vm1232_vm10 = vcmp.lt.s32.totalorder %v1168_v1, 1024  ;;  %v1485_v9 = vmul.f32 %v1421_v17, %v1421_v17  ;;  %v1039_v2 = vsub.f32 %v969_v18, %v3381_v47 }
 0x1db   : >> { %v1108_v28 = vadd.s32 192, %v3376_v45  ;;  %v1423_v61 = vsel %vm1231_vm9, %v1037_v11, 0.0  ;;  %v1171_v25 = vadd.s32 %v3544_v35, %v1106_v13  ;;  %vm1233_vm11 = vcmp.lt.s32.totalorder %v1169_v6, 1024  ;;  %v973_v13 = vld [vmem:[%s3385_s5 + $0xc0] sm:$0xff] }
 0x1dc   : >> { %v1545_v22 = vadd.f32 %v1544_v7, %v1482_v53  ;;  %v1486_v50 = vmul.f32 %v1422_v23, %v1422_v23  ;;  %v1040_v53 = vsub.f32 %v970_v60, %v3381_v47  ;;  %v1109_v55 = vadd.s32 200, %v3376_v45 }
 0x1dd   : >> { %v1424_v56 = vsel %vm1232_vm10, %v1038_v52, 0.0  ;;  %v1172_v63 = vadd.s32 %v3544_v35, %v1107_v5  ;;  %vm1234_vm12 = vcmp.lt.s32.totalorder %v1170_v0, 1024  ;;  %v1487_v16 = vmul.f32 %v1423_v61, %v1423_v61  ;;  %v974_v5 = vld [vmem:[%s3385_s5 + $0xc8] sm:$0xff] }
 0x1de   : >> { %v1546_v4 = vadd.f32 %v1545_v22, %v1483_v15  ;;  %v1041_v15 = vsub.f32 %v971_v12, %v3381_v47  ;;  %v1110_v7 = vadd.s32 208, %v3376_v45  ;;  %v1425_v11 = vsel %vm1233_vm11, %v1039_v2, 0.0 }
 0x1df   : >> { %v1173_v17 = vadd.s32 %v3544_v35, %v1108_v28  ;;  %vm1235_vm13 = vcmp.lt.s32.totalorder %v1171_v25, 1024  ;;  %v1488_v18 = vmul.f32 %v1424_v56, %v1424_v56  ;;  %v1111_v22 = vadd.s32 216, %v3376_v45  ;;  %v975_v28 = vld [vmem:[%s3385_s5 + $0xd0] sm:$0xff] }
 0x1e0   : >> { %v1547_v51 = vadd.f32 %v1546_v4, %v1484_v49  ;;  %v1042_v49 = vsub.f32 %v972_v54, %v3381_v47  ;;  %v1426_v52 = vsel %vm1234_vm12, %v1040_v53, 0.0  ;;  %v1174_v23 = vadd.s32 %v3544_v35, %v1109_v55  ;;  %v976_v55 = vld [vmem:[%s3385_s5 + $0xd8] sm:$0xff] }
 0x1e1   : >> { %vm1236_vm14 = vcmp.lt.s32.totalorder %v1172_v63, 1024  ;;  %v1489_v60 = vmul.f32 %v1425_v11, %v1425_v11  ;;  %v1112_v4 = vadd.s32 224, %v3376_v45  ;;  %v1427_v2 = vsel %vm1235_vm13, %v1041_v15, 0.0 }
 0x1e2   : >> { %v1548_v1 = vadd.f32 %v1547_v51, %v1485_v9  ;;  %v1043_v9 = vsub.f32 %v973_v13, %v3381_v47  ;;  %v1175_v61 = vadd.s32 %v3544_v35, %v1110_v7  ;;  %vm1237_vm15 = vcmp.lt.s32.totalorder %v1173_v17, 1024  ;;  %v977_v7 = vld [vmem:[%s3385_s5 + $0xe0] sm:$0xff] }
 0x1e3   : >> { %v1490_v12 = vmul.f32 %v1426_v52, %v1426_v52  ;;  %v1113_v51 = vadd.s32 232, %v3376_v45  ;;  %v1428_v53 = vsel %vm1236_vm14, %v1042_v49, 0.0  ;;  %v1176_v56 = vadd.s32 %v3544_v35, %v1111_v22  ;;  %v978_v22 = vld [vmem:[%s3385_s5 + $0xe8] sm:$0xff] }
 0x1e4   : >> { %v1549_v6 = vadd.f32 %v1548_v1, %v1486_v50  ;;  %v1044_v50 = vsub.f32 %v974_v5, %v3381_v47  ;;  %vm1238_vm0 = vcmp.lt.s32.totalorder %v1174_v23, 1024  ;;  %v1491_v54 = vmul.f32 %v1427_v2, %v1427_v2 }
 0x1e5   : >> { %v1114_v1 = vadd.s32 240, %v3376_v45  ;;  %v1429_v15 = vsel %vm1237_vm15, %v1043_v9, 0.0  ;;  %v1177_v11 = vadd.s32 %v3544_v35, %v1112_v4  ;;  %vm1239_vm4 = vcmp.lt.s32.totalorder %v1175_v61, 1024  ;;  %v979_v4 = vld [vmem:[%s3385_s5 + $0xf0] sm:$0xff] }
 0x1e6   : >> { %v1550_v0 = vadd.f32 %v1549_v6, %v1487_v16  ;;  %v1045_v16 = vsub.f32 %v975_v28, %v3381_v47  ;;  %v1492_v13 = vmul.f32 %v1428_v53, %v1428_v53  ;;  %v1115_v6 = vadd.s32 248, %v3376_v45 }
 0x1e7   : >> { %v1430_v49 = vsel %vm1238_vm0, %v1044_v50, 0.0  ;;  %v1178_v52 = vadd.s32 %v3544_v35, %v1113_v51  ;;  %vm1240_vm5 = vcmp.lt.s32.totalorder %v1176_v56, 1024  ;;  %v1493_v5 = vmul.f32 %v1429_v15, %v1429_v15  ;;  %v980_v50 = vld [vmem:[%s3385_s5 + $0xf8] sm:$0xff] }
 0x1e8   : >> { %v1551_v25 = vadd.f32 %v1550_v0, %v1488_v18  ;;  %v1046_v18 = vsub.f32 %v976_v55, %v3381_v47  ;;  %v1116_v0 = vadd.s32 256, %v3376_v45  ;;  %v1431_v9 = vsel %vm1239_vm4, %v1045_v16, 0.0 }
 0x1e9   : >> { %v1179_v2 = vadd.s32 %v3544_v35, %v1114_v1  ;;  %vm1241_vm6 = vcmp.lt.s32.totalorder %v1177_v11, 1024  ;;  %v1494_v28 = vmul.f32 %v1430_v49, %v1430_v49  ;;  %v1180_v51 = vadd.s32 %v3544_v35, %v1115_v6 }
 0x1ea   : >> { %v1552_v63 = vadd.f32 %v1551_v25, %v1489_v60  ;;  %v1047_v60 = vsub.f32 %v977_v7, %v3381_v47  ;;  %v1432_v25 = vsel %vm1240_vm5, %v1046_v18, 0.0  ;;  %vm1242_vm1 = vcmp.lt.s32.totalorder %v1178_v52, 1024 }
 0x1eb   : >> { %v1495_v53 = vmul.f32 %v1431_v9, %v1431_v9  ;;  %v1049_v56 = vsub.f32 %v979_v4, %v3381_v47  ;;  %vm1243_vm2 = vcmp.lt.s32.totalorder %v1179_v2, 1024  ;;  %v1496_v16 = vmul.f32 %v1432_v25, %v1432_v25 }
 0x1ec   : >> { %v1553_v17 = vadd.f32 %v1552_v63, %v1490_v12  ;;  %v1048_v12 = vsub.f32 %v978_v22, %v3381_v47  ;;  %v1433_v45 = vsel %vm1241_vm6, %v1047_v60, 0.0  ;;  %v1181_v63 = vadd.s32 %v3544_v35, %v1116_v0 }
 0x1ed   : >> { %v1050_v15 = vsub.f32 %v980_v50, %v3381_v47  ;;  %vm1244_vm3 = vcmp.lt.s32.totalorder %v1180_v51, 1024  ;;  %v1497_v11 = vmul.f32 %v1433_v45, %v1433_v45  ;;  %v1435_v18 = vsel %vm1243_vm2, %v1049_v56, 0.0 }
 0x1ee   : >> { %v1554_v23 = vadd.f32 %v1553_v17, %v1491_v54  ;;  %v981_v54 = vld [vmem:[%s3385_s5 + $0x100] sm:$0xff]  ;;  %v1434_v7 = vsel %vm1242_vm1, %v1048_v12, 0.0  ;;  %vm1245_vm7 = vcmp.lt.s32.totalorder %v1181_v63, 1024  ;;  %v1499_v52 = vmul.f32 %v1435_v18, %v1435_v18 }
 0x1ef   : >> { %v1051_v17 = vsub.f32 %v981_v54, %v3381_v47  ;;  %v1498_v6 = vmul.f32 %v1434_v7, %v1434_v7  ;;  %v1436_v22 = vsel %vm1244_vm3, %v1050_v15, 0.0  ;;  %v1502_v4 = vmul.f32 %v3709_v43, %v3709_v43 }
 0x1f0   : >> { %v1555_v61 = vadd.f32 %v1554_v23, %v1492_v13  ;;  %v1500_v35 = vmul.f32 %v1436_v22, %v1436_v22  ;;  %v1504_v12 = vmul.f32 %v3723_v41, %v3723_v41  ;;  %v1505_v50 = vmul.f32 %v3730_v39, %v3730_v39 }
 0x1f1   : >> { %v1437_v23 = vsel %vm1245_vm7, %v1051_v17, 0.0  ;;  %v1507_v43 = vmul.f32 %v3744_v37, %v3744_v37  ;;  %v1509_v41 = vmul.f32 %v3758_v20, %v3758_v20  ;;  %v1510_v39 = vmul.f32 %v3765_v31, %v3765_v31 }
 0x1f2   : >> { %v1556_v55 = vadd.f32 %v1555_v61, %v1493_v5  ;;  %v1501_v0 = vmul.f32 %v1437_v23, %v1437_v23  ;;  %v1512_v37 = vmul.f32 %v3779_v40, %v3779_v40  ;;  %v1514_v20 = vmul.f32 %v3793_v24, %v3793_v24 }
 0x1f3   : >> { %v1515_v31 = vmul.f32 %v3800_v44, %v3800_v44  ;;  %v1517_v40 = vmul.f32 %v3814_v46, %v3814_v46  ;;  %v1519_v24 = vmul.f32 %v3828_v30, %v3828_v30  ;;  %v1520_v44 = vmul.f32 %v3835_v32, %v3835_v32 }
 0x1f4   : >> { %v1557_v1 = vadd.f32 %v1556_v55, %v1494_v28  ;;  %v1503_v28 = vmul.f32 %v3716_v59, %v3716_v59  ;;  %v1508_v59 = vmul.f32 %v3751_v34, %v3751_v34  ;;  %v1513_v34 = vmul.f32 %v3786_v36, %v3786_v36 }
 0x1f5   : >> { %v1518_v36 = vmul.f32 %v3821_v33, %v3821_v33  ;;  %v1522_v46 = vmul.f32 %v3849_v8, %v3849_v8  ;;  %v1523_v33 = vmul.f32 %v3856_v27, %v3856_v27  ;;  %v1524_v30 = vmul.f32 %v3863_v14, %v3863_v14 }
 0x1f6   : >> { %v1558_v13 = vadd.f32 %v1557_v1, %v1495_v53  ;;  %v1506_v53 = vmul.f32 %v3737_v38, %v3737_v38  ;;  %v1511_v38 = vmul.f32 %v3772_v29, %v3772_v29  ;;  %v1516_v29 = vmul.f32 %v3807_v26, %v3807_v26 }
 0x1f7   : >> { %v1521_v26 = vmul.f32 %v3842_v21, %v3842_v21  ;;  %v1525_v32 = vmul.f32 %v3870_v42, %v3870_v42  ;;  %v1526_v21 = vmul.f32 %v3877_v58, %v3877_v58  ;;  %v1527_v8 = vmul.f32 %v3884_v62, %v3884_v62 }
 0x1f8   : >> { %v1559_v49 = vadd.f32 %v1558_v13, %v1496_v16  ;;  %v1528_v27 = vmul.f32 %v3891_v19, %v3891_v19  ;;  %v1529_v14 = vmul.f32 %v3898_v48, %v3898_v48  ;;  %v1530_v42 = vmul.f32 %v3905_v57, %v3905_v57 }
 0x1f9   : >> { %v1531_v58 = vmul.f32 %v3913_v3, %v3913_v3  ;;  %v1532_v62 = vmul.f32 %v3920_v10, %v3920_v10 }
 0x1fa   : >> { %v1560_v5 = vadd.f32 %v1559_v49, %v1497_v11 }
 0x1fc   : >> { %v1561_v60 = vadd.f32 %v1560_v5, %v1498_v6 }
 0x1fe   : >> { %v1562_v9 = vadd.f32 %v1561_v60, %v1499_v52 }
 0x200   : >> { %v1563_v2 = vadd.f32 %v1562_v9, %v1500_v35 }
 0x202   : >> { %v1564_v61 = vadd.f32 %v1563_v2, %v1501_v0 }
 0x204   : >> { %v1565_v25 = vadd.f32 %v1564_v61, %v1502_v4 }
 0x206   : >> { %v1566_v51 = vadd.f32 %v1565_v25, %v1503_v28 }
 0x208   : >> { %v1567_v55 = vadd.f32 %v1566_v51, %v1504_v12 }
 0x20a   : >> { %v1568_v56 = vadd.f32 %v1567_v55, %v1505_v50 }
 0x20c   : >> { %v1569_v45 = vadd.f32 %v1568_v56, %v1506_v53 }
 0x20e   : >> { %v1570_v54 = vadd.f32 %v1569_v45, %v1507_v43  ;;  %v4456_v43 = vld [vmem:[#allocation5_spill] sm:$0xff] }
 0x210   : >> { %v1571_v63 = vadd.f32 %v1570_v54, %v1508_v59 }
 0x212   : >> { %v1572_v16 = vadd.f32 %v1571_v63, %v1509_v41 }
 0x214   : >> { %v1573_v1 = vadd.f32 %v1572_v16, %v1510_v39 }
 0x216   : >> { %v1574_v15 = vadd.f32 %v1573_v1, %v1511_v38 }
 0x218   : >> { %v1575_v7 = vadd.f32 %v1574_v15, %v1512_v37 }
 0x21a   : >> { %v1576_v11 = vadd.f32 %v1575_v7, %v1513_v34 }
 0x21c   : >> { %v1577_v13 = vadd.f32 %v1576_v11, %v1514_v20 }
 0x21e   : >> { %v1578_v17 = vadd.f32 %v1577_v13, %v1515_v31 }
 0x220   : >> { %v1579_v18 = vadd.f32 %v1578_v17, %v1516_v29 }
 0x222   : >> { %v1580_v6 = vadd.f32 %v1579_v18, %v1517_v40 }
 0x224   : >> { %v1581_v49 = vadd.f32 %v1580_v6, %v1518_v36 }
 0x226   : >> { %v1582_v22 = vadd.f32 %v1581_v49, %v1519_v24 }
 0x228   : >> { %v1583_v52 = vadd.f32 %v1582_v22, %v1520_v44 }
 0x22a   : >> { %v1584_v5 = vadd.f32 %v1583_v52, %v1521_v26 }
 0x22c   : >> { %v1585_v23 = vadd.f32 %v1584_v5, %v1522_v46 }
 0x22e   : >> { %v1586_v35 = vadd.f32 %v1585_v23, %v1523_v33 }
 0x230   : >> { %v1587_v60 = vadd.f32 %v1586_v35, %v1524_v30 }
 0x232   : >> { %v1588_v0 = vadd.f32 %v1587_v60, %v1525_v32 }
 0x234   : >> { %v1589_v9 = vadd.f32 %v1588_v0, %v1526_v21 }
 0x236   : >> { %v1590_v4 = vadd.f32 %v1589_v9, %v1527_v8 }
 0x238   : >> { %v1591_v2 = vadd.f32 %v1590_v4, %v1528_v27 }
 0x23a   : >> { %v1592_v28 = vadd.f32 %v1591_v2, %v1529_v14 }
 0x23c   : >> { %v1593_v61 = vadd.f32 %v1592_v28, %v1530_v42 }
 0x23e   : >> { %v1594_v12 = vadd.f32 %v1593_v61, %v1531_v58 }
 0x240   : >> { %v1595_v25 = vadd.f32 %v1594_v12, %v1532_v62 }
 0x242   : >> { %v1596_v19 = vrot.slane %v1595_v25, 4 }
 0x244   : >> { %v1597_v50 = vadd.f32 %v1596_v19, %v1595_v25 }
 0x246   : >> { %v1598_v51 = vrot.slane %v1597_v50, 2 }
 0x248   : >> { %v1599_v53 = vadd.f32 %v1598_v51, %v1597_v50 }
 0x24a   : >> { %v1600_v48 = vrot.slane %v1599_v53, 1  ;;  %944 = sbr.rel (!%p942_p9) target bundleno = 397 (0x18d), region = 84 }
 0x24c   : >> { %v1601_v55 = vadd.f32 %v1600_v48, %v1599_v53 }
 0x24e   : >> { %v1602_v56 = vadd.f32 %v4456_v43, %v1601_v55  }
 0x250   : >> { %v4457_v43 = vmov %v1602_v56  ;;  %v1603_v57 = vmul.f32 (%p942_p9), 0.0009765625, %v1602_v56 }
 0x252   : > { %v1604_v3 = vadd.f32 1e-05, %v1603_v57 }
 0x254   : > { %3023 = vrsqrt.f32 %v1604_v3 }
 0x25e   : > { %v4121_v10 = vpop.eup %3023 }
 0x25f LB: >> { %s2500_s7 = sshll.u32 %s3087_s6, 9  ;;  %s1611_s6 = sadd.s32 1, %s3087_s6   ;;  %s3087_s6 = sphi %s4123_s6, %s1611_s6  }
 0x260   : >> { %s4129_s8 = scalar_lea.vmem [#allocation2], %s2500_s7  ;;  %s4136_s9 = sshra.s32 %s2500_s7, 3 }
 0x261   : >> { %v1614_v59 = vld [vmem:[%s4129_s8] sm:$0xff]  ;;  %v1615_v45 = vld [vmem:[%s4129_s8 + $0x8] sm:$0xff]  ;;  %v1616_v41 = vld [vmem:[%s4129_s8 + $0x10] sm:$0xff]  ;;  %s2565_s10 = sshll.u32 %s4136_s9, 2  ;;  %p1608_p10 = scmp.ge.s32.totalorder %s1611_s6, 2  }
 0x262   : >> { %v1684_v54 = vsub.f32 %v1614_v59, %v3381_v47  ;;  %v1685_v39 = vsub.f32 %v1615_v45, %v3381_v47  ;;  %v1617_v63 = vld [vmem:[%s4129_s8 + $0x18] sm:$0xff]  ;;  %v1686_v38 = vsub.f32 %v1616_v41, %v3381_v47  ;;  %v1618_v16 = vld [vmem:[%s4129_s8 + $0x20] sm:$0xff]  ;;  %v1619_v37 = vld [vmem:[%s4129_s8 + $0x28] sm:$0xff]  ;;  %s4157_s16 = scalar_lea.vmem %s3141_s22, %s2565_s10 }
 0x263   : >> { %v1687_v1 = vsub.f32 %v1617_v63, %v3381_v47  ;;  %v1688_v34 = vsub.f32 %v1618_v16, %v3381_v47  ;;  %v1689_v15 = vsub.f32 %v1619_v37, %v3381_v47  ;;  %v1620_v20 = vld [vmem:[%s4129_s8 + $0x30] sm:$0xff]  ;;  %v1621_v7 = vld [vmem:[%s4129_s8 + $0x38] sm:$0xff]  ;;  %v1622_v46 = vld [vmem:[%s4129_s8 + $0x40] sm:$0xff] }
 0x264   : >> { %v1748_v31 = vmul.f32 %v4121_v10, %v1684_v54  ;;  %v1749_v11 = vmul.f32 %v4121_v10, %v1685_v39  ;;  %v1750_v29 = vmul.f32 %v4121_v10, %v1686_v38  ;;  %v1690_v13 = vsub.f32 %v1620_v20, %v3381_v47  ;;  %v1623_v52 = vld [vmem:[%s4129_s8 + $0x48] sm:$0xff]  ;;  %v1624_v33 = vld [vmem:[%s4129_s8 + $0x50] sm:$0xff]  ;;  %v1625_v14 = vld [vmem:[%s4129_s8 + $0x58] sm:$0xff] }
 0x265   : >> { %v1751_v40 = vmul.f32 %v4121_v10, %v1687_v1  ;;  %v1752_v17 = vmul.f32 %v4121_v10, %v1688_v34  ;;  %v1753_v36 = vmul.f32 %v4121_v10, %v1689_v15  ;;  %v1691_v18 = vsub.f32 %v1621_v7, %v3381_v47  ;;  %v1626_v42 = vld [vmem:[%s4129_s8 + $0x60] sm:$0xff]  ;;  %v1627_v51 = vld [vmem:[%s4129_s8 + $0x68] sm:$0xff]  ;;  %v1628_v43 = vld [vmem:[%s4129_s8 + $0x70] sm:$0xff] }
 0x266   : >> { %vm1812_vm8 = vcmp.ge.f32.partialorder %v1748_v31, 0.0  ;;  %vm1813_vm9 = vcmp.ge.f32.partialorder %v1749_v11, 0.0  ;;  %v1876_v24 = vmul.f32 0.2, %v1748_v31  ;;  %v1877_v6 = vmul.f32 0.2, %v1749_v11 }
 0x267   : >> { %vm1814_vm10 = vcmp.ge.f32.partialorder %v1750_v29, 0.0  ;;  %vm1815_vm11 = vcmp.ge.f32.partialorder %v1751_v40, 0.0  ;;  %v1878_v44 = vmul.f32 0.2, %v1750_v29  ;;  %v1879_v49 = vmul.f32 0.2, %v1751_v40 }
 0x268   : >> { %v1940_v26 = vsel %vm1812_vm8, %v1748_v31, %v1876_v24  ;;  %v1941_v22 = vsel %vm1813_vm9, %v1749_v11, %v1877_v6  ;;  %vm1816_vm12 = vcmp.ge.f32.partialorder %v1752_v17, 0.0  ;;  %vm1817_vm13 = vcmp.ge.f32.partialorder %v1753_v36, 0.0  ;;  %v1629_v39 = vld [vmem:[%s4129_s8 + $0x78] sm:$0xff]  ;;  %v1630_v37 = vld [vmem:[%s4129_s8 + $0x80] sm:$0xff] }
 0x269   : >> { %v2636_v5 = vpack.c.bf16 %v1941_v22, %v1940_v26  ;;  %v1942_v30 = vsel %vm1814_vm10, %v1750_v29, %v1878_v44  ;;  %v1943_v23 = vsel %vm1815_vm11, %v1751_v40, %v1879_v49  ;;  %v1880_v32 = vmul.f32 0.2, %v1752_v17  ;;  %v1631_v29 = vld [vmem:[%s4129_s8 + $0x88] sm:$0xff]  ;;  %v1633_v44 = vld [vmem:[%s4129_s8 + $0x98] sm:$0xff] }
 0x26a   : >> { %v2641_v35 = vpack.c.bf16 %v1943_v23, %v1942_v30  ;;  %v1881_v21 = vmul.f32 0.2, %v1753_v36  ;;  %v1754_v60 = vmul.f32 %v4121_v10, %v1690_v13  ;;  %v1755_v8 = vmul.f32 %v4121_v10, %v1691_v18  ;;  %v1632_v13 = vld [vmem:[%s4129_s8 + $0x90] sm:$0xff] }
 0x26b   : >> { %2637 = vst [vmem:[%s4157_s16] sm:$0xff] %v2636_v5   ;;  %v1944_v0 = vsel %vm1816_vm12, %v1752_v17, %v1880_v32  ;;  %v1692_v27 = vsub.f32 %v1622_v46, %v3381_v47  ;;  %v1693_v9 = vsub.f32 %v1623_v52, %v3381_v47  ;;  %v1694_v4 = vsub.f32 %v1624_v33, %v3381_v47  ;;  %v1634_v52 = vld [vmem:[%s4129_s8 + $0xa0] sm:$0xff]  ;;  %v1635_v33 = vld [vmem:[%s4129_s8 + $0xa8] sm:$0xff] }
 0x26c   : >> { %2793 = vst [vmem:[%s4157_s16 + $0x8] sm:$0xff] %v2641_v35   ;;  %v1945_v2 = vsel %vm1817_vm13, %v1753_v36, %v1881_v21  ;;  %vm1818_vm14 = vcmp.ge.f32.partialorder %v1754_v60, 0.0  ;;  %vm1819_vm15 = vcmp.ge.f32.partialorder %v1755_v8, 0.0  ;;  %v1882_v58 = vmul.f32 0.2, %v1754_v60 }
 0x26d   : >> { %v2646_v28 = vpack.c.bf16 %v1945_v2, %v1944_v0  ;;  %v1883_v62 = vmul.f32 0.2, %v1755_v8  ;;  %v1756_v61 = vmul.f32 %v4121_v10, %v1692_v27  ;;  %v1757_v12 = vmul.f32 %v4121_v10, %v1693_v9  ;;  %v1636_v9 = vld [vmem:[%s4129_s8 + $0xb0] sm:$0xff] }
 0x26e   : >> { %v1946_v25 = vsel %vm1818_vm14, %v1754_v60, %v1882_v58  ;;  %v1695_v19 = vsub.f32 %v1625_v14, %v3381_v47  ;;  %v1758_v50 = vmul.f32 %v4121_v10, %v1694_v4  ;;  %v1696_v53 = vsub.f32 %v1626_v42, %v3381_v47  ;;  %v1637_v14 = vld [vmem:[%s4129_s8 + $0xb8] sm:$0xff] }
 0x26f   : >> { %2794 = vst [vmem:[%s4157_s16 + $0x10] sm:$0xff] %v2646_v28   ;;  %v1947_v48 = vsel %vm1819_vm15, %v1755_v8, %v1883_v62  ;;  %vm1820_vm0 = vcmp.ge.f32.partialorder %v1756_v61, 0.0  ;;  %vm1821_vm4 = vcmp.ge.f32.partialorder %v1757_v12, 0.0  ;;  %v1884_v55 = vmul.f32 0.2, %v1756_v61 }
 0x270   : >> { %v2651_v56 = vpack.c.bf16 %v1947_v48, %v1946_v25  ;;  %v1885_v57 = vmul.f32 0.2, %v1757_v12  ;;  %v1759_v3 = vmul.f32 %v4121_v10, %v1695_v19  ;;  %vm1822_vm5 = vcmp.ge.f32.partialorder %v1758_v50, 0.0 }
 0x271   : >> { %v1948_v59 = vsel %vm1820_vm0, %v1756_v61, %v1884_v55  ;;  %v1886_v45 = vmul.f32 0.2, %v1758_v50  ;;  %v1697_v41 = vsub.f32 %v1627_v51, %v3381_v47  ;;  %v1760_v54 = vmul.f32 %v4121_v10, %v1696_v53  ;;  %v1639_v55 = vld [vmem:[%s4129_s8 + $0xc8] sm:$0xff] }
 0x272   : >> { %2795 = vst [vmem:[%s4157_s16 + $0x18] sm:$0xff] %v2651_v56   ;;  %v1949_v63 = vsel %vm1821_vm4, %v1757_v12, %v1885_v57  ;;  %vm1823_vm6 = vcmp.ge.f32.partialorder %v1759_v3, 0.0  ;;  %v1887_v38 = vmul.f32 0.2, %v1759_v3  ;;  %v1698_v16 = vsub.f32 %v1628_v43, %v3381_v47 }
 0x273   : >> { %v2656_v1 = vpack.c.bf16 %v1949_v63, %v1948_v59  ;;  %v1950_v34 = vsel %vm1822_vm5, %v1758_v50, %v1886_v45  ;;  %v1761_v15 = vmul.f32 %v4121_v10, %v1697_v41  ;;  %vm1824_vm1 = vcmp.ge.f32.partialorder %v1760_v54, 0.0  ;;  %v1638_v50 = vld [vmem:[%s4129_s8 + $0xc0] sm:$0xff]  ;;  %v1640_v41 = vld [vmem:[%s4129_s8 + $0xd0] sm:$0xff] }
 0x274   : >> { %v1951_v20 = vsel %vm1823_vm6, %v1759_v3, %v1887_v38  ;;  %v1888_v7 = vmul.f32 0.2, %v1760_v54  ;;  %v1699_v31 = vsub.f32 %v1629_v39, %v3381_v47  ;;  %v1762_v11 = vmul.f32 %v4121_v10, %v1698_v16  ;;  %v1641_v16 = vld [vmem:[%s4129_s8 + $0xd8] sm:$0xff] }
 0x275   : >> { %2796 = vst [vmem:[%s4157_s16 + $0x20] sm:$0xff] %v2656_v1   ;;  %v2661_v40 = vpack.c.bf16 %v1951_v20, %v1950_v34  ;;  %vm1825_vm2 = vcmp.ge.f32.partialorder %v1761_v15, 0.0  ;;  %v1889_v17 = vmul.f32 0.2, %v1761_v15  ;;  %v1700_v36 = vsub.f32 %v1630_v37, %v3381_v47  ;;  %v1642_v37 = vld [vmem:[%s4129_s8 + $0xe0] sm:$0xff]  ;;  %v1643_v1 = vld [vmem:[%s4129_s8 + $0xe8] sm:$0xff] }
 0x276   : >> { %v1952_v18 = vsel %vm1824_vm1, %v1760_v54, %v1888_v7  ;;  %v1763_v24 = vmul.f32 %v4121_v10, %v1699_v31  ;;  %vm1826_vm3 = vcmp.ge.f32.partialorder %v1762_v11, 0.0  ;;  %v1890_v6 = vmul.f32 0.2, %v1762_v11 }
 0x277   : >> { %2797 = vst [vmem:[%s4157_s16 + $0x28] sm:$0xff] %v2661_v40   ;;  %v1953_v49 = vsel %vm1825_vm2, %v1761_v15, %v1889_v17  ;;  %v1701_v26 = vsub.f32 %v1631_v29, %v3381_v47  ;;  %v1764_v22 = vmul.f32 %v4121_v10, %v1700_v36  ;;  %v1702_v46 = vsub.f32 %v1632_v13, %v3381_v47  ;;  %v1644_v36 = vld [vmem:[%s4129_s8 + $0xf0] sm:$0xff] }
 0x278   : >> { %v2666_v5 = vpack.c.bf16 %v1953_v49, %v1952_v18  ;;  %vm1827_vm7 = vcmp.ge.f32.partialorder %v1763_v24, 0.0  ;;  %v1891_v30 = vmul.f32 0.2, %v1763_v24  ;;  %v1954_v23 = vsel %vm1826_vm3, %v1762_v11, %v1890_v6 }
 0x279   : >> { %v1765_v32 = vmul.f32 %v4121_v10, %v1701_v26  ;;  %vm1828_vm8 = vcmp.ge.f32.partialorder %v1764_v22, 0.0  ;;  %v1892_v35 = vmul.f32 0.2, %v1764_v22  ;;  %v1703_v21 = vsub.f32 %v1633_v44, %v3381_v47 }
 0x27a   : >> { %2798 = vst [vmem:[%s4157_s16 + $0x30] sm:$0xff] %v2666_v5   ;;  %v1955_v60 = vsel %vm1827_vm7, %v1763_v24, %v1891_v30  ;;  %v1766_v8 = vmul.f32 %v4121_v10, %v1702_v46  ;;  %v1704_v0 = vsub.f32 %v1634_v52, %v3381_v47  ;;  %v1705_v27 = vsub.f32 %v1635_v33, %v3381_v47  ;;  %v1645_v33 = vld [vmem:[%s4129_s8 + $0xf8] sm:$0xff] }
 0x27b   : >> { %v2671_v4 = vpack.c.bf16 %v1955_v60, %v1954_v23  ;;  %vm1829_vm9 = vcmp.ge.f32.partialorder %v1765_v32, 0.0  ;;  %v1893_v42 = vmul.f32 0.2, %v1765_v32  ;;  %v1956_v2 = vsel %vm1828_vm8, %v1764_v22, %v1892_v35  ;;  %v1647_v35 = vld [vmem:[%s4129_s8 + $0x108] sm:$0xff] }
 0x27c   : >> { %v1767_v58 = vmul.f32 %v4121_v10, %v1703_v21  ;;  %vm1830_vm10 = vcmp.ge.f32.partialorder %v1766_v8, 0.0  ;;  %v1894_v28 = vmul.f32 0.2, %v1766_v8  ;;  %v1768_v62 = vmul.f32 %v4121_v10, %v1704_v0 }
 0x27d   : >> { %2799 = vst [vmem:[%s4157_s16 + $0x38] sm:$0xff] %v2671_v4   ;;  %v1957_v61 = vsel %vm1829_vm9, %v1765_v32, %v1893_v42  ;;  %v1769_v12 = vmul.f32 %v4121_v10, %v1705_v27  ;;  %v1706_v25 = vsub.f32 %v1636_v9, %v3381_v47  ;;  %v1707_v19 = vsub.f32 %v1637_v14, %v3381_v47  ;;  %v1646_v32 = vld [vmem:[%s4129_s8 + $0x100] sm:$0xff] }
 0x27e   : >> { %v2676_v51 = vpack.c.bf16 %v1957_v61, %v1956_v2  ;;  %vm1831_vm11 = vcmp.ge.f32.partialorder %v1767_v58, 0.0  ;;  %v1895_v53 = vmul.f32 0.2, %v1767_v58  ;;  %v1958_v48 = vsel %vm1830_vm10, %v1766_v8, %v1894_v28 }
 0x27f   : >> { %vm1832_vm12 = vcmp.ge.f32.partialorder %v1768_v62, 0.0  ;;  %vm1833_vm13 = vcmp.ge.f32.partialorder %v1769_v12, 0.0  ;;  %v1896_v43 = vmul.f32 0.2, %v1768_v62  ;;  %v1897_v56 = vmul.f32 0.2, %v1769_v12 }
 0x280   : >> { %2800 = vst [vmem:[%s4157_s16 + $0x40] sm:$0xff] %v2676_v51   ;;  %v1959_v57 = vsel %vm1831_vm11, %v1767_v58, %v1895_v53  ;;  %v1770_v3 = vmul.f32 %v4121_v10, %v1706_v25  ;;  %v1771_v59 = vmul.f32 %v4121_v10, %v1707_v19  ;;  %v1708_v45 = vsub.f32 %v1638_v50, %v3381_v47  ;;  %v1648_v58 = vld [vmem:[%s4129_s8 + $0x110] sm:$0xff]  ;;  %v1649_v25 = vld [vmem:[%s4129_s8 + $0x118] sm:$0xff] }
 0x281   : >> { %v2681_v54 = vpack.c.bf16 %v1959_v57, %v1958_v48  ;;  %v1960_v39 = vsel %vm1832_vm12, %v1768_v62, %v1896_v43  ;;  %v1961_v63 = vsel %vm1833_vm13, %v1769_v12, %v1897_v56  ;;  %v1709_v38 = vsub.f32 %v1639_v55, %v3381_v47  ;;  %v1650_v43 = vld [vmem:[%s4129_s8 + $0x120] sm:$0xff] }
 0x282   : >> { %v2686_v34 = vpack.c.bf16 %v1961_v63, %v1960_v39  ;;  %vm1834_vm14 = vcmp.ge.f32.partialorder %v1770_v3, 0.0  ;;  %vm1835_vm15 = vcmp.ge.f32.partialorder %v1771_v59, 0.0  ;;  %v1898_v15 = vmul.f32 0.2, %v1770_v3 }
 0x283   : >> { %2801 = vst [vmem:[%s4157_s16 + $0x48] sm:$0xff] %v2681_v54   ;;  %v1899_v20 = vmul.f32 0.2, %v1771_v59  ;;  %v1772_v7 = vmul.f32 %v4121_v10, %v1708_v45  ;;  %v1773_v31 = vmul.f32 %v4121_v10, %v1709_v38  ;;  %v1710_v11 = vsub.f32 %v1640_v41, %v3381_v47 }
 0x284   : >> { %2802 = vst [vmem:[%s4157_s16 + $0x50] sm:$0xff] %v2686_v34   ;;  %v1962_v29 = vsel %vm1834_vm14, %v1770_v3, %v1898_v15  ;;  %v1711_v13 = vsub.f32 %v1641_v16, %v3381_v47  ;;  %v1712_v40 = vsub.f32 %v1642_v37, %v3381_v47  ;;  %v1713_v17 = vsub.f32 %v1643_v1, %v3381_v47  ;;  %v1652_v37 = vld [vmem:[%s4129_s8 + $0x130] sm:$0xff]  ;;  %v1653_v1 = vld [vmem:[%s4129_s8 + $0x138] sm:$0xff] }
 0x285   : >> { %v1963_v18 = vsel %vm1835_vm15, %v1771_v59, %v1899_v20  ;;  %vm1836_vm0 = vcmp.ge.f32.partialorder %v1772_v7, 0.0  ;;  %vm1837_vm4 = vcmp.ge.f32.partialorder %v1773_v31, 0.0  ;;  %v1900_v24 = vmul.f32 0.2, %v1772_v7  ;;  %v1651_v59 = vld [vmem:[%s4129_s8 + $0x128] sm:$0xff] }
 0x286   : >> { %v2691_v6 = vpack.c.bf16 %v1963_v18, %v1962_v29  ;;  %v1901_v44 = vmul.f32 0.2, %v1773_v31  ;;  %v1774_v49 = vmul.f32 %v4121_v10, %v1710_v11  ;;  %v1775_v26 = vmul.f32 %v4121_v10, %v1711_v13  ;;  %v1655_v18 = vld [vmem:[%s4129_s8 + $0x148] sm:$0xff] }
 0x287   : >> { %v1964_v22 = vsel %vm1836_vm0, %v1772_v7, %v1900_v24  ;;  %v1776_v46 = vmul.f32 %v4121_v10, %v1712_v40  ;;  %v1777_v52 = vmul.f32 %v4121_v10, %v1713_v17  ;;  %v1714_v5 = vsub.f32 %v1644_v36, %v3381_v47  ;;  %v1654_v7 = vld [vmem:[%s4129_s8 + $0x140] sm:$0xff] }
 0x288   : >> { %2803 = vst [vmem:[%s4157_s16 + $0x58] sm:$0xff] %v2691_v6   ;;  %v1965_v30 = vsel %vm1837_vm4, %v1773_v31, %v1901_v44  ;;  %vm1838_vm5 = vcmp.ge.f32.partialorder %v1774_v49, 0.0  ;;  %vm1839_vm6 = vcmp.ge.f32.partialorder %v1775_v26, 0.0  ;;  %v1902_v23 = vmul.f32 0.2, %v1774_v49 }
 0x289   : >> { %v2696_v21 = vpack.c.bf16 %v1965_v30, %v1964_v22  ;;  %v1903_v60 = vmul.f32 0.2, %v1775_v26  ;;  %vm1840_vm1 = vcmp.ge.f32.partialorder %v1776_v46, 0.0  ;;  %vm1841_vm2 = vcmp.ge.f32.partialorder %v1777_v52, 0.0 }
 0x28a   : >> { %v1966_v8 = vsel %vm1838_vm5, %v1774_v49, %v1902_v23  ;;  %v1904_v0 = vmul.f32 0.2, %v1776_v46  ;;  %v1905_v27 = vmul.f32 0.2, %v1777_v52  ;;  %v1715_v9 = vsub.f32 %v1645_v33, %v3381_v47  ;;  %v1656_v49 = vld [vmem:[%s4129_s8 + $0x150] sm:$0xff]  ;;  %v1657_v23 = vld [vmem:[%s4129_s8 + $0x158] sm:$0xff] }
 0x28b   : >> { %2804 = vst [vmem:[%s4157_s16 + $0x60] sm:$0xff] %v2696_v21   ;;  %v1967_v14 = vsel %vm1839_vm6, %v1775_v26, %v1903_v60  ;;  %v1778_v4 = vmul.f32 %v4121_v10, %v1714_v5  ;;  %v1716_v42 = vsub.f32 %v1646_v32, %v3381_v47  ;;  %v1717_v2 = vsub.f32 %v1647_v35, %v3381_v47 }
 0x28c   : >> { %v2701_v28 = vpack.c.bf16 %v1967_v14, %v1966_v8  ;;  %v1968_v62 = vsel %vm1840_vm1, %v1776_v46, %v1904_v0  ;;  %v1969_v61 = vsel %vm1841_vm2, %v1777_v52, %v1905_v27  ;;  %v1779_v12 = vmul.f32 %v4121_v10, %v1715_v9  ;;  %v1658_v27 = vld [vmem:[%s4129_s8 + $0x160] sm:$0xff] }
 0x28d   : >> { %v2706_v19 = vpack.c.bf16 %v1969_v61, %v1968_v62  ;;  %vm1842_vm3 = vcmp.ge.f32.partialorder %v1778_v4, 0.0  ;;  %v1906_v50 = vmul.f32 0.2, %v1778_v4  ;;  %v1780_v51 = vmul.f32 %v4121_v10, %v1716_v42  ;;  %v1659_v42 = vld [vmem:[%s4129_s8 + $0x168] sm:$0xff] }
 0x28e   : >> { %2805 = vst [vmem:[%s4157_s16 + $0x68] sm:$0xff] %v2701_v28   ;;  %vm1843_vm7 = vcmp.ge.f32.partialorder %v1779_v12, 0.0  ;;  %v1907_v53 = vmul.f32 0.2, %v1779_v12  ;;  %v1781_v48 = vmul.f32 %v4121_v10, %v1717_v2  ;;  %v1718_v55 = vsub.f32 %v1648_v58, %v3381_v47 }
 0x28f   : >> { %2806 = vst [vmem:[%s4157_s16 + $0x70] sm:$0xff] %v2706_v19   ;;  %v1970_v56 = vsel %vm1842_vm3, %v1778_v4, %v1906_v50  ;;  %vm1844_vm8 = vcmp.ge.f32.partialorder %v1780_v51, 0.0  ;;  %v1908_v57 = vmul.f32 0.2, %v1780_v51  ;;  %v1719_v3 = vsub.f32 %v1649_v25, %v3381_v47  ;;  %v1660_v19 = vld [vmem:[%s4129_s8 + $0x170] sm:$0xff]  ;;  %v1661_v50 = vld [vmem:[%s4129_s8 + $0x178] sm:$0xff] }
 0x290   : >> { %v1971_v45 = vsel %vm1843_vm7, %v1779_v12, %v1907_v53  ;;  %vm1845_vm9 = vcmp.ge.f32.partialorder %v1781_v48, 0.0  ;;  %v1909_v41 = vmul.f32 0.2, %v1781_v48  ;;  %v1782_v54 = vmul.f32 %v4121_v10, %v1718_v55  ;;  %v1662_v55 = vld [vmem:[%s4129_s8 + $0x180] sm:$0xff] }
 0x291   : >> { %v2711_v39 = vpack.c.bf16 %v1971_v45, %v1970_v56  ;;  %v1972_v63 = vsel %vm1844_vm8, %v1780_v51, %v1908_v57  ;;  %v1783_v38 = vmul.f32 %v4121_v10, %v1719_v3  ;;  %v1720_v16 = vsub.f32 %v1650_v43, %v3381_v47 }
 0x292   : >> { %v1973_v34 = vsel %vm1845_vm9, %v1781_v48, %v1909_v41  ;;  %vm1846_vm10 = vcmp.ge.f32.partialorder %v1782_v54, 0.0  ;;  %v1910_v15 = vmul.f32 0.2, %v1782_v54  ;;  %v1721_v20 = vsub.f32 %v1651_v59, %v3381_v47 }
 0x293   : >> { %2807 = vst [vmem:[%s4157_s16 + $0x78] sm:$0xff] %v2711_v39   ;;  %v2716_v31 = vpack.c.bf16 %v1973_v34, %v1972_v63  ;;  %vm1847_vm11 = vcmp.ge.f32.partialorder %v1783_v38, 0.0  ;;  %v1911_v11 = vmul.f32 0.2, %v1783_v38  ;;  %v1784_v29 = vmul.f32 %v4121_v10, %v1720_v16  ;;  %v1664_v16 = vld [vmem:[%s4129_s8 + $0x190] sm:$0xff] }
 0x294   : >> { %v1974_v13 = vsel %vm1846_vm10, %v1782_v54, %v1910_v15  ;;  %v1785_v40 = vmul.f32 %v4121_v10, %v1721_v20  ;;  %v1722_v17 = vsub.f32 %v1652_v37, %v3381_v47  ;;  %v1723_v36 = vsub.f32 %v1653_v1, %v3381_v47  ;;  %v1663_v54 = vld [vmem:[%s4129_s8 + $0x188] sm:$0xff] }
 0x295   : >> { %2808 = vst [vmem:[%s4157_s16 + $0x80] sm:$0xff] %v2716_v31   ;;  %v1975_v24 = vsel %vm1847_vm11, %v1783_v38, %v1911_v11  ;;  %vm1848_vm12 = vcmp.ge.f32.partialorder %v1784_v29, 0.0  ;;  %v1912_v6 = vmul.f32 0.2, %v1784_v29  ;;  %v1724_v44 = vsub.f32 %v1654_v7, %v3381_v47  ;;  %v1665_v11 = vld [vmem:[%s4129_s8 + $0x198] sm:$0xff] }
 0x296   : >> { %v2721_v26 = vpack.c.bf16 %v1975_v24, %v1974_v13  ;;  %vm1849_vm13 = vcmp.ge.f32.partialorder %v1785_v40, 0.0  ;;  %v1913_v22 = vmul.f32 0.2, %v1785_v40  ;;  %v1786_v46 = vmul.f32 %v4121_v10, %v1722_v17  ;;  %v1666_v24 = vld [vmem:[%s4129_s8 + $0x1a0] sm:$0xff] }
 0x297   : >> { %v1976_v52 = vsel %vm1848_vm12, %v1784_v29, %v1912_v6  ;;  %v1787_v33 = vmul.f32 %v4121_v10, %v1723_v36  ;;  %v1725_v5 = vsub.f32 %v1655_v18, %v3381_v47  ;;  %v1788_v30 = vmul.f32 %v4121_v10, %v1724_v44 }
 0x298   : >> { %2809 = vst [vmem:[%s4157_s16 + $0x88] sm:$0xff] %v2721_v26   ;;  %v1977_v32 = vsel %vm1849_vm13, %v1785_v40, %v1913_v22  ;;  %vm1850_vm14 = vcmp.ge.f32.partialorder %v1786_v46, 0.0  ;;  %v1914_v35 = vmul.f32 0.2, %v1786_v46  ;;  %v1726_v21 = vsub.f32 %v1656_v49, %v3381_v47  ;;  %v1667_v26 = vld [vmem:[%s4129_s8 + $0x1a8] sm:$0xff] }
 0x299   : >> { %v2726_v60 = vpack.c.bf16 %v1977_v32, %v1976_v52  ;;  %vm1851_vm15 = vcmp.ge.f32.partialorder %v1787_v33, 0.0  ;;  %v1915_v8 = vmul.f32 0.2, %v1787_v33  ;;  %v1789_v0 = vmul.f32 %v4121_v10, %v1725_v5  ;;  %v1668_v32 = vld [vmem:[%s4129_s8 + $0x1b0] sm:$0xff] }
 0x29a   : >> { %v1978_v9 = vsel %vm1850_vm14, %v1786_v46, %v1914_v35  ;;  %vm1852_vm0 = vcmp.ge.f32.partialorder %v1788_v30, 0.0  ;;  %v1916_v14 = vmul.f32 0.2, %v1788_v30  ;;  %v1727_v4 = vsub.f32 %v1657_v23, %v3381_v47  ;;  %v1669_v35 = vld [vmem:[%s4129_s8 + $0x1b8] sm:$0xff] }
 0x29b   : >> { %2810 = vst [vmem:[%s4157_s16 + $0x90] sm:$0xff] %v2726_v60   ;;  %v1979_v2 = vsel %vm1851_vm15, %v1787_v33, %v1915_v8  ;;  %vm1853_vm4 = vcmp.ge.f32.partialorder %v1789_v0, 0.0  ;;  %v1917_v58 = vmul.f32 0.2, %v1789_v0  ;;  %v1790_v28 = vmul.f32 %v4121_v10, %v1726_v21 }
 0x29c   : >> { %v2731_v62 = vpack.c.bf16 %v1979_v2, %v1978_v9  ;;  %v1980_v61 = vsel %vm1852_vm0, %v1788_v30, %v1916_v14  ;;  %v1791_v12 = vmul.f32 %v4121_v10, %v1727_v4  ;;  %v1728_v25 = vsub.f32 %v1658_v27, %v3381_v47 }
 0x29d   : >> { %v1981_v51 = vsel %vm1853_vm4, %v1789_v0, %v1917_v58  ;;  %vm1854_vm5 = vcmp.ge.f32.partialorder %v1790_v28, 0.0  ;;  %v1918_v53 = vmul.f32 0.2, %v1790_v28  ;;  %v1729_v48 = vsub.f32 %v1659_v42, %v3381_v47  ;;  %v1670_v0 = vld [vmem:[%s4129_s8 + $0x1c0] sm:$0xff] }
 0x29e   : >> { %2811 = vst [vmem:[%s4157_s16 + $0x98] sm:$0xff] %v2731_v62   ;;  %v2736_v43 = vpack.c.bf16 %v1981_v51, %v1980_v61  ;;  %vm1855_vm6 = vcmp.ge.f32.partialorder %v1791_v12, 0.0  ;;  %v1919_v56 = vmul.f32 0.2, %v1791_v12  ;;  %v1792_v57 = vmul.f32 %v4121_v10, %v1728_v25  ;;  %v1672_v25 = vld [vmem:[%s4129_s8 + $0x1d0] sm:$0xff] }
 0x29f   : >> { %v1982_v3 = vsel %vm1854_vm5, %v1790_v28, %v1918_v53  ;;  %v1793_v59 = vmul.f32 %v4121_v10, %v1729_v48  ;;  %v1730_v45 = vsub.f32 %v1660_v19, %v3381_v47  ;;  %v1731_v41 = vsub.f32 %v1661_v50, %v3381_v47  ;;  %v1671_v28 = vld [vmem:[%s4129_s8 + $0x1c8] sm:$0xff] }
 0x2a0   : >> { %2812 = vst [vmem:[%s4157_s16 + $0xa0] sm:$0xff] %v2736_v43   ;;  %v1983_v39 = vsel %vm1855_vm6, %v1791_v12, %v1919_v56  ;;  %vm1856_vm1 = vcmp.ge.f32.partialorder %v1792_v57, 0.0  ;;  %v1920_v63 = vmul.f32 0.2, %v1792_v57  ;;  %v1732_v38 = vsub.f32 %v1662_v55, %v3381_v47  ;;  %v1673_v56 = vld [vmem:[%s4129_s8 + $0x1d8] sm:$0xff] }
 0x2a1   : >> { %v2741_v37 = vpack.c.bf16 %v1983_v39, %v1982_v3  ;;  %vm1857_vm2 = vcmp.ge.f32.partialorder %v1793_v59, 0.0  ;;  %v1921_v1 = vmul.f32 0.2, %v1793_v59  ;;  %v1794_v34 = vmul.f32 %v4121_v10, %v1730_v45  ;;  %v1674_v39 = vld [vmem:[%s4129_s8 + $0x1e0] sm:$0xff] }
 0x2a2   : >> { %v1984_v15 = vsel %vm1856_vm1, %v1792_v57, %v1920_v63  ;;  %v1795_v20 = vmul.f32 %v4121_v10, %v1731_v41  ;;  %v1733_v7 = vsub.f32 %v1663_v54, %v3381_v47  ;;  %v1796_v31 = vmul.f32 %v4121_v10, %v1732_v38 }
 0x2a3   : >> { %2813 = vst [vmem:[%s4157_s16 + $0xa8] sm:$0xff] %v2741_v37   ;;  %v1985_v29 = vsel %vm1857_vm2, %v1793_v59, %v1921_v1  ;;  %vm1858_vm3 = vcmp.ge.f32.partialorder %v1794_v34, 0.0  ;;  %v1922_v13 = vmul.f32 0.2, %v1794_v34  ;;  %v1734_v40 = vsub.f32 %v1664_v16, %v3381_v47  ;;  %v1675_v37 = vld [vmem:[%s4129_s8 + $0x1e8] sm:$0xff] }
 0x2a4   : >> { %v2746_v17 = vpack.c.bf16 %v1985_v29, %v1984_v15  ;;  %vm1859_vm7 = vcmp.ge.f32.partialorder %v1795_v20, 0.0  ;;  %v1923_v36 = vmul.f32 0.2, %v1795_v20  ;;  %v1797_v18 = vmul.f32 %v4121_v10, %v1733_v7  ;;  %v1676_v29 = vld [vmem:[%s4129_s8 + $0x1f0] sm:$0xff] }
 0x2a5   : >> { %v1986_v6 = vsel %vm1858_vm3, %v1794_v34, %v1922_v13  ;;  %vm1860_vm8 = vcmp.ge.f32.partialorder %v1796_v31, 0.0  ;;  %v1924_v44 = vmul.f32 0.2, %v1796_v31  ;;  %v1735_v49 = vsub.f32 %v1665_v11, %v3381_v47  ;;  %v1677_v13 = vld [vmem:[%s4129_s8 + $0x1f8] sm:$0xff] }
 0x2a6   : >> { %2814 = vst [vmem:[%s4157_s16 + $0xb0] sm:$0xff] %v2746_v17   ;;  %v1987_v22 = vsel %vm1859_vm7, %v1795_v20, %v1923_v36  ;;  %vm1861_vm9 = vcmp.ge.f32.partialorder %v1797_v18, 0.0  ;;  %v1925_v46 = vmul.f32 0.2, %v1797_v18  ;;  %v1798_v52 = vmul.f32 %v4121_v10, %v1734_v40 }
 0x2a7   : >> { %v2751_v33 = vpack.c.bf16 %v1987_v22, %v1986_v6  ;;  %v1988_v5 = vsel %vm1860_vm8, %v1796_v31, %v1924_v44  ;;  %v1799_v30 = vmul.f32 %v4121_v10, %v1735_v49  ;;  %v1736_v23 = vsub.f32 %v1666_v24, %v3381_v47 }
 0x2a8   : >> { %v1989_v21 = vsel %vm1861_vm9, %v1797_v18, %v1925_v46  ;;  %vm1862_vm10 = vcmp.ge.f32.partialorder %v1798_v52, 0.0  ;;  %v1926_v60 = vmul.f32 0.2, %v1798_v52  ;;  %v1737_v8 = vsub.f32 %v1667_v26, %v3381_v47 }
 0x2a9   : >> { %2815 = vst [vmem:[%s4157_s16 + $0xb8] sm:$0xff] %v2751_v33   ;;  %v2756_v27 = vpack.c.bf16 %v1989_v21, %v1988_v5  ;;  %vm1863_vm11 = vcmp.ge.f32.partialorder %v1799_v30, 0.0  ;;  %v1927_v9 = vmul.f32 0.2, %v1799_v30  ;;  %v1800_v14 = vmul.f32 %v4121_v10, %v1736_v23 }
 0x2aa   : >> { %v1990_v4 = vsel %vm1862_vm10, %v1798_v52, %v1926_v60  ;;  %v1801_v42 = vmul.f32 %v4121_v10, %v1737_v8  ;;  %v1738_v2 = vsub.f32 %v1668_v32, %v3381_v47  ;;  %v1739_v58 = vsub.f32 %v1669_v35, %v3381_v47 }
 0x2ab   : >> { %2816 = vst [vmem:[%s4157_s16 + $0xc0] sm:$0xff] %v2756_v27   ;;  %v1991_v62 = vsel %vm1863_vm11, %v1799_v30, %v1927_v9  ;;  %vm1864_vm12 = vcmp.ge.f32.partialorder %v1800_v14, 0.0  ;;  %v1928_v61 = vmul.f32 0.2, %v1800_v14  ;;  %v1740_v12 = vsub.f32 %v1670_v0, %v3381_v47 }
 0x2ac   : >> { %v2761_v19 = vpack.c.bf16 %v1991_v62, %v1990_v4  ;;  %vm1865_vm13 = vcmp.ge.f32.partialorder %v1801_v42, 0.0  ;;  %v1929_v50 = vmul.f32 0.2, %v1801_v42  ;;  %v1802_v51 = vmul.f32 %v4121_v10, %v1738_v2 }
 0x2ad   : >> { %v1992_v53 = vsel %vm1864_vm12, %v1800_v14, %v1928_v61  ;;  %v1803_v48 = vmul.f32 %v4121_v10, %v1739_v58  ;;  %v1741_v55 = vsub.f32 %v1671_v28, %v3381_v47  ;;  %v1804_v43 = vmul.f32 %v4121_v10, %v1740_v12 }
 0x2ae   : >> { %2817 = vst [vmem:[%s4157_s16 + $0xc8] sm:$0xff] %v2761_v19   ;;  %v1993_v57 = vsel %vm1865_vm13, %v1801_v42, %v1929_v50  ;;  %vm1866_vm14 = vcmp.ge.f32.partialorder %v1802_v51, 0.0  ;;  %v1930_v3 = vmul.f32 0.2, %v1802_v51  ;;  %v1742_v59 = vsub.f32 %v1672_v25, %v3381_v47 }
 0x2af   : >> { %v2766_v45 = vpack.c.bf16 %v1993_v57, %v1992_v53  ;;  %vm1867_vm15 = vcmp.ge.f32.partialorder %v1803_v48, 0.0  ;;  %v1931_v41 = vmul.f32 0.2, %v1803_v48  ;;  %v1805_v54 = vmul.f32 %v4121_v10, %v1741_v55 }
 0x2b0   : >> { %v1994_v63 = vsel %vm1866_vm14, %v1802_v51, %v1930_v3  ;;  %vm1868_vm0 = vcmp.ge.f32.partialorder %v1804_v43, 0.0  ;;  %v1932_v38 = vmul.f32 0.2, %v1804_v43  ;;  %v1743_v16 = vsub.f32 %v1673_v56, %v3381_v47 }
 0x2b1   : >> { %2818 = vst [vmem:[%s4157_s16 + $0xd0] sm:$0xff] %v2766_v45   ;;  %v1995_v1 = vsel %vm1867_vm15, %v1803_v48, %v1931_v41  ;;  %vm1869_vm4 = vcmp.ge.f32.partialorder %v1805_v54, 0.0  ;;  %v1933_v34 = vmul.f32 0.2, %v1805_v54  ;;  %v1806_v15 = vmul.f32 %v4121_v10, %v1742_v59 }
 0x2b2   : >> { %v2771_v20 = vpack.c.bf16 %v1995_v1, %v1994_v63  ;;  %v1996_v7 = vsel %vm1868_vm0, %v1804_v43, %v1932_v38  ;;  %v1807_v31 = vmul.f32 %v4121_v10, %v1743_v16  ;;  %v1744_v11 = vsub.f32 %v1674_v39, %v3381_v47 }
 0x2b3   : >> { %v1997_v40 = vsel %vm1869_vm4, %v1805_v54, %v1933_v34  ;;  %vm1870_vm5 = vcmp.ge.f32.partialorder %v1806_v15, 0.0  ;;  %v1934_v17 = vmul.f32 0.2, %v1806_v15  ;;  %v1745_v36 = vsub.f32 %v1675_v37, %v3381_v47 }
 0x2b4   : >> { %2819 = vst [vmem:[%s4157_s16 + $0xd8] sm:$0xff] %v2771_v20   ;;  %v2776_v18 = vpack.c.bf16 %v1997_v40, %v1996_v7  ;;  %vm1871_vm6 = vcmp.ge.f32.partialorder %v1807_v31, 0.0  ;;  %v1935_v24 = vmul.f32 0.2, %v1807_v31  ;;  %v1808_v6 = vmul.f32 %v4121_v10, %v1744_v11 }
 0x2b5   : >> { %v1998_v44 = vsel %vm1870_vm5, %v1806_v15, %v1934_v17  ;;  %v1809_v49 = vmul.f32 %v4121_v10, %v1745_v36  ;;  %v1746_v26 = vsub.f32 %v1676_v29, %v3381_v47  ;;  %v1747_v22 = vsub.f32 %v1677_v13, %v3381_v47 }
 0x2b6   : >> { %2820 = vst [vmem:[%s4157_s16 + $0xe0] sm:$0xff] %v2776_v18   ;;  %v1999_v46 = vsel %vm1871_vm6, %v1807_v31, %v1935_v24  ;;  %vm1872_vm1 = vcmp.ge.f32.partialorder %v1808_v6, 0.0  ;;  %v1936_v52 = vmul.f32 0.2, %v1808_v6 }
 0x2b7   : >> { %v2781_v33 = vpack.c.bf16 %v1999_v46, %v1998_v44  ;;  %vm1873_vm2 = vcmp.ge.f32.partialorder %v1809_v49, 0.0  ;;  %v1937_v5 = vmul.f32 0.2, %v1809_v49  ;;  %v1810_v30 = vmul.f32 %v4121_v10, %v1746_v26 }
 0x2b8   : >> { %v2000_v23 = vsel %vm1872_vm1, %v1808_v6, %v1936_v52  ;;  %v1811_v32 = vmul.f32 %v4121_v10, %v1747_v22 }
 0x2b9   : >> { %2821 = vst [vmem:[%s4157_s16 + $0xe8] sm:$0xff] %v2781_v33   ;;  %v2001_v35 = vsel %vm1873_vm2, %v1809_v49, %v1937_v5  ;;  %vm1874_vm3 = vcmp.ge.f32.partialorder %v1810_v30, 0.0  ;;  %v1938_v21 = vmul.f32 0.2, %v1810_v30  ;;  %1610 = sbr.rel (!%p1608_p10) target bundleno = 607 (0x25f), region = 95 }
 0x2ba   : >> { %v2786_v60 = vpack.c.bf16 %v2001_v35, %v2000_v23  ;;  %vm1875_vm7 = vcmp.ge.f32.partialorder %v1811_v32, 0.0  ;;  %v1939_v8 = vmul.f32 0.2, %v1811_v32 }
 0x2bb   : >> { %v2002_v0 = vsel %vm1874_vm3, %v1810_v30, %v1938_v21 }
 0x2bc   : >> { %2822 = vst [vmem:[%s4157_s16 + $0xf0] sm:$0xff] %v2786_v60   ;;  %v2003_v27 = vsel %vm1875_vm7, %v1811_v32, %v1939_v8 }
 0x2bd   : >> { %v2791_v9 = vpack.c.bf16 %v2003_v27, %v2002_v0 }
 0x2bf   : >> { %2823 = vst [vmem:[%s4157_s16 + $0xf8] sm:$0xff] %v2791_v9  }
 0x2c0 PF: > { %s12_s13 = sadd.s32 1, %s3075_s13   ;;  %s4458_s9 = smov %s3067_s11 }
 0x2c1   : > { %p9_p11 = scmp.ge.s32.totalorder %s12_s13, 6   ;;  %s4459_s10 = smov %s3071_s12 }
 0x2c2   : > { %s4460_s11 = smov %s4463_s14  ;;  %s4461_s12 = smov %s4467_s15 }
 0x2c3   :  { %11 = sbr.rel (!%p9_p11) target bundleno = 3 (0x3), region = 106 }

// kernel: discriminator_forward.12
= control target key start
LH: loop header
LB: loop body
LE: loop exit
PB: predicated region body
PF: predicated region fallthrough
CT: control target
= control target key end

     0   :  { %s3167_s9 = smov 0   ;;  %s3169_s10 = smov 0   ;;  %s4470_s0 = inlined_call_operand.vmem [shape: bf16[2,1024,72], index: 0, kind: input, shape index: {}]   ;;  %s4471_s1 = inlined_call_operand.vmem [shape: bf16[72,128], index: 1, kind: input, shape index: {}]   ;;  %s4472_s2 = inlined_call_operand.vmem [shape: bf16[2,1024,128], index: 2, kind: output, shape index: {}]  }
   0x1   :  { %s3171_s11 = smov 0   ;;  %s3173_s12 = smov 0  }
   0x2   :  { %s3175_s13 = smov 0  }
   0x3 LB: > { %s21_s14 = sadd.s32 1, %s3129_s11  ;;  %s24_s15 = sadd.s32 1, %s3133_s12  ;;  %s3137_s13 = sphi %s3175_s13, %s12_s13   ;;  %s3133_s12 = sphi %s3173_s12, %s4551_s12   ;;  %s3129_s11 = sphi %s3171_s11, %s4550_s11   ;;  %s3125_s10 = sphi %s3169_s10, %s4549_s10   ;;  %s3121_s9 = sphi %s3167_s9, %s4548_s9  }
   0x4   : > { %p22_p0 = scmp.ge.s32.totalorder %s21_s14, 2  ;;  %p2457_p1 = scmp.ge.s32.totalorder %s3137_s13, 1 }
   0x5   : > { %p131_p2 = scmp.lt.s32.totalorder %s3137_s13, 5 }
   0x6   : > { %s4553_s14 = smov (%p22_p0, %s21_s14), 0  ;;  %s4555_s15 = smov (!%p22_p0, %s24_s15), %s3133_s12 }
   0x7   : > { %p132_p3 = pnand %p2457_p1, %p131_p2  ;;  %p26_p4 = scmp.ge.s32.totalorder %s4555_s15, 2 }
   0x8   : > { %s2458_s16 = sshll.u32 (!%p132_p3), %s3121_s9, 6  ;;  %p158_p5 = scmp.lt.s32.totalorder (!%p132_p3), %s3125_s10, 1 }
   0x9   : > { %s4557_s15 = smov (%p26_p4, %s4555_s15), 0  ;;  %135 = sbr.rel (%p132_p3) target bundleno = 720 (0x2d0), region = 28 }
   0xa   : > { %p160_p6 = scmp.lt.s32.totalorder (!%p132_p3), %s2458_s16, 127  ;;  %p2463_p7 = scmp.ne.s32.totalorder (!%p132_p3), %s3121_s9, 0 }
  0x10   : > { %s4559_s10 = smov (!%p158_p5, %s3125_s10), 1  ;;  %s4561_s16 = smov (!%p160_p6, %s2458_s16), 127 }
  0x11   : > { %s2459_s17 = sshll.u32 %s4559_s10, 7  ;;  %s2604_s18 = sshll.u32 %s4559_s10, 9  ;;  %v3151_v0 = vmov (!%p2463_p7), 0.0  }
  0x12   : > { %s163_s19 = sadd.s32 %s2459_s17, %s4561_s16  ;;  %s3203_s22 = scalar_lea.vmem %s4472_s2, %s2604_s18  ;;  %177 = vst [vmem:[#allocation3] sm:$0x1] (!%p2463_p7), %v3151_v0 }
  0x13   : > { %s2460_s23 = sshll.u32 %s163_s19, 2  ;;  %176 = sbr.rel (%p2463_p7) target bundleno = 26 (0x1a), region = 32 }
  0x14   : > { %s3208_s26 = scalar_lea.vmem %s4470_s0, %s2460_s23 }
  0x1a PF: > { %v3048_v1 = vld [vmem:[%s4471_s1] sm:$0xff]   ;;  %v3049_v2 = vld [vmem:[%s4471_s1 + $0x8] sm:$0xff]   ;;  %v3050_v3 = vld [vmem:[%s4471_s1 + $0x10] sm:$0xff]   ;;  %vm438_vm0 = vcmask 588800   ;;  %vm535_vm1 = vcmask 1043456   ;;  %s2533_s10 = sshll.u32 %s3121_s9, 9 }
  0x1b   : > { %2897 = vmatprep.subr.bf16.mxu0 %v3048_v1  ;;  %2971 = vmatprep.subr.bf16.mxu1 %v3048_v1  ;;  %v3053_v4 = vld [vmem:[%s3208_s26] sm:$0xff]   ;;  %v3051_v5 = vld [vmem:[%s4471_s1 + $0x18] sm:$0xff]   ;;  %v3054_v8 = vld [vmem:[%s3208_s26 + $0x8] sm:$0xff]   ;;  %s3291_s16 = scalar_lea.vmem [#allocation2], %s2533_s10  ;;  %p2534_p8 = scmp.ne.s32.totalorder %s3121_s9, 1 }
  0x1c   : > { %2898 = vmatpush3.bf16.msra.mxu0 %v3048_v1  ;;  %2976 = vmatpush3.bf16.msra.mxu1 %v3048_v1  ;;  %v3052_v6 = vld [vmem:[%s4471_s1 + $0x20] ss:$0 sps:$4 sm:$0xff]   ;;  %v3055_v9 = vld [vmem:[%s3208_s26 + $0x10] sm:$0xff]   ;;  %v3070_v11 = vld [vmem:[%s3208_s26 + $0x88] sm:$0xff]  }
  0x1d   : > { %2899 = vmatprep.subr.bf16.mxu0 %v3049_v2  ;;  %2972 = vmatprep.subr.bf16.mxu1 %v3049_v2  ;;  %v537_v7 = vsel %vm535_vm1, %v3052_v6, 0  ;;  %v3069_v10 = vld [vmem:[%s3208_s26 + $0x80] sm:$0xff]   ;;  %v3071_v12 = vld [vmem:[%s3208_s26 + $0x90] sm:$0xff]   ;;  %v3056_v13 = vld [vmem:[%s3208_s26 + $0x18] sm:$0xff]  }
  0x1e   : > { %2907 = vmatprep.mubr.msk.bf16.mxu0 %vm438_vm0, %v3053_v4  ;;  %2939 = vmatprep.mubr.msk.bf16.mxu1 %vm438_vm0, %v3069_v10  ;;  %v3057_v14 = vld [vmem:[%s3208_s26 + $0x20] sm:$0xff]   ;;  %v3072_v15 = vld [vmem:[%s3208_s26 + $0x98] sm:$0xff]   ;;  %v3058_v17 = vld [vmem:[%s3208_s26 + $0x28] sm:$0xff]  }
  0x1f   : > { %v3073_v16 = vld [vmem:[%s3208_s26 + $0xa0] sm:$0xff]   ;;  %v3059_v18 = vld [vmem:[%s3208_s26 + $0x30] sm:$0xff]   ;;  %v3074_v19 = vld [vmem:[%s3208_s26 + $0xa8] sm:$0xff]  }
  0x20   : > { %2900 = vmatpush3.bf16.msra.mxu0 %v3049_v2  ;;  %2977 = vmatpush3.bf16.msra.mxu1 %v3049_v2  ;;  %v3075_v20 = vld [vmem:[%s3208_s26 + $0xb0] sm:$0xff]   ;;  %v3060_v21 = vld [vmem:[%s3208_s26 + $0x38] sm:$0xff]   ;;  %v3061_v22 = vld [vmem:[%s3208_s26 + $0x40] sm:$0xff]  }
  0x21   : > { %2901 = vmatprep.subr.bf16.mxu0 %v3050_v3  ;;  %2973 = vmatprep.subr.bf16.mxu1 %v3050_v3  ;;  %v3076_v23 = vld [vmem:[%s3208_s26 + $0xb8] sm:$0xff]   ;;  %v3077_v24 = vld [vmem:[%s3208_s26 + $0xc0] sm:$0xff]   ;;  %v3062_v25 = vld [vmem:[%s3208_s26 + $0x48] sm:$0xff]  }
  0x22   : > { %v3063_v26 = vld [vmem:[%s3208_s26 + $0x50] sm:$0xff]   ;;  %v3078_v27 = vld [vmem:[%s3208_s26 + $0xc8] sm:$0xff]   ;;  %v3064_v29 = vld [vmem:[%s3208_s26 + $0x58] sm:$0xff]  }
  0x23   : > { %v3079_v28 = vld [vmem:[%s3208_s26 + $0xd0] sm:$0xff]   ;;  %v3065_v30 = vld [vmem:[%s3208_s26 + $0x60] sm:$0xff]   ;;  %v3080_v31 = vld [vmem:[%s3208_s26 + $0xd8] sm:$0xff]  }
  0x24   : > { %2902 = vmatpush3.bf16.msra.mxu0 %v3050_v3  ;;  %2978 = vmatpush3.bf16.msra.mxu1 %v3050_v3  ;;  %v3081_v32 = vld [vmem:[%s3208_s26 + $0xe0] sm:$0xff]   ;;  %v3066_v33 = vld [vmem:[%s3208_s26 + $0x68] sm:$0xff]   ;;  %v3067_v34 = vld [vmem:[%s3208_s26 + $0x70] sm:$0xff]  }
  0x25   : > { %2903 = vmatprep.subr.bf16.mxu0 %v3051_v5  ;;  %2974 = vmatprep.subr.bf16.mxu1 %v3051_v5  ;;  %v3082_v35 = vld [vmem:[%s3208_s26 + $0xe8] sm:$0xff]   ;;  %v3083_v36 = vld [vmem:[%s3208_s26 + $0xf0] sm:$0xff]   ;;  %v3068_v37 = vld [vmem:[%s3208_s26 + $0x78] sm:$0xff]  }
  0x26   : > { %v3084_v38 = vld [vmem:[%s3208_s26 + $0xf8] sm:$0xff]  }
  0x28   : > { %2904 = vmatpush3.bf16.msra.mxu0 %v3051_v5  ;;  %2979 = vmatpush3.bf16.msra.mxu1 %v3051_v5 }
  0x29   : > { %2981 = vmatprep.subr.msk.bf16.mxu0 %vm535_vm1, %v3052_v6  ;;  %2982 = vmatprep.subr.msk.bf16.mxu1 %vm535_vm1, %v3052_v6 }
  0x2c   : > { %2906 = vmatpush3.bf16.msra.mxu0 %v537_v7  ;;  %2980 = vmatpush3.bf16.msra.mxu1 %v537_v7 }
  0x2f   : > { %2908 = vmatmul.mubr.msk.bf16.vlgmr.msra.gmra.mrb[0].mxu0 %vm438_vm0, %v3054_v8  ;;  %2940 = vmatmul.mubr.msk.bf16.vlgmr.msra.gmra.mrb[0].mxu1 %vm438_vm0, %v3070_v11 }
  0x30   : > { %2911 = vmatprep.mubr.msk.bf16.mxu0 %vm438_vm0, %v3055_v9  ;;  %2943 = vmatprep.mubr.msk.bf16.mxu1 %vm438_vm0, %v3071_v12 }
  0x37   : > { %2912 = vmatmul.mubr.msk.bf16.gmra.mrb[4].mxu0 %vm438_vm0, %v3056_v13  ;;  %2944 = vmatmul.mubr.msk.bf16.gmra.mrb[4].mxu1 %vm438_vm0, %v3072_v15 }
  0x38   : > { %2915 = vmatprep.mubr.msk.bf16.mxu0 %vm438_vm0, %v3057_v14  ;;  %2947 = vmatprep.mubr.msk.bf16.mxu1 %vm438_vm0, %v3073_v16 }
  0x3f   : > { %2916 = vmatmul.mubr.msk.bf16.gmra.mrb[8].mxu0 %vm438_vm0, %v3058_v17  ;;  %2948 = vmatmul.mubr.msk.bf16.gmra.mrb[8].mxu1 %vm438_vm0, %v3074_v19 }
  0x40   : > { %2919 = vmatprep.mubr.msk.bf16.mxu0 %vm438_vm0, %v3059_v18  ;;  %2951 = vmatprep.mubr.msk.bf16.mxu1 %vm438_vm0, %v3075_v20 }
  0x47   : > { %2920 = vmatmul.mubr.msk.bf16.gmra.mrb[12].mxu0 %vm438_vm0, %v3060_v21  ;;  %2952 = vmatmul.mubr.msk.bf16.gmra.mrb[12].mxu1 %vm438_vm0, %v3076_v23 }
  0x48   : > { %2923 = vmatprep.mubr.msk.bf16.mxu0 %vm438_vm0, %v3061_v22  ;;  %2955 = vmatprep.mubr.msk.bf16.mxu1 %vm438_vm0, %v3077_v24 }
  0x4f   : > { %2924 = vmatmul.mubr.msk.bf16.gmra.mrb[16].mxu0 %vm438_vm0, %v3062_v25  ;;  %2956 = vmatmul.mubr.msk.bf16.gmra.mrb[16].mxu1 %vm438_vm0, %v3078_v27 }
  0x50   : > { %2927 = vmatprep.mubr.msk.bf16.mxu0 %vm438_vm0, %v3063_v26  ;;  %2959 = vmatprep.mubr.msk.bf16.mxu1 %vm438_vm0, %v3079_v28 }
  0x57   : > { %2928 = vmatmul.mubr.msk.bf16.gmra.mrb[20].mxu0 %vm438_vm0, %v3064_v29  ;;  %2960 = vmatmul.mubr.msk.bf16.gmra.mrb[20].mxu1 %vm438_vm0, %v3080_v31 }
  0x58   : > { %2931 = vmatprep.mubr.msk.bf16.mxu0 %vm438_vm0, %v3065_v30  ;;  %2963 = vmatprep.mubr.msk.bf16.mxu1 %vm438_vm0, %v3081_v32 }
  0x5f   : > { %2932 = vmatmul.mubr.msk.bf16.gmra.mrb[24].mxu0 %vm438_vm0, %v3066_v33  ;;  %2964 = vmatmul.mubr.msk.bf16.gmra.mrb[24].mxu1 %vm438_vm0, %v3082_v35 }
  0x60   : > { %2935 = vmatprep.mubr.msk.bf16.mxu0 %vm438_vm0, %v3067_v34  ;;  %2967 = vmatprep.mubr.msk.bf16.mxu1 %vm438_vm0, %v3083_v36 }
  0x67   : > { %2936 = vmatmul.mubr.msk.bf16.gmra.mrb[28].mxu0 %vm438_vm0, %v3068_v37  ;;  %2968 = vmatmul.mubr.msk.bf16.gmra.mrb[28].mxu1 %vm438_vm0, %v3084_v38 }
 0x102   : > { %v2909_v39 = vpop.f32.mrb[0].mxu0  ;;  %v3295_v42 = vpop.f32.mrb[0].mxu1 }
 0x103   : > { %832 = vst [vmem:[%s3291_s16 + $0x10] sm:$0xff] %v2909_v39  ;;  %v573_v40 = vpop.f32.mrb[1].mxu0  ;;  %864 = vst [vmem:[%s3291_s16 + $0x110] sm:$0xff] %v3295_v42  ;;  %v3300_v44 = vpop.f32.mrb[1].mxu1 }
 0x104   : > { %830 = vst [vmem:[%s3291_s16] sm:$0xff] %v573_v40  ;;  %v2910_v41 = vpop.f32.mrb[2].mxu0  ;;  %862 = vst [vmem:[%s3291_s16 + $0x100] sm:$0xff] %v3300_v44  ;;  %v3305_v46 = vpop.f32.mrb[2].mxu1 }
 0x105   : > { %833 = vst [vmem:[%s3291_s16 + $0x18] sm:$0xff] %v2910_v41  ;;  %v576_v43 = vpop.f32.mrb[3].mxu0  ;;  %865 = vst [vmem:[%s3291_s16 + $0x118] sm:$0xff] %v3305_v46  ;;  %v3309_v47 = vpop.f32.mrb[3].mxu1 }
 0x106   : > { %831 = vst [vmem:[%s3291_s16 + $0x8] sm:$0xff] %v576_v43  ;;  %v895_v45 = vadd.f32 %v576_v43, %v573_v40  ;;  %863 = vst [vmem:[%s3291_s16 + $0x108] sm:$0xff] %v3309_v47 }
 0x108   : > { %v896_v48 = vadd.f32 %v2909_v39, %v895_v45 }
 0x10a   : > { %v2913_v49 = vpop.f32.mrb[4].mxu0  ;;  %v897_v50 = vadd.f32 %v2910_v41, %v896_v48  ;;  %v3315_v54 = vpop.f32.mrb[4].mxu1 }
 0x10b   : > { %836 = vst [vmem:[%s3291_s16 + $0x30] sm:$0xff] %v2913_v49  ;;  %v589_v51 = vpop.f32.mrb[5].mxu0  ;;  %868 = vst [vmem:[%s3291_s16 + $0x130] sm:$0xff] %v3315_v54  ;;  %v3320_v56 = vpop.f32.mrb[5].mxu1 }
 0x10c   : > { %834 = vst [vmem:[%s3291_s16 + $0x20] sm:$0xff] %v589_v51  ;;  %v898_v52 = vadd.f32 %v897_v50, %v589_v51  ;;  %v2914_v53 = vpop.f32.mrb[6].mxu0  ;;  %866 = vst [vmem:[%s3291_s16 + $0x120] sm:$0xff] %v3320_v56  ;;  %v3325_v58 = vpop.f32.mrb[6].mxu1 }
 0x10d   : > { %837 = vst [vmem:[%s3291_s16 + $0x38] sm:$0xff] %v2914_v53  ;;  %v592_v55 = vpop.f32.mrb[7].mxu0  ;;  %869 = vst [vmem:[%s3291_s16 + $0x138] sm:$0xff] %v3325_v58  ;;  %v3329_v59 = vpop.f32.mrb[7].mxu1 }
 0x10e   : > { %835 = vst [vmem:[%s3291_s16 + $0x28] sm:$0xff] %v592_v55  ;;  %v899_v57 = vadd.f32 %v898_v52, %v592_v55  ;;  %867 = vst [vmem:[%s3291_s16 + $0x128] sm:$0xff] %v3329_v59 }
 0x110   : > { %v900_v60 = vadd.f32 %v2913_v49, %v899_v57 }
 0x112   : > { %v2917_v61 = vpop.f32.mrb[8].mxu0  ;;  %v901_v62 = vadd.f32 %v2914_v53, %v900_v60  ;;  %v3335_v2 = vpop.f32.mrb[8].mxu1 }
 0x113   : > { %840 = vst [vmem:[%s3291_s16 + $0x50] sm:$0xff] %v2917_v61  ;;  %v605_v63 = vpop.f32.mrb[9].mxu0  ;;  %872 = vst [vmem:[%s3291_s16 + $0x150] sm:$0xff] %v3335_v2  ;;  %v3340_v4 = vpop.f32.mrb[9].mxu1 }
 0x114   : > { %838 = vst [vmem:[%s3291_s16 + $0x40] sm:$0xff] %v605_v63  ;;  %v902_v0 = vadd.f32 %v901_v62, %v605_v63  ;;  %v2918_v1 = vpop.f32.mrb[10].mxu0  ;;  %870 = vst [vmem:[%s3291_s16 + $0x140] sm:$0xff] %v3340_v4  ;;  %v3345_v6 = vpop.f32.mrb[10].mxu1 }
 0x115   : > { %841 = vst [vmem:[%s3291_s16 + $0x58] sm:$0xff] %v2918_v1  ;;  %v608_v3 = vpop.f32.mrb[11].mxu0  ;;  %873 = vst [vmem:[%s3291_s16 + $0x158] sm:$0xff] %v3345_v6  ;;  %v3349_v7 = vpop.f32.mrb[11].mxu1 }
 0x116   : > { %839 = vst [vmem:[%s3291_s16 + $0x48] sm:$0xff] %v608_v3  ;;  %v903_v5 = vadd.f32 %v902_v0, %v608_v3  ;;  %871 = vst [vmem:[%s3291_s16 + $0x148] sm:$0xff] %v3349_v7 }
 0x118   : > { %v904_v8 = vadd.f32 %v2917_v61, %v903_v5 }
 0x11a   : > { %v2921_v9 = vpop.f32.mrb[12].mxu0  ;;  %v905_v10 = vadd.f32 %v2918_v1, %v904_v8  ;;  %v3355_v14 = vpop.f32.mrb[12].mxu1 }
 0x11b   : > { %844 = vst [vmem:[%s3291_s16 + $0x70] sm:$0xff] %v2921_v9  ;;  %v621_v11 = vpop.f32.mrb[13].mxu0  ;;  %876 = vst [vmem:[%s3291_s16 + $0x170] sm:$0xff] %v3355_v14  ;;  %v3360_v16 = vpop.f32.mrb[13].mxu1 }
 0x11c   : > { %842 = vst [vmem:[%s3291_s16 + $0x60] sm:$0xff] %v621_v11  ;;  %v906_v12 = vadd.f32 %v905_v10, %v621_v11  ;;  %v2922_v13 = vpop.f32.mrb[14].mxu0  ;;  %874 = vst [vmem:[%s3291_s16 + $0x160] sm:$0xff] %v3360_v16  ;;  %v3365_v18 = vpop.f32.mrb[14].mxu1 }
 0x11d   : > { %845 = vst [vmem:[%s3291_s16 + $0x78] sm:$0xff] %v2922_v13  ;;  %v624_v15 = vpop.f32.mrb[15].mxu0  ;;  %877 = vst [vmem:[%s3291_s16 + $0x178] sm:$0xff] %v3365_v18  ;;  %v3369_v19 = vpop.f32.mrb[15].mxu1 }
 0x11e   : > { %843 = vst [vmem:[%s3291_s16 + $0x68] sm:$0xff] %v624_v15  ;;  %v907_v17 = vadd.f32 %v906_v12, %v624_v15  ;;  %875 = vst [vmem:[%s3291_s16 + $0x168] sm:$0xff] %v3369_v19 }
 0x120   : > { %v908_v20 = vadd.f32 %v2921_v9, %v907_v17 }
 0x122   : > { %v2925_v21 = vpop.f32.mrb[16].mxu0  ;;  %v909_v22 = vadd.f32 %v2922_v13, %v908_v20  ;;  %v3375_v26 = vpop.f32.mrb[16].mxu1 }
 0x123   : > { %848 = vst [vmem:[%s3291_s16 + $0x90] sm:$0xff] %v2925_v21  ;;  %v637_v23 = vpop.f32.mrb[17].mxu0  ;;  %880 = vst [vmem:[%s3291_s16 + $0x190] sm:$0xff] %v3375_v26  ;;  %v3380_v28 = vpop.f32.mrb[17].mxu1 }
 0x124   : > { %846 = vst [vmem:[%s3291_s16 + $0x80] sm:$0xff] %v637_v23  ;;  %v910_v24 = vadd.f32 %v909_v22, %v637_v23  ;;  %v2926_v25 = vpop.f32.mrb[18].mxu0  ;;  %878 = vst [vmem:[%s3291_s16 + $0x180] sm:$0xff] %v3380_v28  ;;  %v3385_v30 = vpop.f32.mrb[18].mxu1 }
 0x125   : > { %849 = vst [vmem:[%s3291_s16 + $0x98] sm:$0xff] %v2926_v25  ;;  %v640_v27 = vpop.f32.mrb[19].mxu0  ;;  %881 = vst [vmem:[%s3291_s16 + $0x198] sm:$0xff] %v3385_v30  ;;  %v3389_v31 = vpop.f32.mrb[19].mxu1 }
 0x126   : > { %847 = vst [vmem:[%s3291_s16 + $0x88] sm:$0xff] %v640_v27  ;;  %v911_v29 = vadd.f32 %v910_v24, %v640_v27  ;;  %879 = vst [vmem:[%s3291_s16 + $0x188] sm:$0xff] %v3389_v31 }
 0x128   : > { %v912_v32 = vadd.f32 %v2925_v21, %v911_v29 }
 0x12a   : > { %v2929_v33 = vpop.f32.mrb[20].mxu0  ;;  %v913_v34 = vadd.f32 %v2926_v25, %v912_v32  ;;  %v3395_v38 = vpop.f32.mrb[20].mxu1 }
 0x12b   : > { %852 = vst [vmem:[%s3291_s16 + $0xb0] sm:$0xff] %v2929_v33  ;;  %v653_v35 = vpop.f32.mrb[21].mxu0  ;;  %884 = vst [vmem:[%s3291_s16 + $0x1b0] sm:$0xff] %v3395_v38  ;;  %v3400_v40 = vpop.f32.mrb[21].mxu1 }
 0x12c   : > { %850 = vst [vmem:[%s3291_s16 + $0xa0] sm:$0xff] %v653_v35  ;;  %v914_v36 = vadd.f32 %v913_v34, %v653_v35  ;;  %v2930_v37 = vpop.f32.mrb[22].mxu0  ;;  %882 = vst [vmem:[%s3291_s16 + $0x1a0] sm:$0xff] %v3400_v40  ;;  %v3405_v43 = vpop.f32.mrb[22].mxu1 }
 0x12d   : > { %853 = vst [vmem:[%s3291_s16 + $0xb8] sm:$0xff] %v2930_v37  ;;  %v656_v39 = vpop.f32.mrb[23].mxu0  ;;  %885 = vst [vmem:[%s3291_s16 + $0x1b8] sm:$0xff] %v3405_v43  ;;  %v3409_v45 = vpop.f32.mrb[23].mxu1 }
 0x12e   : > { %851 = vst [vmem:[%s3291_s16 + $0xa8] sm:$0xff] %v656_v39  ;;  %v915_v41 = vadd.f32 %v914_v36, %v656_v39  ;;  %883 = vst [vmem:[%s3291_s16 + $0x1a8] sm:$0xff] %v3409_v45 }
 0x130   : > { %v916_v48 = vadd.f32 %v2929_v33, %v915_v41 }
 0x132   : > { %v2933_v49 = vpop.f32.mrb[24].mxu0  ;;  %v917_v50 = vadd.f32 %v2930_v37, %v916_v48  ;;  %v2965_v55 = vpop.f32.mrb[24].mxu1 }
 0x133   : > { %856 = vst [vmem:[%s3291_s16 + $0xd0] sm:$0xff] %v2933_v49  ;;  %v669_v51 = vpop.f32.mrb[25].mxu0  ;;  %888 = vst [vmem:[%s3291_s16 + $0x1d0] sm:$0xff] %v2965_v55  ;;  %v797_v60 = vpop.f32.mrb[25].mxu1 }
 0x134   : > { %854 = vst [vmem:[%s3291_s16 + $0xc0] sm:$0xff] %v669_v51  ;;  %v918_v52 = vadd.f32 %v917_v50, %v669_v51  ;;  %v2934_v53 = vpop.f32.mrb[26].mxu0  ;;  %886 = vst [vmem:[%s3291_s16 + $0x1c0] sm:$0xff] %v797_v60  ;;  %v2966_v62 = vpop.f32.mrb[26].mxu1 }
 0x135   : > { %857 = vst [vmem:[%s3291_s16 + $0xd8] sm:$0xff] %v2934_v53  ;;  %v672_v57 = vpop.f32.mrb[27].mxu0  ;;  %889 = vst [vmem:[%s3291_s16 + $0x1d8] sm:$0xff] %v2966_v62  ;;  %v800_v63 = vpop.f32.mrb[27].mxu1 }
 0x136   : > { %855 = vst [vmem:[%s3291_s16 + $0xc8] sm:$0xff] %v672_v57  ;;  %v919_v61 = vadd.f32 %v918_v52, %v672_v57  ;;  %887 = vst [vmem:[%s3291_s16 + $0x1c8] sm:$0xff] %v800_v63 }
 0x138   : > { %v920_v0 = vadd.f32 %v2933_v49, %v919_v61 }
 0x13a   : > { %v2937_v1 = vpop.f32.mrb[28].mxu0  ;;  %v921_v3 = vadd.f32 %v2934_v53, %v920_v0  ;;  %v2969_v10 = vpop.f32.mrb[28].mxu1 }
 0x13b   : > { %860 = vst [vmem:[%s3291_s16 + $0xf0] sm:$0xff] %v2937_v1  ;;  %v685_v5 = vpop.f32.mrb[29].mxu0  ;;  %892 = vst [vmem:[%s3291_s16 + $0x1f0] sm:$0xff] %v2969_v10  ;;  %v813_v12 = vpop.f32.mrb[29].mxu1 }
 0x13c   : > { %858 = vst [vmem:[%s3291_s16 + $0xe0] sm:$0xff] %v685_v5  ;;  %v922_v8 = vadd.f32 %v921_v3, %v685_v5  ;;  %v2938_v9 = vpop.f32.mrb[30].mxu0  ;;  %890 = vst [vmem:[%s3291_s16 + $0x1e0] sm:$0xff] %v813_v12  ;;  %v2970_v15 = vpop.f32.mrb[30].mxu1 }
 0x13d   : > { %861 = vst [vmem:[%s3291_s16 + $0xf8] sm:$0xff] %v2938_v9  ;;  %v688_v11 = vpop.f32.mrb[31].mxu0  ;;  %893 = vst [vmem:[%s3291_s16 + $0x1f8] sm:$0xff] %v2970_v15  ;;  %v816_v17 = vpop.f32.mrb[31].mxu1 }
 0x13e   : > { %859 = vst [vmem:[%s3291_s16 + $0xe8] sm:$0xff] %v688_v11  ;;  %v923_v13 = vadd.f32 %v922_v8, %v688_v11  ;;  %891 = vst [vmem:[%s3291_s16 + $0x1e8] sm:$0xff] %v816_v17 }
 0x140   : > { %v924_v20 = vadd.f32 %v2937_v1, %v923_v13 }
 0x142   : > { %v925_v21 = vadd.f32 %v2938_v9, %v924_v20 }
 0x144   : > { %v926_v22 = vadd.f32 %v925_v21, %v3300_v44 }
 0x146   : > { %v927_v23 = vadd.f32 %v926_v22, %v3309_v47 }
 0x148   : > { %v928_v24 = vadd.f32 %v3295_v42, %v927_v23 }
 0x14a   : > { %v929_v25 = vadd.f32 %v3305_v46, %v928_v24 }
 0x14c   : > { %v930_v27 = vadd.f32 %v929_v25, %v3320_v56 }
 0x14e   : > { %v931_v29 = vadd.f32 %v930_v27, %v3329_v59 }
 0x150   : > { %v932_v32 = vadd.f32 %v3315_v54, %v931_v29 }
 0x152   : > { %v933_v33 = vadd.f32 %v3325_v58, %v932_v32 }
 0x154   : > { %v934_v34 = vadd.f32 %v933_v33, %v3340_v4 }
 0x156   : > { %v935_v35 = vadd.f32 %v934_v34, %v3349_v7 }
 0x158   : > { %v936_v44 = vadd.f32 %v3335_v2, %v935_v35 }
 0x15a   : > { %v937_v47 = vadd.f32 %v3345_v6, %v936_v44 }
 0x15c   : > { %v938_v42 = vadd.f32 %v937_v47, %v3360_v16 }
 0x15e   : > { %v939_v46 = vadd.f32 %v938_v42, %v3369_v19 }
 0x160   : > { %v940_v56 = vadd.f32 %v3355_v14, %v939_v46 }
 0x162   : > { %v941_v59 = vadd.f32 %v3365_v18, %v940_v56 }
 0x164   : > { %v942_v54 = vadd.f32 %v941_v59, %v3380_v28 }
 0x166   : > { %v943_v58 = vadd.f32 %v942_v54, %v3389_v31 }
 0x168   : > { %v944_v4 = vadd.f32 %v3375_v26, %v943_v58 }
 0x16a   : > { %v945_v7 = vadd.f32 %v3385_v30, %v944_v4 }
 0x16c   : > { %v946_v2 = vadd.f32 %v945_v7, %v3400_v40  ;;  %v894_v40 = vld [vmem:[#allocation3] sm:$0x1] }
 0x16e   : > { %v947_v6 = vadd.f32 %v946_v2, %v3409_v45 }
 0x170   : > { %v948_v16 = vadd.f32 %v3395_v38, %v947_v6 }
 0x172   : > { %v949_v19 = vadd.f32 %v3405_v43, %v948_v16 }
 0x174   : > { %v950_v36 = vadd.f32 %v949_v19, %v797_v60 }
 0x176   : > { %v951_v14 = vadd.f32 %v950_v36, %v800_v63 }
 0x178   : > { %v952_v37 = vadd.f32 %v2965_v55, %v951_v14 }
 0x17a   : > { %v953_v18 = vadd.f32 %v2966_v62, %v952_v37 }
 0x17c   : > { %v954_v39 = vadd.f32 %v953_v18, %v813_v12 }
 0x17e   : > { %v955_v28 = vadd.f32 %v954_v39, %v816_v17 }
 0x180   : > { %v956_v41 = vadd.f32 %v2969_v10, %v955_v28 }
 0x182   : > { %v957_v31 = vadd.f32 %v2970_v15, %v956_v41 }
 0x184   : > { %v958_v48 = vrot.slane %v957_v31, 4 }
 0x186   : > { %v959_v26 = vadd.f32 %v958_v48, %v957_v31 }
 0x188   : > { %v960_v49 = vrot.slane %v959_v26, 2 }
 0x18a   : > { %v961_v30 = vadd.f32 %v960_v49, %v959_v26 }
 0x18c   : > { %v962_v50 = vrot.slane %v961_v30, 1  ;;  %969 = sbr.rel (%p2534_p8) target bundleno = 720 (0x2d0), region = 36 }
 0x18e   : > { %v963_v51 = vadd.f32 %v962_v50, %v961_v30 }
 0x190   : > { %v964_v45 = vadd.f32 %v963_v51, %v894_v40 }
 0x192   : > { %965 = vst [vmem:[#allocation3] sm:$0x1] %v964_v45 }
 0x193   : > { %v3456_v52 = vmov 0.0   ;;  %s3458_s17 = smov 0  }
 0x199   : > { %v970_v38 = vld [vmem:[#allocation3] sm:$0x1] }
 0x19a   : > { %v3454_v43 = vmul.f32 0.0009765625, %v970_v38 }
 0x19c   : > { %4481 = vst [vmem:[#allocation4_spill] sm:$0xff] %v3454_v43 }
 0x19d LB: >> { %4482 = vst [vmem:[#allocation5_spill] sm:$0xff] %v3141_v52  ;;  %v1046_v53 = vlaneseq  ;;  %s2535_s9 = sshll.u32 %s3145_s17, 9  ;;  %s977_s17 = sadd.s32 1, %s3145_s17   ;;  %s3145_s17 = sphi %s3458_s17, %s977_s17   ;;  %v3141_v52 = vphi %v3456_v52, %v4547_v52  }
 0x19e   : >> { %s3475_s18 = scalar_lea.vmem [#allocation2], %s2535_s9  ;;  %v3634_v48 = vstv %s2535_s9  ;;  %p974_p9 = scmp.ge.s32.totalorder %s977_s17, 2  }
 0x19f   : >> { %v3466_v55 = vshrl.u32 %v1046_v53, 7  ;;  %v3478_v61 = vld [vmem:[%s3475_s18 + $0x108] sm:$0xff]  ;;  %v3481_v62 = vld [vmem:[%s3475_s18 + $0x110] sm:$0xff]  ;;  %v3484_v63 = vld [vmem:[%s3475_s18 + $0x118] sm:$0xff]  ;;  %s4213_s19 = smov (%p974_p9), 0  }
 0x1a0   : >> { %v3487_v0 = vld [vmem:[%s3475_s18 + $0x120] sm:$0xff]  ;;  %v3490_v1 = vld [vmem:[%s3475_s18 + $0x128] sm:$0xff]  ;;  %v3493_v3 = vld [vmem:[%s3475_s18 + $0x130] sm:$0xff] }
 0x1a1   : >> { %v1048_v57 = vsub.s32 0, %v3466_v55  ;;  %v3502_v10 = vld [vmem:[%s3475_s18 + $0x138] sm:$0xff]  ;;  %v3505_v11 = vld [vmem:[%s3475_s18 + $0x140] sm:$0xff]  ;;  %v3508_v12 = vld [vmem:[%s3475_s18 + $0x148] sm:$0xff]  ;;  %v1149_v51 = vadd.s32 264, %v3466_v55  ;;  %v1150_v45 = vadd.s32 272, %v3466_v55 }
 0x1a2   : >> { %v3517_v20 = vld [vmem:[%s3475_s18 + $0x150] sm:$0xff]  ;;  %v3520_v21 = vld [vmem:[%s3475_s18 + $0x158] sm:$0xff]  ;;  %v3523_v22 = vld [vmem:[%s3475_s18 + $0x160] sm:$0xff]  ;;  %v1151_v31 = vadd.s32 280, %v3466_v55  ;;  %v1152_v53 = vadd.s32 288, %v3466_v55  ;;  %v1153_v18 = vadd.s32 296, %v3466_v55 }
 0x1a3   : >> { %v4483_v43 = vld [vmem:[#allocation4_spill] sm:$0xff]  ;;  %v3535_v29 = vld [vmem:[%s3475_s18 + $0x170] sm:$0xff]  ;;  %v3538_v32 = vld [vmem:[%s3475_s18 + $0x178] sm:$0xff]  ;;  %v1155_v26 = vadd.s32 312, %v3466_v55  ;;  %v1156_v37 = vadd.s32 320, %v3466_v55  ;;  %v1157_v40 = vadd.s32 328, %v3466_v55 }
 0x1a4   : >> { %v3471_v60 = vrot.slane %v4483_v43, %v1048_v57  ;;  %v3532_v27 = vld [vmem:[%s3475_s18 + $0x168] sm:$0xff]  ;;  %v3547_v44 = vld [vmem:[%s3475_s18 + $0x180] sm:$0xff]  ;;  %v3553_v42 = vld [vmem:[%s3475_s18 + $0x190] sm:$0xff]  ;;  %v1154_v57 = vadd.s32 304, %v3466_v55  ;;  %v1158_v14 = vadd.s32 336, %v3466_v55  ;;  %v1159_v6 = vadd.s32 344, %v3466_v55 }
 0x1a5   : >> { %v3550_v47 = vld [vmem:[%s3475_s18 + $0x188] sm:$0xff]  ;;  %v3562_v54 = vld [vmem:[%s3475_s18 + $0x198] sm:$0xff]  ;;  %v3565_v58 = vld [vmem:[%s3475_s18 + $0x1a0] sm:$0xff]  ;;  %v1160_v2 = vadd.s32 352, %v3466_v55  ;;  %v1161_v7 = vadd.s32 360, %v3466_v55  ;;  %v1162_v59 = vadd.s32 368, %v3466_v55 }
 0x1a6   : >> { %v3568_v4 = vld [vmem:[%s3475_s18 + $0x1a8] sm:$0xff]  ;;  %v3577_v16 = vld [vmem:[%s3475_s18 + $0x1b0] sm:$0xff]  ;;  %v3580_v19 = vld [vmem:[%s3475_s18 + $0x1b8] sm:$0xff]  ;;  %v1163_v56 = vadd.s32 376, %v3466_v55  ;;  %v1164_v46 = vadd.s32 384, %v3466_v55  ;;  %v1165_v35 = vadd.s32 392, %v3466_v55 }
 0x1a7   : >> { %v3583_v36 = vld [vmem:[%s3475_s18 + $0x1c0] sm:$0xff]  ;;  %v3592_v39 = vld [vmem:[%s3475_s18 + $0x1c8] sm:$0xff]  ;;  %v3595_v28 = vld [vmem:[%s3475_s18 + $0x1d0] sm:$0xff]  ;;  %v1166_v34 = vadd.s32 400, %v3466_v55  ;;  %v1167_v33 = vadd.s32 408, %v3466_v55  ;;  %v1168_v25 = vadd.s32 416, %v3466_v55 }
 0x1a8   : >> { %4484 = vst [vmem:[#allocation6_spill] sm:$0xff] %v3583_v36  ;;  %4485 = vst [vmem:[#allocation7_spill] sm:$0xff] %v3592_v39  ;;  %v3598_v41 = vld [vmem:[%s3475_s18 + $0x1d8] sm:$0xff]  ;;  %v3607_v49 = vld [vmem:[%s3475_s18 + $0x1e0] sm:$0xff]  ;;  %v1169_v24 = vadd.s32 424, %v3466_v55  ;;  %v1170_v23 = vadd.s32 432, %v3466_v55  ;;  %v3683_v39 = vadd.s32 %v3634_v48, %v1154_v57  ;;  %v3686_v36 = vadd.s32 %v3634_v48, %v1155_v26 }
 0x1a9   : >> { %4486 = vst [vmem:[#allocation8_spill] sm:$0xff] %v3595_v28  ;;  %4487 = vst [vmem:[#allocation9_spill] sm:$0xff] %v3598_v41  ;;  %v3610_v30 = vld [vmem:[%s3475_s18 + $0x1e8] sm:$0xff]  ;;  %v3613_v50 = vld [vmem:[%s3475_s18 + $0x1f0] sm:$0xff]  ;;  %v1171_v17 = vadd.s32 440, %v3466_v55  ;;  %v1172_v15 = vadd.s32 448, %v3466_v55  ;;  %v3677_v41 = vadd.s32 %v3634_v48, %v1152_v53  ;;  %v3680_v28 = vadd.s32 %v3634_v48, %v1153_v18 }
 0x1aa   : >> { %4488 = vst [vmem:[#allocation10_spill] sm:$0xff] %v3607_v49  ;;  %4489 = vst [vmem:[#allocation11_spill] sm:$0xff] %v3610_v30  ;;  %v3622_v38 = vld [vmem:[%s3475_s18 + $0x1f8] sm:$0xff]  ;;  %v1173_v13 = vadd.s32 456, %v3466_v55  ;;  %v1174_v9 = vadd.s32 464, %v3466_v55  ;;  %v1175_v8 = vadd.s32 472, %v3466_v55  ;;  %v3671_v30 = vadd.s32 %v3634_v48, %v1150_v45 }
 0x1ab   : >> { %4490 = vst [vmem:[#allocation12_spill] sm:$0xff] %v3613_v50  ;;  %4491 = vst [vmem:[#allocation13_spill] sm:$0xff] %v3622_v38  ;;  %v1176_v5 = vadd.s32 480, %v3466_v55  ;;  %v1177_v43 = vadd.s32 488, %v3466_v55  ;;  %v1178_v52 = vadd.s32 496, %v3466_v55  ;;  %v1179_v38 = vadd.s32 504, %v3466_v55 }
 0x1ac   : >> { %v3668_v50 = vadd.s32 %v3634_v48, %v1149_v51  ;;  %v3674_v49 = vadd.s32 %v3634_v48, %v1151_v31  ;;  %v3689_v51 = vadd.s32 %v3634_v48, %v1156_v37  ;;  %v3692_v45 = vadd.s32 %v3634_v48, %v1157_v40 }
 0x1ad   : >> { %v3695_v31 = vadd.s32 %v3634_v48, %v1158_v14  ;;  %v3698_v53 = vadd.s32 %v3634_v48, %v1159_v6  ;;  %v3701_v18 = vadd.s32 %v3634_v48, %v1160_v2  ;;  %v3704_v57 = vadd.s32 %v3634_v48, %v1161_v7 }
 0x1ae   : >> { %v3707_v26 = vadd.s32 %v3634_v48, %v1162_v59  ;;  %v3710_v37 = vadd.s32 %v3634_v48, %v1163_v56  ;;  %v3713_v40 = vadd.s32 %v3634_v48, %v1164_v46  ;;  %v3716_v14 = vadd.s32 %v3634_v48, %v1165_v35 }
 0x1af   : >> { %v3719_v6 = vadd.s32 %v3634_v48, %v1166_v34  ;;  %v3722_v2 = vadd.s32 %v3634_v48, %v1167_v33  ;;  %v3725_v7 = vadd.s32 %v3634_v48, %v1168_v25  ;;  %v3728_v59 = vadd.s32 %v3634_v48, %v1169_v24 }
 0x1b0   : >> { %v3731_v56 = vadd.s32 %v3634_v48, %v1170_v23  ;;  %v3734_v46 = vadd.s32 %v3634_v48, %v1171_v17  ;;  %v3737_v35 = vadd.s32 %v3634_v48, %v1172_v15  ;;  %v3740_v34 = vadd.s32 %v3634_v48, %v1173_v13 }
 0x1b1   : >> { %v3743_v33 = vadd.s32 %v3634_v48, %v1174_v9  ;;  %v3746_v25 = vadd.s32 %v3634_v48, %v1175_v8  ;;  %v3749_v24 = vadd.s32 %v3634_v48, %v1176_v5  ;;  %v3752_v23 = vadd.s32 %v3634_v48, %v1177_v43 }
 0x1b2   : >> { %v3755_v17 = vadd.s32 %v3634_v48, %v1178_v52  ;;  %v3758_v15 = vadd.s32 %v3634_v48, %v1179_v38  ;;  %v3761_v13 = vadd.s32 8, %v3466_v55  ;;  %vm1278_vm2 = vcmp.lt.s32.totalorder %v3668_v50, 1024 }
 0x1b3   : >> { %vm1279_vm3 = vcmp.lt.s32.totalorder %v3671_v30, 1024  ;;  %vm1280_vm4 = vcmp.lt.s32.totalorder %v3674_v49, 1024  ;;  %vm1281_vm5 = vcmp.lt.s32.totalorder %v3677_v41, 1024  ;;  %vm1282_vm6 = vcmp.lt.s32.totalorder %v3680_v28, 1024 }
 0x1b4   : >> { %vm1283_vm7 = vcmp.lt.s32.totalorder %v3683_v39, 1024  ;;  %vm1299_vm13 = vcmp.lt.s32.totalorder %v3731_v56, 1024  ;;  %vm1300_vm14 = vcmp.lt.s32.totalorder %v3734_v46, 1024  ;;  %vm1301_vm15 = vcmp.lt.s32.totalorder %v3737_v35, 1024 }
 0x1b5   : >> { %vm1302_vm0 = vcmp.lt.s32.totalorder %v3740_v34, 1024  ;;  %vm1303_vm1 = vcmp.lt.s32.totalorder %v3743_v33, 1024  ;;  %vm1304_vm8 = vcmp.lt.s32.totalorder %v3746_v25, 1024  ;;  %vm1305_vm9 = vcmp.lt.s32.totalorder %v3749_v24, 1024  ;;  %v4542_v25 = vld [vmem:[#allocation12_spill] sm:$0xff]  ;;  %v4544_v24 = vld [vmem:[#allocation13_spill] sm:$0xff] }
 0x1b6   : >> { %vm1306_vm10 = vcmp.lt.s32.totalorder %v3752_v23, 1024  ;;  %vm1307_vm11 = vcmp.lt.s32.totalorder %v3755_v17, 1024  ;;  %vm1308_vm12 = vcmp.lt.s32.totalorder %v3758_v15, 1024  ;;  %v4492_v43 = vsub.f32 %v3478_v61, %v3471_v60  ;;  %v982_v23 = vld [vmem:[%s3475_s18 + $0x8] sm:$0xff] }
 0x1b7   : >> { %v4493_v5 = vsub.f32 %v3481_v62, %v3471_v60  ;;  %v4494_v9 = vsub.f32 %v3484_v63, %v3471_v60  ;;  %v4495_v61 = vsub.f32 %v3487_v0, %v3471_v60  ;;  %v4496_v62 = vsub.f32 %v3490_v1, %v3471_v60 }
 0x1b8   : >> { %v3799_v52 = vsel %vm1278_vm2, %v4492_v43, 0.0  ;;  %v4497_v63 = vsub.f32 %v3493_v3, %v3471_v60  ;;  %v4498_v0 = vsub.f32 %v3502_v10, %v3471_v60  ;;  %vm4499_vm2 = vcmp.lt.s32.totalorder %v3686_v36, 1024 }
 0x1b9   : >> { %v3806_v8 = vsel %vm1279_vm3, %v4493_v5, 0.0  ;;  %v3813_v38 = vsel %vm1280_vm4, %v4494_v9, 0.0  ;;  %v3820_v50 = vsel %vm1281_vm5, %v4495_v61, 0.0  ;;  %v3827_v30 = vsel %vm1282_vm6, %v4496_v62, 0.0  ;;  %v4536_v61 = vld [vmem:[#allocation9_spill] sm:$0xff] }
 0x1ba   : >> { %v3834_v49 = vsel %vm1283_vm7, %v4497_v63, 0.0  ;;  %v3841_v41 = vsel %vm4499_vm2, %v4498_v0, 0.0  ;;  %v4500_v1 = vsub.f32 %v3505_v11, %v3471_v60  ;;  %vm4501_vm3 = vcmp.lt.s32.totalorder %v3689_v51, 1024  ;;  %v4538_v63 = vld [vmem:[#allocation10_spill] sm:$0xff] }
 0x1bb   : >> { %v4502_v3 = vsub.f32 %v3508_v12, %v3471_v60  ;;  %vm4503_vm4 = vcmp.lt.s32.totalorder %v3692_v45, 1024  ;;  %v4504_v10 = vsub.f32 %v3517_v20, %v3471_v60  ;;  %vm4505_vm5 = vcmp.lt.s32.totalorder %v3695_v31, 1024 }
 0x1bc   : >> { %v3848_v28 = vsel %vm4501_vm3, %v4500_v1, 0.0  ;;  %v4506_v11 = vsub.f32 %v3520_v21, %v3471_v60  ;;  %vm4507_vm6 = vcmp.lt.s32.totalorder %v3698_v53, 1024  ;;  %v4508_v12 = vsub.f32 %v3523_v22, %v3471_v60  ;;  %v4540_v1 = vld [vmem:[#allocation11_spill] sm:$0xff] }
 0x1bd   : >> { %v3855_v39 = vsel %vm4503_vm4, %v4502_v3, 0.0  ;;  %v3862_v36 = vsel %vm4505_vm5, %v4504_v10, 0.0  ;;  %vm4509_vm7 = vcmp.lt.s32.totalorder %v3701_v18, 1024  ;;  %v4510_v20 = vsub.f32 %v3532_v27, %v3471_v60 }
 0x1be   : >> { %v3869_v51 = vsel %vm4507_vm6, %v4506_v11, 0.0  ;;  %v3876_v45 = vsel %vm4509_vm7, %v4508_v12, 0.0  ;;  %vm4511_vm2 = vcmp.lt.s32.totalorder %v3704_v57, 1024  ;;  %v4512_v21 = vsub.f32 %v3535_v29, %v3471_v60 }
 0x1bf   : >> { %v3883_v31 = vsel %vm4511_vm2, %v4510_v20, 0.0  ;;  %vm4513_vm3 = vcmp.lt.s32.totalorder %v3707_v26, 1024  ;;  %v4514_v22 = vsub.f32 %v3538_v32, %v3471_v60  ;;  %vm4515_vm4 = vcmp.lt.s32.totalorder %v3710_v37, 1024 }
 0x1c0   : >> { %v3890_v53 = vsel %vm4513_vm3, %v4512_v21, 0.0  ;;  %v4516_v27 = vsub.f32 %v3547_v44, %v3471_v60  ;;  %vm4517_vm5 = vcmp.lt.s32.totalorder %v3713_v40, 1024  ;;  %v4518_v29 = vsub.f32 %v3550_v47, %v3471_v60 }
 0x1c1   : >> { %v3897_v18 = vsel %vm4515_vm4, %v4514_v22, 0.0  ;;  %vm4519_vm6 = vcmp.lt.s32.totalorder %v3716_v14, 1024  ;;  %v4520_v32 = vsub.f32 %v3553_v42, %v3471_v60  ;;  %vm4521_vm7 = vcmp.lt.s32.totalorder %v3719_v6, 1024  ;;  %v981_v22 = vld [vmem:[%s3475_s18] sm:$0xff] }
 0x1c2   : >> { %v3904_v57 = vsel %vm4517_vm5, %v4516_v27, 0.0  ;;  %v3911_v26 = vsel %vm4519_vm6, %v4518_v29, 0.0  ;;  %v4522_v44 = vsub.f32 %v3562_v54, %v3471_v60  ;;  %vm4523_vm2 = vcmp.lt.s32.totalorder %v3722_v2, 1024 }
 0x1c3   : >> { %v3918_v37 = vsel %vm4521_vm7, %v4520_v32, 0.0  ;;  %v4524_v47 = vsub.f32 %v3565_v58, %v3471_v60  ;;  %vm4525_vm3 = vcmp.lt.s32.totalorder %v3725_v7, 1024  ;;  %v4526_v42 = vsub.f32 %v3568_v4, %v3471_v60  ;;  %v4530_v4 = vld [vmem:[#allocation6_spill] sm:$0xff] }
 0x1c4   : >> { %v3925_v40 = vsel %vm4523_vm2, %v4522_v44, 0.0  ;;  %vm4527_vm4 = vcmp.lt.s32.totalorder %v3728_v59, 1024  ;;  %v4528_v54 = vsub.f32 %v3577_v16, %v3471_v60  ;;  %v4529_v58 = vsub.f32 %v3580_v19, %v3471_v60  ;;  %v4532_v16 = vld [vmem:[#allocation7_spill] sm:$0xff]  ;;  %v4534_v19 = vld [vmem:[#allocation8_spill] sm:$0xff]  ;;  %v983_v32 = vld [vmem:[%s3475_s18 + $0x10] sm:$0xff] }
 0x1c5   : >> { %v3932_v14 = vsel %vm4525_vm3, %v4524_v47, 0.0  ;;  %v3939_v6 = vsel %vm4527_vm4, %v4526_v42, 0.0  ;;  %v4531_v59 = vsub.f32 %v4530_v4, %v3471_v60  ;;  %v4533_v56 = vsub.f32 %v4532_v16, %v3471_v60 }
 0x1c6   : >> { %v3946_v2 = vsel %vm1299_vm13, %v4528_v54, 0.0  ;;  %v3953_v7 = vsel %vm1300_vm14, %v4529_v58, 0.0  ;;  %v4535_v46 = vsub.f32 %v4534_v19, %v3471_v60  ;;  %v4537_v62 = vsub.f32 %v4536_v61, %v3471_v60  ;;  %v984_v54 = vld [vmem:[%s3475_s18 + $0x18] sm:$0xff] }
 0x1c7   : >> { %v3960_v43 = vsel %vm1301_vm15, %v4531_v59, 0.0  ;;  %v3967_v5 = vsel %vm1302_vm0, %v4533_v56, 0.0  ;;  %v4539_v0 = vsub.f32 %v4538_v63, %v3471_v60  ;;  %v4541_v33 = vsub.f32 %v4540_v1, %v3471_v60  ;;  %v985_v59 = vld [vmem:[%s3475_s18 + $0x20] sm:$0xff] }
 0x1c8   : >> { %v3974_v9 = vsel %vm1303_vm1, %v4535_v46, 0.0  ;;  %v3981_v35 = vsel %vm1304_vm8, %v4537_v62, 0.0  ;;  %v1118_v10 = vadd.s32 16, %v3466_v55  ;;  %v4543_v11 = vsub.f32 %v4542_v25, %v3471_v60  ;;  %v986_v62 = vld [vmem:[%s3475_s18 + $0x28] sm:$0xff]  ;;  %v987_v25 = vld [vmem:[%s3475_s18 + $0x30] sm:$0xff] }
 0x1c9   : >> { %v3988_v34 = vsel %vm1305_vm9, %v4539_v0, 0.0  ;;  %v3995_v3 = vsel %vm1306_vm10, %v4541_v33, 0.0  ;;  %v4545_v20 = vsub.f32 %v4544_v24, %v3471_v60  ;;  %v1119_v27 = vadd.s32 24, %v3466_v55 }
 0x1ca   : >> { %v4003_v12 = vsel %vm1307_vm11, %v4543_v11, 0.0  ;;  %v1181_v29 = vadd.s32 %v3634_v48, %v3466_v55  ;;  %v1182_v17 = vadd.s32 %v3634_v48, %v3761_v13  ;;  %v1120_v44 = vadd.s32 32, %v3466_v55 }
 0x1cb   : >> { %v4010_v21 = vsel %vm1308_vm12, %v4545_v20, 0.0  ;;  %v1183_v47 = vadd.s32 %v3634_v48, %v1118_v10  ;;  %v1051_v15 = vsub.f32 %v981_v22, %v3471_v60  ;;  %v1052_v42 = vsub.f32 %v982_v23, %v3471_v60 }
 0x1cc   : >> { %v1121_v58 = vadd.s32 40, %v3466_v55  ;;  %v1184_v4 = vadd.s32 %v3634_v48, %v1119_v27  ;;  %vm1245_vm8 = vcmp.lt.s32.totalorder %v1181_v29, 1024  ;;  %vm1246_vm9 = vcmp.lt.s32.totalorder %v1182_v17, 1024  ;;  %v988_v27 = vld [vmem:[%s3475_s18 + $0x38] sm:$0xff] }
 0x1cd   : >> { %v1053_v13 = vsub.f32 %v983_v32, %v3471_v60  ;;  %v1122_v16 = vadd.s32 48, %v3466_v55  ;;  %v1185_v56 = vadd.s32 %v3634_v48, %v1120_v44  ;;  %vm1247_vm10 = vcmp.lt.s32.totalorder %v1183_v47, 1024 }
 0x1ce   : >> { %v1054_v19 = vsub.f32 %v984_v54, %v3471_v60  ;;  %v1437_v46 = vsel %vm1245_vm8, %v1051_v15, 0.0  ;;  %v1438_v61 = vsel %vm1246_vm9, %v1052_v42, 0.0  ;;  %v1123_v63 = vadd.s32 56, %v3466_v55  ;;  %v989_v42 = vld [vmem:[%s3475_s18 + $0x40] sm:$0xff] }
 0x1cf   : >> { %v1186_v0 = vadd.s32 %v3634_v48, %v1121_v58  ;;  %vm1248_vm11 = vcmp.lt.s32.totalorder %v1184_v4, 1024  ;;  %v1055_v1 = vsub.f32 %v985_v59, %v3471_v60  ;;  %v1124_v33 = vadd.s32 64, %v3466_v55 }
 0x1d0   : >> { %v1439_v10 = vsel %vm1247_vm10, %v1053_v13, 0.0  ;;  %v1187_v11 = vadd.s32 %v3634_v48, %v1122_v16  ;;  %vm1249_vm12 = vcmp.lt.s32.totalorder %v1185_v56, 1024  ;;  %v1501_v24 = vmul.f32 %v1437_v46, %v1437_v46  ;;  %v990_v56 = vld [vmem:[%s3475_s18 + $0x48] sm:$0xff] }
 0x1d1   : >> { %v1502_v20 = vmul.f32 %v1438_v61, %v1438_v61  ;;  %v1056_v22 = vsub.f32 %v986_v62, %v3471_v60  ;;  %v1440_v23 = vsel %vm1248_vm11, %v1054_v19, 0.0  ;;  %v1125_v29 = vadd.s32 72, %v3466_v55 }
 0x1d2   : >> { %v1188_v17 = vadd.s32 %v3634_v48, %v1123_v63  ;;  %vm1250_vm13 = vcmp.lt.s32.totalorder %v1186_v0, 1024  ;;  %v1503_v32 = vmul.f32 %v1439_v10, %v1439_v10  ;;  %v1057_v44 = vsub.f32 %v987_v25, %v3471_v60 }
 0x1d3   : >> { %v1126_v47 = vadd.s32 80, %v3466_v55  ;;  %v1441_v15 = vsel %vm1249_vm12, %v1055_v1, 0.0  ;;  %v1189_v54 = vadd.s32 %v3634_v48, %v1124_v33  ;;  %vm1251_vm14 = vcmp.lt.s32.totalorder %v1187_v11, 1024  ;;  %v991_v1 = vld [vmem:[%s3475_s18 + $0x50] sm:$0xff] }
 0x1d4   : >> { %v1504_v58 = vmul.f32 %v1440_v23, %v1440_v23  ;;  %v1565_v4 = vadd.f32 %v1502_v20, %v1501_v24  ;;  %v1058_v13 = vsub.f32 %v988_v27, %v3471_v60  ;;  %v1127_v59 = vadd.s32 88, %v3466_v55 }
 0x1d5   : >> { %v1442_v16 = vsel %vm1250_vm13, %v1056_v22, 0.0  ;;  %v1190_v19 = vadd.s32 %v3634_v48, %v1125_v29  ;;  %vm1252_vm15 = vcmp.lt.s32.totalorder %v1188_v17, 1024  ;;  %v1505_v46 = vmul.f32 %v1441_v15, %v1441_v15  ;;  %v992_v22 = vld [vmem:[%s3475_s18 + $0x58] sm:$0xff] }
 0x1d6   : >> { %v1566_v61 = vadd.f32 %v1565_v4, %v1503_v32  ;;  %v1059_v62 = vsub.f32 %v989_v42, %v3471_v60  ;;  %v1128_v63 = vadd.s32 96, %v3466_v55  ;;  %v1443_v0 = vsel %vm1251_vm14, %v1057_v44, 0.0 }
 0x1d7   : >> { %v1191_v33 = vadd.s32 %v3634_v48, %v1126_v47  ;;  %vm1253_vm0 = vcmp.lt.s32.totalorder %v1189_v54, 1024  ;;  %v1506_v10 = vmul.f32 %v1442_v16, %v1442_v16  ;;  %v1060_v11 = vsub.f32 %v990_v56, %v3471_v60  ;;  %v993_v47 = vld [vmem:[%s3475_s18 + $0x60] sm:$0xff] }
 0x1d8   : >> { %v1567_v25 = vadd.f32 %v1566_v61, %v1504_v58  ;;  %v1129_v24 = vadd.s32 104, %v3466_v55  ;;  %v1444_v20 = vsel %vm1252_vm15, %v1058_v13, 0.0  ;;  %v1192_v23 = vadd.s32 %v3634_v48, %v1127_v59  ;;  %v994_v59 = vld [vmem:[%s3475_s18 + $0x68] sm:$0xff] }
 0x1d9   : >> { %vm1254_vm1 = vcmp.lt.s32.totalorder %v1190_v19, 1024  ;;  %v1507_v27 = vmul.f32 %v1443_v0, %v1443_v0  ;;  %v1061_v17 = vsub.f32 %v991_v1, %v3471_v60  ;;  %v1130_v32 = vadd.s32 112, %v3466_v55 }
 0x1da   : >> { %v1568_v29 = vadd.f32 %v1567_v25, %v1505_v46  ;;  %v1445_v44 = vsel %vm1253_vm0, %v1059_v62, 0.0  ;;  %v1193_v15 = vadd.s32 %v3634_v48, %v1128_v63  ;;  %vm1255_vm5 = vcmp.lt.s32.totalorder %v1191_v33, 1024  ;;  %v995_v63 = vld [vmem:[%s3475_s18 + $0x70] sm:$0xff] }
 0x1db   : >> { %v1508_v42 = vmul.f32 %v1444_v20, %v1444_v20  ;;  %v1062_v58 = vsub.f32 %v992_v22, %v3471_v60  ;;  %v1131_v4 = vadd.s32 120, %v3466_v55  ;;  %v1446_v13 = vsel %vm1254_vm1, %v1060_v11, 0.0 }
 0x1dc   : >> { %v1569_v54 = vadd.f32 %v1568_v29, %v1506_v10  ;;  %v1194_v16 = vadd.s32 %v3634_v48, %v1129_v24  ;;  %vm1256_vm6 = vcmp.lt.s32.totalorder %v1192_v23, 1024  ;;  %v1509_v56 = vmul.f32 %v1445_v44, %v1445_v44  ;;  %v996_v24 = vld [vmem:[%s3475_s18 + $0x78] sm:$0xff] }
 0x1dd   : >> { %v1063_v46 = vsub.f32 %v993_v47, %v3471_v60  ;;  %v1132_v61 = vadd.s32 128, %v3466_v55  ;;  %v1447_v62 = vsel %vm1255_vm5, %v1061_v17, 0.0  ;;  %v1195_v0 = vadd.s32 %v3634_v48, %v1130_v32  ;;  %v997_v32 = vld [vmem:[%s3475_s18 + $0x80] sm:$0xff] }
 0x1de   : >> { %v1570_v19 = vadd.f32 %v1569_v54, %v1507_v27  ;;  %vm1257_vm7 = vcmp.lt.s32.totalorder %v1193_v15, 1024  ;;  %v1510_v1 = vmul.f32 %v1446_v13, %v1446_v13  ;;  %v1064_v10 = vsub.f32 %v994_v59, %v3471_v60 }
 0x1df   : >> { %v1133_v25 = vadd.s32 136, %v3466_v55  ;;  %v1448_v11 = vsel %vm1256_vm6, %v1062_v58, 0.0  ;;  %v1196_v20 = vadd.s32 %v3634_v48, %v1131_v4  ;;  %vm1258_vm2 = vcmp.lt.s32.totalorder %v1194_v16, 1024  ;;  %v998_v4 = vld [vmem:[%s3475_s18 + $0x88] sm:$0xff] }
 0x1e0   : >> { %v1571_v33 = vadd.f32 %v1570_v19, %v1508_v42  ;;  %v1511_v22 = vmul.f32 %v1447_v62, %v1447_v62  ;;  %v1065_v27 = vsub.f32 %v995_v63, %v3471_v60  ;;  %v1134_v29 = vadd.s32 144, %v3466_v55 }
 0x1e1   : >> { %v1449_v17 = vsel %vm1257_vm7, %v1063_v46, 0.0  ;;  %v1197_v44 = vadd.s32 %v3634_v48, %v1132_v61  ;;  %vm1259_vm3 = vcmp.lt.s32.totalorder %v1195_v0, 1024  ;;  %v1512_v47 = vmul.f32 %v1448_v11, %v1448_v11  ;;  %v999_v61 = vld [vmem:[%s3475_s18 + $0x90] sm:$0xff] }
 0x1e2   : >> { %v1572_v23 = vadd.f32 %v1571_v33, %v1509_v56  ;;  %v1066_v42 = vsub.f32 %v996_v24, %v3471_v60  ;;  %v1135_v54 = vadd.s32 152, %v3466_v55  ;;  %v1450_v58 = vsel %vm1258_vm2, %v1064_v10, 0.0 }
 0x1e3   : >> { %v1198_v13 = vadd.s32 %v3634_v48, %v1133_v25  ;;  %vm1260_vm4 = vcmp.lt.s32.totalorder %v1196_v20, 1024  ;;  %v1513_v59 = vmul.f32 %v1449_v17, %v1449_v17  ;;  %v1067_v56 = vsub.f32 %v997_v32, %v3471_v60  ;;  %v1000_v25 = vld [vmem:[%s3475_s18 + $0x98] sm:$0xff] }
 0x1e4   : >> { %v1573_v15 = vadd.f32 %v1572_v23, %v1510_v1  ;;  %v1136_v19 = vadd.s32 160, %v3466_v55  ;;  %v1451_v46 = vsel %vm1259_vm3, %v1065_v27, 0.0  ;;  %v1199_v62 = vadd.s32 %v3634_v48, %v1134_v29  ;;  %v1001_v29 = vld [vmem:[%s3475_s18 + $0xa0] sm:$0xff] }
 0x1e5   : >> { %vm1261_vm8 = vcmp.lt.s32.totalorder %v1197_v44, 1024  ;;  %v1514_v63 = vmul.f32 %v1450_v58, %v1450_v58  ;;  %v1068_v1 = vsub.f32 %v998_v4, %v3471_v60  ;;  %v1137_v33 = vadd.s32 168, %v3466_v55 }
 0x1e6   : >> { %v1574_v16 = vadd.f32 %v1573_v15, %v1511_v22  ;;  %v1452_v10 = vsel %vm1260_vm4, %v1066_v42, 0.0  ;;  %v1200_v11 = vadd.s32 %v3634_v48, %v1135_v54  ;;  %vm1262_vm9 = vcmp.lt.s32.totalorder %v1198_v13, 1024  ;;  %v1002_v54 = vld [vmem:[%s3475_s18 + $0xa8] sm:$0xff] }
 0x1e7   : >> { %v1515_v24 = vmul.f32 %v1451_v46, %v1451_v46  ;;  %v1069_v22 = vsub.f32 %v999_v61, %v3471_v60  ;;  %v1138_v23 = vadd.s32 176, %v3466_v55  ;;  %v1453_v27 = vsel %vm1261_vm8, %v1067_v56, 0.0 }
 0x1e8   : >> { %v1575_v0 = vadd.f32 %v1574_v16, %v1512_v47  ;;  %v1201_v17 = vadd.s32 %v3634_v48, %v1136_v19  ;;  %vm1263_vm10 = vcmp.lt.s32.totalorder %v1199_v62, 1024  ;;  %v1516_v32 = vmul.f32 %v1452_v10, %v1452_v10  ;;  %v1003_v19 = vld [vmem:[%s3475_s18 + $0xb0] sm:$0xff] }
 0x1e9   : >> { %v1070_v47 = vsub.f32 %v1000_v25, %v3471_v60  ;;  %v1139_v15 = vadd.s32 184, %v3466_v55  ;;  %v1454_v42 = vsel %vm1262_vm9, %v1068_v1, 0.0  ;;  %v1202_v58 = vadd.s32 %v3634_v48, %v1137_v33  ;;  %v1004_v33 = vld [vmem:[%s3475_s18 + $0xb8] sm:$0xff] }
 0x1ea   : >> { %v1576_v20 = vadd.f32 %v1575_v0, %v1513_v59  ;;  %vm1264_vm11 = vcmp.lt.s32.totalorder %v1200_v11, 1024  ;;  %v1517_v4 = vmul.f32 %v1453_v27, %v1453_v27  ;;  %v1071_v59 = vsub.f32 %v1001_v29, %v3471_v60 }
 0x1eb   : >> { %v1140_v16 = vadd.s32 192, %v3466_v55  ;;  %v1455_v56 = vsel %vm1263_vm10, %v1069_v22, 0.0  ;;  %v1203_v46 = vadd.s32 %v3634_v48, %v1138_v23  ;;  %vm1265_vm12 = vcmp.lt.s32.totalorder %v1201_v17, 1024  ;;  %v1005_v23 = vld [vmem:[%s3475_s18 + $0xc0] sm:$0xff] }
 0x1ec   : >> { %v1577_v44 = vadd.f32 %v1576_v20, %v1514_v63  ;;  %v1518_v61 = vmul.f32 %v1454_v42, %v1454_v42  ;;  %v1072_v63 = vsub.f32 %v1002_v54, %v3471_v60  ;;  %v1141_v0 = vadd.s32 200, %v3466_v55 }
 0x1ed   : >> { %v1456_v1 = vsel %vm1264_vm11, %v1070_v47, 0.0  ;;  %v1204_v10 = vadd.s32 %v3634_v48, %v1139_v15  ;;  %vm1266_vm13 = vcmp.lt.s32.totalorder %v1202_v58, 1024  ;;  %v1519_v25 = vmul.f32 %v1455_v56, %v1455_v56  ;;  %v1006_v15 = vld [vmem:[%s3475_s18 + $0xc8] sm:$0xff] }
 0x1ee   : >> { %v1578_v13 = vadd.f32 %v1577_v44, %v1515_v24  ;;  %v1073_v24 = vsub.f32 %v1003_v19, %v3471_v60  ;;  %v1142_v20 = vadd.s32 208, %v3466_v55  ;;  %v1457_v22 = vsel %vm1265_vm12, %v1071_v59, 0.0 }
 0x1ef   : >> { %v1205_v27 = vadd.s32 %v3634_v48, %v1140_v16  ;;  %vm1267_vm14 = vcmp.lt.s32.totalorder %v1203_v46, 1024  ;;  %v1520_v29 = vmul.f32 %v1456_v1, %v1456_v1  ;;  %v1143_v44 = vadd.s32 216, %v3466_v55  ;;  %v1007_v16 = vld [vmem:[%s3475_s18 + $0xd0] sm:$0xff] }
 0x1f0   : >> { %v1579_v62 = vadd.f32 %v1578_v13, %v1516_v32  ;;  %v1074_v32 = vsub.f32 %v1004_v33, %v3471_v60  ;;  %v1458_v47 = vsel %vm1266_vm13, %v1072_v63, 0.0  ;;  %v1206_v42 = vadd.s32 %v3634_v48, %v1141_v0  ;;  %v1008_v0 = vld [vmem:[%s3475_s18 + $0xd8] sm:$0xff] }
 0x1f1   : >> { %vm1268_vm15 = vcmp.lt.s32.totalorder %v1204_v10, 1024  ;;  %v1521_v54 = vmul.f32 %v1457_v22, %v1457_v22  ;;  %v1144_v13 = vadd.s32 224, %v3466_v55  ;;  %v1459_v59 = vsel %vm1267_vm14, %v1073_v24, 0.0 }
 0x1f2   : >> { %v1580_v11 = vadd.f32 %v1579_v62, %v1517_v4  ;;  %v1075_v4 = vsub.f32 %v1005_v23, %v3471_v60  ;;  %v1207_v56 = vadd.s32 %v3634_v48, %v1142_v20  ;;  %vm1269_vm0 = vcmp.lt.s32.totalorder %v1205_v27, 1024  ;;  %v1009_v20 = vld [vmem:[%s3475_s18 + $0xe0] sm:$0xff] }
 0x1f3   : >> { %v1522_v19 = vmul.f32 %v1458_v47, %v1458_v47  ;;  %v1145_v62 = vadd.s32 232, %v3466_v55  ;;  %v1460_v63 = vsel %vm1268_vm15, %v1074_v32, 0.0  ;;  %v1208_v1 = vadd.s32 %v3634_v48, %v1143_v44  ;;  %v1010_v44 = vld [vmem:[%s3475_s18 + $0xe8] sm:$0xff] }
 0x1f4   : >> { %v1581_v17 = vadd.f32 %v1580_v11, %v1518_v61  ;;  %v1076_v61 = vsub.f32 %v1006_v15, %v3471_v60  ;;  %vm1270_vm1 = vcmp.lt.s32.totalorder %v1206_v42, 1024  ;;  %v1523_v33 = vmul.f32 %v1459_v59, %v1459_v59 }
 0x1f5   : >> { %v1146_v11 = vadd.s32 240, %v3466_v55  ;;  %v1461_v24 = vsel %vm1269_vm0, %v1075_v4, 0.0  ;;  %v1209_v22 = vadd.s32 %v3634_v48, %v1144_v13  ;;  %vm1271_vm5 = vcmp.lt.s32.totalorder %v1207_v56, 1024  ;;  %v1011_v13 = vld [vmem:[%s3475_s18 + $0xf0] sm:$0xff] }
 0x1f6   : >> { %v1582_v58 = vadd.f32 %v1581_v17, %v1519_v25  ;;  %v1077_v25 = vsub.f32 %v1007_v16, %v3471_v60  ;;  %v1524_v23 = vmul.f32 %v1460_v63, %v1460_v63  ;;  %v1147_v17 = vadd.s32 248, %v3466_v55 }
 0x1f7   : >> { %v1462_v32 = vsel %vm1270_vm1, %v1076_v61, 0.0  ;;  %v1210_v47 = vadd.s32 %v3634_v48, %v1145_v62  ;;  %vm1272_vm6 = vcmp.lt.s32.totalorder %v1208_v1, 1024  ;;  %v1525_v15 = vmul.f32 %v1461_v24, %v1461_v24  ;;  %v1012_v61 = vld [vmem:[%s3475_s18 + $0xf8] sm:$0xff] }
 0x1f8   : >> { %v1583_v46 = vadd.f32 %v1582_v58, %v1520_v29  ;;  %v1078_v29 = vsub.f32 %v1008_v0, %v3471_v60  ;;  %v1148_v58 = vadd.s32 256, %v3466_v55  ;;  %v1463_v4 = vsel %vm1271_vm5, %v1077_v25, 0.0 }
 0x1f9   : >> { %v1211_v59 = vadd.s32 %v3634_v48, %v1146_v11  ;;  %vm1273_vm7 = vcmp.lt.s32.totalorder %v1209_v22, 1024  ;;  %v1526_v16 = vmul.f32 %v1462_v32, %v1462_v32  ;;  %v1212_v62 = vadd.s32 %v3634_v48, %v1147_v17 }
 0x1fa   : >> { %v1584_v10 = vadd.f32 %v1583_v46, %v1521_v54  ;;  %v1079_v54 = vsub.f32 %v1009_v20, %v3471_v60  ;;  %v1464_v46 = vsel %vm1272_vm6, %v1078_v29, 0.0  ;;  %vm1274_vm2 = vcmp.lt.s32.totalorder %v1210_v47, 1024 }
 0x1fb   : >> { %v1527_v63 = vmul.f32 %v1463_v4, %v1463_v4  ;;  %v1081_v1 = vsub.f32 %v1011_v13, %v3471_v60  ;;  %vm1275_vm3 = vcmp.lt.s32.totalorder %v1211_v59, 1024  ;;  %v1528_v25 = vmul.f32 %v1464_v46, %v1464_v46 }
 0x1fc   : >> { %v1585_v27 = vadd.f32 %v1584_v10, %v1522_v19  ;;  %v1080_v19 = vsub.f32 %v1010_v44, %v3471_v60  ;;  %v1465_v55 = vsel %vm1273_vm7, %v1079_v54, 0.0  ;;  %v1213_v10 = vadd.s32 %v3634_v48, %v1148_v58 }
 0x1fd   : >> { %v1082_v24 = vsub.f32 %v1012_v61, %v3471_v60  ;;  %vm1276_vm4 = vcmp.lt.s32.totalorder %v1212_v62, 1024  ;;  %v1529_v22 = vmul.f32 %v1465_v55, %v1465_v55  ;;  %v1467_v29 = vsel %vm1275_vm3, %v1081_v1, 0.0 }
 0x1fe   : >> { %v1586_v42 = vadd.f32 %v1585_v27, %v1523_v33  ;;  %v1013_v33 = vld [vmem:[%s3475_s18 + $0x100] sm:$0xff]  ;;  %v1466_v20 = vsel %vm1274_vm2, %v1080_v19, 0.0  ;;  %vm1277_vm8 = vcmp.lt.s32.totalorder %v1213_v10, 1024  ;;  %v1531_v47 = vmul.f32 %v1467_v29, %v1467_v29 }
 0x1ff   : >> { %v1083_v27 = vsub.f32 %v1013_v33, %v3471_v60  ;;  %v1530_v17 = vmul.f32 %v1466_v20, %v1466_v20  ;;  %v1468_v44 = vsel %vm1276_vm4, %v1082_v24, 0.0  ;;  %v1534_v13 = vmul.f32 %v3799_v52, %v3799_v52 }
 0x200   : >> { %v1587_v56 = vadd.f32 %v1586_v42, %v1524_v23  ;;  %v1532_v48 = vmul.f32 %v1468_v44, %v1468_v44  ;;  %v1536_v19 = vmul.f32 %v3813_v38, %v3813_v38  ;;  %v1537_v61 = vmul.f32 %v3820_v50, %v3820_v50 }
 0x201   : >> { %v1469_v42 = vsel %vm1277_vm8, %v1083_v27, 0.0  ;;  %v1539_v52 = vmul.f32 %v3834_v49, %v3834_v49  ;;  %v1541_v38 = vmul.f32 %v3848_v28, %v3848_v28  ;;  %v1542_v50 = vmul.f32 %v3855_v39, %v3855_v39 }
 0x202   : >> { %v1588_v0 = vadd.f32 %v1587_v56, %v1525_v15  ;;  %v1533_v58 = vmul.f32 %v1469_v42, %v1469_v42  ;;  %v1544_v49 = vmul.f32 %v3869_v51, %v3869_v51  ;;  %v1546_v28 = vmul.f32 %v3883_v31, %v3883_v31 }
 0x203   : >> { %v1547_v39 = vmul.f32 %v3890_v53, %v3890_v53  ;;  %v1549_v51 = vmul.f32 %v3904_v57, %v3904_v57  ;;  %v1551_v31 = vmul.f32 %v3918_v37, %v3918_v37  ;;  %v1552_v53 = vmul.f32 %v3925_v40, %v3925_v40 }
 0x204   : >> { %v1589_v11 = vadd.f32 %v1588_v0, %v1526_v16  ;;  %v1535_v16 = vmul.f32 %v3806_v8, %v3806_v8  ;;  %v1540_v8 = vmul.f32 %v3841_v41, %v3841_v41  ;;  %v1545_v41 = vmul.f32 %v3876_v45, %v3876_v45 }
 0x205   : >> { %v1550_v45 = vmul.f32 %v3911_v26, %v3911_v26  ;;  %v1554_v57 = vmul.f32 %v3939_v6, %v3939_v6  ;;  %v1555_v26 = vmul.f32 %v3946_v2, %v3946_v2  ;;  %v1556_v37 = vmul.f32 %v3953_v7, %v3953_v7 }
 0x206   : >> { %v1590_v23 = vadd.f32 %v1589_v11, %v1527_v63  ;;  %v1538_v63 = vmul.f32 %v3827_v30, %v3827_v30  ;;  %v1543_v30 = vmul.f32 %v3862_v36, %v3862_v36  ;;  %v1548_v36 = vmul.f32 %v3897_v18, %v3897_v18 }
 0x207   : >> { %v1553_v18 = vmul.f32 %v3932_v14, %v3932_v14  ;;  %v1557_v40 = vmul.f32 %v3960_v43, %v3960_v43  ;;  %v1558_v14 = vmul.f32 %v3967_v5, %v3967_v5  ;;  %v1559_v6 = vmul.f32 %v3974_v9, %v3974_v9 }
 0x208   : >> { %v1591_v32 = vadd.f32 %v1590_v23, %v1528_v25  ;;  %v1560_v2 = vmul.f32 %v3981_v35, %v3981_v35  ;;  %v1561_v7 = vmul.f32 %v3988_v34, %v3988_v34  ;;  %v1562_v43 = vmul.f32 %v3995_v3, %v3995_v3 }
 0x209   : >> { %v1563_v5 = vmul.f32 %v4003_v12, %v4003_v12  ;;  %v1564_v9 = vmul.f32 %v4010_v21, %v4010_v21 }
 0x20a   : >> { %v1592_v15 = vadd.f32 %v1591_v32, %v1529_v22 }
 0x20c   : >> { %v1593_v54 = vadd.f32 %v1592_v15, %v1530_v17 }
 0x20e   : >> { %v1594_v4 = vadd.f32 %v1593_v54, %v1531_v47 }
 0x210   : >> { %v1595_v59 = vadd.f32 %v1594_v4, %v1532_v48 }
 0x212   : >> { %v1596_v56 = vadd.f32 %v1595_v59, %v1533_v58 }
 0x214   : >> { %v1597_v46 = vadd.f32 %v1596_v56, %v1534_v13 }
 0x216   : >> { %v1598_v62 = vadd.f32 %v1597_v46, %v1535_v16 }
 0x218   : >> { %v1599_v0 = vadd.f32 %v1598_v62, %v1536_v19 }
 0x21a   : >> { %v1600_v1 = vadd.f32 %v1599_v0, %v1537_v61 }
 0x21c   : >> { %v1601_v55 = vadd.f32 %v1600_v1, %v1538_v63 }
 0x21e   : >> { %v1602_v33 = vadd.f32 %v1601_v55, %v1539_v52  ;;  %v4546_v52 = vld [vmem:[#allocation5_spill] sm:$0xff] }
 0x220   : >> { %v1603_v10 = vadd.f32 %v1602_v33, %v1540_v8 }
 0x222   : >> { %v1604_v25 = vadd.f32 %v1603_v10, %v1541_v38 }
 0x224   : >> { %v1605_v11 = vadd.f32 %v1604_v25, %v1542_v50 }
 0x226   : >> { %v1606_v24 = vadd.f32 %v1605_v11, %v1543_v30 }
 0x228   : >> { %v1607_v20 = vadd.f32 %v1606_v24, %v1544_v49 }
 0x22a   : >> { %v1608_v22 = vadd.f32 %v1607_v20, %v1545_v41 }
 0x22c   : >> { %v1609_v23 = vadd.f32 %v1608_v22, %v1546_v28 }
 0x22e   : >> { %v1610_v27 = vadd.f32 %v1609_v23, %v1547_v39 }
 0x230   : >> { %v1611_v29 = vadd.f32 %v1610_v27, %v1548_v36 }
 0x232   : >> { %v1612_v17 = vadd.f32 %v1611_v29, %v1549_v51 }
 0x234   : >> { %v1613_v32 = vadd.f32 %v1612_v17, %v1550_v45 }
 0x236   : >> { %v1614_v44 = vadd.f32 %v1613_v32, %v1551_v31 }
 0x238   : >> { %v1615_v47 = vadd.f32 %v1614_v44, %v1552_v53 }
 0x23a   : >> { %v1616_v15 = vadd.f32 %v1615_v47, %v1553_v18 }
 0x23c   : >> { %v1617_v42 = vadd.f32 %v1616_v15, %v1554_v57 }
 0x23e   : >> { %v1618_v48 = vadd.f32 %v1617_v42, %v1555_v26 }
 0x240   : >> { %v1619_v54 = vadd.f32 %v1618_v48, %v1556_v37 }
 0x242   : >> { %v1620_v58 = vadd.f32 %v1619_v54, %v1557_v40 }
 0x244   : >> { %v1621_v4 = vadd.f32 %v1620_v58, %v1558_v14 }
 0x246   : >> { %v1622_v13 = vadd.f32 %v1621_v4, %v1559_v6 }
 0x248   : >> { %v1623_v59 = vadd.f32 %v1622_v13, %v1560_v2 }
 0x24a   : >> { %v1624_v16 = vadd.f32 %v1623_v59, %v1561_v7 }
 0x24c   : >> { %v1625_v56 = vadd.f32 %v1624_v16, %v1562_v43 }
 0x24e   : >> { %v1626_v19 = vadd.f32 %v1625_v56, %v1563_v5 }
 0x250   : >> { %v1627_v46 = vadd.f32 %v1626_v19, %v1564_v9 }
 0x252   : >> { %v1628_v35 = vrot.slane %v1627_v46, 4 }
 0x254   : >> { %v1629_v61 = vadd.f32 %v1628_v35, %v1627_v46 }
 0x256   : >> { %v1630_v62 = vrot.slane %v1629_v61, 2 }
 0x258   : >> { %v1631_v63 = vadd.f32 %v1630_v62, %v1629_v61 }
 0x25a   : >> { %v1632_v34 = vrot.slane %v1631_v63, 1  ;;  %976 = sbr.rel (!%p974_p9) target bundleno = 413 (0x19d), region = 84 }
 0x25c   : >> { %v1633_v0 = vadd.f32 %v1632_v34, %v1631_v63 }
 0x25e   : >> { %v1634_v1 = vadd.f32 %v4546_v52, %v1633_v0  }
 0x260   : >> { %v4547_v52 = vmov %v1634_v1  ;;  %v1635_v3 = vmul.f32 (%p974_p9), 0.0009765625, %v1634_v1 }
 0x262   : > { %v1636_v12 = vadd.f32 1e-05, %v1635_v3 }
 0x264   : > { %3085 = vrsqrt.f32 %v1636_v12 }
 0x26e   : > { %v4211_v21 = vpop.eup %3085 }
 0x26f LB: >> { %s2536_s20 = sshll.u32 %s3149_s19, 9  ;;  %s1643_s19 = sadd.s32 1, %s3149_s19   ;;  %s3149_s19 = sphi %s4213_s19, %s1643_s19  }
 0x270   : >> { %s4219_s21 = scalar_lea.vmem [#allocation2], %s2536_s20  ;;  %s4226_s23 = sshra.s32 %s2536_s20, 3 }
 0x271   : >> { %v1646_v8 = vld [vmem:[%s4219_s21] sm:$0xff]  ;;  %v1647_v55 = vld [vmem:[%s4219_s21 + $0x8] sm:$0xff]  ;;  %v1648_v38 = vld [vmem:[%s4219_s21 + $0x10] sm:$0xff]  ;;  %s2601_s24 = sshll.u32 %s4226_s23, 2  ;;  %p1640_p10 = scmp.ge.s32.totalorder %s1643_s19, 2  }
 0x272   : >> { %v1716_v33 = vsub.f32 %v1646_v8, %v3471_v60  ;;  %v1717_v50 = vsub.f32 %v1647_v55, %v3471_v60  ;;  %v1649_v10 = vld [vmem:[%s4219_s21 + $0x18] sm:$0xff]  ;;  %v1718_v30 = vsub.f32 %v1648_v38, %v3471_v60  ;;  %v1650_v25 = vld [vmem:[%s4219_s21 + $0x20] sm:$0xff]  ;;  %v1651_v49 = vld [vmem:[%s4219_s21 + $0x28] sm:$0xff]  ;;  %s4247_s25 = scalar_lea.vmem %s3203_s22, %s2601_s24 }
 0x273   : >> { %v1719_v11 = vsub.f32 %v1649_v10, %v3471_v60  ;;  %v1720_v41 = vsub.f32 %v1650_v25, %v3471_v60  ;;  %v1721_v24 = vsub.f32 %v1651_v49, %v3471_v60  ;;  %v1652_v28 = vld [vmem:[%s4219_s21 + $0x30] sm:$0xff]  ;;  %v1653_v20 = vld [vmem:[%s4219_s21 + $0x38] sm:$0xff]  ;;  %v1654_v57 = vld [vmem:[%s4219_s21 + $0x40] sm:$0xff] }
 0x274   : >> { %v1780_v39 = vmul.f32 %v4211_v21, %v1716_v33  ;;  %v1781_v22 = vmul.f32 %v4211_v21, %v1717_v50  ;;  %v1782_v36 = vmul.f32 %v4211_v21, %v1718_v30  ;;  %v1722_v23 = vsub.f32 %v1652_v28, %v3471_v60  ;;  %v1655_v47 = vld [vmem:[%s4219_s21 + $0x48] sm:$0xff]  ;;  %v1656_v26 = vld [vmem:[%s4219_s21 + $0x50] sm:$0xff]  ;;  %v1657_v7 = vld [vmem:[%s4219_s21 + $0x58] sm:$0xff] }
 0x275   : >> { %v1783_v51 = vmul.f32 %v4211_v21, %v1719_v11  ;;  %v1784_v27 = vmul.f32 %v4211_v21, %v1720_v41  ;;  %v1785_v45 = vmul.f32 %v4211_v21, %v1721_v24  ;;  %v1723_v29 = vsub.f32 %v1653_v20, %v3471_v60  ;;  %v1658_v43 = vld [vmem:[%s4219_s21 + $0x60] sm:$0xff]  ;;  %v1659_v62 = vld [vmem:[%s4219_s21 + $0x68] sm:$0xff]  ;;  %v1660_v52 = vld [vmem:[%s4219_s21 + $0x70] sm:$0xff] }
 0x276   : >> { %vm1844_vm9 = vcmp.ge.f32.partialorder %v1780_v39, 0.0  ;;  %vm1845_vm10 = vcmp.ge.f32.partialorder %v1781_v22, 0.0  ;;  %v1908_v31 = vmul.f32 0.2, %v1780_v39  ;;  %v1909_v17 = vmul.f32 0.2, %v1781_v22 }
 0x277   : >> { %vm1846_vm11 = vcmp.ge.f32.partialorder %v1782_v36, 0.0  ;;  %vm1847_vm12 = vcmp.ge.f32.partialorder %v1783_v51, 0.0  ;;  %v1910_v53 = vmul.f32 0.2, %v1782_v36  ;;  %v1911_v32 = vmul.f32 0.2, %v1783_v51 }
 0x278   : >> { %v1972_v18 = vsel %vm1844_vm9, %v1780_v39, %v1908_v31  ;;  %v1973_v44 = vsel %vm1845_vm10, %v1781_v22, %v1909_v17  ;;  %vm1848_vm13 = vcmp.ge.f32.partialorder %v1784_v27, 0.0  ;;  %vm1849_vm14 = vcmp.ge.f32.partialorder %v1785_v45, 0.0  ;;  %v1661_v50 = vld [vmem:[%s4219_s21 + $0x78] sm:$0xff]  ;;  %v1662_v49 = vld [vmem:[%s4219_s21 + $0x80] sm:$0xff] }
 0x279   : >> { %v2672_v15 = vpack.c.bf16 %v1973_v44, %v1972_v18  ;;  %v1974_v37 = vsel %vm1846_vm11, %v1782_v36, %v1910_v53  ;;  %v1975_v42 = vsel %vm1847_vm12, %v1783_v51, %v1911_v32  ;;  %v1912_v40 = vmul.f32 0.2, %v1784_v27  ;;  %v1663_v36 = vld [vmem:[%s4219_s21 + $0x88] sm:$0xff]  ;;  %v1665_v53 = vld [vmem:[%s4219_s21 + $0x98] sm:$0xff] }
 0x27a   : >> { %v2677_v48 = vpack.c.bf16 %v1975_v42, %v1974_v37  ;;  %v1913_v14 = vmul.f32 0.2, %v1785_v45  ;;  %v1786_v54 = vmul.f32 %v4211_v21, %v1722_v23  ;;  %v1787_v6 = vmul.f32 %v4211_v21, %v1723_v29  ;;  %v1664_v23 = vld [vmem:[%s4219_s21 + $0x90] sm:$0xff] }
 0x27b   : >> { %2673 = vst [vmem:[%s4247_s25] sm:$0xff] %v2672_v15   ;;  %v1976_v58 = vsel %vm1848_vm13, %v1784_v27, %v1912_v40  ;;  %v1724_v2 = vsub.f32 %v1654_v57, %v3471_v60  ;;  %v1725_v4 = vsub.f32 %v1655_v47, %v3471_v60  ;;  %v1726_v13 = vsub.f32 %v1656_v26, %v3471_v60  ;;  %v1666_v47 = vld [vmem:[%s4219_s21 + $0xa0] sm:$0xff]  ;;  %v1667_v26 = vld [vmem:[%s4219_s21 + $0xa8] sm:$0xff] }
 0x27c   : >> { %2829 = vst [vmem:[%s4247_s25 + $0x8] sm:$0xff] %v2677_v48   ;;  %v1977_v59 = vsel %vm1849_vm14, %v1785_v45, %v1913_v14  ;;  %vm1850_vm15 = vcmp.ge.f32.partialorder %v1786_v54, 0.0  ;;  %vm1851_vm0 = vcmp.ge.f32.partialorder %v1787_v6, 0.0  ;;  %v1914_v5 = vmul.f32 0.2, %v1786_v54 }
 0x27d   : >> { %v2682_v16 = vpack.c.bf16 %v1977_v59, %v1976_v58  ;;  %v1915_v9 = vmul.f32 0.2, %v1787_v6  ;;  %v1788_v56 = vmul.f32 %v4211_v21, %v1724_v2  ;;  %v1789_v19 = vmul.f32 %v4211_v21, %v1725_v4  ;;  %v1668_v4 = vld [vmem:[%s4219_s21 + $0xb0] sm:$0xff] }
 0x27e   : >> { %v1978_v46 = vsel %vm1850_vm15, %v1786_v54, %v1914_v5  ;;  %v1727_v35 = vsub.f32 %v1657_v7, %v3471_v60  ;;  %v1790_v61 = vmul.f32 %v4211_v21, %v1726_v13  ;;  %v1728_v63 = vsub.f32 %v1658_v43, %v3471_v60  ;;  %v1669_v7 = vld [vmem:[%s4219_s21 + $0xb8] sm:$0xff] }
 0x27f   : >> { %2830 = vst [vmem:[%s4247_s25 + $0x10] sm:$0xff] %v2682_v16   ;;  %v1979_v34 = vsel %vm1851_vm0, %v1787_v6, %v1915_v9  ;;  %vm1852_vm1 = vcmp.ge.f32.partialorder %v1788_v56, 0.0  ;;  %vm1853_vm5 = vcmp.ge.f32.partialorder %v1789_v19, 0.0  ;;  %v1916_v0 = vmul.f32 0.2, %v1788_v56 }
 0x280   : >> { %v2687_v1 = vpack.c.bf16 %v1979_v34, %v1978_v46  ;;  %v1917_v3 = vmul.f32 0.2, %v1789_v19  ;;  %v1791_v12 = vmul.f32 %v4211_v21, %v1727_v35  ;;  %vm1854_vm6 = vcmp.ge.f32.partialorder %v1790_v61, 0.0 }
 0x281   : >> { %v1980_v8 = vsel %vm1852_vm1, %v1788_v56, %v1916_v0  ;;  %v1918_v55 = vmul.f32 0.2, %v1790_v61  ;;  %v1729_v38 = vsub.f32 %v1659_v62, %v3471_v60  ;;  %v1792_v33 = vmul.f32 %v4211_v21, %v1728_v63  ;;  %v1671_v0 = vld [vmem:[%s4219_s21 + $0xc8] sm:$0xff] }
 0x282   : >> { %2831 = vst [vmem:[%s4247_s25 + $0x18] sm:$0xff] %v2687_v1   ;;  %v1981_v10 = vsel %vm1853_vm5, %v1789_v19, %v1917_v3  ;;  %vm1855_vm7 = vcmp.ge.f32.partialorder %v1791_v12, 0.0  ;;  %v1919_v30 = vmul.f32 0.2, %v1791_v12  ;;  %v1730_v25 = vsub.f32 %v1660_v52, %v3471_v60 }
 0x283   : >> { %v2692_v11 = vpack.c.bf16 %v1981_v10, %v1980_v8  ;;  %v1982_v41 = vsel %vm1854_vm6, %v1790_v61, %v1918_v55  ;;  %v1793_v24 = vmul.f32 %v4211_v21, %v1729_v38  ;;  %vm1856_vm2 = vcmp.ge.f32.partialorder %v1792_v33, 0.0  ;;  %v1670_v61 = vld [vmem:[%s4219_s21 + $0xc0] sm:$0xff]  ;;  %v1672_v38 = vld [vmem:[%s4219_s21 + $0xd0] sm:$0xff] }
 0x284   : >> { %v1983_v28 = vsel %vm1855_vm7, %v1791_v12, %v1919_v30  ;;  %v1920_v20 = vmul.f32 0.2, %v1792_v33  ;;  %v1731_v39 = vsub.f32 %v1661_v50, %v3471_v60  ;;  %v1794_v22 = vmul.f32 %v4211_v21, %v1730_v25  ;;  %v1673_v25 = vld [vmem:[%s4219_s21 + $0xd8] sm:$0xff] }
 0x285   : >> { %2832 = vst [vmem:[%s4247_s25 + $0x20] sm:$0xff] %v2692_v11   ;;  %v2697_v51 = vpack.c.bf16 %v1983_v28, %v1982_v41  ;;  %vm1857_vm3 = vcmp.ge.f32.partialorder %v1793_v24, 0.0  ;;  %v1921_v27 = vmul.f32 0.2, %v1793_v24  ;;  %v1732_v45 = vsub.f32 %v1662_v49, %v3471_v60  ;;  %v1674_v49 = vld [vmem:[%s4219_s21 + $0xe0] sm:$0xff]  ;;  %v1675_v11 = vld [vmem:[%s4219_s21 + $0xe8] sm:$0xff] }
 0x286   : >> { %v1984_v29 = vsel %vm1856_vm2, %v1792_v33, %v1920_v20  ;;  %v1795_v31 = vmul.f32 %v4211_v21, %v1731_v39  ;;  %vm1858_vm4 = vcmp.ge.f32.partialorder %v1794_v22, 0.0  ;;  %v1922_v17 = vmul.f32 0.2, %v1794_v22 }
 0x287   : >> { %2833 = vst [vmem:[%s4247_s25 + $0x28] sm:$0xff] %v2697_v51   ;;  %v1985_v32 = vsel %vm1857_vm3, %v1793_v24, %v1921_v27  ;;  %v1733_v18 = vsub.f32 %v1663_v36, %v3471_v60  ;;  %v1796_v44 = vmul.f32 %v4211_v21, %v1732_v45  ;;  %v1734_v57 = vsub.f32 %v1664_v23, %v3471_v60  ;;  %v1676_v45 = vld [vmem:[%s4219_s21 + $0xf0] sm:$0xff] }
 0x288   : >> { %v2702_v15 = vpack.c.bf16 %v1985_v32, %v1984_v29  ;;  %vm1859_vm8 = vcmp.ge.f32.partialorder %v1795_v31, 0.0  ;;  %v1923_v37 = vmul.f32 0.2, %v1795_v31  ;;  %v1986_v42 = vsel %vm1858_vm4, %v1794_v22, %v1922_v17 }
 0x289   : >> { %v1797_v40 = vmul.f32 %v4211_v21, %v1733_v18  ;;  %vm1860_vm9 = vcmp.ge.f32.partialorder %v1796_v44, 0.0  ;;  %v1924_v48 = vmul.f32 0.2, %v1796_v44  ;;  %v1735_v14 = vsub.f32 %v1665_v53, %v3471_v60 }
 0x28a   : >> { %2834 = vst [vmem:[%s4247_s25 + $0x30] sm:$0xff] %v2702_v15   ;;  %v1987_v54 = vsel %vm1859_vm8, %v1795_v31, %v1923_v37  ;;  %v1798_v6 = vmul.f32 %v4211_v21, %v1734_v57  ;;  %v1736_v58 = vsub.f32 %v1666_v47, %v3471_v60  ;;  %v1737_v2 = vsub.f32 %v1667_v26, %v3471_v60  ;;  %v1677_v26 = vld [vmem:[%s4219_s21 + $0xf8] sm:$0xff] }
 0x28b   : >> { %v2707_v13 = vpack.c.bf16 %v1987_v54, %v1986_v42  ;;  %vm1861_vm10 = vcmp.ge.f32.partialorder %v1797_v40, 0.0  ;;  %v1925_v43 = vmul.f32 0.2, %v1797_v40  ;;  %v1988_v59 = vsel %vm1860_vm9, %v1796_v44, %v1924_v48  ;;  %v1679_v48 = vld [vmem:[%s4219_s21 + $0x108] sm:$0xff] }
 0x28c   : >> { %v1799_v5 = vmul.f32 %v4211_v21, %v1735_v14  ;;  %vm1862_vm11 = vcmp.ge.f32.partialorder %v1798_v6, 0.0  ;;  %v1926_v16 = vmul.f32 0.2, %v1798_v6  ;;  %v1800_v9 = vmul.f32 %v4211_v21, %v1736_v58 }
 0x28d   : >> { %2835 = vst [vmem:[%s4247_s25 + $0x38] sm:$0xff] %v2707_v13   ;;  %v1989_v56 = vsel %vm1861_vm10, %v1797_v40, %v1925_v43  ;;  %v1801_v19 = vmul.f32 %v4211_v21, %v1737_v2  ;;  %v1738_v46 = vsub.f32 %v1668_v4, %v3471_v60  ;;  %v1739_v35 = vsub.f32 %v1669_v7, %v3471_v60  ;;  %v1678_v40 = vld [vmem:[%s4219_s21 + $0x100] sm:$0xff] }
 0x28e   : >> { %v2712_v62 = vpack.c.bf16 %v1989_v56, %v1988_v59  ;;  %vm1863_vm12 = vcmp.ge.f32.partialorder %v1799_v5, 0.0  ;;  %v1927_v63 = vmul.f32 0.2, %v1799_v5  ;;  %v1990_v34 = vsel %vm1862_vm11, %v1798_v6, %v1926_v16 }
 0x28f   : >> { %vm1864_vm13 = vcmp.ge.f32.partialorder %v1800_v9, 0.0  ;;  %vm1865_vm14 = vcmp.ge.f32.partialorder %v1801_v19, 0.0  ;;  %v1928_v52 = vmul.f32 0.2, %v1800_v9  ;;  %v1929_v1 = vmul.f32 0.2, %v1801_v19 }
 0x290   : >> { %2836 = vst [vmem:[%s4247_s25 + $0x40] sm:$0xff] %v2712_v62   ;;  %v1991_v3 = vsel %vm1863_vm12, %v1799_v5, %v1927_v63  ;;  %v1802_v12 = vmul.f32 %v4211_v21, %v1738_v46  ;;  %v1803_v8 = vmul.f32 %v4211_v21, %v1739_v35  ;;  %v1740_v55 = vsub.f32 %v1670_v61, %v3471_v60  ;;  %v1680_v5 = vld [vmem:[%s4219_s21 + $0x110] sm:$0xff]  ;;  %v1681_v46 = vld [vmem:[%s4219_s21 + $0x118] sm:$0xff] }
 0x291   : >> { %v2717_v33 = vpack.c.bf16 %v1991_v3, %v1990_v34  ;;  %v1992_v50 = vsel %vm1864_vm13, %v1800_v9, %v1928_v52  ;;  %v1993_v10 = vsel %vm1865_vm14, %v1801_v19, %v1929_v1  ;;  %v1741_v30 = vsub.f32 %v1671_v0, %v3471_v60  ;;  %v1682_v52 = vld [vmem:[%s4219_s21 + $0x120] sm:$0xff] }
 0x292   : >> { %v2722_v41 = vpack.c.bf16 %v1993_v10, %v1992_v50  ;;  %vm1866_vm15 = vcmp.ge.f32.partialorder %v1802_v12, 0.0  ;;  %vm1867_vm0 = vcmp.ge.f32.partialorder %v1803_v8, 0.0  ;;  %v1930_v24 = vmul.f32 0.2, %v1802_v12 }
 0x293   : >> { %2837 = vst [vmem:[%s4247_s25 + $0x48] sm:$0xff] %v2717_v33   ;;  %v1931_v28 = vmul.f32 0.2, %v1803_v8  ;;  %v1804_v20 = vmul.f32 %v4211_v21, %v1740_v55  ;;  %v1805_v39 = vmul.f32 %v4211_v21, %v1741_v30  ;;  %v1742_v22 = vsub.f32 %v1672_v38, %v3471_v60 }
 0x294   : >> { %2838 = vst [vmem:[%s4247_s25 + $0x50] sm:$0xff] %v2722_v41   ;;  %v1994_v36 = vsel %vm1866_vm15, %v1802_v12, %v1930_v24  ;;  %v1743_v23 = vsub.f32 %v1673_v25, %v3471_v60  ;;  %v1744_v51 = vsub.f32 %v1674_v49, %v3471_v60  ;;  %v1745_v27 = vsub.f32 %v1675_v11, %v3471_v60  ;;  %v1684_v49 = vld [vmem:[%s4219_s21 + $0x130] sm:$0xff]  ;;  %v1685_v11 = vld [vmem:[%s4219_s21 + $0x138] sm:$0xff] }
 0x295   : >> { %v1995_v29 = vsel %vm1867_vm0, %v1803_v8, %v1931_v28  ;;  %vm1868_vm1 = vcmp.ge.f32.partialorder %v1804_v20, 0.0  ;;  %vm1869_vm5 = vcmp.ge.f32.partialorder %v1805_v39, 0.0  ;;  %v1932_v31 = vmul.f32 0.2, %v1804_v20  ;;  %v1683_v8 = vld [vmem:[%s4219_s21 + $0x128] sm:$0xff] }
 0x296   : >> { %v2727_v17 = vpack.c.bf16 %v1995_v29, %v1994_v36  ;;  %v1933_v53 = vmul.f32 0.2, %v1805_v39  ;;  %v1806_v32 = vmul.f32 %v4211_v21, %v1742_v22  ;;  %v1807_v18 = vmul.f32 %v4211_v21, %v1743_v23  ;;  %v1687_v29 = vld [vmem:[%s4219_s21 + $0x148] sm:$0xff] }
 0x297   : >> { %v1996_v44 = vsel %vm1868_vm1, %v1804_v20, %v1932_v31  ;;  %v1808_v57 = vmul.f32 %v4211_v21, %v1744_v51  ;;  %v1809_v47 = vmul.f32 %v4211_v21, %v1745_v27  ;;  %v1746_v15 = vsub.f32 %v1676_v45, %v3471_v60  ;;  %v1686_v20 = vld [vmem:[%s4219_s21 + $0x140] sm:$0xff] }
 0x298   : >> { %2839 = vst [vmem:[%s4247_s25 + $0x58] sm:$0xff] %v2727_v17   ;;  %v1997_v37 = vsel %vm1869_vm5, %v1805_v39, %v1933_v53  ;;  %vm1870_vm6 = vcmp.ge.f32.partialorder %v1806_v32, 0.0  ;;  %vm1871_vm7 = vcmp.ge.f32.partialorder %v1807_v18, 0.0  ;;  %v1934_v42 = vmul.f32 0.2, %v1806_v32 }
 0x299   : >> { %v2732_v14 = vpack.c.bf16 %v1997_v37, %v1996_v44  ;;  %v1935_v54 = vmul.f32 0.2, %v1807_v18  ;;  %vm1872_vm2 = vcmp.ge.f32.partialorder %v1808_v57, 0.0  ;;  %vm1873_vm3 = vcmp.ge.f32.partialorder %v1809_v47, 0.0 }
 0x29a   : >> { %v1998_v6 = vsel %vm1870_vm6, %v1806_v32, %v1934_v42  ;;  %v1936_v58 = vmul.f32 0.2, %v1808_v57  ;;  %v1937_v2 = vmul.f32 0.2, %v1809_v47  ;;  %v1747_v4 = vsub.f32 %v1677_v26, %v3471_v60  ;;  %v1688_v32 = vld [vmem:[%s4219_s21 + $0x150] sm:$0xff]  ;;  %v1689_v42 = vld [vmem:[%s4219_s21 + $0x158] sm:$0xff] }
 0x29b   : >> { %2840 = vst [vmem:[%s4247_s25 + $0x60] sm:$0xff] %v2732_v14   ;;  %v1999_v7 = vsel %vm1871_vm7, %v1807_v18, %v1935_v54  ;;  %v1810_v13 = vmul.f32 %v4211_v21, %v1746_v15  ;;  %v1748_v43 = vsub.f32 %v1678_v40, %v3471_v60  ;;  %v1749_v59 = vsub.f32 %v1679_v48, %v3471_v60 }
 0x29c   : >> { %v2737_v16 = vpack.c.bf16 %v1999_v7, %v1998_v6  ;;  %v2000_v9 = vsel %vm1872_vm2, %v1808_v57, %v1936_v58  ;;  %v2001_v56 = vsel %vm1873_vm3, %v1809_v47, %v1937_v2  ;;  %v1811_v19 = vmul.f32 %v4211_v21, %v1747_v4  ;;  %v1690_v2 = vld [vmem:[%s4219_s21 + $0x160] sm:$0xff] }
 0x29d   : >> { %v2742_v35 = vpack.c.bf16 %v2001_v56, %v2000_v9  ;;  %vm1874_vm4 = vcmp.ge.f32.partialorder %v1810_v13, 0.0  ;;  %v1938_v61 = vmul.f32 0.2, %v1810_v13  ;;  %v1812_v62 = vmul.f32 %v4211_v21, %v1748_v43  ;;  %v1691_v43 = vld [vmem:[%s4219_s21 + $0x168] sm:$0xff] }
 0x29e   : >> { %2841 = vst [vmem:[%s4247_s25 + $0x68] sm:$0xff] %v2737_v16   ;;  %vm1875_vm8 = vcmp.ge.f32.partialorder %v1811_v19, 0.0  ;;  %v1939_v63 = vmul.f32 0.2, %v1811_v19  ;;  %v1813_v34 = vmul.f32 %v4211_v21, %v1749_v59  ;;  %v1750_v0 = vsub.f32 %v1680_v5, %v3471_v60 }
 0x29f   : >> { %2842 = vst [vmem:[%s4247_s25 + $0x70] sm:$0xff] %v2742_v35   ;;  %v2002_v1 = vsel %vm1874_vm4, %v1810_v13, %v1938_v61  ;;  %vm1876_vm9 = vcmp.ge.f32.partialorder %v1812_v62, 0.0  ;;  %v1940_v3 = vmul.f32 0.2, %v1812_v62  ;;  %v1751_v12 = vsub.f32 %v1681_v46, %v3471_v60  ;;  %v1692_v35 = vld [vmem:[%s4219_s21 + $0x170] sm:$0xff]  ;;  %v1693_v61 = vld [vmem:[%s4219_s21 + $0x178] sm:$0xff] }
 0x2a0   : >> { %v2003_v55 = vsel %vm1875_vm8, %v1811_v19, %v1939_v63  ;;  %vm1877_vm10 = vcmp.ge.f32.partialorder %v1813_v34, 0.0  ;;  %v1941_v38 = vmul.f32 0.2, %v1813_v34  ;;  %v1814_v33 = vmul.f32 %v4211_v21, %v1750_v0  ;;  %v1694_v0 = vld [vmem:[%s4219_s21 + $0x180] sm:$0xff] }
 0x2a1   : >> { %v2747_v50 = vpack.c.bf16 %v2003_v55, %v2002_v1  ;;  %v2004_v10 = vsel %vm1876_vm9, %v1812_v62, %v1940_v3  ;;  %v1815_v30 = vmul.f32 %v4211_v21, %v1751_v12  ;;  %v1752_v25 = vsub.f32 %v1682_v52, %v3471_v60 }
 0x2a2   : >> { %v2005_v41 = vsel %vm1877_vm10, %v1813_v34, %v1941_v38  ;;  %vm1878_vm11 = vcmp.ge.f32.partialorder %v1814_v33, 0.0  ;;  %v1942_v24 = vmul.f32 0.2, %v1814_v33  ;;  %v1753_v28 = vsub.f32 %v1683_v8, %v3471_v60 }
 0x2a3   : >> { %2843 = vst [vmem:[%s4247_s25 + $0x78] sm:$0xff] %v2747_v50   ;;  %v2752_v39 = vpack.c.bf16 %v2005_v41, %v2004_v10  ;;  %vm1879_vm12 = vcmp.ge.f32.partialorder %v1815_v30, 0.0  ;;  %v1943_v22 = vmul.f32 0.2, %v1815_v30  ;;  %v1816_v36 = vmul.f32 %v4211_v21, %v1752_v25  ;;  %v1696_v25 = vld [vmem:[%s4219_s21 + $0x190] sm:$0xff] }
 0x2a4   : >> { %v2006_v23 = vsel %vm1878_vm11, %v1814_v33, %v1942_v24  ;;  %v1817_v51 = vmul.f32 %v4211_v21, %v1753_v28  ;;  %v1754_v27 = vsub.f32 %v1684_v49, %v3471_v60  ;;  %v1755_v45 = vsub.f32 %v1685_v11, %v3471_v60  ;;  %v1695_v33 = vld [vmem:[%s4219_s21 + $0x188] sm:$0xff] }
 0x2a5   : >> { %2844 = vst [vmem:[%s4247_s25 + $0x80] sm:$0xff] %v2752_v39   ;;  %v2007_v31 = vsel %vm1879_vm12, %v1815_v30, %v1943_v22  ;;  %vm1880_vm13 = vcmp.ge.f32.partialorder %v1816_v36, 0.0  ;;  %v1944_v17 = vmul.f32 0.2, %v1816_v36  ;;  %v1756_v53 = vsub.f32 %v1686_v20, %v3471_v60  ;;  %v1697_v22 = vld [vmem:[%s4219_s21 + $0x198] sm:$0xff] }
 0x2a6   : >> { %v2757_v18 = vpack.c.bf16 %v2007_v31, %v2006_v23  ;;  %vm1881_vm14 = vcmp.ge.f32.partialorder %v1817_v51, 0.0  ;;  %v1945_v44 = vmul.f32 0.2, %v1817_v51  ;;  %v1818_v57 = vmul.f32 %v4211_v21, %v1754_v27  ;;  %v1698_v31 = vld [vmem:[%s4219_s21 + $0x1a0] sm:$0xff] }
 0x2a7   : >> { %v2008_v47 = vsel %vm1880_vm13, %v1816_v36, %v1944_v17  ;;  %v1819_v26 = vmul.f32 %v4211_v21, %v1755_v45  ;;  %v1757_v15 = vsub.f32 %v1687_v29, %v3471_v60  ;;  %v1820_v37 = vmul.f32 %v4211_v21, %v1756_v53 }
 0x2a8   : >> { %2845 = vst [vmem:[%s4247_s25 + $0x88] sm:$0xff] %v2757_v18   ;;  %v2009_v40 = vsel %vm1881_vm14, %v1817_v51, %v1945_v44  ;;  %vm1882_vm15 = vcmp.ge.f32.partialorder %v1818_v57, 0.0  ;;  %v1946_v48 = vmul.f32 0.2, %v1818_v57  ;;  %v1758_v14 = vsub.f32 %v1688_v32, %v3471_v60  ;;  %v1699_v18 = vld [vmem:[%s4219_s21 + $0x1a8] sm:$0xff] }
 0x2a9   : >> { %v2762_v54 = vpack.c.bf16 %v2009_v40, %v2008_v47  ;;  %vm1883_vm0 = vcmp.ge.f32.partialorder %v1819_v26, 0.0  ;;  %v1947_v6 = vmul.f32 0.2, %v1819_v26  ;;  %v1821_v58 = vmul.f32 %v4211_v21, %v1757_v15  ;;  %v1700_v40 = vld [vmem:[%s4219_s21 + $0x1b0] sm:$0xff] }
 0x2aa   : >> { %v2010_v4 = vsel %vm1882_vm15, %v1818_v57, %v1946_v48  ;;  %vm1884_vm1 = vcmp.ge.f32.partialorder %v1820_v37, 0.0  ;;  %v1948_v7 = vmul.f32 0.2, %v1820_v37  ;;  %v1759_v13 = vsub.f32 %v1689_v42, %v3471_v60  ;;  %v1701_v48 = vld [vmem:[%s4219_s21 + $0x1b8] sm:$0xff] }
 0x2ab   : >> { %2846 = vst [vmem:[%s4247_s25 + $0x90] sm:$0xff] %v2762_v54   ;;  %v2011_v59 = vsel %vm1883_vm0, %v1819_v26, %v1947_v6  ;;  %vm1885_vm5 = vcmp.ge.f32.partialorder %v1821_v58, 0.0  ;;  %v1949_v5 = vmul.f32 0.2, %v1821_v58  ;;  %v1822_v16 = vmul.f32 %v4211_v21, %v1758_v14 }
 0x2ac   : >> { %v2767_v9 = vpack.c.bf16 %v2011_v59, %v2010_v4  ;;  %v2012_v56 = vsel %vm1884_vm1, %v1820_v37, %v1948_v7  ;;  %v1823_v19 = vmul.f32 %v4211_v21, %v1759_v13  ;;  %v1760_v46 = vsub.f32 %v1690_v2, %v3471_v60 }
 0x2ad   : >> { %v2013_v62 = vsel %vm1885_vm5, %v1821_v58, %v1949_v5  ;;  %vm1886_vm6 = vcmp.ge.f32.partialorder %v1822_v16, 0.0  ;;  %v1950_v63 = vmul.f32 0.2, %v1822_v16  ;;  %v1761_v34 = vsub.f32 %v1691_v43, %v3471_v60  ;;  %v1702_v58 = vld [vmem:[%s4219_s21 + $0x1c0] sm:$0xff] }
 0x2ae   : >> { %2847 = vst [vmem:[%s4247_s25 + $0x98] sm:$0xff] %v2767_v9   ;;  %v2772_v52 = vpack.c.bf16 %v2013_v62, %v2012_v56  ;;  %vm1887_vm7 = vcmp.ge.f32.partialorder %v1823_v19, 0.0  ;;  %v1951_v1 = vmul.f32 0.2, %v1823_v19  ;;  %v1824_v3 = vmul.f32 %v4211_v21, %v1760_v46  ;;  %v1704_v46 = vld [vmem:[%s4219_s21 + $0x1d0] sm:$0xff] }
 0x2af   : >> { %v2014_v12 = vsel %vm1886_vm6, %v1822_v16, %v1950_v63  ;;  %v1825_v8 = vmul.f32 %v4211_v21, %v1761_v34  ;;  %v1762_v55 = vsub.f32 %v1692_v35, %v3471_v60  ;;  %v1763_v38 = vsub.f32 %v1693_v61, %v3471_v60  ;;  %v1703_v16 = vld [vmem:[%s4219_s21 + $0x1c8] sm:$0xff] }
 0x2b0   : >> { %2848 = vst [vmem:[%s4247_s25 + $0xa0] sm:$0xff] %v2772_v52   ;;  %v2015_v50 = vsel %vm1887_vm7, %v1823_v19, %v1951_v1  ;;  %vm1888_vm2 = vcmp.ge.f32.partialorder %v1824_v3, 0.0  ;;  %v1952_v10 = vmul.f32 0.2, %v1824_v3  ;;  %v1764_v30 = vsub.f32 %v1694_v0, %v3471_v60  ;;  %v1705_v1 = vld [vmem:[%s4219_s21 + $0x1d8] sm:$0xff] }
 0x2b1   : >> { %v2777_v49 = vpack.c.bf16 %v2015_v50, %v2014_v12  ;;  %vm1889_vm3 = vcmp.ge.f32.partialorder %v1825_v8, 0.0  ;;  %v1953_v11 = vmul.f32 0.2, %v1825_v8  ;;  %v1826_v41 = vmul.f32 %v4211_v21, %v1762_v55  ;;  %v1706_v50 = vld [vmem:[%s4219_s21 + $0x1e0] sm:$0xff] }
 0x2b2   : >> { %v2016_v24 = vsel %vm1888_vm2, %v1824_v3, %v1952_v10  ;;  %v1827_v28 = vmul.f32 %v4211_v21, %v1763_v38  ;;  %v1765_v20 = vsub.f32 %v1695_v33, %v3471_v60  ;;  %v1828_v39 = vmul.f32 %v4211_v21, %v1764_v30 }
 0x2b3   : >> { %2849 = vst [vmem:[%s4247_s25 + $0xa8] sm:$0xff] %v2777_v49   ;;  %v2017_v36 = vsel %vm1889_vm3, %v1825_v8, %v1953_v11  ;;  %vm1890_vm4 = vcmp.ge.f32.partialorder %v1826_v41, 0.0  ;;  %v1954_v23 = vmul.f32 0.2, %v1826_v41  ;;  %v1766_v51 = vsub.f32 %v1696_v25, %v3471_v60  ;;  %v1707_v49 = vld [vmem:[%s4219_s21 + $0x1e8] sm:$0xff] }
 0x2b4   : >> { %v2782_v27 = vpack.c.bf16 %v2017_v36, %v2016_v24  ;;  %vm1891_vm8 = vcmp.ge.f32.partialorder %v1827_v28, 0.0  ;;  %v1955_v45 = vmul.f32 0.2, %v1827_v28  ;;  %v1829_v29 = vmul.f32 %v4211_v21, %v1765_v20  ;;  %v1708_v36 = vld [vmem:[%s4219_s21 + $0x1f0] sm:$0xff] }
 0x2b5   : >> { %v2018_v17 = vsel %vm1890_vm4, %v1826_v41, %v1954_v23  ;;  %vm1892_vm9 = vcmp.ge.f32.partialorder %v1828_v39, 0.0  ;;  %v1956_v53 = vmul.f32 0.2, %v1828_v39  ;;  %v1767_v32 = vsub.f32 %v1697_v22, %v3471_v60  ;;  %v1709_v23 = vld [vmem:[%s4219_s21 + $0x1f8] sm:$0xff] }
 0x2b6   : >> { %2850 = vst [vmem:[%s4247_s25 + $0xb0] sm:$0xff] %v2782_v27   ;;  %v2019_v44 = vsel %vm1891_vm8, %v1827_v28, %v1955_v45  ;;  %vm1893_vm10 = vcmp.ge.f32.partialorder %v1829_v29, 0.0  ;;  %v1957_v57 = vmul.f32 0.2, %v1829_v29  ;;  %v1830_v47 = vmul.f32 %v4211_v21, %v1766_v51 }
 0x2b7   : >> { %v2787_v26 = vpack.c.bf16 %v2019_v44, %v2018_v17  ;;  %v2020_v15 = vsel %vm1892_vm9, %v1828_v39, %v1956_v53  ;;  %v1831_v37 = vmul.f32 %v4211_v21, %v1767_v32  ;;  %v1768_v42 = vsub.f32 %v1698_v31, %v3471_v60 }
 0x2b8   : >> { %v2021_v14 = vsel %vm1893_vm10, %v1829_v29, %v1957_v57  ;;  %vm1894_vm11 = vcmp.ge.f32.partialorder %v1830_v47, 0.0  ;;  %v1958_v54 = vmul.f32 0.2, %v1830_v47  ;;  %v1769_v6 = vsub.f32 %v1699_v18, %v3471_v60 }
 0x2b9   : >> { %2851 = vst [vmem:[%s4247_s25 + $0xb8] sm:$0xff] %v2787_v26   ;;  %v2792_v2 = vpack.c.bf16 %v2021_v14, %v2020_v15  ;;  %vm1895_vm12 = vcmp.ge.f32.partialorder %v1831_v37, 0.0  ;;  %v1959_v4 = vmul.f32 0.2, %v1831_v37  ;;  %v1832_v7 = vmul.f32 %v4211_v21, %v1768_v42 }
 0x2ba   : >> { %v2022_v13 = vsel %vm1894_vm11, %v1830_v47, %v1958_v54  ;;  %v1833_v43 = vmul.f32 %v4211_v21, %v1769_v6  ;;  %v1770_v59 = vsub.f32 %v1700_v40, %v3471_v60  ;;  %v1771_v5 = vsub.f32 %v1701_v48, %v3471_v60 }
 0x2bb   : >> { %2852 = vst [vmem:[%s4247_s25 + $0xc0] sm:$0xff] %v2792_v2   ;;  %v2023_v9 = vsel %vm1895_vm12, %v1831_v37, %v1959_v4  ;;  %vm1896_vm13 = vcmp.ge.f32.partialorder %v1832_v7, 0.0  ;;  %v1960_v56 = vmul.f32 0.2, %v1832_v7  ;;  %v1772_v19 = vsub.f32 %v1702_v58, %v3471_v60 }
 0x2bc   : >> { %v2797_v35 = vpack.c.bf16 %v2023_v9, %v2022_v13  ;;  %vm1897_vm14 = vcmp.ge.f32.partialorder %v1833_v43, 0.0  ;;  %v1961_v61 = vmul.f32 0.2, %v1833_v43  ;;  %v1834_v62 = vmul.f32 %v4211_v21, %v1770_v59 }
 0x2bd   : >> { %v2024_v63 = vsel %vm1896_vm13, %v1832_v7, %v1960_v56  ;;  %v1835_v34 = vmul.f32 %v4211_v21, %v1771_v5  ;;  %v1773_v0 = vsub.f32 %v1703_v16, %v3471_v60  ;;  %v1836_v52 = vmul.f32 %v4211_v21, %v1772_v19 }
 0x2be   : >> { %2853 = vst [vmem:[%s4247_s25 + $0xc8] sm:$0xff] %v2797_v35   ;;  %v2025_v3 = vsel %vm1897_vm14, %v1833_v43, %v1961_v61  ;;  %vm1898_vm15 = vcmp.ge.f32.partialorder %v1834_v62, 0.0  ;;  %v1962_v12 = vmul.f32 0.2, %v1834_v62  ;;  %v1774_v8 = vsub.f32 %v1704_v46, %v3471_v60 }
 0x2bf   : >> { %v2802_v55 = vpack.c.bf16 %v2025_v3, %v2024_v63  ;;  %vm1899_vm0 = vcmp.ge.f32.partialorder %v1835_v34, 0.0  ;;  %v1963_v38 = vmul.f32 0.2, %v1835_v34  ;;  %v1837_v33 = vmul.f32 %v4211_v21, %v1773_v0 }
 0x2c0   : >> { %v2026_v10 = vsel %vm1898_vm15, %v1834_v62, %v1962_v12  ;;  %vm1900_vm1 = vcmp.ge.f32.partialorder %v1836_v52, 0.0  ;;  %v1964_v30 = vmul.f32 0.2, %v1836_v52  ;;  %v1775_v25 = vsub.f32 %v1705_v1, %v3471_v60 }
 0x2c1   : >> { %2854 = vst [vmem:[%s4247_s25 + $0xd0] sm:$0xff] %v2802_v55   ;;  %v2027_v11 = vsel %vm1899_vm0, %v1835_v34, %v1963_v38  ;;  %vm1901_vm5 = vcmp.ge.f32.partialorder %v1837_v33, 0.0  ;;  %v1965_v41 = vmul.f32 0.2, %v1837_v33  ;;  %v1838_v24 = vmul.f32 %v4211_v21, %v1774_v8 }
 0x2c2   : >> { %v2807_v28 = vpack.c.bf16 %v2027_v11, %v2026_v10  ;;  %v2028_v20 = vsel %vm1900_vm1, %v1836_v52, %v1964_v30  ;;  %v1839_v39 = vmul.f32 %v4211_v21, %v1775_v25  ;;  %v1776_v22 = vsub.f32 %v1706_v50, %v3471_v60 }
 0x2c3   : >> { %v2029_v51 = vsel %vm1901_vm5, %v1837_v33, %v1965_v41  ;;  %vm1902_vm6 = vcmp.ge.f32.partialorder %v1838_v24, 0.0  ;;  %v1966_v27 = vmul.f32 0.2, %v1838_v24  ;;  %v1777_v45 = vsub.f32 %v1707_v49, %v3471_v60 }
 0x2c4   : >> { %2855 = vst [vmem:[%s4247_s25 + $0xd8] sm:$0xff] %v2807_v28   ;;  %v2812_v29 = vpack.c.bf16 %v2029_v51, %v2028_v20  ;;  %vm1903_vm7 = vcmp.ge.f32.partialorder %v1839_v39, 0.0  ;;  %v1967_v31 = vmul.f32 0.2, %v1839_v39  ;;  %v1840_v17 = vmul.f32 %v4211_v21, %v1776_v22 }
 0x2c5   : >> { %v2030_v53 = vsel %vm1902_vm6, %v1838_v24, %v1966_v27  ;;  %v1841_v32 = vmul.f32 %v4211_v21, %v1777_v45  ;;  %v1778_v18 = vsub.f32 %v1708_v36, %v3471_v60  ;;  %v1779_v44 = vsub.f32 %v1709_v23, %v3471_v60 }
 0x2c6   : >> { %2856 = vst [vmem:[%s4247_s25 + $0xe0] sm:$0xff] %v2812_v29   ;;  %v2031_v57 = vsel %vm1903_vm7, %v1839_v39, %v1967_v31  ;;  %vm1904_vm2 = vcmp.ge.f32.partialorder %v1840_v17, 0.0  ;;  %v1968_v47 = vmul.f32 0.2, %v1840_v17 }
 0x2c7   : >> { %v2817_v26 = vpack.c.bf16 %v2031_v57, %v2030_v53  ;;  %vm1905_vm3 = vcmp.ge.f32.partialorder %v1841_v32, 0.0  ;;  %v1969_v15 = vmul.f32 0.2, %v1841_v32  ;;  %v1842_v37 = vmul.f32 %v4211_v21, %v1778_v18 }
 0x2c8   : >> { %v2032_v42 = vsel %vm1904_vm2, %v1840_v17, %v1968_v47  ;;  %v1843_v40 = vmul.f32 %v4211_v21, %v1779_v44 }
 0x2c9   : >> { %2857 = vst [vmem:[%s4247_s25 + $0xe8] sm:$0xff] %v2817_v26   ;;  %v2033_v48 = vsel %vm1905_vm3, %v1841_v32, %v1969_v15  ;;  %vm1906_vm4 = vcmp.ge.f32.partialorder %v1842_v37, 0.0  ;;  %v1970_v14 = vmul.f32 0.2, %v1842_v37  ;;  %1642 = sbr.rel (!%p1640_p10) target bundleno = 623 (0x26f), region = 95 }
 0x2ca   : >> { %v2822_v54 = vpack.c.bf16 %v2033_v48, %v2032_v42  ;;  %vm1907_vm8 = vcmp.ge.f32.partialorder %v1843_v40, 0.0  ;;  %v1971_v6 = vmul.f32 0.2, %v1843_v40 }
 0x2cb   : >> { %v2034_v58 = vsel %vm1906_vm4, %v1842_v37, %v1970_v14 }
 0x2cc   : >> { %2858 = vst [vmem:[%s4247_s25 + $0xf0] sm:$0xff] %v2822_v54   ;;  %v2035_v2 = vsel %vm1907_vm8, %v1843_v40, %v1971_v6 }
 0x2cd   : >> { %v2827_v4 = vpack.c.bf16 %v2035_v2, %v2034_v58 }
 0x2cf   : >> { %2859 = vst [vmem:[%s4247_s25 + $0xf8] sm:$0xff] %v2827_v4  }
 0x2d0 PF: > { %s12_s13 = sadd.s32 1, %s3137_s13   ;;  %s4548_s9 = smov %s3129_s11 }
 0x2d1   : > { %p9_p11 = scmp.ge.s32.totalorder %s12_s13, 6   ;;  %s4549_s10 = smov %s3133_s12 }
 0x2d2   : > { %s4550_s11 = smov %s4553_s14  ;;  %s4551_s12 = smov %s4557_s15 }
 0x2d3   :  { %11 = sbr.rel (!%p9_p11) target bundleno = 3 (0x3), region = 106 }

// kernel: discriminator_forward.13
= control target key start
LH: loop header
LB: loop body
LE: loop exit
PB: predicated region body
PF: predicated region fallthrough
CT: control target
= control target key end

     0   :  { %s1687_s9 = smov 0   ;;  %s1689_s10 = smov 0   ;;  %s2253_s0 = inlined_call_operand.vmem [shape: bf16[2,256,72], index: 0, kind: input, shape index: {}]   ;;  %s2254_s1 = inlined_call_operand.vmem [shape: bf16[72,128], index: 1, kind: input, shape index: {}]   ;;  %s2255_s2 = inlined_call_operand.vmem [shape: bf16[2,256,128], index: 2, kind: output, shape index: {}]  }
   0x1   :  { %s1691_s11 = smov 0  }
   0x2 LB: > { %s24_s12 = sadd.s32 1, %s1665_s10  ;;  %p1319_p0 = scmp.ge.s32.totalorder %s1669_s11, 1  ;;  %s1669_s11 = sphi %s1691_s11, %s12_s11   ;;  %s1665_s10 = sphi %s1689_s10, %s2271_s10   ;;  %s1661_s9 = sphi %s1687_s9, %s2270_s9  }
   0x3   : > { %p26_p1 = scmp.ge.s32.totalorder %s24_s12, 2  ;;  %p131_p2 = scmp.lt.s32.totalorder %s1669_s11, 3 }
   0x5   : > { %s2273_s12 = smov (%p26_p1, %s24_s12), 0  ;;  %p132_p3 = pnand %p1319_p0, %p131_p2 }
   0x6   : > { %v1624_v0 = vld [vmem:[%s2254_s1] sm:$0xff] (!%p132_p3)   ;;  %v1625_v1 = vld [vmem:[%s2254_s1 + $0x8] sm:$0xff] (!%p132_p3)   ;;  %p158_p4 = scmp.lt.s32.totalorder (!%p132_p3), %s1661_s9, 1  ;;  %v1626_v2 = vld [vmem:[%s2254_s1 + $0x10] sm:$0xff] (!%p132_p3)   ;;  %vm326_vm0 = vcmask (!%p132_p3), 588800   ;;  %vm375_vm1 = vcmask (!%p132_p3), 1043456  }
   0x7   : > { %135 = sbr.rel (%p132_p3) target bundleno = 465 (0x1d1), region = 28  ;;  %1545 = vmatprep.subr.bf16.mxu0 (!%p132_p3), %v1624_v0  ;;  %1587 = vmatprep.subr.bf16.mxu1 (!%p132_p3), %v1624_v0  ;;  %v1627_v4 = vld [vmem:[%s2254_s1 + $0x18] sm:$0xff] (!%p132_p3)   ;;  %v1628_v5 = vld [vmem:[%s2254_s1 + $0x20] ss:$0 sps:$4 sm:$0xff] (!%p132_p3)   ;;  %v1671_v22 = vmov (!%p132_p3), 0.0  }
   0x8   : > { %1546 = vmatpush3.bf16.msra.mxu0 (!%p132_p3), %v1624_v0  ;;  %1592 = vmatpush3.bf16.msra.mxu1 (!%p132_p3), %v1624_v0  ;;  %v377_v7 = vsel (!%p132_p3), %vm375_vm1, %v1628_v5, 0  ;;  %177 = vst [vmem:[#allocation3] sm:$0x1] (!%p132_p3), %v1671_v22 }
   0x9   : > { %1547 = vmatprep.subr.bf16.mxu0 (!%p132_p3), %v1625_v1  ;;  %1588 = vmatprep.subr.bf16.mxu1 (!%p132_p3), %v1625_v1 }
   0xc   : > { %1548 = vmatpush3.bf16.msra.mxu0 (!%p132_p3), %v1625_v1  ;;  %1593 = vmatpush3.bf16.msra.mxu1 (!%p132_p3), %v1625_v1 }
   0xd   : > { %1549 = vmatprep.subr.bf16.mxu0 (!%p132_p3), %v1626_v2  ;;  %1589 = vmatprep.subr.bf16.mxu1 (!%p132_p3), %v1626_v2 }
   0xe   : > { %s2275_s9 = smov (!%p158_p4, %s1661_s9), 1 }
   0xf   : > { %s1395_s19 = sshll.u32 %s2275_s9, 7 }
  0x10   : > { %s1722_s22 = scalar_lea.vmem %s2253_s0, %s1395_s19  ;;  %1550 = vmatpush3.bf16.msra.mxu0 %v1626_v2  ;;  %1594 = vmatpush3.bf16.msra.mxu1 %v1626_v2  ;;  %s2206_s29 = scalar_lea.vmem %s2255_s2, %s1395_s19 }
  0x11   : > { %v1629_v3 = vld [vmem:[%s1722_s22] sm:$0xff]   ;;  %1551 = vmatprep.subr.bf16.mxu0 %v1627_v4  ;;  %1590 = vmatprep.subr.bf16.mxu1 %v1627_v4  ;;  %v1630_v8 = vld [vmem:[%s1722_s22 + $0x8] sm:$0xff]   ;;  %v1631_v9 = vld [vmem:[%s1722_s22 + $0x10] sm:$0xff]  }
  0x12   : > { %1555 = vmatprep.mubr.msk.bf16.mxu0 %vm326_vm0, %v1629_v3  ;;  %v1637_v6 = vld [vmem:[%s1722_s22 + $0x40] sm:$0xff]   ;;  %v1638_v10 = vld [vmem:[%s1722_s22 + $0x48] sm:$0xff]   ;;  %v1639_v11 = vld [vmem:[%s1722_s22 + $0x50] sm:$0xff]  }
  0x13   : > { %1571 = vmatprep.mubr.msk.bf16.mxu1 %vm326_vm0, %v1637_v6  ;;  %v1632_v12 = vld [vmem:[%s1722_s22 + $0x18] sm:$0xff]   ;;  %v1633_v14 = vld [vmem:[%s1722_s22 + $0x20] sm:$0xff]   ;;  %v1634_v16 = vld [vmem:[%s1722_s22 + $0x28] sm:$0xff]  }
  0x14   : > { %1552 = vmatpush3.bf16.msra.mxu0 %v1627_v4  ;;  %1595 = vmatpush3.bf16.msra.mxu1 %v1627_v4  ;;  %v1640_v13 = vld [vmem:[%s1722_s22 + $0x58] sm:$0xff]   ;;  %v1641_v15 = vld [vmem:[%s1722_s22 + $0x60] sm:$0xff]   ;;  %v1642_v17 = vld [vmem:[%s1722_s22 + $0x68] sm:$0xff]  }
  0x15   : > { %1597 = vmatprep.subr.msk.bf16.mxu0 %vm375_vm1, %v1628_v5  ;;  %1598 = vmatprep.subr.msk.bf16.mxu1 %vm375_vm1, %v1628_v5  ;;  %v1635_v18 = vld [vmem:[%s1722_s22 + $0x30] sm:$0xff]   ;;  %v1636_v20 = vld [vmem:[%s1722_s22 + $0x38] sm:$0xff]  }
  0x16   : > { %v1643_v19 = vld [vmem:[%s1722_s22 + $0x70] sm:$0xff]   ;;  %v1644_v21 = vld [vmem:[%s1722_s22 + $0x78] sm:$0xff]  }
  0x18   : > { %1554 = vmatpush3.bf16.msra.mxu0 %v377_v7  ;;  %1596 = vmatpush3.bf16.msra.mxu1 %v377_v7 }
  0x1b   : > { %1556 = vmatmul.mubr.msk.bf16.vlgmr.msra.gmra.mrb[0].mxu0 %vm326_vm0, %v1630_v8  ;;  %1572 = vmatmul.mubr.msk.bf16.vlgmr.msra.gmra.mrb[0].mxu1 %vm326_vm0, %v1638_v10 }
  0x1c   : > { %1559 = vmatprep.mubr.msk.bf16.mxu0 %vm326_vm0, %v1631_v9  ;;  %1575 = vmatprep.mubr.msk.bf16.mxu1 %vm326_vm0, %v1639_v11 }
  0x23   : > { %1560 = vmatmul.mubr.msk.bf16.gmra.mrb[4].mxu0 %vm326_vm0, %v1632_v12  ;;  %1576 = vmatmul.mubr.msk.bf16.gmra.mrb[4].mxu1 %vm326_vm0, %v1640_v13 }
  0x24   : > { %1563 = vmatprep.mubr.msk.bf16.mxu0 %vm326_vm0, %v1633_v14  ;;  %1579 = vmatprep.mubr.msk.bf16.mxu1 %vm326_vm0, %v1641_v15 }
  0x2b   : > { %1564 = vmatmul.mubr.msk.bf16.gmra.mrb[8].mxu0 %vm326_vm0, %v1634_v16  ;;  %1580 = vmatmul.mubr.msk.bf16.gmra.mrb[8].mxu1 %vm326_vm0, %v1642_v17 }
  0x2c   : > { %1567 = vmatprep.mubr.msk.bf16.mxu0 %vm326_vm0, %v1635_v18  ;;  %1583 = vmatprep.mubr.msk.bf16.mxu1 %vm326_vm0, %v1643_v19 }
  0x33   : > { %1568 = vmatmul.mubr.msk.bf16.gmra.mrb[12].mxu0 %vm326_vm0, %v1636_v20  ;;  %1584 = vmatmul.mubr.msk.bf16.gmra.mrb[12].mxu1 %vm326_vm0, %v1644_v21 }
  0xee   : > { %v1762_v23 = vpop.f32.mrb[0].mxu0  ;;  %v1764_v24 = vpop.f32.mrb[0].mxu1 }
  0xef   : > { %v1766_v25 = vpop.f32.mrb[1].mxu0  ;;  %v1768_v26 = vpop.f32.mrb[1].mxu1 }
  0xf0   : > { %v1770_v27 = vpop.f32.mrb[2].mxu0  ;;  %v1772_v28 = vpop.f32.mrb[2].mxu1 }
  0xf1   : > { %v1774_v29 = vpop.f32.mrb[3].mxu0  ;;  %v1776_v30 = vpop.f32.mrb[3].mxu1 }
  0xf2   : > { %v575_v31 = vadd.f32 %v1774_v29, %v1766_v25 }
  0xf4   : > { %v576_v32 = vadd.f32 %v1762_v23, %v575_v31 }
  0xf6   : > { %v1781_v33 = vpop.f32.mrb[4].mxu0  ;;  %v577_v34 = vadd.f32 %v1770_v27, %v576_v32  ;;  %v1784_v35 = vpop.f32.mrb[4].mxu1 }
  0xf7   : > { %v1786_v36 = vpop.f32.mrb[5].mxu0  ;;  %v1788_v37 = vpop.f32.mrb[5].mxu1 }
  0xf8   : > { %v578_v38 = vadd.f32 %v577_v34, %v1786_v36  ;;  %v1791_v39 = vpop.f32.mrb[6].mxu0  ;;  %v1793_v40 = vpop.f32.mrb[6].mxu1 }
  0xf9   : > { %v1795_v41 = vpop.f32.mrb[7].mxu0  ;;  %v1797_v42 = vpop.f32.mrb[7].mxu1 }
  0xfa   : > { %v579_v43 = vadd.f32 %v578_v38, %v1795_v41 }
  0xfc   : > { %v580_v44 = vadd.f32 %v1781_v33, %v579_v43  ;;  %v574_v43 = vld [vmem:[#allocation3] sm:$0x1] }
  0xfe   : > { %v1801_v45 = vpop.f32.mrb[8].mxu0  ;;  %v581_v46 = vadd.f32 %v1791_v39, %v580_v44  ;;  %v1804_v47 = vpop.f32.mrb[8].mxu1 }
  0xff   : > { %v1806_v48 = vpop.f32.mrb[9].mxu0  ;;  %v1808_v49 = vpop.f32.mrb[9].mxu1 }
 0x100   : > { %v582_v50 = vadd.f32 %v581_v46, %v1806_v48  ;;  %v1811_v51 = vpop.f32.mrb[10].mxu0  ;;  %v1813_v52 = vpop.f32.mrb[10].mxu1 }
 0x101   : > { %v1815_v53 = vpop.f32.mrb[11].mxu0  ;;  %v1817_v54 = vpop.f32.mrb[11].mxu1 }
 0x102   : > { %v583_v55 = vadd.f32 %v582_v50, %v1815_v53  ;;  %v652_v50 = vlaneseq }
 0x104   : > { %v584_v56 = vadd.f32 %v1801_v45, %v583_v55  ;;  %v653_v55 = vshrl.u32 %v652_v50, 7 }
 0x106   : > { %v1821_v57 = vpop.f32.mrb[12].mxu0  ;;  %v585_v58 = vadd.f32 %v1811_v51, %v584_v56  ;;  %v1824_v59 = vpop.f32.mrb[12].mxu1 }
 0x107   : > { %v1826_v60 = vpop.f32.mrb[13].mxu0  ;;  %v1828_v61 = vpop.f32.mrb[13].mxu1 }
 0x108   : > { %v586_v62 = vadd.f32 %v585_v58, %v1826_v60  ;;  %v1831_v63 = vpop.f32.mrb[14].mxu0  ;;  %v1833_v0 = vpop.f32.mrb[14].mxu1 }
 0x109   : > { %v1835_v1 = vpop.f32.mrb[15].mxu0  ;;  %v1837_v2 = vpop.f32.mrb[15].mxu1 }
 0x10a   : > { %v587_v3 = vadd.f32 %v586_v62, %v1835_v1  ;;  %v654_v62 = vsub.s32 0, %v653_v55 }
 0x10c   : > { %v588_v4 = vadd.f32 %v1821_v57, %v587_v3 }
 0x10e   : > { %v589_v5 = vadd.f32 %v1831_v63, %v588_v4 }
 0x110   : > { %v590_v6 = vadd.f32 %v589_v5, %v1768_v26 }
 0x112   : > { %v591_v7 = vadd.f32 %v590_v6, %v1776_v30 }
 0x114   : > { %v592_v8 = vadd.f32 %v1764_v24, %v591_v7 }
 0x116   : > { %v593_v9 = vadd.f32 %v1772_v28, %v592_v8 }
 0x118   : > { %v594_v10 = vadd.f32 %v593_v9, %v1788_v37 }
 0x11a   : > { %v595_v11 = vadd.f32 %v594_v10, %v1797_v42 }
 0x11c   : > { %v596_v12 = vadd.f32 %v1784_v35, %v595_v11 }
 0x11e   : > { %v597_v13 = vadd.f32 %v1793_v40, %v596_v12 }
 0x120   : > { %v598_v14 = vadd.f32 %v597_v13, %v1808_v49 }
 0x122   : > { %v599_v15 = vadd.f32 %v598_v14, %v1817_v54 }
 0x124   : > { %v600_v16 = vadd.f32 %v1804_v47, %v599_v15 }
 0x126   : > { %v601_v17 = vadd.f32 %v1813_v52, %v600_v16 }
 0x128   : > { %v602_v18 = vadd.f32 %v601_v17, %v1828_v61 }
 0x12a   : > { %v603_v19 = vadd.f32 %v602_v18, %v1837_v2 }
 0x12c   : > { %v604_v20 = vadd.f32 %v1824_v59, %v603_v19 }
 0x12e   : > { %v605_v21 = vadd.f32 %v1833_v0, %v604_v20 }
 0x130   : > { %v606_v22 = vrot.slane %v605_v21, 4 }
 0x132   : > { %v607_v31 = vadd.f32 %v606_v22, %v605_v21 }
 0x134   : > { %v608_v32 = vrot.slane %v607_v31, 2 }
 0x136   : > { %v609_v34 = vadd.f32 %v608_v32, %v607_v31 }
 0x138   : > { %v610_v38 = vrot.slane %v609_v34, 1 }
 0x13a   : > { %v611_v44 = vadd.f32 %v610_v38, %v609_v34 }
 0x13c   : > { %v612_v46 = vadd.f32 %v611_v44, %v574_v43 }
 0x13e   : > { %613 = vst [vmem:[#allocation3] sm:$0x1] %v612_v46 }
 0x145   : > { %v617_v56 = vld [vmem:[#allocation3] sm:$0x1] }
 0x146   : > { %v618_v58 = vmul.f32 0.00390625, %v617_v56 }
 0x148   : > { %v1858_v3 = vrot.slane %v618_v58, %v654_v62 }
 0x14a   : > { %v1862_v4 = vsub.f32 %v1766_v25, %v1858_v3  ;;  %v1866_v5 = vsub.f32 %v1774_v29, %v1858_v3  ;;  %v1870_v6 = vsub.f32 %v1762_v23, %v1858_v3  ;;  %v1878_v9 = vsub.f32 %v1770_v27, %v1858_v3 }
 0x14b   : > { %v1882_v25 = vsub.f32 %v1786_v36, %v1858_v3  ;;  %v1888_v23 = vsub.f32 %v1795_v41, %v1858_v3  ;;  %v1894_v27 = vsub.f32 %v1781_v33, %v1858_v3  ;;  %v1900_v14 = vsub.f32 %v1791_v39, %v1858_v3 }
 0x14c   : > { %v883_v7 = vmul.f32 %v1862_v4, %v1862_v4  ;;  %v884_v8 = vmul.f32 %v1866_v5, %v1866_v5  ;;  %v885_v29 = vmul.f32 %v1870_v6, %v1870_v6  ;;  %v886_v11 = vmul.f32 %v1878_v9, %v1878_v9 }
 0x14d   : > { %v887_v36 = vmul.f32 %v1882_v25, %v1882_v25  ;;  %v888_v41 = vmul.f32 %v1888_v23, %v1888_v23  ;;  %v1906_v16 = vsub.f32 %v1806_v48, %v1858_v3  ;;  %v889_v33 = vmul.f32 %v1894_v27, %v1894_v27 }
 0x14e   : > { %v915_v10 = vadd.f32 %v884_v8, %v883_v7  ;;  %v1912_v18 = vsub.f32 %v1815_v53, %v1858_v3  ;;  %v890_v39 = vmul.f32 %v1900_v14, %v1900_v14  ;;  %v1918_v20 = vsub.f32 %v1801_v45, %v1858_v3 }
 0x14f   : > { %v891_v48 = vmul.f32 %v1906_v16, %v1906_v16  ;;  %v1924_v22 = vsub.f32 %v1811_v51, %v1858_v3  ;;  %v1930_v32 = vsub.f32 %v1826_v60, %v1858_v3  ;;  %v1936_v38 = vsub.f32 %v1835_v1, %v1858_v3 }
 0x150   : > { %v916_v12 = vadd.f32 %v915_v10, %v885_v29  ;;  %v892_v53 = vmul.f32 %v1912_v18, %v1912_v18  ;;  %v893_v45 = vmul.f32 %v1918_v20, %v1918_v20  ;;  %v1942_v44 = vsub.f32 %v1821_v57, %v1858_v3 }
 0x151   : > { %v894_v51 = vmul.f32 %v1924_v22, %v1924_v22  ;;  %v895_v60 = vmul.f32 %v1930_v32, %v1930_v32  ;;  %v1948_v50 = vsub.f32 %v1831_v63, %v1858_v3  ;;  %v896_v1 = vmul.f32 %v1936_v38, %v1936_v38 }
 0x152   : > { %v917_v13 = vadd.f32 %v916_v12, %v886_v11  ;;  %v1954_v56 = vsub.f32 %v1768_v26, %v1858_v3  ;;  %v897_v57 = vmul.f32 %v1942_v44, %v1942_v44  ;;  %v674_v62 = vsub.f32 %v1776_v30, %v1858_v3 }
 0x153   : > { %v898_v7 = vmul.f32 %v1948_v50, %v1948_v50  ;;  %v675_v8 = vsub.f32 %v1764_v24, %v1858_v3  ;;  %v676_v26 = vsub.f32 %v1772_v28, %v1858_v3  ;;  %v679_v24 = vsub.f32 %v1784_v35, %v1858_v3 }
 0x154   : > { %v918_v15 = vadd.f32 %v917_v13, %v887_v36  ;;  %v899_v29 = vmul.f32 %v1954_v56, %v1954_v56  ;;  %v900_v11 = vmul.f32 %v674_v62, %v674_v62  ;;  %v677_v36 = vsub.f32 %v1788_v37, %v1858_v3 }
 0x155   : > { %v901_v30 = vmul.f32 %v675_v8, %v675_v8  ;;  %v680_v28 = vsub.f32 %v1793_v40, %v1858_v3  ;;  %v681_v37 = vsub.f32 %v1808_v49, %v1858_v3  ;;  %v683_v35 = vsub.f32 %v1804_v47, %v1858_v3 }
 0x156   : > { %v919_v17 = vadd.f32 %v918_v15, %v888_v41  ;;  %v678_v41 = vsub.f32 %v1797_v42, %v1858_v3  ;;  %v902_v15 = vmul.f32 %v676_v26, %v676_v26  ;;  %v682_v42 = vsub.f32 %v1817_v54, %v1858_v3 }
 0x157   : > { %v684_v40 = vsub.f32 %v1813_v52, %v1858_v3  ;;  %v685_v49 = vsub.f32 %v1828_v61, %v1858_v3  ;;  %v686_v54 = vsub.f32 %v1837_v2, %v1858_v3  ;;  %v687_v47 = vsub.f32 %v1824_v59, %v1858_v3 }
 0x158   : > { %v920_v19 = vadd.f32 %v919_v17, %v889_v33  ;;  %v903_v17 = vmul.f32 %v677_v36, %v677_v36  ;;  %v688_v52 = vsub.f32 %v1833_v0, %v1858_v3 }
 0x15a   : > { %v921_v21 = vadd.f32 %v920_v19, %v890_v39  ;;  %v904_v19 = vmul.f32 %v678_v41, %v678_v41  ;;  %v914_v61 = vmul.f32 %v688_v52, %v688_v52 }
 0x15c   : > { %v922_v31 = vadd.f32 %v921_v21, %v891_v48  ;;  %v905_v21 = vmul.f32 %v679_v24, %v679_v24 }
 0x15e   : > { %v923_v34 = vadd.f32 %v922_v31, %v892_v53  ;;  %v906_v31 = vmul.f32 %v680_v28, %v680_v28 }
 0x160   : > { %v924_v43 = vadd.f32 %v923_v34, %v893_v45  ;;  %v907_v34 = vmul.f32 %v681_v37, %v681_v37 }
 0x162   : > { %v925_v46 = vadd.f32 %v924_v43, %v894_v51  ;;  %v908_v43 = vmul.f32 %v682_v42, %v682_v42 }
 0x164   : > { %v926_v55 = vadd.f32 %v925_v46, %v895_v60  ;;  %v909_v46 = vmul.f32 %v683_v35, %v683_v35 }
 0x166   : > { %v927_v58 = vadd.f32 %v926_v55, %v896_v1  ;;  %v910_v55 = vmul.f32 %v684_v40, %v684_v40 }
 0x168   : > { %v928_v63 = vadd.f32 %v927_v58, %v897_v57  ;;  %v911_v58 = vmul.f32 %v685_v49, %v685_v49 }
 0x16a   : > { %v929_v10 = vadd.f32 %v928_v63, %v898_v7  ;;  %v912_v63 = vmul.f32 %v686_v54, %v686_v54 }
 0x16c   : > { %v930_v12 = vadd.f32 %v929_v10, %v899_v29  ;;  %v913_v10 = vmul.f32 %v687_v47, %v687_v47 }
 0x16e   : > { %v931_v13 = vadd.f32 %v930_v12, %v900_v11 }
 0x170   : > { %v932_v33 = vadd.f32 %v931_v13, %v901_v30 }
 0x172   : > { %v933_v39 = vadd.f32 %v932_v33, %v902_v15 }
 0x174   : > { %v934_v48 = vadd.f32 %v933_v39, %v903_v17 }
 0x176   : > { %v935_v53 = vadd.f32 %v934_v48, %v904_v19 }
 0x178   : > { %v936_v45 = vadd.f32 %v935_v53, %v905_v21 }
 0x17a   : > { %v937_v51 = vadd.f32 %v936_v45, %v906_v31 }
 0x17c   : > { %v938_v60 = vadd.f32 %v937_v51, %v907_v34 }
 0x17e   : > { %v939_v1 = vadd.f32 %v938_v60, %v908_v43 }
 0x180   : > { %v940_v57 = vadd.f32 %v939_v1, %v909_v46 }
 0x182   : > { %v941_v7 = vadd.f32 %v940_v57, %v910_v55 }
 0x184   : > { %v942_v29 = vadd.f32 %v941_v7, %v911_v58 }
 0x186   : > { %v943_v11 = vadd.f32 %v942_v29, %v912_v63 }
 0x188   : > { %v944_v12 = vadd.f32 %v943_v11, %v913_v10 }
 0x18a   : > { %v945_v30 = vadd.f32 %v944_v12, %v914_v61 }
 0x18c   : > { %v946_v13 = vrot.slane %v945_v30, 4 }
 0x18e   : > { %v947_v15 = vadd.f32 %v946_v13, %v945_v30 }
 0x190   : > { %v948_v2 = vrot.slane %v947_v15, 2 }
 0x192   : > { %v949_v33 = vadd.f32 %v948_v2, %v947_v15 }
 0x194   : > { %v950_v17 = vrot.slane %v949_v33, 1 }
 0x196   : > { %v951_v39 = vadd.f32 %v950_v17, %v949_v33 }
 0x198   : > { %v953_v19 = vmul.f32 0.00390625, %v951_v39 }
 0x19a   : > { %v954_v59 = vadd.f32 1e-05, %v953_v19 }
 0x19c   : > { %1645 = vrsqrt.f32 %v954_v59 }
 0x1a6   : > { %v1646_v48 = vpop.eup %1645 }
 0x1a7   : > { %v1993_v21 = vmul.f32 %v1646_v48, %v1954_v56  ;;  %v1995_v0 = vmul.f32 %v1646_v48, %v674_v62  ;;  %v1997_v3 = vmul.f32 %v1646_v48, %v675_v8  ;;  %v1999_v53 = vmul.f32 %v1646_v48, %v676_v26 }
 0x1a8   : > { %v2001_v31 = vmul.f32 %v1646_v48, %v677_v36  ;;  %v2003_v45 = vmul.f32 %v1646_v48, %v678_v41  ;;  %v2005_v34 = vmul.f32 %v1646_v48, %v679_v24  ;;  %v2007_v51 = vmul.f32 %v1646_v48, %v680_v28 }
 0x1a9   : > { %v2009_v43 = vmul.f32 %v1646_v48, %v681_v37  ;;  %v2011_v60 = vmul.f32 %v1646_v48, %v682_v42  ;;  %v2013_v56 = vmul.f32 %v1646_v48, %v683_v35  ;;  %v2015_v62 = vmul.f32 %v1646_v48, %v684_v40 }
 0x1aa   : > { %v2017_v8 = vmul.f32 %v1646_v48, %v685_v49  ;;  %v2019_v26 = vmul.f32 %v1646_v48, %v686_v54  ;;  %v2021_v36 = vmul.f32 %v1646_v48, %v687_v47  ;;  %v2023_v41 = vmul.f32 %v1646_v48, %v688_v52 }
 0x1ab   : > { %v956_v24 = vmul.f32 %v1646_v48, %v1862_v4  ;;  %v957_v28 = vmul.f32 %v1646_v48, %v1866_v5  ;;  %v958_v37 = vmul.f32 %v1646_v48, %v1870_v6  ;;  %v2029_v42 = vmul.f32 %v1646_v48, %v1878_v9 }
 0x1ac   : > { %v2032_v35 = vmul.f32 %v1646_v48, %v1882_v25  ;;  %v2035_v40 = vmul.f32 %v1646_v48, %v1888_v23  ;;  %v2038_v49 = vmul.f32 %v1646_v48, %v1894_v27  ;;  %v2041_v46 = vmul.f32 %v1646_v48, %v1900_v14 }
 0x1ad   : > { %v2044_v4 = vmul.f32 %v1646_v48, %v1906_v16  ;;  %v2047_v5 = vmul.f32 %v1646_v48, %v1912_v18  ;;  %v2050_v6 = vmul.f32 %v1646_v48, %v1918_v20  ;;  %v2053_v9 = vmul.f32 %v1646_v48, %v1924_v22 }
 0x1ae   : > { %v2056_v25 = vmul.f32 %v1646_v48, %v1930_v32  ;;  %v2059_v23 = vmul.f32 %v1646_v48, %v1936_v38  ;;  %v2062_v27 = vmul.f32 %v1646_v48, %v1942_v44  ;;  %v2065_v14 = vmul.f32 %v1646_v48, %v1948_v50 }
 0x1af   : > { %vm988_vm2 = vcmp.ge.f32.partialorder %v956_v24, 0.0  ;;  %vm989_vm3 = vcmp.ge.f32.partialorder %v957_v28, 0.0  ;;  %vm990_vm4 = vcmp.ge.f32.partialorder %v958_v37, 0.0  ;;  %vm991_vm5 = vcmp.ge.f32.partialorder %v2029_v42, 0.0 }
 0x1b0   : > { %vm992_vm6 = vcmp.ge.f32.partialorder %v2032_v35, 0.0  ;;  %vm993_vm7 = vcmp.ge.f32.partialorder %v2035_v40, 0.0  ;;  %vm994_vm8 = vcmp.ge.f32.partialorder %v2038_v49, 0.0  ;;  %vm997_vm11 = vcmp.ge.f32.partialorder %v2047_v5, 0.0 }
 0x1b1   : > { %vm998_vm12 = vcmp.ge.f32.partialorder %v2050_v6, 0.0  ;;  %v1020_v16 = vmul.f32 0.2, %v956_v24  ;;  %v1021_v18 = vmul.f32 0.2, %v957_v28  ;;  %vm1003_vm1 = vcmp.ge.f32.partialorder %v2065_v14, 0.0 }
 0x1b2   : > { %v1022_v20 = vmul.f32 0.2, %v958_v37  ;;  %v1023_v22 = vmul.f32 0.2, %v2029_v42  ;;  %v1024_v32 = vmul.f32 0.2, %v2032_v35 }
 0x1b3   : > { %v1025_v38 = vmul.f32 0.2, %v2035_v40  ;;  %vm1008_vm13 = vcmp.ge.f32.partialorder %v2001_v31, 0.0  ;;  %v1026_v44 = vmul.f32 0.2, %v2038_v49  ;;  %v2093_v54 = vsel %vm988_vm2, %v956_v24, %v1020_v16 }
 0x1b4   : > { %v1027_v50 = vmul.f32 0.2, %v2041_v46  ;;  %v1028_v1 = vmul.f32 0.2, %v2044_v4  ;;  %vm1012_vm14 = vcmp.ge.f32.partialorder %v2009_v43, 0.0  ;;  %v2103_v58 = vsel %vm989_vm3, %v957_v28, %v1021_v18 }
 0x1b5   : > { %v1029_v55 = vmul.f32 0.2, %v2047_v5  ;;  %v1030_v57 = vmul.f32 0.2, %v2050_v6  ;;  %v1031_v47 = vmul.f32 0.2, %v2053_v9  ;;  %v1054_v29 = vsel %vm990_vm4, %v958_v37, %v1022_v20 }
 0x1b6   : > { %vm1014_vm2 = vcmp.ge.f32.partialorder %v2013_v56, 0.0  ;;  %vm1015_vm0 = vcmp.ge.f32.partialorder %v2015_v62, 0.0  ;;  %vm1016_vm10 = vcmp.ge.f32.partialorder %v2017_v8, 0.0  ;;  %vm1017_vm9 = vcmp.ge.f32.partialorder %v2019_v26, 0.0 }
 0x1b7   : > { %v1032_v7 = vmul.f32 0.2, %v2056_v25  ;;  %v1033_v52 = vmul.f32 0.2, %v2059_v23  ;;  %v1034_v63 = vmul.f32 0.2, %v2062_v27  ;;  %v1055_v12 = vsel %vm991_vm5, %v2029_v42, %v1023_v22 }
 0x1b8   : > { %vm1018_vm15 = vcmp.ge.f32.partialorder %v2021_v36, 0.0  ;;  %vm1019_vm3 = vcmp.ge.f32.partialorder %v2023_v41, 0.0  ;;  %v1035_v10 = vmul.f32 0.2, %v2065_v14  ;;  %v1036_v11 = vmul.f32 0.2, %v1993_v21 }
 0x1b9   : > { %v1037_v61 = vmul.f32 0.2, %v1995_v0  ;;  %v1038_v30 = vmul.f32 0.2, %v1997_v3  ;;  %v1039_v13 = vmul.f32 0.2, %v1999_v53  ;;  %v1056_v2 = vsel %vm992_vm6, %v2032_v35, %v1024_v32 }
 0x1ba   : > { %v1040_v15 = vmul.f32 0.2, %v2001_v31  ;;  %v1041_v33 = vmul.f32 0.2, %v2003_v45  ;;  %v1042_v17 = vmul.f32 0.2, %v2005_v34  ;;  %v1057_v19 = vsel %vm993_vm7, %v2035_v40, %v1025_v38 }
 0x1bb   : > { %v1043_v39 = vmul.f32 0.2, %v2007_v51  ;;  %v1044_v59 = vmul.f32 0.2, %v2009_v43  ;;  %v1045_v48 = vmul.f32 0.2, %v2011_v60  ;;  %v1058_v28 = vsel %vm994_vm8, %v2038_v49, %v1026_v44 }
 0x1bc   : > { %v1046_v24 = vmul.f32 0.2, %v2013_v56  ;;  %v1047_v37 = vmul.f32 0.2, %v2015_v62  ;;  %v1048_v42 = vmul.f32 0.2, %v2017_v8  ;;  %v1061_v49 = vsel %vm997_vm11, %v2047_v5, %v1029_v55 }
 0x1bd   : > { %v1049_v35 = vmul.f32 0.2, %v2019_v26  ;;  %vm2256_vm4 = vcmp.ge.f32.partialorder %v2041_v46, 0.0  ;;  %v1050_v16 = vmul.f32 0.2, %v2021_v36  ;;  %vm2257_vm5 = vcmp.ge.f32.partialorder %v2044_v4, 0.0 }
 0x1be   : > { %v1059_v40 = vsel %vm2256_vm4, %v2041_v46, %v1027_v50  ;;  %v1051_v18 = vmul.f32 0.2, %v2023_v41  ;;  %v1060_v20 = vsel %vm2257_vm5, %v2044_v4, %v1028_v1  ;;  %v1062_v22 = vsel %vm998_vm12, %v2050_v6, %v1030_v57 }
 0x1bf   : > { %vm2258_vm6 = vcmp.ge.f32.partialorder %v2053_v9, 0.0  ;;  %vm2259_vm7 = vcmp.ge.f32.partialorder %v2056_v25, 0.0  ;;  %vm2260_vm8 = vcmp.ge.f32.partialorder %v2059_v23, 0.0  ;;  %vm2261_vm11 = vcmp.ge.f32.partialorder %v2062_v27, 0.0 }
 0x1c0   : > { %v1063_v46 = vsel %vm2258_vm6, %v2053_v9, %v1031_v47  ;;  %v1064_v32 = vsel %vm2259_vm7, %v2056_v25, %v1032_v7  ;;  %v1065_v4 = vsel %vm2260_vm8, %v2059_v23, %v1033_v52  ;;  %v1066_v5 = vsel %vm2261_vm11, %v2062_v27, %v1034_v63 }
 0x1c1   : > { %v1067_v6 = vsel %vm1003_vm1, %v2065_v14, %v1035_v10  ;;  %vm2262_vm12 = vcmp.ge.f32.partialorder %v1993_v21, 0.0  ;;  %vm2263_vm4 = vcmp.ge.f32.partialorder %v1995_v0, 0.0  ;;  %vm2264_vm5 = vcmp.ge.f32.partialorder %v1997_v3, 0.0 }
 0x1c2   : > { %v1068_v9 = vsel %vm2262_vm12, %v1993_v21, %v1036_v11  ;;  %v1069_v25 = vsel %vm2263_vm4, %v1995_v0, %v1037_v61  ;;  %v1070_v23 = vsel %vm2264_vm5, %v1997_v3, %v1038_v30  ;;  %vm2265_vm6 = vcmp.ge.f32.partialorder %v1999_v53, 0.0 }
 0x1c3   : > { %v1071_v27 = vsel %vm2265_vm6, %v1999_v53, %v1039_v13  ;;  %v1072_v14 = vsel %vm1008_vm13, %v2001_v31, %v1040_v15  ;;  %vm2266_vm1 = vcmp.ge.f32.partialorder %v2003_v45, 0.0  ;;  %vm2267_vm7 = vcmp.ge.f32.partialorder %v2005_v34, 0.0 }
 0x1c4   : > { %v1073_v21 = vsel %vm2266_vm1, %v2003_v45, %v1041_v33  ;;  %v1074_v0 = vsel %vm2267_vm7, %v2005_v34, %v1042_v17  ;;  %vm2268_vm8 = vcmp.ge.f32.partialorder %v2007_v51, 0.0  ;;  %v1076_v53 = vsel %vm1012_vm14, %v2009_v43, %v1044_v59 }
 0x1c5   : > { %v1075_v3 = vsel %vm2268_vm8, %v2007_v51, %v1043_v39  ;;  %vm2269_vm11 = vcmp.ge.f32.partialorder %v2011_v60, 0.0  ;;  %v1078_v45 = vsel %vm1014_vm2, %v2013_v56, %v1046_v24  ;;  %v1079_v34 = vsel %vm1015_vm0, %v2015_v62, %v1047_v37 }
 0x1c6   : > { %v1077_v31 = vsel %vm2269_vm11, %v2011_v60, %v1045_v48  ;;  %v1080_v51 = vsel %vm1016_vm10, %v2017_v8, %v1048_v42  ;;  %v1081_v43 = vsel %vm1017_vm9, %v2019_v26, %v1049_v35  ;;  %v1082_v60 = vsel %vm1018_vm15, %v2021_v36, %v1050_v16 }
 0x1c7   : > { %v1083_v56 = vsel %vm1019_vm3, %v2023_v41, %v1051_v18  ;;  %v1432_v62 = vpack.c.bf16 %v2103_v58, %v2093_v54  ;;  %v1437_v8 = vpack.c.bf16 %v1055_v12, %v1054_v29  ;;  %v1442_v38 = vpack.c.bf16 %v1057_v19, %v1056_v2 }
 0x1c8   : > { %v1447_v44 = vpack.c.bf16 %v1059_v40, %v1058_v28  ;;  %v1452_v50 = vpack.c.bf16 %v1061_v49, %v1060_v20  ;;  %v1457_v26 = vpack.c.bf16 %v1063_v46, %v1062_v22  ;;  %v1462_v36 = vpack.c.bf16 %v1065_v4, %v1064_v32 }
 0x1c9   : > { %1433 = vst [vmem:[%s2206_s29] sm:$0xff] %v1432_v62   ;;  %1509 = vst [vmem:[%s2206_s29 + $0x8] sm:$0xff] %v1437_v8   ;;  %v1467_v1 = vpack.c.bf16 %v1067_v6, %v1066_v5  ;;  %v1472_v55 = vpack.c.bf16 %v1069_v25, %v1068_v9  ;;  %v1477_v41 = vpack.c.bf16 %v1071_v27, %v1070_v23 }
 0x1ca   : > { %1510 = vst [vmem:[%s2206_s29 + $0x10] sm:$0xff] %v1442_v38   ;;  %1511 = vst [vmem:[%s2206_s29 + $0x18] sm:$0xff] %v1447_v44   ;;  %v1482_v54 = vpack.c.bf16 %v1073_v21, %v1072_v14  ;;  %v1487_v57 = vpack.c.bf16 %v1075_v3, %v1074_v0  ;;  %v1492_v47 = vpack.c.bf16 %v1077_v31, %v1076_v53 }
 0x1cb   : > { %1512 = vst [vmem:[%s2206_s29 + $0x20] sm:$0xff] %v1452_v50   ;;  %1513 = vst [vmem:[%s2206_s29 + $0x28] sm:$0xff] %v1457_v26   ;;  %v1497_v58 = vpack.c.bf16 %v1079_v34, %v1078_v45  ;;  %v1502_v7 = vpack.c.bf16 %v1081_v43, %v1080_v51  ;;  %v1507_v52 = vpack.c.bf16 %v1083_v56, %v1082_v60 }
 0x1cc   : > { %1514 = vst [vmem:[%s2206_s29 + $0x30] sm:$0xff] %v1462_v36   ;;  %1515 = vst [vmem:[%s2206_s29 + $0x38] sm:$0xff] %v1467_v1  }
 0x1cd   : > { %1516 = vst [vmem:[%s2206_s29 + $0x40] sm:$0xff] %v1472_v55   ;;  %1517 = vst [vmem:[%s2206_s29 + $0x48] sm:$0xff] %v1477_v41  }
 0x1ce   : > { %1518 = vst [vmem:[%s2206_s29 + $0x50] sm:$0xff] %v1482_v54   ;;  %1519 = vst [vmem:[%s2206_s29 + $0x58] sm:$0xff] %v1487_v57  }
 0x1cf   : > { %1520 = vst [vmem:[%s2206_s29 + $0x60] sm:$0xff] %v1492_v47   ;;  %1521 = vst [vmem:[%s2206_s29 + $0x68] sm:$0xff] %v1497_v58  }
 0x1d0   : > { %1522 = vst [vmem:[%s2206_s29 + $0x70] sm:$0xff] %v1502_v7   ;;  %1523 = vst [vmem:[%s2206_s29 + $0x78] sm:$0xff] %v1507_v52  }
 0x1d1 PF: > { %s12_s11 = sadd.s32 1, %s1669_s11   ;;  %s2270_s9 = smov %s1665_s10 }
 0x1d2   : > { %p9_p5 = scmp.ge.s32.totalorder %s12_s11, 4   ;;  %s2271_s10 = smov %s2273_s12 }
 0x1d4   :  { %11 = sbr.rel (!%p9_p5) target bundleno = 2 (0x2), region = 67 }

// kernel: discriminator_forward.14
= control target key start
LH: loop header
LB: loop body
LE: loop exit
PB: predicated region body
PF: predicated region fallthrough
CT: control target
= control target key end

     0   :  { %s1790_s9 = smov 0   ;;  %s1792_s10 = smov 0   ;;  %s2381_s0 = inlined_call_operand.vmem [shape: bf16[2,256,144], index: 0, kind: input, shape index: {}]   ;;  %s2382_s1 = inlined_call_operand.vmem [shape: bf16[144,128], index: 1, kind: input, shape index: {}]   ;;  %s2383_s2 = inlined_call_operand.vmem [shape: bf16[2,256,128], index: 2, kind: output, shape index: {}]  }
   0x1   :  { %s1794_s11 = smov 0  }
   0x2 LB: > { %s24_s12 = sadd.s32 1, %s1767_s10  ;;  %p1421_p0 = scmp.ge.s32.totalorder %s1771_s11, 1  ;;  %s1771_s11 = sphi %s1794_s11, %s12_s11   ;;  %s1767_s10 = sphi %s1792_s10, %s2399_s10   ;;  %s1763_s9 = sphi %s1790_s9, %s2398_s9  }
   0x3   : > { %p26_p1 = scmp.ge.s32.totalorder %s24_s12, 2  ;;  %p132_p2 = scmp.lt.s32.totalorder %s1771_s11, 3 }
   0x5   : > { %s2401_s12 = smov (%p26_p1, %s24_s12), 0  ;;  %p133_p3 = pnand %p1421_p0, %p132_p2 }
   0x6   : > { %v1690_v0 = vld [vmem:[%s2382_s1] sm:$0xff] (!%p133_p3)   ;;  %v1773_v1 = vmov (!%p133_p3), 0   ;;  %p160_p4 = scmp.lt.s32.totalorder (!%p133_p3), %s1763_s9, 1  ;;  %v1691_v2 = vld [vmem:[%s2382_s1 + $0x8] sm:$0xff] (!%p133_p3)   ;;  %v1692_v3 = vld [vmem:[%s2382_s1 + $0x10] sm:$0xff] (!%p133_p3)   ;;  %vm429_vm0 = vcmask (!%p133_p3), 130048  }
   0x7   : > { %136 = sbr.rel (%p133_p3) target bundleno = 508 (0x1fc), region = 28  ;;  %478 = vmatprep.subr.bf16.mxu0 (!%p133_p3), %v1773_v1  ;;  %1646 = vmatprep.subr.bf16.mxu1 (!%p133_p3), %v1773_v1  ;;  %v1693_v4 = vld [vmem:[%s2382_s1 + $0x18] sm:$0xff] (!%p133_p3)   ;;  %v1694_v6 = vld [vmem:[%s2382_s1 + $0x20] sm:$0xff] (!%p133_p3)   ;;  %v1695_v8 = vld [vmem:[%s2382_s1 + $0x28] sm:$0xff] (!%p133_p3)   ;;  %v1774_v42 = vmov (!%p133_p3), 0.0  }
   0x8   : > { %479 = vmatpush1.bf16.msra.mxu0 (!%p133_p3), %v1690_v0  ;;  %1655 = vmatpush1.bf16.msra.mxu1 (!%p133_p3), %v1690_v0  ;;  %v1696_v9 = vld [vmem:[%s2382_s1 + $0x30] sm:$0xff] (!%p133_p3)   ;;  %v1697_v10 = vld [vmem:[%s2382_s1 + $0x38] sm:$0xff] (!%p133_p3)   ;;  %v1698_v11 = vld [vmem:[%s2382_s1 + $0x40] sm:$0xff] (!%p133_p3)   ;;  %180 = vst [vmem:[#allocation3] sm:$0x1] (!%p133_p3), %v1774_v42 }
   0x9   : > { %480 = vmatprep.subr.bf16.mxu0 (!%p133_p3), %v1773_v1  ;;  %1647 = vmatprep.subr.bf16.mxu1 (!%p133_p3), %v1773_v1 }
   0xc   : > { %481 = vmatpush1.bf16.msra.mxu0 (!%p133_p3), %v1691_v2  ;;  %1656 = vmatpush1.bf16.msra.mxu1 (!%p133_p3), %v1691_v2 }
   0xd   : > { %482 = vmatprep.subr.bf16.mxu0 (!%p133_p3), %v1773_v1  ;;  %1648 = vmatprep.subr.bf16.mxu1 (!%p133_p3), %v1773_v1 }
   0xe   : > { %s2403_s9 = smov (!%p160_p4, %s1763_s9), 1 }
   0xf   : > { %s1517_s17 = sshll.u32 %s2403_s9, 8  ;;  %s1518_s7 = sshll.u32 %s2403_s9, 7 }
  0x10   : > { %s1823_s22 = scalar_lea.vmem %s2381_s0, %s1517_s17  ;;  %483 = vmatpush1.bf16.msra.mxu0 %v1692_v3  ;;  %1657 = vmatpush1.bf16.msra.mxu1 %v1692_v3  ;;  %s2334_s13 = scalar_lea.vmem %s2383_s2, %s1518_s7 }
  0x11   : > { %v1701_v5 = vld [vmem:[%s1823_s22 + $0x4] ss:$8 sps:$4 sm:$0xff]   ;;  %484 = vmatprep.subr.bf16.mxu0 %v1773_v1  ;;  %1649 = vmatprep.subr.bf16.mxu1 %v1773_v1  ;;  %v1699_v12 = vld [vmem:[%s1823_s22] ss:$8 sps:$4 sm:$0xff]   ;;  %v1702_v14 = vld [vmem:[%s1823_s22 + $0x14] ss:$8 sps:$4 sm:$0xff]  }
  0x12   : > { %1467 = vmatprep.mubr.msk.bf16.mxu0 %vm429_vm0, %v1701_v5  ;;  %v1713_v7 = vld [vmem:[%s1823_s22 + $0x84] ss:$8 sps:$4 sm:$0xff]   ;;  %v1711_v13 = vld [vmem:[%s1823_s22 + $0x80] ss:$8 sps:$4 sm:$0xff]   ;;  %v1717_v15 = vld [vmem:[%s1823_s22 + $0x94] ss:$8 sps:$4 sm:$0xff]  }
  0x13   : > { %1475 = vmatprep.mubr.msk.bf16.mxu1 %vm429_vm0, %v1713_v7  ;;  %v1704_v16 = vld [vmem:[%s1823_s22 + $0x10] ss:$8 sps:$4 sm:$0xff]   ;;  %v1705_v18 = vld [vmem:[%s1823_s22 + $0x24] ss:$8 sps:$4 sm:$0xff]   ;;  %v1707_v20 = vld [vmem:[%s1823_s22 + $0x20] ss:$8 sps:$4 sm:$0xff]  }
  0x14   : > { %485 = vmatpush1.bf16.msra.mxu0 %v1693_v4  ;;  %1658 = vmatpush1.bf16.msra.mxu1 %v1693_v4  ;;  %v1719_v17 = vld [vmem:[%s1823_s22 + $0x90] ss:$8 sps:$4 sm:$0xff]   ;;  %v1723_v19 = vld [vmem:[%s1823_s22 + $0xa4] ss:$8 sps:$4 sm:$0xff]   ;;  %v1725_v21 = vld [vmem:[%s1823_s22 + $0xa0] ss:$8 sps:$4 sm:$0xff]  }
  0x15   : > { %486 = vmatprep.subr.bf16.mxu0 %v1773_v1  ;;  %1650 = vmatprep.subr.bf16.mxu1 %v1773_v1  ;;  %v1708_v22 = vld [vmem:[%s1823_s22 + $0x34] ss:$8 sps:$4 sm:$0xff]   ;;  %v1710_v24 = vld [vmem:[%s1823_s22 + $0x30] ss:$8 sps:$4 sm:$0xff]   ;;  %v1714_v26 = vld [vmem:[%s1823_s22 + $0x44] ss:$8 sps:$4 sm:$0xff]  }
  0x16   : > { %v1729_v23 = vld [vmem:[%s1823_s22 + $0xb4] ss:$8 sps:$4 sm:$0xff]   ;;  %v1731_v25 = vld [vmem:[%s1823_s22 + $0xb0] ss:$8 sps:$4 sm:$0xff]   ;;  %v1735_v27 = vld [vmem:[%s1823_s22 + $0xc4] ss:$8 sps:$4 sm:$0xff]  }
  0x17   : > { %v1716_v28 = vld [vmem:[%s1823_s22 + $0x40] ss:$8 sps:$4 sm:$0xff]   ;;  %v1720_v30 = vld [vmem:[%s1823_s22 + $0x54] ss:$8 sps:$4 sm:$0xff]   ;;  %v1722_v32 = vld [vmem:[%s1823_s22 + $0x50] ss:$8 sps:$4 sm:$0xff]  }
  0x18   : > { %487 = vmatpush1.bf16.msra.mxu0 %v1694_v6  ;;  %1659 = vmatpush1.bf16.msra.mxu1 %v1694_v6  ;;  %v1737_v29 = vld [vmem:[%s1823_s22 + $0xc0] ss:$8 sps:$4 sm:$0xff]   ;;  %v1738_v31 = vld [vmem:[%s1823_s22 + $0xd4] ss:$8 sps:$4 sm:$0xff]   ;;  %v1740_v33 = vld [vmem:[%s1823_s22 + $0xd0] ss:$8 sps:$4 sm:$0xff]  }
  0x19   : > { %488 = vmatprep.subr.bf16.mxu0 %v1773_v1  ;;  %1651 = vmatprep.subr.bf16.mxu1 %v1773_v1  ;;  %v1726_v34 = vld [vmem:[%s1823_s22 + $0x64] ss:$8 sps:$4 sm:$0xff]   ;;  %v1728_v36 = vld [vmem:[%s1823_s22 + $0x60] ss:$8 sps:$4 sm:$0xff]   ;;  %v1732_v38 = vld [vmem:[%s1823_s22 + $0x74] ss:$8 sps:$4 sm:$0xff]  }
  0x1a   : > { %v1741_v35 = vld [vmem:[%s1823_s22 + $0xe4] ss:$8 sps:$4 sm:$0xff]   ;;  %v1743_v37 = vld [vmem:[%s1823_s22 + $0xe0] ss:$8 sps:$4 sm:$0xff]   ;;  %v1744_v39 = vld [vmem:[%s1823_s22 + $0xf4] ss:$8 sps:$4 sm:$0xff]  }
  0x1b   : > { %v1734_v40 = vld [vmem:[%s1823_s22 + $0x70] ss:$8 sps:$4 sm:$0xff]  }
  0x1c   : > { %489 = vmatpush1.bf16.msra.mxu0 %v1695_v8  ;;  %1660 = vmatpush1.bf16.msra.mxu1 %v1695_v8  ;;  %v1746_v41 = vld [vmem:[%s1823_s22 + $0xf0] ss:$8 sps:$4 sm:$0xff]  }
  0x1d   : > { %490 = vmatprep.subr.bf16.mxu0 %v1773_v1  ;;  %1652 = vmatprep.subr.bf16.mxu1 %v1773_v1 }
  0x20   : > { %491 = vmatpush1.bf16.msra.mxu0 %v1696_v9  ;;  %1661 = vmatpush1.bf16.msra.mxu1 %v1696_v9 }
  0x21   : > { %492 = vmatprep.subr.bf16.mxu0 %v1773_v1  ;;  %1653 = vmatprep.subr.bf16.mxu1 %v1773_v1 }
  0x24   : > { %493 = vmatpush1.bf16.msra.mxu0 %v1697_v10  ;;  %1662 = vmatpush1.bf16.msra.mxu1 %v1697_v10 }
  0x25   : > { %494 = vmatprep.subr.bf16.mxu0 %v1773_v1  ;;  %1654 = vmatprep.subr.bf16.mxu1 %v1773_v1 }
  0x28   : > { %495 = vmatpush1.bf16.msra.mxu0 %v1698_v11  ;;  %1663 = vmatpush1.bf16.msra.mxu1 %v1698_v11 }
  0x2b   : > { %511 = vmatmul.mubr.bf16.vlgmr.msra.gmra.mrb[0].mxu0 %v1699_v12  ;;  %575 = vmatmul.mubr.bf16.vlgmr.msra.gmra.mrb[0].mxu1 %v1711_v13 }
  0x2c   : > { %1468 = vmatprep.mubr.msk.bf16.mxu0 %vm429_vm0, %v1702_v14  ;;  %1476 = vmatprep.mubr.msk.bf16.mxu1 %vm429_vm0, %v1717_v15 }
  0x33   : > { %519 = vmatmul.mubr.bf16.gmra.mrb[4].mxu0 %v1704_v16  ;;  %583 = vmatmul.mubr.bf16.gmra.mrb[4].mxu1 %v1719_v17 }
  0x34   : > { %1469 = vmatprep.mubr.msk.bf16.mxu0 %vm429_vm0, %v1705_v18  ;;  %1477 = vmatprep.mubr.msk.bf16.mxu1 %vm429_vm0, %v1723_v19 }
  0x3b   : > { %527 = vmatmul.mubr.bf16.gmra.mrb[8].mxu0 %v1707_v20  ;;  %591 = vmatmul.mubr.bf16.gmra.mrb[8].mxu1 %v1725_v21 }
  0x3c   : > { %1470 = vmatprep.mubr.msk.bf16.mxu0 %vm429_vm0, %v1708_v22  ;;  %1478 = vmatprep.mubr.msk.bf16.mxu1 %vm429_vm0, %v1729_v23 }
  0x43   : > { %535 = vmatmul.mubr.bf16.gmra.mrb[12].mxu0 %v1710_v24  ;;  %599 = vmatmul.mubr.bf16.gmra.mrb[12].mxu1 %v1731_v25 }
  0x44   : > { %1471 = vmatprep.mubr.msk.bf16.mxu0 %vm429_vm0, %v1714_v26  ;;  %1479 = vmatprep.mubr.msk.bf16.mxu1 %vm429_vm0, %v1735_v27 }
  0x4b   : > { %543 = vmatmul.mubr.bf16.gmra.mrb[16].mxu0 %v1716_v28  ;;  %607 = vmatmul.mubr.bf16.gmra.mrb[16].mxu1 %v1737_v29 }
  0x4c   : > { %1472 = vmatprep.mubr.msk.bf16.mxu0 %vm429_vm0, %v1720_v30  ;;  %1480 = vmatprep.mubr.msk.bf16.mxu1 %vm429_vm0, %v1738_v31 }
  0x53   : > { %551 = vmatmul.mubr.bf16.gmra.mrb[20].mxu0 %v1722_v32  ;;  %615 = vmatmul.mubr.bf16.gmra.mrb[20].mxu1 %v1740_v33 }
  0x54   : > { %1473 = vmatprep.mubr.msk.bf16.mxu0 %vm429_vm0, %v1726_v34  ;;  %1481 = vmatprep.mubr.msk.bf16.mxu1 %vm429_vm0, %v1741_v35 }
  0x5b   : > { %559 = vmatmul.mubr.bf16.gmra.mrb[24].mxu0 %v1728_v36  ;;  %623 = vmatmul.mubr.bf16.gmra.mrb[24].mxu1 %v1743_v37 }
  0x5c   : > { %1474 = vmatprep.mubr.msk.bf16.mxu0 %vm429_vm0, %v1732_v38  ;;  %1482 = vmatprep.mubr.msk.bf16.mxu1 %vm429_vm0, %v1744_v39 }
  0x63   : > { %567 = vmatmul.mubr.bf16.gmra.mrb[28].mxu0 %v1734_v40  ;;  %631 = vmatmul.mubr.bf16.gmra.mrb[28].mxu1 %v1746_v41 }
  0xfe   : > { %v1891_v43 = vpop.f32.mrb[0].mxu0  ;;  %v1893_v44 = vpop.f32.mrb[0].mxu1 }
  0xff   : > { %v514_v45 = vpop.f32.mrb[1].mxu0  ;;  %v578_v46 = vpop.f32.mrb[1].mxu1 }
 0x100   : > { %v1895_v47 = vpop.f32.mrb[2].mxu0  ;;  %v1897_v48 = vpop.f32.mrb[2].mxu1 }
 0x101   : > { %v674_v49 = vadd.f32 %v1895_v47, %v1891_v43  ;;  %v517_v50 = vpop.f32.mrb[3].mxu0  ;;  %v581_v51 = vpop.f32.mrb[3].mxu1 }
 0x106   : > { %v1901_v52 = vpop.f32.mrb[4].mxu0  ;;  %v1903_v53 = vpop.f32.mrb[4].mxu1 }
 0x107   : > { %v675_v54 = vadd.f32 %v674_v49, %v1901_v52  ;;  %v522_v55 = vpop.f32.mrb[5].mxu0  ;;  %v586_v56 = vpop.f32.mrb[5].mxu1 }
 0x108   : > { %v1906_v57 = vpop.f32.mrb[6].mxu0  ;;  %v1908_v58 = vpop.f32.mrb[6].mxu1 }
 0x109   : > { %v676_v59 = vadd.f32 %v675_v54, %v1906_v57  ;;  %v525_v60 = vpop.f32.mrb[7].mxu0  ;;  %v589_v61 = vpop.f32.mrb[7].mxu1 }
 0x10e   : > { %v1911_v62 = vpop.f32.mrb[8].mxu0  ;;  %v1913_v63 = vpop.f32.mrb[8].mxu1 }
 0x10f   : > { %v677_v0 = vadd.f32 %v676_v59, %v1911_v62  ;;  %v530_v1 = vpop.f32.mrb[9].mxu0  ;;  %v594_v2 = vpop.f32.mrb[9].mxu1 }
 0x110   : > { %v1916_v3 = vpop.f32.mrb[10].mxu0  ;;  %v1918_v4 = vpop.f32.mrb[10].mxu1 }
 0x111   : > { %v678_v5 = vadd.f32 %v677_v0, %v1916_v3  ;;  %v533_v6 = vpop.f32.mrb[11].mxu0  ;;  %v597_v7 = vpop.f32.mrb[11].mxu1 }
 0x116   : > { %v1921_v8 = vpop.f32.mrb[12].mxu0  ;;  %v1923_v9 = vpop.f32.mrb[12].mxu1 }
 0x117   : > { %v679_v10 = vadd.f32 %v678_v5, %v1921_v8  ;;  %v538_v11 = vpop.f32.mrb[13].mxu0  ;;  %v602_v12 = vpop.f32.mrb[13].mxu1 }
 0x118   : > { %v1926_v13 = vpop.f32.mrb[14].mxu0  ;;  %v1928_v14 = vpop.f32.mrb[14].mxu1 }
 0x119   : > { %v680_v15 = vadd.f32 %v679_v10, %v1926_v13  ;;  %v541_v16 = vpop.f32.mrb[15].mxu0  ;;  %v605_v17 = vpop.f32.mrb[15].mxu1 }
 0x11e   : > { %v1931_v18 = vpop.f32.mrb[16].mxu0  ;;  %v1933_v19 = vpop.f32.mrb[16].mxu1 }
 0x11f   : > { %v681_v20 = vadd.f32 %v680_v15, %v1931_v18  ;;  %v546_v21 = vpop.f32.mrb[17].mxu0  ;;  %v610_v22 = vpop.f32.mrb[17].mxu1 }
 0x120   : > { %v1936_v23 = vpop.f32.mrb[18].mxu0  ;;  %v1938_v24 = vpop.f32.mrb[18].mxu1 }
 0x121   : > { %v682_v25 = vadd.f32 %v681_v20, %v1936_v23  ;;  %v549_v26 = vpop.f32.mrb[19].mxu0  ;;  %v613_v27 = vpop.f32.mrb[19].mxu1 }
 0x126   : > { %v1941_v28 = vpop.f32.mrb[20].mxu0  ;;  %v1943_v29 = vpop.f32.mrb[20].mxu1 }
 0x127   : > { %v683_v30 = vadd.f32 %v682_v25, %v1941_v28  ;;  %v554_v31 = vpop.f32.mrb[21].mxu0  ;;  %v618_v32 = vpop.f32.mrb[21].mxu1 }
 0x128   : > { %v1946_v33 = vpop.f32.mrb[22].mxu0  ;;  %v1948_v34 = vpop.f32.mrb[22].mxu1 }
 0x129   : > { %v684_v35 = vadd.f32 %v683_v30, %v1946_v33  ;;  %v557_v36 = vpop.f32.mrb[23].mxu0  ;;  %v621_v37 = vpop.f32.mrb[23].mxu1 }
 0x12e   : > { %v1951_v38 = vpop.f32.mrb[24].mxu0  ;;  %v1953_v39 = vpop.f32.mrb[24].mxu1 }
 0x12f   : > { %v685_v40 = vadd.f32 %v684_v35, %v1951_v38  ;;  %v562_v41 = vpop.f32.mrb[25].mxu0  ;;  %v626_v42 = vpop.f32.mrb[25].mxu1 }
 0x130   : > { %v1956_v45 = vpop.f32.mrb[26].mxu0  ;;  %v1958_v46 = vpop.f32.mrb[26].mxu1  ;;  %v673_v41 = vld [vmem:[#allocation3] sm:$0x1] }
 0x131   : > { %v686_v49 = vadd.f32 %v685_v40, %v1956_v45  ;;  %v565_v50 = vpop.f32.mrb[27].mxu0  ;;  %v629_v51 = vpop.f32.mrb[27].mxu1 }
 0x132   : > { %v751_v50 = vlaneseq }
 0x134   : > { %v752_v51 = vshrl.u32 %v751_v50, 7 }
 0x136   : > { %v1961_v54 = vpop.f32.mrb[28].mxu0  ;;  %v1963_v55 = vpop.f32.mrb[28].mxu1 }
 0x137   : > { %v687_v56 = vadd.f32 %v686_v49, %v1961_v54  ;;  %v570_v59 = vpop.f32.mrb[29].mxu0  ;;  %v634_v60 = vpop.f32.mrb[29].mxu1 }
 0x138   : > { %v1966_v61 = vpop.f32.mrb[30].mxu0  ;;  %v1968_v0 = vpop.f32.mrb[30].mxu1  ;;  %v753_v60 = vsub.s32 0, %v752_v51 }
 0x139   : > { %v688_v1 = vadd.f32 %v687_v56, %v1966_v61  ;;  %v573_v2 = vpop.f32.mrb[31].mxu0  ;;  %v637_v5 = vpop.f32.mrb[31].mxu1 }
 0x13b   : > { %v689_v6 = vadd.f32 %v688_v1, %v1893_v44 }
 0x13d   : > { %v690_v7 = vadd.f32 %v689_v6, %v1897_v48 }
 0x13f   : > { %v691_v10 = vadd.f32 %v690_v7, %v1903_v53 }
 0x141   : > { %v692_v11 = vadd.f32 %v691_v10, %v1908_v58 }
 0x143   : > { %v693_v12 = vadd.f32 %v692_v11, %v1913_v63 }
 0x145   : > { %v694_v15 = vadd.f32 %v693_v12, %v1918_v4 }
 0x147   : > { %v695_v16 = vadd.f32 %v694_v15, %v1923_v9 }
 0x149   : > { %v696_v17 = vadd.f32 %v695_v16, %v1928_v14 }
 0x14b   : > { %v697_v20 = vadd.f32 %v696_v17, %v1933_v19 }
 0x14d   : > { %v698_v21 = vadd.f32 %v697_v20, %v1938_v24 }
 0x14f   : > { %v699_v22 = vadd.f32 %v698_v21, %v1943_v29 }
 0x151   : > { %v700_v25 = vadd.f32 %v699_v22, %v1948_v34 }
 0x153   : > { %v701_v26 = vadd.f32 %v700_v25, %v1953_v39 }
 0x155   : > { %v702_v27 = vadd.f32 %v701_v26, %v1958_v46 }
 0x157   : > { %v703_v30 = vadd.f32 %v702_v27, %v1963_v55 }
 0x159   : > { %v704_v31 = vadd.f32 %v703_v30, %v1968_v0 }
 0x15b   : > { %v705_v32 = vrot.slane %v704_v31, 4 }
 0x15d   : > { %v706_v35 = vadd.f32 %v705_v32, %v704_v31 }
 0x15f   : > { %v707_v36 = vrot.slane %v706_v35, 2 }
 0x161   : > { %v708_v37 = vadd.f32 %v707_v36, %v706_v35 }
 0x163   : > { %v709_v40 = vrot.slane %v708_v37, 1 }
 0x165   : > { %v710_v42 = vadd.f32 %v709_v40, %v708_v37 }
 0x167   : > { %v711_v49 = vadd.f32 %v710_v42, %v673_v41 }
 0x169   : > { %712 = vst [vmem:[#allocation3] sm:$0x1] %v711_v49 }
 0x170   : > { %v716_v56 = vld [vmem:[#allocation3] sm:$0x1] }
 0x171   : > { %v717_v59 = vmul.f32 0.00390625, %v716_v56 }
 0x173   : > { %v1987_v1 = vrot.slane %v717_v59, %v753_v60 }
 0x175   : > { %v1991_v2 = vsub.f32 %v1891_v43, %v1987_v1  ;;  %v1995_v5 = vsub.f32 %v1895_v47, %v1987_v1  ;;  %v1999_v6 = vsub.f32 %v1901_v52, %v1987_v1  ;;  %v2007_v11 = vsub.f32 %v1906_v57, %v1987_v1 }
 0x176   : > { %v2011_v43 = vsub.f32 %v1911_v62, %v1987_v1  ;;  %v2017_v52 = vsub.f32 %v1916_v3, %v1987_v1  ;;  %v2023_v57 = vsub.f32 %v1921_v8, %v1987_v1  ;;  %v2029_v20 = vsub.f32 %v1926_v13, %v1987_v1 }
 0x177   : > { %v982_v7 = vmul.f32 %v1991_v2, %v1991_v2  ;;  %v983_v10 = vmul.f32 %v1995_v5, %v1995_v5  ;;  %v984_v47 = vmul.f32 %v1999_v6, %v1999_v6  ;;  %v985_v15 = vmul.f32 %v2007_v11, %v2007_v11 }
 0x178   : > { %v986_v62 = vmul.f32 %v2011_v43, %v2011_v43  ;;  %v987_v3 = vmul.f32 %v2017_v52, %v2017_v52  ;;  %v2035_v22 = vsub.f32 %v1931_v18, %v1987_v1  ;;  %v988_v8 = vmul.f32 %v2023_v57, %v2023_v57 }
 0x179   : > { %v1014_v12 = vadd.f32 %v983_v10, %v982_v7  ;;  %v2041_v26 = vsub.f32 %v1936_v23, %v1987_v1  ;;  %v989_v13 = vmul.f32 %v2029_v20, %v2029_v20  ;;  %v2047_v30 = vsub.f32 %v1941_v28, %v1987_v1 }
 0x17a   : > { %v990_v18 = vmul.f32 %v2035_v22, %v2035_v22  ;;  %v2053_v32 = vsub.f32 %v1946_v33, %v1987_v1  ;;  %v2059_v36 = vsub.f32 %v1951_v38, %v1987_v1  ;;  %v2065_v40 = vsub.f32 %v1956_v45, %v1987_v1 }
 0x17b   : > { %v1015_v16 = vadd.f32 %v1014_v12, %v984_v47  ;;  %v991_v23 = vmul.f32 %v2041_v26, %v2041_v26  ;;  %v992_v28 = vmul.f32 %v2047_v30, %v2047_v30  ;;  %v2071_v42 = vsub.f32 %v1961_v54, %v1987_v1 }
 0x17c   : > { %v993_v33 = vmul.f32 %v2053_v32, %v2053_v32  ;;  %v994_v38 = vmul.f32 %v2059_v36, %v2059_v36  ;;  %v2077_v50 = vsub.f32 %v1966_v61, %v1987_v1  ;;  %v995_v45 = vmul.f32 %v2065_v40, %v2065_v40 }
 0x17d   : > { %v1016_v17 = vadd.f32 %v1015_v16, %v985_v15  ;;  %v2083_v56 = vsub.f32 %v1893_v44, %v1987_v1  ;;  %v996_v54 = vmul.f32 %v2071_v42, %v2071_v42  ;;  %v773_v60 = vsub.f32 %v1897_v48, %v1987_v1 }
 0x17e   : > { %v997_v7 = vmul.f32 %v2077_v50, %v2077_v50  ;;  %v774_v10 = vsub.f32 %v1903_v53, %v1987_v1  ;;  %v775_v44 = vsub.f32 %v1908_v58, %v1987_v1  ;;  %v778_v53 = vsub.f32 %v1923_v9, %v1987_v1 }
 0x17f   : > { %v1017_v21 = vadd.f32 %v1016_v17, %v986_v62  ;;  %v998_v47 = vmul.f32 %v2083_v56, %v2083_v56  ;;  %v999_v15 = vmul.f32 %v773_v60, %v773_v60  ;;  %v776_v62 = vsub.f32 %v1913_v63, %v1987_v1 }
 0x180   : > { %v1000_v48 = vmul.f32 %v774_v10, %v774_v10  ;;  %v779_v58 = vsub.f32 %v1928_v14, %v1987_v1  ;;  %v780_v63 = vsub.f32 %v1933_v19, %v1987_v1  ;;  %v782_v9 = vsub.f32 %v1943_v29, %v1987_v1 }
 0x181   : > { %v1018_v25 = vadd.f32 %v1017_v21, %v987_v3  ;;  %v777_v3 = vsub.f32 %v1918_v4, %v1987_v1  ;;  %v1001_v21 = vmul.f32 %v775_v44, %v775_v44  ;;  %v781_v4 = vsub.f32 %v1938_v24, %v1987_v1 }
 0x182   : > { %v783_v14 = vsub.f32 %v1948_v34, %v1987_v1  ;;  %v784_v19 = vsub.f32 %v1953_v39, %v1987_v1  ;;  %v785_v24 = vsub.f32 %v1958_v46, %v1987_v1  ;;  %v786_v29 = vsub.f32 %v1963_v55, %v1987_v1 }
 0x183   : > { %v1019_v27 = vadd.f32 %v1018_v25, %v988_v8  ;;  %v1002_v25 = vmul.f32 %v776_v62, %v776_v62  ;;  %v787_v34 = vsub.f32 %v1968_v0, %v1987_v1 }
 0x185   : > { %v1020_v31 = vadd.f32 %v1019_v27, %v989_v13  ;;  %v1003_v27 = vmul.f32 %v777_v3, %v777_v3  ;;  %v1013_v39 = vmul.f32 %v787_v34, %v787_v34 }
 0x187   : > { %v1021_v35 = vadd.f32 %v1020_v31, %v990_v18  ;;  %v1004_v31 = vmul.f32 %v778_v53, %v778_v53 }
 0x189   : > { %v1022_v37 = vadd.f32 %v1021_v35, %v991_v23  ;;  %v1005_v35 = vmul.f32 %v779_v58, %v779_v58 }
 0x18b   : > { %v1023_v41 = vadd.f32 %v1022_v37, %v992_v28  ;;  %v1006_v37 = vmul.f32 %v780_v63, %v780_v63 }
 0x18d   : > { %v1024_v49 = vadd.f32 %v1023_v41, %v993_v33  ;;  %v1007_v41 = vmul.f32 %v781_v4, %v781_v4 }
 0x18f   : > { %v1025_v51 = vadd.f32 %v1024_v49, %v994_v38  ;;  %v1008_v49 = vmul.f32 %v782_v9, %v782_v9 }
 0x191   : > { %v1026_v59 = vadd.f32 %v1025_v51, %v995_v45  ;;  %v1009_v51 = vmul.f32 %v783_v14, %v783_v14 }
 0x193   : > { %v1027_v61 = vadd.f32 %v1026_v59, %v996_v54  ;;  %v1010_v59 = vmul.f32 %v784_v19, %v784_v19 }
 0x195   : > { %v1028_v12 = vadd.f32 %v1027_v61, %v997_v7  ;;  %v1011_v61 = vmul.f32 %v785_v24, %v785_v24 }
 0x197   : > { %v1029_v16 = vadd.f32 %v1028_v12, %v998_v47  ;;  %v1012_v12 = vmul.f32 %v786_v29, %v786_v29 }
 0x199   : > { %v1030_v17 = vadd.f32 %v1029_v16, %v999_v15 }
 0x19b   : > { %v1031_v8 = vadd.f32 %v1030_v17, %v1000_v48 }
 0x19d   : > { %v1032_v13 = vadd.f32 %v1031_v8, %v1001_v21 }
 0x19f   : > { %v1033_v18 = vadd.f32 %v1032_v13, %v1002_v25 }
 0x1a1   : > { %v1034_v23 = vadd.f32 %v1033_v18, %v1003_v27 }
 0x1a3   : > { %v1035_v28 = vadd.f32 %v1034_v23, %v1004_v31 }
 0x1a5   : > { %v1036_v33 = vadd.f32 %v1035_v28, %v1005_v35 }
 0x1a7   : > { %v1037_v38 = vadd.f32 %v1036_v33, %v1006_v37 }
 0x1a9   : > { %v1038_v45 = vadd.f32 %v1037_v38, %v1007_v41 }
 0x1ab   : > { %v1039_v54 = vadd.f32 %v1038_v45, %v1008_v49 }
 0x1ad   : > { %v1040_v7 = vadd.f32 %v1039_v54, %v1009_v51 }
 0x1af   : > { %v1041_v47 = vadd.f32 %v1040_v7, %v1010_v59 }
 0x1b1   : > { %v1042_v15 = vadd.f32 %v1041_v47, %v1011_v61 }
 0x1b3   : > { %v1043_v16 = vadd.f32 %v1042_v15, %v1012_v12 }
 0x1b5   : > { %v1044_v48 = vadd.f32 %v1043_v16, %v1013_v39 }
 0x1b7   : > { %v1045_v17 = vrot.slane %v1044_v48, 4 }
 0x1b9   : > { %v1046_v21 = vadd.f32 %v1045_v17, %v1044_v48 }
 0x1bb   : > { %v1047_v46 = vrot.slane %v1046_v21, 2 }
 0x1bd   : > { %v1048_v8 = vadd.f32 %v1047_v46, %v1046_v21 }
 0x1bf   : > { %v1049_v25 = vrot.slane %v1048_v8, 1 }
 0x1c1   : > { %v1050_v13 = vadd.f32 %v1049_v25, %v1048_v8 }
 0x1c3   : > { %v1052_v27 = vmul.f32 0.00390625, %v1050_v13 }
 0x1c5   : > { %v1053_v55 = vadd.f32 1e-05, %v1052_v27 }
 0x1c7   : > { %1747 = vrsqrt.f32 %v1053_v55 }
 0x1d1   : > { %v1748_v18 = vpop.eup %1747 }
 0x1d2   : > { %v2122_v31 = vmul.f32 %v1748_v18, %v2083_v56  ;;  %v2124_v0 = vmul.f32 %v1748_v18, %v773_v60  ;;  %v2126_v1 = vmul.f32 %v1748_v18, %v774_v10  ;;  %v2128_v23 = vmul.f32 %v1748_v18, %v775_v44 }
 0x1d3   : > { %v2130_v35 = vmul.f32 %v1748_v18, %v776_v62  ;;  %v2132_v28 = vmul.f32 %v1748_v18, %v777_v3  ;;  %v2134_v37 = vmul.f32 %v1748_v18, %v778_v53  ;;  %v2136_v33 = vmul.f32 %v1748_v18, %v779_v58 }
 0x1d4   : > { %v2138_v41 = vmul.f32 %v1748_v18, %v780_v63  ;;  %v2140_v38 = vmul.f32 %v1748_v18, %v781_v4  ;;  %v2142_v56 = vmul.f32 %v1748_v18, %v782_v9  ;;  %v2144_v60 = vmul.f32 %v1748_v18, %v783_v14 }
 0x1d5   : > { %v2146_v10 = vmul.f32 %v1748_v18, %v784_v19  ;;  %v2148_v44 = vmul.f32 %v1748_v18, %v785_v24  ;;  %v2150_v62 = vmul.f32 %v1748_v18, %v786_v29  ;;  %v2152_v3 = vmul.f32 %v1748_v18, %v787_v34 }
 0x1d6   : > { %v1055_v53 = vmul.f32 %v1748_v18, %v1991_v2  ;;  %v1056_v58 = vmul.f32 %v1748_v18, %v1995_v5  ;;  %v1057_v63 = vmul.f32 %v1748_v18, %v1999_v6  ;;  %v2158_v4 = vmul.f32 %v1748_v18, %v2007_v11 }
 0x1d7   : > { %v2161_v9 = vmul.f32 %v1748_v18, %v2011_v43  ;;  %v2164_v14 = vmul.f32 %v1748_v18, %v2017_v52  ;;  %v2167_v19 = vmul.f32 %v1748_v18, %v2023_v57  ;;  %v2170_v49 = vmul.f32 %v1748_v18, %v2029_v20 }
 0x1d8   : > { %v2173_v2 = vmul.f32 %v1748_v18, %v2035_v22  ;;  %v2176_v5 = vmul.f32 %v1748_v18, %v2041_v26  ;;  %v2179_v6 = vmul.f32 %v1748_v18, %v2047_v30  ;;  %v2182_v11 = vmul.f32 %v1748_v18, %v2053_v32 }
 0x1d9   : > { %v2185_v43 = vmul.f32 %v1748_v18, %v2059_v36  ;;  %v2188_v52 = vmul.f32 %v1748_v18, %v2065_v40  ;;  %v2191_v57 = vmul.f32 %v1748_v18, %v2071_v42  ;;  %v2194_v20 = vmul.f32 %v1748_v18, %v2077_v50 }
 0x1da   : > { %vm1087_vm1 = vcmp.ge.f32.partialorder %v1055_v53, 0.0  ;;  %vm1088_vm2 = vcmp.ge.f32.partialorder %v1056_v58, 0.0  ;;  %vm1089_vm3 = vcmp.ge.f32.partialorder %v1057_v63, 0.0  ;;  %vm1090_vm4 = vcmp.ge.f32.partialorder %v2158_v4, 0.0 }
 0x1db   : > { %vm1091_vm5 = vcmp.ge.f32.partialorder %v2161_v9, 0.0  ;;  %vm1092_vm6 = vcmp.ge.f32.partialorder %v2164_v14, 0.0  ;;  %vm1093_vm7 = vcmp.ge.f32.partialorder %v2167_v19, 0.0  ;;  %vm1096_vm10 = vcmp.ge.f32.partialorder %v2176_v5, 0.0 }
 0x1dc   : > { %vm1097_vm11 = vcmp.ge.f32.partialorder %v2179_v6, 0.0  ;;  %v1119_v22 = vmul.f32 0.2, %v1055_v53  ;;  %v1120_v26 = vmul.f32 0.2, %v1056_v58  ;;  %vm1102_vm0 = vcmp.ge.f32.partialorder %v2194_v20, 0.0 }
 0x1dd   : > { %v1121_v30 = vmul.f32 0.2, %v1057_v63  ;;  %v1122_v32 = vmul.f32 0.2, %v2158_v4  ;;  %v1123_v36 = vmul.f32 0.2, %v2161_v9 }
 0x1de   : > { %v1124_v40 = vmul.f32 0.2, %v2164_v14  ;;  %vm1107_vm12 = vcmp.ge.f32.partialorder %v2130_v35, 0.0  ;;  %v1125_v42 = vmul.f32 0.2, %v2167_v19  ;;  %v2222_v24 = vsel %vm1087_vm1, %v1055_v53, %v1119_v22 }
 0x1df   : > { %v1126_v50 = vmul.f32 0.2, %v2170_v49  ;;  %v1127_v45 = vmul.f32 0.2, %v2173_v2  ;;  %vm1111_vm13 = vcmp.ge.f32.partialorder %v2138_v41, 0.0  ;;  %v2232_v59 = vsel %vm1088_vm2, %v1056_v58, %v1120_v26 }
 0x1e0   : > { %v1128_v51 = vmul.f32 0.2, %v2176_v5  ;;  %v1129_v54 = vmul.f32 0.2, %v2179_v6  ;;  %v1130_v29 = vmul.f32 0.2, %v2182_v11  ;;  %v1153_v47 = vsel %vm1089_vm3, %v1057_v63, %v1121_v30 }
 0x1e1   : > { %vm1113_vm1 = vcmp.ge.f32.partialorder %v2142_v56, 0.0  ;;  %vm1114_vm15 = vcmp.ge.f32.partialorder %v2144_v60, 0.0  ;;  %vm1115_vm9 = vcmp.ge.f32.partialorder %v2146_v10, 0.0  ;;  %vm1116_vm8 = vcmp.ge.f32.partialorder %v2148_v44, 0.0 }
 0x1e2   : > { %v1131_v7 = vmul.f32 0.2, %v2185_v43  ;;  %v1132_v34 = vmul.f32 0.2, %v2188_v52  ;;  %v1133_v61 = vmul.f32 0.2, %v2191_v57  ;;  %v1154_v16 = vsel %vm1090_vm4, %v2158_v4, %v1122_v32 }
 0x1e3   : > { %vm1117_vm14 = vcmp.ge.f32.partialorder %v2150_v62, 0.0  ;;  %vm1118_vm2 = vcmp.ge.f32.partialorder %v2152_v3, 0.0  ;;  %v1134_v12 = vmul.f32 0.2, %v2194_v20  ;;  %v1135_v15 = vmul.f32 0.2, %v2122_v31 }
 0x1e4   : > { %v1136_v39 = vmul.f32 0.2, %v2124_v0  ;;  %v1137_v48 = vmul.f32 0.2, %v2126_v1  ;;  %v1138_v17 = vmul.f32 0.2, %v2128_v23  ;;  %v1155_v46 = vsel %vm1091_vm5, %v2161_v9, %v1123_v36 }
 0x1e5   : > { %v1139_v21 = vmul.f32 0.2, %v2130_v35  ;;  %v1140_v8 = vmul.f32 0.2, %v2132_v28  ;;  %v1141_v25 = vmul.f32 0.2, %v2134_v37  ;;  %v1156_v27 = vsel %vm1092_vm6, %v2164_v14, %v1124_v40 }
 0x1e6   : > { %v1142_v13 = vmul.f32 0.2, %v2136_v33  ;;  %v1143_v55 = vmul.f32 0.2, %v2138_v41  ;;  %v1144_v18 = vmul.f32 0.2, %v2140_v38  ;;  %v1157_v58 = vsel %vm1093_vm7, %v2167_v19, %v1125_v42 }
 0x1e7   : > { %v1145_v53 = vmul.f32 0.2, %v2142_v56  ;;  %v1146_v63 = vmul.f32 0.2, %v2144_v60  ;;  %v1147_v4 = vmul.f32 0.2, %v2146_v10  ;;  %v1160_v19 = vsel %vm1096_vm10, %v2176_v5, %v1128_v51 }
 0x1e8   : > { %v1148_v9 = vmul.f32 0.2, %v2148_v44  ;;  %vm2384_vm3 = vcmp.ge.f32.partialorder %v2170_v49, 0.0  ;;  %v1149_v22 = vmul.f32 0.2, %v2150_v62  ;;  %vm2385_vm4 = vcmp.ge.f32.partialorder %v2173_v2, 0.0 }
 0x1e9   : > { %v1158_v14 = vsel %vm2384_vm3, %v2170_v49, %v1126_v50  ;;  %v1150_v26 = vmul.f32 0.2, %v2152_v3  ;;  %v1159_v30 = vsel %vm2385_vm4, %v2173_v2, %v1127_v45  ;;  %v1161_v32 = vsel %vm1097_vm11, %v2179_v6, %v1129_v54 }
 0x1ea   : > { %vm2386_vm5 = vcmp.ge.f32.partialorder %v2182_v11, 0.0  ;;  %vm2387_vm6 = vcmp.ge.f32.partialorder %v2185_v43, 0.0  ;;  %vm2388_vm7 = vcmp.ge.f32.partialorder %v2188_v52, 0.0  ;;  %vm2389_vm10 = vcmp.ge.f32.partialorder %v2191_v57, 0.0 }
 0x1eb   : > { %v1162_v49 = vsel %vm2386_vm5, %v2182_v11, %v1130_v29  ;;  %v1163_v36 = vsel %vm2387_vm6, %v2185_v43, %v1131_v7  ;;  %v1164_v2 = vsel %vm2388_vm7, %v2188_v52, %v1132_v34  ;;  %v1165_v5 = vsel %vm2389_vm10, %v2191_v57, %v1133_v61 }
 0x1ec   : > { %v1166_v6 = vsel %vm1102_vm0, %v2194_v20, %v1134_v12  ;;  %vm2390_vm11 = vcmp.ge.f32.partialorder %v2122_v31, 0.0  ;;  %vm2391_vm3 = vcmp.ge.f32.partialorder %v2124_v0, 0.0  ;;  %vm2392_vm4 = vcmp.ge.f32.partialorder %v2126_v1, 0.0 }
 0x1ed   : > { %v1167_v11 = vsel %vm2390_vm11, %v2122_v31, %v1135_v15  ;;  %v1168_v43 = vsel %vm2391_vm3, %v2124_v0, %v1136_v39  ;;  %v1169_v52 = vsel %vm2392_vm4, %v2126_v1, %v1137_v48  ;;  %vm2393_vm5 = vcmp.ge.f32.partialorder %v2128_v23, 0.0 }
 0x1ee   : > { %v1170_v57 = vsel %vm2393_vm5, %v2128_v23, %v1138_v17  ;;  %v1171_v20 = vsel %vm1107_vm12, %v2130_v35, %v1139_v21  ;;  %vm2394_vm0 = vcmp.ge.f32.partialorder %v2132_v28, 0.0  ;;  %vm2395_vm6 = vcmp.ge.f32.partialorder %v2134_v37, 0.0 }
 0x1ef   : > { %v1172_v31 = vsel %vm2394_vm0, %v2132_v28, %v1140_v8  ;;  %v1173_v0 = vsel %vm2395_vm6, %v2134_v37, %v1141_v25  ;;  %vm2396_vm7 = vcmp.ge.f32.partialorder %v2136_v33, 0.0  ;;  %v1175_v23 = vsel %vm1111_vm13, %v2138_v41, %v1143_v55 }
 0x1f0   : > { %v1174_v1 = vsel %vm2396_vm7, %v2136_v33, %v1142_v13  ;;  %vm2397_vm10 = vcmp.ge.f32.partialorder %v2140_v38, 0.0  ;;  %v1177_v28 = vsel %vm1113_vm1, %v2142_v56, %v1145_v53  ;;  %v1178_v37 = vsel %vm1114_vm15, %v2144_v60, %v1146_v63 }
 0x1f1   : > { %v1176_v35 = vsel %vm2397_vm10, %v2140_v38, %v1144_v18  ;;  %v1179_v33 = vsel %vm1115_vm9, %v2146_v10, %v1147_v4  ;;  %v1180_v41 = vsel %vm1116_vm8, %v2148_v44, %v1148_v9  ;;  %v1181_v38 = vsel %vm1117_vm14, %v2150_v62, %v1149_v22 }
 0x1f2   : > { %v1182_v56 = vsel %vm1118_vm2, %v2152_v3, %v1150_v26  ;;  %v1554_v60 = vpack.c.bf16 %v2232_v59, %v2222_v24  ;;  %v1559_v10 = vpack.c.bf16 %v1154_v16, %v1153_v47  ;;  %v1564_v40 = vpack.c.bf16 %v1156_v27, %v1155_v46 }
 0x1f3   : > { %v1569_v42 = vpack.c.bf16 %v1158_v14, %v1157_v58  ;;  %v1574_v50 = vpack.c.bf16 %v1160_v19, %v1159_v30  ;;  %v1579_v44 = vpack.c.bf16 %v1162_v49, %v1161_v32  ;;  %v1584_v62 = vpack.c.bf16 %v1164_v2, %v1163_v36 }
 0x1f4   : > { %1555 = vst [vmem:[%s2334_s13] sm:$0xff] %v1554_v60   ;;  %1631 = vst [vmem:[%s2334_s13 + $0x8] sm:$0xff] %v1559_v10   ;;  %v1589_v45 = vpack.c.bf16 %v1166_v6, %v1165_v5  ;;  %v1594_v51 = vpack.c.bf16 %v1168_v43, %v1167_v11  ;;  %v1599_v3 = vpack.c.bf16 %v1170_v57, %v1169_v52 }
 0x1f5   : > { %1632 = vst [vmem:[%s2334_s13 + $0x10] sm:$0xff] %v1564_v40   ;;  %1633 = vst [vmem:[%s2334_s13 + $0x18] sm:$0xff] %v1569_v42   ;;  %v1604_v24 = vpack.c.bf16 %v1172_v31, %v1171_v20  ;;  %v1609_v54 = vpack.c.bf16 %v1174_v1, %v1173_v0  ;;  %v1614_v29 = vpack.c.bf16 %v1176_v35, %v1175_v23 }
 0x1f6   : > { %1634 = vst [vmem:[%s2334_s13 + $0x20] sm:$0xff] %v1574_v50   ;;  %1635 = vst [vmem:[%s2334_s13 + $0x28] sm:$0xff] %v1579_v44   ;;  %v1619_v59 = vpack.c.bf16 %v1178_v37, %v1177_v28  ;;  %v1624_v7 = vpack.c.bf16 %v1180_v41, %v1179_v33  ;;  %v1629_v34 = vpack.c.bf16 %v1182_v56, %v1181_v38 }
 0x1f7   : > { %1636 = vst [vmem:[%s2334_s13 + $0x30] sm:$0xff] %v1584_v62   ;;  %1637 = vst [vmem:[%s2334_s13 + $0x38] sm:$0xff] %v1589_v45  }
 0x1f8   : > { %1638 = vst [vmem:[%s2334_s13 + $0x40] sm:$0xff] %v1594_v51   ;;  %1639 = vst [vmem:[%s2334_s13 + $0x48] sm:$0xff] %v1599_v3  }
 0x1f9   : > { %1640 = vst [vmem:[%s2334_s13 + $0x50] sm:$0xff] %v1604_v24   ;;  %1641 = vst [vmem:[%s2334_s13 + $0x58] sm:$0xff] %v1609_v54  }
 0x1fa   : > { %1642 = vst [vmem:[%s2334_s13 + $0x60] sm:$0xff] %v1614_v29   ;;  %1643 = vst [vmem:[%s2334_s13 + $0x68] sm:$0xff] %v1619_v59  }
 0x1fb   : > { %1644 = vst [vmem:[%s2334_s13 + $0x70] sm:$0xff] %v1624_v7   ;;  %1645 = vst [vmem:[%s2334_s13 + $0x78] sm:$0xff] %v1629_v34  }
 0x1fc PF: > { %s12_s11 = sadd.s32 1, %s1771_s11   ;;  %s2398_s9 = smov %s1767_s10 }
 0x1fd   : > { %p9_p5 = scmp.ge.s32.totalorder %s12_s11, 4   ;;  %s2399_s10 = smov %s2401_s12 }
 0x1ff   :  { %11 = sbr.rel (!%p9_p5) target bundleno = 2 (0x2), region = 67 }

// kernel: discriminator_forward.15
= control target key start
LH: loop header
LB: loop body
LE: loop exit
PB: predicated region body
PF: predicated region fallthrough
CT: control target
= control target key end

     0   :  { %s830_s9 = smov 0   ;;  %s832_s10 = smov 0   ;;  %s916_s0 = inlined_call_operand.vmem [shape: bf16[2,64,144], index: 0, kind: input, shape index: {}]   ;;  %s917_s1 = inlined_call_operand.vmem [shape: bf16[144,128], index: 1, kind: input, shape index: {}]   ;;  %s918_s2 = inlined_call_operand.vmem [shape: bf16[2,64,128], index: 2, kind: output, shape index: {}]  }
   0x1   :  { %s834_s11 = smov 0  }
   0x2 LB: > { %s24_s12 = sadd.s32 1, %s807_s10  ;;  %p653_p0 = scmp.ge.s32.totalorder %s811_s11, 1  ;;  %s811_s11 = sphi %s834_s11, %s12_s11   ;;  %s807_s10 = sphi %s832_s10, %s920_s10   ;;  %s803_s9 = sphi %s830_s9, %s919_s9  }
   0x3   : > { %p26_p1 = scmp.ge.s32.totalorder %s24_s12, 2  ;;  %p132_p2 = scmp.lt.s32.totalorder %s811_s11, 3 }
   0x5   : > { %s922_s12 = smov (%p26_p1, %s24_s12), 0  ;;  %p133_p3 = pnand %p653_p0, %p132_p2 }
   0x6   : > { %v766_v0 = vld [vmem:[%s917_s1] sm:$0xff] (!%p133_p3)   ;;  %v813_v1 = vmov (!%p133_p3), 0   ;;  %p160_p4 = scmp.lt.s32.totalorder (!%p133_p3), %s803_s9, 1  ;;  %v767_v2 = vld [vmem:[%s917_s1 + $0x8] sm:$0xff] (!%p133_p3)   ;;  %v768_v3 = vld [vmem:[%s917_s1 + $0x10] sm:$0xff] (!%p133_p3)   ;;  %vm297_vm0 = vcmask (!%p133_p3), 130048   ;;  %v415_v50 = vlaneseq (!%p133_p3) }
   0x7   : > { %136 = sbr.rel (%p133_p3) target bundleno = 358 (0x166), region = 28  ;;  %310 = vmatprep.subr.bf16.mxu0 (!%p133_p3), %v813_v1  ;;  %722 = vmatprep.subr.bf16.mxu1 (!%p133_p3), %v813_v1  ;;  %v769_v4 = vld [vmem:[%s917_s1 + $0x18] sm:$0xff] (!%p133_p3)   ;;  %v770_v7 = vld [vmem:[%s917_s1 + $0x20] sm:$0xff] (!%p133_p3)   ;;  %v771_v8 = vld [vmem:[%s917_s1 + $0x28] sm:$0xff] (!%p133_p3)   ;;  %v814_v18 = vmov (!%p133_p3), 0.0  }
   0x8   : > { %311 = vmatpush1.bf16.msra.mxu0 (!%p133_p3), %v766_v0  ;;  %731 = vmatpush1.bf16.msra.mxu1 (!%p133_p3), %v766_v0  ;;  %v772_v9 = vld [vmem:[%s917_s1 + $0x30] sm:$0xff] (!%p133_p3)   ;;  %v773_v10 = vld [vmem:[%s917_s1 + $0x38] sm:$0xff] (!%p133_p3)   ;;  %v774_v11 = vld [vmem:[%s917_s1 + $0x40] sm:$0xff] (!%p133_p3)   ;;  %180 = vst [vmem:[#allocation3] sm:$0x1] (!%p133_p3), %v814_v18  ;;  %v416_v51 = vshrl.u32 (!%p133_p3), %v415_v50, 7 }
   0x9   : > { %312 = vmatprep.subr.bf16.mxu0 (!%p133_p3), %v813_v1  ;;  %723 = vmatprep.subr.bf16.mxu1 (!%p133_p3), %v813_v1 }
   0xa   : > { %v417_v52 = vsub.s32 (!%p133_p3), 0, %v416_v51 }
   0xc   : > { %313 = vmatpush1.bf16.msra.mxu0 (!%p133_p3), %v767_v2  ;;  %732 = vmatpush1.bf16.msra.mxu1 (!%p133_p3), %v767_v2 }
   0xd   : > { %314 = vmatprep.subr.bf16.mxu0 (!%p133_p3), %v813_v1  ;;  %724 = vmatprep.subr.bf16.mxu1 (!%p133_p3), %v813_v1 }
   0xe   : > { %s924_s9 = smov (!%p160_p4, %s803_s9), 1 }
   0xf   : > { %s689_s17 = sshll.u32 %s924_s9, 6  ;;  %v385_v47 = vld [vmem:[#allocation3] sm:$0x1]  ;;  %s690_s7 = sshll.u32 %s924_s9, 5 }
  0x10   : > { %s863_s22 = scalar_lea.vmem %s916_s0, %s689_s17  ;;  %315 = vmatpush1.bf16.msra.mxu0 %v768_v3  ;;  %733 = vmatpush1.bf16.msra.mxu1 %v768_v3  ;;  %s174_s9 = scalar_lea.vmem %s918_s2, %s690_s7 }
  0x11   : > { %v777_v5 = vld [vmem:[%s863_s22 + $0x4] ss:$8 sps:$4 sm:$0xff]   ;;  %316 = vmatprep.subr.bf16.mxu0 %v813_v1  ;;  %725 = vmatprep.subr.bf16.mxu1 %v813_v1  ;;  %v775_v12 = vld [vmem:[%s863_s22] ss:$8 sps:$4 sm:$0xff]   ;;  %v781_v14 = vld [vmem:[%s863_s22 + $0x14] ss:$8 sps:$4 sm:$0xff]  }
  0x12   : > { %v780_v6 = vld [vmem:[%s863_s22 + $0x24] ss:$8 sps:$4 sm:$0xff]   ;;  %675 = vmatprep.mubr.msk.bf16.mxu0 %vm297_vm0, %v777_v5  ;;  %v778_v13 = vld [vmem:[%s863_s22 + $0x20] ss:$8 sps:$4 sm:$0xff]   ;;  %v784_v15 = vld [vmem:[%s863_s22 + $0x34] ss:$8 sps:$4 sm:$0xff]  }
  0x13   : > { %677 = vmatprep.mubr.msk.bf16.mxu1 %vm297_vm0, %v780_v6  ;;  %v783_v16 = vld [vmem:[%s863_s22 + $0x10] ss:$8 sps:$4 sm:$0xff]  }
  0x14   : > { %317 = vmatpush1.bf16.msra.mxu0 %v769_v4  ;;  %734 = vmatpush1.bf16.msra.mxu1 %v769_v4  ;;  %v786_v17 = vld [vmem:[%s863_s22 + $0x30] ss:$8 sps:$4 sm:$0xff]  }
  0x15   : > { %318 = vmatprep.subr.bf16.mxu0 %v813_v1  ;;  %726 = vmatprep.subr.bf16.mxu1 %v813_v1 }
  0x18   : > { %319 = vmatpush1.bf16.msra.mxu0 %v770_v7  ;;  %735 = vmatpush1.bf16.msra.mxu1 %v770_v7 }
  0x19   : > { %320 = vmatprep.subr.bf16.mxu0 %v813_v1  ;;  %727 = vmatprep.subr.bf16.mxu1 %v813_v1 }
  0x1c   : > { %321 = vmatpush1.bf16.msra.mxu0 %v771_v8  ;;  %736 = vmatpush1.bf16.msra.mxu1 %v771_v8 }
  0x1d   : > { %322 = vmatprep.subr.bf16.mxu0 %v813_v1  ;;  %728 = vmatprep.subr.bf16.mxu1 %v813_v1 }
  0x20   : > { %323 = vmatpush1.bf16.msra.mxu0 %v772_v9  ;;  %737 = vmatpush1.bf16.msra.mxu1 %v772_v9 }
  0x21   : > { %324 = vmatprep.subr.bf16.mxu0 %v813_v1  ;;  %729 = vmatprep.subr.bf16.mxu1 %v813_v1 }
  0x24   : > { %325 = vmatpush1.bf16.msra.mxu0 %v773_v10  ;;  %738 = vmatpush1.bf16.msra.mxu1 %v773_v10 }
  0x25   : > { %326 = vmatprep.subr.bf16.mxu0 %v813_v1  ;;  %730 = vmatprep.subr.bf16.mxu1 %v813_v1 }
  0x28   : > { %327 = vmatpush1.bf16.msra.mxu0 %v774_v11  ;;  %739 = vmatpush1.bf16.msra.mxu1 %v774_v11 }
  0x2b   : > { %343 = vmatmul.mubr.bf16.vlgmr.msra.gmra.mrb[0].mxu0 %v775_v12  ;;  %359 = vmatmul.mubr.bf16.vlgmr.msra.gmra.mrb[0].mxu1 %v778_v13 }
  0x2c   : > { %676 = vmatprep.mubr.msk.bf16.mxu0 %vm297_vm0, %v781_v14  ;;  %678 = vmatprep.mubr.msk.bf16.mxu1 %vm297_vm0, %v784_v15 }
  0x33   : > { %351 = vmatmul.mubr.bf16.gmra.mrb[4].mxu0 %v783_v16  ;;  %367 = vmatmul.mubr.bf16.gmra.mrb[4].mxu1 %v786_v17 }
  0xfe   : > { %v344_v19 = vpop.f32.mrb[0].mxu0  ;;  %v360_v20 = vpop.f32.mrb[0].mxu1 }
  0xff   : > { %v346_v21 = vpop.f32.mrb[1].mxu0  ;;  %v362_v22 = vpop.f32.mrb[1].mxu1 }
 0x100   : > { %v347_v23 = vpop.f32.mrb[2].mxu0  ;;  %v363_v24 = vpop.f32.mrb[2].mxu1 }
 0x101   : > { %v386_v25 = vadd.f32 %v347_v23, %v344_v19  ;;  %v349_v26 = vpop.f32.mrb[3].mxu0  ;;  %v365_v27 = vpop.f32.mrb[3].mxu1 }
 0x106   : > { %v352_v28 = vpop.f32.mrb[4].mxu0  ;;  %v368_v29 = vpop.f32.mrb[4].mxu1 }
 0x107   : > { %v387_v30 = vadd.f32 %v386_v25, %v352_v28  ;;  %v354_v31 = vpop.f32.mrb[5].mxu0  ;;  %v370_v32 = vpop.f32.mrb[5].mxu1 }
 0x108   : > { %v355_v33 = vpop.f32.mrb[6].mxu0  ;;  %v371_v34 = vpop.f32.mrb[6].mxu1 }
 0x109   : > { %v388_v35 = vadd.f32 %v387_v30, %v355_v33  ;;  %v357_v36 = vpop.f32.mrb[7].mxu0  ;;  %v373_v37 = vpop.f32.mrb[7].mxu1 }
 0x10b   : > { %v389_v38 = vadd.f32 %v388_v35, %v360_v20 }
 0x10d   : > { %v390_v39 = vadd.f32 %v389_v38, %v363_v24 }
 0x10f   : > { %v391_v40 = vadd.f32 %v390_v39, %v368_v29 }
 0x111   : > { %v392_v41 = vadd.f32 %v391_v40, %v371_v34 }
 0x113   : > { %v393_v42 = vrot.slane %v392_v41, 4 }
 0x115   : > { %v394_v43 = vadd.f32 %v393_v42, %v392_v41 }
 0x117   : > { %v395_v44 = vrot.slane %v394_v43, 2 }
 0x119   : > { %v396_v45 = vadd.f32 %v395_v44, %v394_v43 }
 0x11b   : > { %v397_v46 = vrot.slane %v396_v45, 1 }
 0x11d   : > { %v398_v48 = vadd.f32 %v397_v46, %v396_v45 }
 0x11f   : > { %v399_v49 = vadd.f32 %v398_v48, %v385_v47 }
 0x121   : > { %400 = vst [vmem:[#allocation3] sm:$0x1] %v399_v49 }
 0x128   : > { %v404_v53 = vld [vmem:[#allocation3] sm:$0x1] }
 0x129   : > { %v405_v54 = vmul.f32 0.015625, %v404_v53 }
 0x12b   : > { %v418_v55 = vrot.slane %v405_v54, %v417_v52 }
 0x12d   : > { %v420_v56 = vsub.f32 %v344_v19, %v418_v55  ;;  %v421_v57 = vsub.f32 %v347_v23, %v418_v55  ;;  %v422_v58 = vsub.f32 %v352_v28, %v418_v55  ;;  %v423_v59 = vsub.f32 %v355_v33, %v418_v55 }
 0x12e   : > { %v424_v62 = vsub.f32 %v360_v20, %v418_v55  ;;  %v425_v1 = vsub.f32 %v363_v24, %v418_v55  ;;  %v426_v4 = vsub.f32 %v368_v29, %v418_v55  ;;  %v427_v7 = vsub.f32 %v371_v34, %v418_v55 }
 0x12f   : > { %v478_v60 = vmul.f32 %v420_v56, %v420_v56  ;;  %v479_v61 = vmul.f32 %v421_v57, %v421_v57  ;;  %v480_v63 = vmul.f32 %v422_v58, %v422_v58  ;;  %v481_v2 = vmul.f32 %v423_v59, %v423_v59 }
 0x130   : > { %v482_v5 = vmul.f32 %v424_v62, %v424_v62  ;;  %v483_v8 = vmul.f32 %v425_v1, %v425_v1  ;;  %v484_v10 = vmul.f32 %v426_v4, %v426_v4  ;;  %v485_v12 = vmul.f32 %v427_v7, %v427_v7 }
 0x131   : > { %v486_v0 = vadd.f32 %v479_v61, %v478_v60 }
 0x133   : > { %v487_v3 = vadd.f32 %v486_v0, %v480_v63 }
 0x135   : > { %v488_v6 = vadd.f32 %v487_v3, %v481_v2 }
 0x137   : > { %v489_v9 = vadd.f32 %v488_v6, %v482_v5 }
 0x139   : > { %v490_v11 = vadd.f32 %v489_v9, %v483_v8 }
 0x13b   : > { %v491_v13 = vadd.f32 %v490_v11, %v484_v10 }
 0x13d   : > { %v492_v14 = vadd.f32 %v491_v13, %v485_v12 }
 0x13f   : > { %v493_v15 = vrot.slane %v492_v14, 4 }
 0x141   : > { %v494_v16 = vadd.f32 %v493_v15, %v492_v14 }
 0x143   : > { %v495_v17 = vrot.slane %v494_v16, 2 }
 0x145   : > { %v496_v18 = vadd.f32 %v495_v17, %v494_v16 }
 0x147   : > { %v497_v19 = vrot.slane %v496_v18, 1 }
 0x149   : > { %v498_v20 = vadd.f32 %v497_v19, %v496_v18 }
 0x14b   : > { %v500_v21 = vmul.f32 0.015625, %v498_v20 }
 0x14d   : > { %v501_v22 = vadd.f32 1e-05, %v500_v21 }
 0x14f   : > { %787 = vrsqrt.f32 %v501_v22 }
 0x159   : > { %v788_v23 = vpop.eup %787 }
 0x15a   : > { %v503_v24 = vmul.f32 %v788_v23, %v420_v56  ;;  %v504_v25 = vmul.f32 %v788_v23, %v421_v57  ;;  %v505_v26 = vmul.f32 %v788_v23, %v422_v58  ;;  %v506_v27 = vmul.f32 %v788_v23, %v423_v59 }
 0x15b   : > { %v507_v28 = vmul.f32 %v788_v23, %v424_v62  ;;  %v508_v29 = vmul.f32 %v788_v23, %v425_v1  ;;  %v509_v30 = vmul.f32 %v788_v23, %v426_v4  ;;  %v510_v31 = vmul.f32 %v788_v23, %v427_v7 }
 0x15c   : > { %vm511_vm1 = vcmp.ge.f32.partialorder %v503_v24, 0.0  ;;  %vm512_vm2 = vcmp.ge.f32.partialorder %v504_v25, 0.0  ;;  %vm513_vm3 = vcmp.ge.f32.partialorder %v505_v26, 0.0  ;;  %vm514_vm4 = vcmp.ge.f32.partialorder %v506_v27, 0.0 }
 0x15d   : > { %vm515_vm5 = vcmp.ge.f32.partialorder %v507_v28, 0.0  ;;  %vm516_vm6 = vcmp.ge.f32.partialorder %v508_v29, 0.0  ;;  %vm517_vm7 = vcmp.ge.f32.partialorder %v509_v30, 0.0  ;;  %vm518_vm8 = vcmp.ge.f32.partialorder %v510_v31, 0.0 }
 0x15e   : > { %v519_v32 = vmul.f32 0.2, %v503_v24  ;;  %v520_v33 = vmul.f32 0.2, %v504_v25  ;;  %v521_v34 = vmul.f32 0.2, %v505_v26 }
 0x15f   : > { %v522_v35 = vmul.f32 0.2, %v506_v27  ;;  %v523_v36 = vmul.f32 0.2, %v507_v28  ;;  %v524_v37 = vmul.f32 0.2, %v508_v29 }
 0x160   : > { %v525_v38 = vmul.f32 0.2, %v509_v30  ;;  %v526_v39 = vmul.f32 0.2, %v510_v31  ;;  %v527_v40 = vsel %vm511_vm1, %v503_v24, %v519_v32  ;;  %v528_v41 = vsel %vm512_vm2, %v504_v25, %v520_v33 }
 0x161   : > { %v529_v42 = vsel %vm513_vm3, %v505_v26, %v521_v34  ;;  %v530_v43 = vsel %vm514_vm4, %v506_v27, %v522_v35  ;;  %v531_v44 = vsel %vm515_vm5, %v507_v28, %v523_v36  ;;  %v532_v45 = vsel %vm516_vm6, %v508_v29, %v524_v37 }
 0x162   : > { %v533_v46 = vsel %vm517_vm7, %v509_v30, %v525_v38  ;;  %v534_v47 = vsel %vm518_vm8, %v510_v31, %v526_v39  ;;  %v702_v48 = vpack.c.bf16 %v528_v41, %v527_v40  ;;  %v707_v49 = vpack.c.bf16 %v530_v43, %v529_v42 }
 0x163   : > { %v712_v50 = vpack.c.bf16 %v532_v45, %v531_v44  ;;  %v717_v51 = vpack.c.bf16 %v534_v47, %v533_v46 }
 0x164   : > { %703 = vst [vmem:[%s174_s9] sm:$0xff] %v702_v48   ;;  %719 = vst [vmem:[%s174_s9 + $0x8] sm:$0xff] %v707_v49  }
 0x165   : > { %720 = vst [vmem:[%s174_s9 + $0x10] sm:$0xff] %v712_v50   ;;  %721 = vst [vmem:[%s174_s9 + $0x18] sm:$0xff] %v717_v51  }
 0x166 PF: > { %s12_s11 = sadd.s32 1, %s811_s11   ;;  %s919_s9 = smov %s807_s10 }
 0x167   : > { %p9_p5 = scmp.ge.s32.totalorder %s12_s11, 4   ;;  %s920_s10 = smov %s922_s12 }
 0x169   :  { %11 = sbr.rel (!%p9_p5) target bundleno = 2 (0x2), region = 67 }

// kernel: discriminator_forward.16
= control target key start
LH: loop header
LB: loop body
LE: loop exit
PB: predicated region body
PF: predicated region fallthrough
CT: control target
= control target key end

     0   :  { %s1078_s9 = smov 0   ;;  %s1080_s10 = smov 0   ;;  %s1195_s0 = inlined_call_operand.vmem [shape: bf16[2,64,288], index: 0, kind: input, shape index: {}]   ;;  %s1196_s1 = inlined_call_operand.vmem [shape: bf16[288,128], index: 1, kind: input, shape index: {}]   ;;  %s1197_s2 = inlined_call_operand.vmem [shape: bf16[2,64,128], index: 2, kind: output, shape index: {}]  }
   0x1   :  { %s1082_s11 = smov 0  }
   0x2 LB: > { %s24_s12 = sadd.s32 1, %s1056_s10  ;;  %p822_p0 = scmp.ge.s32.totalorder %s1060_s11, 1  ;;  %s1060_s11 = sphi %s1082_s11, %s12_s11   ;;  %s1056_s10 = sphi %s1080_s10, %s1199_s10   ;;  %s1052_s9 = sphi %s1078_s9, %s1198_s9  }
   0x3   : > { %p26_p1 = scmp.ge.s32.totalorder %s24_s12, 2  ;;  %p132_p2 = scmp.lt.s32.totalorder %s1060_s11, 3 }
   0x5   : > { %s1201_s12 = smov (%p26_p1, %s24_s12), 0  ;;  %p133_p3 = pnand %p822_p0, %p132_p2 }
   0x6   : > { %v1002_v0 = vld [vmem:[%s1196_s1 + $0x40] sm:$0xff] (!%p133_p3)   ;;  %v1004_v2 = vld [vmem:[%s1196_s1 + $0x48] sm:$0xff] (!%p133_p3)   ;;  %p160_p4 = scmp.lt.s32.totalorder (!%p133_p3), %s1052_s9, 1  ;;  %v1006_v4 = vld [vmem:[%s1196_s1 + $0x50] sm:$0xff] (!%p133_p3)   ;;  %vm401_vm0 = vcmask (!%p133_p3), 261120   ;;  %v1062_v30 = vmov (!%p133_p3), 0.0  }
   0x7   : > { %136 = sbr.rel (%p133_p3) target bundleno = 363 (0x16b), region = 28  ;;  %v1003_v1 = vld [vmem:[%s1196_s1] sm:$0xff] (!%p133_p3)   ;;  %902 = vmatprep.subr.bf16.mxu0 (!%p133_p3), %v1002_v0  ;;  %960 = vmatprep.subr.bf16.mxu1 (!%p133_p3), %v1002_v0  ;;  %v1005_v3 = vld [vmem:[%s1196_s1 + $0x8] sm:$0xff] (!%p133_p3)   ;;  %v1007_v5 = vld [vmem:[%s1196_s1 + $0x10] sm:$0xff] (!%p133_p3)   ;;  %180 = vst [vmem:[#allocation3] sm:$0x1] (!%p133_p3), %v1062_v30 }
   0x8   : > { %903 = vmatpush3.bf16.msra.mxu0 (!%p133_p3), %v1003_v1  ;;  %968 = vmatpush3.bf16.msra.mxu1 (!%p133_p3), %v1003_v1  ;;  %v1008_v6 = vld [vmem:[%s1196_s1 + $0x58] sm:$0xff] (!%p133_p3)   ;;  %v1010_v8 = vld [vmem:[%s1196_s1 + $0x60] sm:$0xff] (!%p133_p3)   ;;  %v1012_v10 = vld [vmem:[%s1196_s1 + $0x68] sm:$0xff] (!%p133_p3)  }
   0x9   : > { %904 = vmatprep.subr.bf16.mxu0 (!%p133_p3), %v1004_v2  ;;  %961 = vmatprep.subr.bf16.mxu1 (!%p133_p3), %v1004_v2  ;;  %v1009_v7 = vld [vmem:[%s1196_s1 + $0x18] sm:$0xff] (!%p133_p3)   ;;  %v1011_v9 = vld [vmem:[%s1196_s1 + $0x20] sm:$0xff] (!%p133_p3)   ;;  %v1013_v13 = vld [vmem:[%s1196_s1 + $0x28] sm:$0xff] (!%p133_p3)  }
   0xa   : > { %v1014_v14 = vld [vmem:[%s1196_s1 + $0x70] sm:$0xff] (!%p133_p3)   ;;  %v1016_v16 = vld [vmem:[%s1196_s1 + $0x78] sm:$0xff] (!%p133_p3)   ;;  %v1024_v18 = vld [vmem:[%s1196_s1 + $0x80] sm:$0xff] (!%p133_p3)  }
   0xb   : > { %v1015_v15 = vld [vmem:[%s1196_s1 + $0x30] sm:$0xff] (!%p133_p3)   ;;  %v1017_v17 = vld [vmem:[%s1196_s1 + $0x38] sm:$0xff] (!%p133_p3)   ;;  %v1025_v22 = vld [vmem:[%s1196_s1 + $0x88] sm:$0xff] (!%p133_p3)  }
   0xc   : > { %905 = vmatpush3.bf16.msra.mxu0 (!%p133_p3), %v1005_v3  ;;  %969 = vmatpush3.bf16.msra.mxu1 (!%p133_p3), %v1005_v3 }
   0xd   : > { %906 = vmatprep.subr.bf16.mxu0 (!%p133_p3), %v1006_v4  ;;  %962 = vmatprep.subr.bf16.mxu1 (!%p133_p3), %v1006_v4 }
   0xe   : > { %s1203_s9 = smov (!%p160_p4, %s1052_s9), 1 }
   0xf   : > { %s976_s27 = smul.u32 96, %s1203_s9  ;;  %s870_s29 = sshll.u32 %s1203_s9, 5 }
  0x10   : > { %907 = vmatpush3.bf16.msra.mxu0 %v1007_v5  ;;  %970 = vmatpush3.bf16.msra.mxu1 %v1007_v5  ;;  %s174_s9 = scalar_lea.vmem %s1197_s2, %s870_s29 }
  0x11   : > { %908 = vmatprep.subr.bf16.mxu0 %v1008_v6  ;;  %963 = vmatprep.subr.bf16.mxu1 %v1008_v6  ;;  %s1129_s6 = scalar_lea.vmem %s1195_s0, %s976_s27 }
  0x12   : > { %v1020_v11 = vld [vmem:[%s1129_s6 + $0x4] ss:$12 sps:$4 sm:$0xff]   ;;  %v1023_v12 = vld [vmem:[%s1129_s6 + $0x4c] ss:$12 sps:$4 sm:$0xff]   ;;  %v1021_v20 = vld [vmem:[%s1129_s6 + $0x48] ss:$12 sps:$4 sm:$0xff]  }
  0x13   : > { %446 = vmatprep.mubr.bf16.mxu0 %v1020_v11  ;;  %470 = vmatprep.mubr.bf16.mxu1 %v1023_v12  ;;  %v1018_v19 = vld [vmem:[%s1129_s6] ss:$12 sps:$4 sm:$0xff]   ;;  %v1026_v21 = vld [vmem:[%s1129_s6 + $0x1c] ss:$12 sps:$4 sm:$0xff]   ;;  %v1029_v24 = vld [vmem:[%s1129_s6 + $0x18] ss:$12 sps:$4 sm:$0xff]  }
  0x14   : > { %909 = vmatpush3.bf16.msra.mxu0 %v1009_v7  ;;  %971 = vmatpush3.bf16.msra.mxu1 %v1009_v7  ;;  %v1028_v23 = vld [vmem:[%s1129_s6 + $0x8] ss:$12 sps:$4 sm:$0xff]   ;;  %v1030_v25 = vld [vmem:[%s1129_s6 + $0x20] ss:$12 sps:$4 sm:$0xff]   ;;  %v1033_v27 = vld [vmem:[%s1129_s6 + $0x38] ss:$12 sps:$4 sm:$0xff]  }
  0x15   : > { %910 = vmatprep.subr.bf16.mxu0 %v1010_v8  ;;  %964 = vmatprep.subr.bf16.mxu1 %v1010_v8  ;;  %v1031_v26 = vld [vmem:[%s1129_s6 + $0x34] ss:$12 sps:$4 sm:$0xff]   ;;  %v1034_v28 = vld [vmem:[%s1129_s6 + $0x30] ss:$12 sps:$4 sm:$0xff]  }
  0x16   : > { %v1035_v29 = vld [vmem:[%s1129_s6 + $0x50] ss:$12 sps:$4 sm:$0xff]  }
  0x18   : > { %911 = vmatpush3.bf16.msra.mxu0 %v1011_v9  ;;  %972 = vmatpush3.bf16.msra.mxu1 %v1011_v9 }
  0x19   : > { %912 = vmatprep.subr.bf16.mxu0 %v1012_v10  ;;  %965 = vmatprep.subr.bf16.mxu1 %v1012_v10 }
  0x1c   : > { %913 = vmatpush3.bf16.msra.mxu0 %v1013_v13  ;;  %973 = vmatpush3.bf16.msra.mxu1 %v1013_v13 }
  0x1d   : > { %914 = vmatprep.subr.bf16.mxu0 %v1014_v14  ;;  %966 = vmatprep.subr.bf16.mxu1 %v1014_v14 }
  0x20   : > { %915 = vmatpush3.bf16.msra.mxu0 %v1015_v15  ;;  %974 = vmatpush3.bf16.msra.mxu1 %v1015_v15 }
  0x21   : > { %916 = vmatprep.subr.bf16.mxu0 %v1016_v16  ;;  %967 = vmatprep.subr.bf16.mxu1 %v1016_v16 }
  0x24   : > { %917 = vmatpush3.bf16.msra.mxu0 %v1017_v17  ;;  %975 = vmatpush3.bf16.msra.mxu1 %v1017_v17 }
  0x25   : > { %948 = vmatprep.subr.bf16.mxu1 %v1024_v18 }
  0x27   : > { %447 = vmatmul.mubr.bf16.vlgmr.msra.gmra.mrb[0].mxu0 %v1018_v19  ;;  %471 = vmatmul.mubr.bf16.vlgmr.msra.gmra.mrb[0].mxu1 %v1021_v20  ;;  %v554_v19 = vld [vmem:[#allocation3] sm:$0x1] }
  0x28   : > { %949 = vmatpush3.bf16.msra.mxu1 %v1024_v18  ;;  %454 = vmatprep.mubr.bf16.mxu0 %v1026_v21 }
  0x29   : > { %950 = vmatprep.subr.bf16.mxu1 %v1025_v22  ;;  %952 = vmatprep.mubr.msk.bf16.mxu1 %vm401_vm0, %v1028_v23 }
  0x2c   : > { %951 = vmatpush3.bf16.msra.mxu1 %v1025_v22  ;;  %v584_v22 = vlaneseq }
  0x2e   : > { %v585_v23 = vshrl.u32 %v584_v22, 7 }
  0x2f   : > { %455 = vmatmul.mubr.bf16.gmra.mrb[4].mxu0 %v1029_v24  ;;  %953 = vmatmul.mubr.msk.bf16.vlgmr.msra.gmra.mrb[4].mxu1 %vm401_vm0, %v1030_v25 }
  0x30   : > { %462 = vmatprep.mubr.bf16.mxu0 %v1031_v26  ;;  %956 = vmatprep.mubr.msk.bf16.mxu1 %vm401_vm0, %v1033_v27  ;;  %v586_v24 = vsub.s32 0, %v585_v23 }
  0x37   : > { %463 = vmatmul.mubr.bf16.gmra.mrb[8].mxu0 %v1034_v28  ;;  %957 = vmatmul.mubr.msk.bf16.gmra.mrb[8].mxu1 %vm401_vm0, %v1035_v29 }
  0xfa   : > { %v918_v31 = vpop.f32.mrb[0].mxu0  ;;  %v936_v32 = vpop.f32.mrb[0].mxu1 }
  0xfb   : > { %v919_v33 = vpop.f32.mrb[1].mxu0  ;;  %v937_v34 = vpop.f32.mrb[1].mxu1 }
  0xfc   : > { %v920_v35 = vadd.f32 %v919_v33, %v918_v31  ;;  %v938_v36 = vadd.f32 %v937_v34, %v936_v32  ;;  %v921_v37 = vpop.f32.mrb[2].mxu0  ;;  %v939_v38 = vpop.f32.mrb[2].mxu1 }
  0xfd   : > { %v922_v39 = vpop.f32.mrb[3].mxu0  ;;  %v940_v40 = vpop.f32.mrb[3].mxu1 }
  0xfe   : > { %v923_v41 = vadd.f32 %v922_v39, %v921_v37  ;;  %v941_v42 = vadd.f32 %v940_v40, %v939_v38 }
 0x102   : > { %v924_v43 = vpop.f32.mrb[4].mxu0  ;;  %v954_v44 = vpop.f32.mrb[4].mxu1 }
 0x103   : > { %v925_v45 = vpop.f32.mrb[5].mxu0  ;;  %v513_v46 = vpop.f32.mrb[5].mxu1 }
 0x104   : > { %v926_v47 = vadd.f32 %v925_v45, %v924_v43  ;;  %v514_v48 = vadd.f32 %v920_v35, %v513_v46  ;;  %v927_v49 = vpop.f32.mrb[6].mxu0  ;;  %v955_v50 = vpop.f32.mrb[6].mxu1 }
 0x105   : > { %v928_v51 = vpop.f32.mrb[7].mxu0  ;;  %v516_v52 = vpop.f32.mrb[7].mxu1 }
 0x106   : > { %v522_v53 = vadd.f32 %v954_v44, %v926_v47  ;;  %v929_v54 = vadd.f32 %v928_v51, %v927_v49  ;;  %v517_v55 = vadd.f32 %v923_v41, %v516_v52 }
 0x108   : > { %v525_v56 = vadd.f32 %v955_v50, %v929_v54  ;;  %v555_v57 = vadd.f32 %v517_v55, %v514_v48 }
 0x10a   : > { %v556_v58 = vadd.f32 %v555_v57, %v522_v53  ;;  %v930_v59 = vpop.f32.mrb[8].mxu0  ;;  %v958_v60 = vpop.f32.mrb[8].mxu1 }
 0x10b   : > { %v538_v61 = vadd.f32 %v958_v60, %v938_v36  ;;  %v931_v62 = vpop.f32.mrb[9].mxu0  ;;  %v529_v63 = vpop.f32.mrb[9].mxu1 }
 0x10c   : > { %v932_v0 = vadd.f32 %v931_v62, %v930_v59  ;;  %v557_v1 = vadd.f32 %v556_v58, %v525_v56  ;;  %v933_v2 = vpop.f32.mrb[10].mxu0  ;;  %v959_v3 = vpop.f32.mrb[10].mxu1 }
 0x10d   : > { %v541_v4 = vadd.f32 %v959_v3, %v941_v42  ;;  %v934_v5 = vpop.f32.mrb[11].mxu0  ;;  %v532_v6 = vpop.f32.mrb[11].mxu1 }
 0x10e   : > { %v530_v7 = vadd.f32 %v932_v0, %v529_v63  ;;  %v935_v8 = vadd.f32 %v934_v5, %v933_v2 }
 0x110   : > { %v558_v9 = vadd.f32 %v557_v1, %v530_v7  ;;  %v533_v10 = vadd.f32 %v935_v8, %v532_v6 }
 0x112   : > { %v559_v11 = vadd.f32 %v558_v9, %v533_v10 }
 0x114   : > { %v560_v12 = vadd.f32 %v559_v11, %v538_v61 }
 0x116   : > { %v561_v13 = vadd.f32 %v560_v12, %v541_v4 }
 0x118   : > { %v562_v14 = vrot.slane %v561_v13, 4 }
 0x11a   : > { %v563_v15 = vadd.f32 %v562_v14, %v561_v13 }
 0x11c   : > { %v564_v16 = vrot.slane %v563_v15, 2 }
 0x11e   : > { %v565_v17 = vadd.f32 %v564_v16, %v563_v15 }
 0x120   : > { %v566_v18 = vrot.slane %v565_v17, 1 }
 0x122   : > { %v567_v20 = vadd.f32 %v566_v18, %v565_v17 }
 0x124   : > { %v568_v21 = vadd.f32 %v567_v20, %v554_v19 }
 0x126   : > { %569 = vst [vmem:[#allocation3] sm:$0x1] %v568_v21 }
 0x12d   : > { %v573_v25 = vld [vmem:[#allocation3] sm:$0x1] }
 0x12e   : > { %v574_v26 = vmul.f32 0.015625, %v573_v25 }
 0x130   : > { %v587_v27 = vrot.slane %v574_v26, %v586_v24 }
 0x132   : > { %v589_v28 = vsub.f32 %v514_v48, %v587_v27  ;;  %v590_v29 = vsub.f32 %v517_v55, %v587_v27  ;;  %v591_v30 = vsub.f32 %v522_v53, %v587_v27  ;;  %v592_v31 = vsub.f32 %v525_v56, %v587_v27 }
 0x133   : > { %v593_v34 = vsub.f32 %v530_v7, %v587_v27  ;;  %v594_v37 = vsub.f32 %v533_v10, %v587_v27  ;;  %v595_v40 = vsub.f32 %v538_v61, %v587_v27  ;;  %v596_v43 = vsub.f32 %v541_v4, %v587_v27 }
 0x134   : > { %v647_v32 = vmul.f32 %v589_v28, %v589_v28  ;;  %v648_v33 = vmul.f32 %v590_v29, %v590_v29  ;;  %v649_v35 = vmul.f32 %v591_v30, %v591_v30  ;;  %v650_v38 = vmul.f32 %v592_v31, %v592_v31 }
 0x135   : > { %v651_v41 = vmul.f32 %v593_v34, %v593_v34  ;;  %v652_v44 = vmul.f32 %v594_v37, %v594_v37  ;;  %v653_v46 = vmul.f32 %v595_v40, %v595_v40  ;;  %v654_v48 = vmul.f32 %v596_v43, %v596_v43 }
 0x136   : > { %v655_v36 = vadd.f32 %v648_v33, %v647_v32 }
 0x138   : > { %v656_v39 = vadd.f32 %v655_v36, %v649_v35 }
 0x13a   : > { %v657_v42 = vadd.f32 %v656_v39, %v650_v38 }
 0x13c   : > { %v658_v45 = vadd.f32 %v657_v42, %v651_v41 }
 0x13e   : > { %v659_v47 = vadd.f32 %v658_v45, %v652_v44 }
 0x140   : > { %v660_v49 = vadd.f32 %v659_v47, %v653_v46 }
 0x142   : > { %v661_v50 = vadd.f32 %v660_v49, %v654_v48 }
 0x144   : > { %v662_v51 = vrot.slane %v661_v50, 4 }
 0x146   : > { %v663_v52 = vadd.f32 %v662_v51, %v661_v50 }
 0x148   : > { %v664_v53 = vrot.slane %v663_v52, 2 }
 0x14a   : > { %v665_v54 = vadd.f32 %v664_v53, %v663_v52 }
 0x14c   : > { %v666_v55 = vrot.slane %v665_v54, 1 }
 0x14e   : > { %v667_v56 = vadd.f32 %v666_v55, %v665_v54 }
 0x150   : > { %v669_v57 = vmul.f32 0.015625, %v667_v56 }
 0x152   : > { %v670_v58 = vadd.f32 1e-05, %v669_v57 }
 0x154   : > { %1036 = vrsqrt.f32 %v670_v58 }
 0x15e   : > { %v1037_v59 = vpop.eup %1036 }
 0x15f   : > { %v672_v60 = vmul.f32 %v1037_v59, %v589_v28  ;;  %v673_v61 = vmul.f32 %v1037_v59, %v590_v29  ;;  %v674_v62 = vmul.f32 %v1037_v59, %v591_v30  ;;  %v675_v63 = vmul.f32 %v1037_v59, %v592_v31 }
 0x160   : > { %v676_v0 = vmul.f32 %v1037_v59, %v593_v34  ;;  %v677_v1 = vmul.f32 %v1037_v59, %v594_v37  ;;  %v678_v2 = vmul.f32 %v1037_v59, %v595_v40  ;;  %v679_v3 = vmul.f32 %v1037_v59, %v596_v43 }
 0x161   : > { %vm680_vm1 = vcmp.ge.f32.partialorder %v672_v60, 0.0  ;;  %vm681_vm2 = vcmp.ge.f32.partialorder %v673_v61, 0.0  ;;  %vm682_vm3 = vcmp.ge.f32.partialorder %v674_v62, 0.0  ;;  %vm683_vm4 = vcmp.ge.f32.partialorder %v675_v63, 0.0 }
 0x162   : > { %vm684_vm5 = vcmp.ge.f32.partialorder %v676_v0, 0.0  ;;  %vm685_vm6 = vcmp.ge.f32.partialorder %v677_v1, 0.0  ;;  %vm686_vm7 = vcmp.ge.f32.partialorder %v678_v2, 0.0  ;;  %vm687_vm8 = vcmp.ge.f32.partialorder %v679_v3, 0.0 }
 0x163   : > { %v688_v4 = vmul.f32 0.2, %v672_v60  ;;  %v689_v5 = vmul.f32 0.2, %v673_v61  ;;  %v690_v6 = vmul.f32 0.2, %v674_v62 }
 0x164   : > { %v691_v7 = vmul.f32 0.2, %v675_v63  ;;  %v692_v8 = vmul.f32 0.2, %v676_v0  ;;  %v693_v9 = vmul.f32 0.2, %v677_v1 }
 0x165   : > { %v694_v10 = vmul.f32 0.2, %v678_v2  ;;  %v695_v11 = vmul.f32 0.2, %v679_v3  ;;  %v696_v12 = vsel %vm680_vm1, %v672_v60, %v688_v4  ;;  %v697_v13 = vsel %vm681_vm2, %v673_v61, %v689_v5 }
 0x166   : > { %v698_v14 = vsel %vm682_vm3, %v674_v62, %v690_v6  ;;  %v699_v15 = vsel %vm683_vm4, %v675_v63, %v691_v7  ;;  %v700_v16 = vsel %vm684_vm5, %v676_v0, %v692_v8  ;;  %v701_v17 = vsel %vm685_vm6, %v677_v1, %v693_v9 }
 0x167   : > { %v702_v18 = vsel %vm686_vm7, %v678_v2, %v694_v10  ;;  %v703_v19 = vsel %vm687_vm8, %v679_v3, %v695_v11  ;;  %v882_v20 = vpack.c.bf16 %v697_v13, %v696_v12  ;;  %v887_v21 = vpack.c.bf16 %v699_v15, %v698_v14 }
 0x168   : > { %v892_v22 = vpack.c.bf16 %v701_v17, %v700_v16  ;;  %v897_v23 = vpack.c.bf16 %v703_v19, %v702_v18 }
 0x169   : > { %883 = vst [vmem:[%s174_s9] sm:$0xff] %v882_v20   ;;  %899 = vst [vmem:[%s174_s9 + $0x8] sm:$0xff] %v887_v21  }
 0x16a   : > { %900 = vst [vmem:[%s174_s9 + $0x10] sm:$0xff] %v892_v22   ;;  %901 = vst [vmem:[%s174_s9 + $0x18] sm:$0xff] %v897_v23  }
 0x16b PF: > { %s12_s11 = sadd.s32 1, %s1060_s11   ;;  %s1198_s9 = smov %s1056_s10 }
 0x16c   : > { %p9_p5 = scmp.ge.s32.totalorder %s12_s11, 4   ;;  %s1199_s10 = smov %s1201_s12 }
 0x16e   :  { %11 = sbr.rel (!%p9_p5) target bundleno = 2 (0x2), region = 67 }

// kernel: discriminator_forward.17
= control target key start
LH: loop header
LB: loop body
LE: loop exit
PB: predicated region body
PF: predicated region fallthrough
CT: control target
= control target key end

     0   :  { %s745_s9 = smov 0   ;;  %s747_s10 = smov 0   ;;  %s836_s0 = inlined_call_operand.vmem [shape: bf16[2,16,288], index: 0, kind: input, shape index: {}]   ;;  %s837_s1 = inlined_call_operand.vmem [shape: bf16[288,128], index: 1, kind: input, shape index: {}]   ;;  %s838_s2 = inlined_call_operand.vmem [shape: bf16[2,16,128], index: 2, kind: output, shape index: {}]  }
   0x1   :  { %s749_s11 = smov 0  }
   0x2 LB: > { %s24_s12 = sadd.s32 1, %s722_s10  ;;  %p582_p0 = scmp.ge.s32.totalorder %s726_s11, 1  ;;  %s726_s11 = sphi %s749_s11, %s12_s11   ;;  %s722_s10 = sphi %s747_s10, %s840_s10   ;;  %s718_s9 = sphi %s745_s9, %s839_s9  }
   0x3   : > { %p26_p1 = scmp.ge.s32.totalorder %s24_s12, 2  ;;  %p132_p2 = scmp.lt.s32.totalorder %s726_s11, 3 }
   0x5   : > { %s842_s12 = smov (%p26_p1, %s24_s12), 0  ;;  %p133_p3 = pnand %p582_p0, %p132_p2 }
   0x6   : > { %v680_v0 = vld [vmem:[%s837_s1 + $0x40] sm:$0xff] (!%p133_p3)   ;;  %v728_v2 = vmov (!%p133_p3), 0.0   ;;  %v682_v3 = vld [vmem:[%s837_s1 + $0x48] sm:$0xff] (!%p133_p3)   ;;  %vm729_vm0 = vmmov (!%p133_p3), 0   ;;  %v684_v5 = vld [vmem:[%s837_s1 + $0x50] sm:$0xff] (!%p133_p3)   ;;  %p160_p4 = scmp.lt.s32.totalorder (!%p133_p3), %s718_s9, 1  ;;  %v452_v43 = vlaneseq (!%p133_p3) }
   0x7   : > { %136 = sbr.rel (%p133_p3) target bundleno = 327 (0x147), region = 28  ;;  %v681_v1 = vld [vmem:[%s837_s1] sm:$0xff] (!%p133_p3)   ;;  %180 = vst [vmem:[#allocation3] sm:$0x1] (!%p133_p3), %v728_v2  ;;  %645 = vmatprep.subr.bf16.mxu1 (!%p133_p3), %v728_v2  ;;  %620 = vmatprep.subr.bf16.mxu0 (!%p133_p3), %v680_v0  ;;  %v683_v4 = vld [vmem:[%s837_s1 + $0x8] sm:$0xff] (!%p133_p3)   ;;  %v685_v6 = vld [vmem:[%s837_s1 + $0x10] sm:$0xff] (!%p133_p3)  }
   0x8   : > { %621 = vmatpush3.bf16.msra.mxu0 (!%p133_p3), %v681_v1  ;;  %649 = vmatprep.mubr.msk.bf16.mxu1 (!%p133_p3), %vm729_vm0, %v728_v2  ;;  %v686_v7 = vld [vmem:[%s837_s1 + $0x58] sm:$0xff] (!%p133_p3)   ;;  %v688_v9 = vld [vmem:[%s837_s1 + $0x60] sm:$0xff] (!%p133_p3)   ;;  %v690_v12 = vld [vmem:[%s837_s1 + $0x68] sm:$0xff] (!%p133_p3)   ;;  %vm344_vm1 = vcmask (!%p133_p3), 261120   ;;  %v453_v44 = vshrl.u32 (!%p133_p3), %v452_v43, 7 }
   0x9   : > { %622 = vmatprep.subr.bf16.mxu0 (!%p133_p3), %v682_v3  ;;  %v687_v8 = vld [vmem:[%s837_s1 + $0x18] sm:$0xff] (!%p133_p3)   ;;  %v694_v10 = vld [vmem:[%s837_s1 + $0x80] sm:$0xff] (!%p133_p3)   ;;  %v697_v13 = vld [vmem:[%s837_s1 + $0x88] sm:$0xff] (!%p133_p3)  }
   0xa   : > { %v689_v11 = vld [vmem:[%s837_s1 + $0x20] sm:$0xff] (!%p133_p3)   ;;  %646 = vmatpush3.bf16.msra.mxu1 (!%p133_p3), %v694_v10  ;;  %v691_v14 = vld [vmem:[%s837_s1 + $0x28] sm:$0xff] (!%p133_p3)   ;;  %v692_v16 = vld [vmem:[%s837_s1 + $0x70] sm:$0xff] (!%p133_p3)   ;;  %v454_v45 = vsub.s32 (!%p133_p3), 0, %v453_v44 }
   0xb   : > { %647 = vmatprep.subr.bf16.mxu1 (!%p133_p3), %v728_v2  ;;  %v693_v18 = vld [vmem:[%s837_s1 + $0x30] sm:$0xff] (!%p133_p3)   ;;  %v695_v19 = vld [vmem:[%s837_s1 + $0x78] sm:$0xff] (!%p133_p3)  }
   0xc   : > { %623 = vmatpush3.bf16.msra.mxu0 (!%p133_p3), %v683_v4  ;;  %v696_v20 = vld [vmem:[%s837_s1 + $0x38] sm:$0xff] (!%p133_p3)  }
   0xd   : > { %624 = vmatprep.subr.bf16.mxu0 (!%p133_p3), %v684_v5 }
   0xe   : > { %s844_s9 = smov (!%p160_p4, %s718_s9), 1  ;;  %648 = vmatpush3.bf16.msra.mxu1 %v697_v13  ;;  %v434_v40 = vld [vmem:[#allocation3] sm:$0x1] }
   0xf   : > { %s653_s3 = smul.u32 24, %s844_s9  ;;  %s612_s29 = sshll.u32 %s844_s9, 3 }
  0x10   : > { %625 = vmatpush3.bf16.msra.mxu0 %v685_v6  ;;  %s174_s4 = scalar_lea.vmem %s838_s2, %s612_s29 }
  0x11   : > { %626 = vmatprep.subr.bf16.mxu0 %v686_v7  ;;  %s168_s16 = scalar_lea.vmem %s836_s0, %s653_s3 }
  0x12   : > { %v700_v15 = vld [vmem:[%s168_s16 + $0x4] ss:$12 sps:$4 sm:$0xff]   ;;  %v701_v17 = vld [vmem:[%s168_s16 + $0x8] ss:$12 sps:$4 sm:$0xff]   ;;  %v698_v21 = vld [vmem:[%s168_s16] ss:$12 sps:$4 sm:$0xff]  }
  0x13   : > { %380 = vmatprep.mubr.bf16.mxu0 %v700_v15  ;;  %650 = vmatmul.mubr.msk.bf16.vlgmr.msra.gmra.mrb[0].mxu1 %vm344_vm1, %v701_v17 }
  0x14   : > { %627 = vmatpush3.bf16.msra.mxu0 %v687_v8 }
  0x15   : > { %628 = vmatprep.subr.bf16.mxu0 %v688_v9 }
  0x18   : > { %629 = vmatpush3.bf16.msra.mxu0 %v689_v11 }
  0x19   : > { %630 = vmatprep.subr.bf16.mxu0 %v690_v12 }
  0x1c   : > { %631 = vmatpush3.bf16.msra.mxu0 %v691_v14 }
  0x1d   : > { %632 = vmatprep.subr.bf16.mxu0 %v692_v16 }
  0x20   : > { %633 = vmatpush3.bf16.msra.mxu0 %v693_v18 }
  0x21   : > { %634 = vmatprep.subr.bf16.mxu0 %v695_v19 }
  0x24   : > { %635 = vmatpush3.bf16.msra.mxu0 %v696_v20 }
  0x27   : > { %381 = vmatmul.mubr.bf16.vlgmr.msra.gmra.mrb[0].mxu0 %v698_v21 }
  0xe6   : > { %v423_v22 = vpop.f32.mrb[0].mxu1 }
  0xe7   : > { %v651_v23 = vpop.f32.mrb[1].mxu1 }
  0xe8   : > { %v426_v24 = vpop.f32.mrb[2].mxu1 }
  0xe9   : > { %v652_v25 = vpop.f32.mrb[3].mxu1 }
  0xfa   : > { %v636_v26 = vpop.f32.mrb[0].mxu0 }
  0xfb   : > { %v637_v27 = vpop.f32.mrb[1].mxu0 }
  0xfc   : > { %v638_v28 = vadd.f32 %v637_v27, %v636_v26  ;;  %v639_v29 = vpop.f32.mrb[2].mxu0 }
  0xfd   : > { %v640_v30 = vpop.f32.mrb[3].mxu0 }
  0xfe   : > { %v424_v31 = vadd.f32 %v638_v28, %v423_v22  ;;  %v641_v32 = vadd.f32 %v640_v30, %v639_v29 }
 0x100   : > { %v427_v33 = vadd.f32 %v641_v32, %v426_v24 }
 0x102   : > { %v435_v34 = vadd.f32 %v427_v33, %v424_v31 }
 0x104   : > { %v436_v35 = vrot.slane %v435_v34, 4 }
 0x106   : > { %v437_v36 = vadd.f32 %v436_v35, %v435_v34 }
 0x108   : > { %v438_v37 = vrot.slane %v437_v36, 2 }
 0x10a   : > { %v439_v38 = vadd.f32 %v438_v37, %v437_v36 }
 0x10c   : > { %v440_v39 = vrot.slane %v439_v38, 1 }
 0x10e   : > { %v441_v41 = vadd.f32 %v440_v39, %v439_v38 }
 0x110   : > { %v442_v42 = vadd.f32 %v441_v41, %v434_v40 }
 0x112   : > { %443 = vst [vmem:[#allocation3] sm:$0x1] %v442_v42 }
 0x119   : > { %v447_v46 = vld [vmem:[#allocation3] sm:$0x1] }
 0x11a   : > { %v448_v47 = vmul.f32 0.0625, %v447_v46 }
 0x11c   : > { %v455_v48 = vrot.slane %v448_v47, %v454_v45 }
 0x11e   : > { %v457_v49 = vsub.f32 %v424_v31, %v455_v48  ;;  %v458_v50 = vsub.f32 %v427_v33, %v455_v48 }
 0x120   : > { %v473_v51 = vmul.f32 %v457_v49, %v457_v49  ;;  %v474_v52 = vmul.f32 %v458_v50, %v458_v50 }
 0x122   : > { %v475_v53 = vadd.f32 %v474_v52, %v473_v51 }
 0x124   : > { %v476_v54 = vrot.slane %v475_v53, 4 }
 0x126   : > { %v477_v55 = vadd.f32 %v476_v54, %v475_v53 }
 0x128   : > { %v478_v56 = vrot.slane %v477_v55, 2 }
 0x12a   : > { %v479_v57 = vadd.f32 %v478_v56, %v477_v55 }
 0x12c   : > { %v480_v58 = vrot.slane %v479_v57, 1 }
 0x12e   : > { %v481_v59 = vadd.f32 %v480_v58, %v479_v57 }
 0x130   : > { %v483_v60 = vmul.f32 0.0625, %v481_v59 }
 0x132   : > { %v484_v61 = vadd.f32 1e-05, %v483_v60 }
 0x134   : > { %702 = vrsqrt.f32 %v484_v61 }
 0x13e   : > { %v703_v62 = vpop.eup %702 }
 0x13f   : > { %v486_v63 = vmul.f32 %v703_v62, %v457_v49  ;;  %v487_v0 = vmul.f32 %v703_v62, %v458_v50 }
 0x141   : > { %vm488_vm2 = vcmp.ge.f32.partialorder %v486_v63, 0.0  ;;  %vm489_vm3 = vcmp.ge.f32.partialorder %v487_v0, 0.0  ;;  %v490_v1 = vmul.f32 0.2, %v486_v63  ;;  %v491_v2 = vmul.f32 0.2, %v487_v0 }
 0x143   : > { %v492_v3 = vsel %vm488_vm2, %v486_v63, %v490_v1  ;;  %v493_v4 = vsel %vm489_vm3, %v487_v0, %v491_v2 }
 0x144   : > { %v618_v5 = vpack.c.bf16 %v493_v4, %v492_v3 }
 0x146   : > { %619 = vst [vmem:[%s174_s4] sm:$0xff] %v618_v5  }
 0x147 PF: > { %s12_s11 = sadd.s32 1, %s726_s11   ;;  %s839_s9 = smov %s722_s10 }
 0x148   : > { %p9_p5 = scmp.ge.s32.totalorder %s12_s11, 4   ;;  %s840_s10 = smov %s842_s12 }
 0x14a   :  { %11 = sbr.rel (!%p9_p5) target bundleno = 2 (0x2), region = 67 }

// kernel: discriminator_forward.18
= control target key start
LH: loop header
LB: loop body
LE: loop exit
PB: predicated region body
PF: predicated region fallthrough
CT: control target
= control target key end

     0   :  { %s1011_s9 = smov 0   ;;  %s1013_s10 = smov 0   ;;  %s1166_s0 = inlined_call_operand.vmem [shape: bf16[2,16,576], index: 0, kind: input, shape index: {}]   ;;  %s1167_s1 = inlined_call_operand.vmem [shape: bf16[576,128], index: 1, kind: input, shape index: {}]   ;;  %s1168_s2 = inlined_call_operand.vmem [shape: bf16[2,16,128], index: 2, kind: output, shape index: {}]  }
   0x1   :  { %s1015_s11 = smov 0  }
   0x2 LB: > { %s24_s12 = sadd.s32 1, %s988_s10  ;;  %p779_p0 = scmp.ge.s32.totalorder %s992_s11, 1  ;;  %s992_s11 = sphi %s1015_s11, %s12_s11   ;;  %s988_s10 = sphi %s1013_s10, %s1170_s10   ;;  %s984_s9 = sphi %s1011_s9, %s1169_s9  }
   0x3   : > { %p26_p1 = scmp.ge.s32.totalorder %s24_s12, 2  ;;  %p132_p2 = scmp.lt.s32.totalorder %s992_s11, 3 }
   0x5   : > { %s1172_s12 = smov (%p26_p1, %s24_s12), 0  ;;  %p133_p3 = pnand %p779_p0, %p132_p2 }
   0x6   : > { %v925_v0 = vld [vmem:[%s1167_s1 + $0x40] sm:$0xff] (!%p133_p3)   ;;  %v994_v3 = vmov (!%p133_p3), 0.0   ;;  %v929_v5 = vld [vmem:[%s1167_s1 + $0x48] sm:$0xff] (!%p133_p3)   ;;  %v933_v9 = vld [vmem:[%s1167_s1 + $0x50] sm:$0xff] (!%p133_p3)   ;;  %p160_p4 = scmp.lt.s32.totalorder (!%p133_p3), %s984_s9, 1  ;;  %vm995_vm0 = vmmov (!%p133_p3), 0  }
   0x7   : > { %136 = sbr.rel (%p133_p3) target bundleno = 341 (0x155), region = 28  ;;  %v926_v1 = vld [vmem:[%s1167_s1 + $0xc0] sm:$0xff] (!%p133_p3)   ;;  %837 = vmatprep.subr.bf16.mxu0 (!%p133_p3), %v925_v0  ;;  %180 = vst [vmem:[#allocation3] sm:$0x1] (!%p133_p3), %v994_v3  ;;  %v930_v6 = vld [vmem:[%s1167_s1 + $0xc8] sm:$0xff] (!%p133_p3)   ;;  %v934_v10 = vld [vmem:[%s1167_s1 + $0xd0] sm:$0xff] (!%p133_p3)  }
   0x8   : > { %v927_v2 = vld [vmem:[%s1167_s1] sm:$0xff] (!%p133_p3)   ;;  %859 = vmatprep.subr.bf16.mxu1 (!%p133_p3), %v926_v1  ;;  %v931_v7 = vld [vmem:[%s1167_s1 + $0x8] sm:$0xff] (!%p133_p3)   ;;  %v935_v11 = vld [vmem:[%s1167_s1 + $0x10] sm:$0xff] (!%p133_p3)   ;;  %vm500_vm1 = vcmask (!%p133_p3), 523264  }
   0x9   : > { %v928_v4 = vld [vmem:[%s1167_s1 + $0x80] sm:$0xff] (!%p133_p3)   ;;  %838 = vmatpush3.bf16.msra.mxu0 (!%p133_p3), %v927_v2  ;;  %v932_v8 = vld [vmem:[%s1167_s1 + $0x88] sm:$0xff] (!%p133_p3)   ;;  %v936_v12 = vld [vmem:[%s1167_s1 + $0x90] sm:$0xff] (!%p133_p3)  }
   0xa   : > { %860 = vmatpush3.bf16.msra.mxu1 (!%p133_p3), %v928_v4  ;;  %839 = vmatprep.subr.bf16.mxu0 (!%p133_p3), %v929_v5  ;;  %v937_v13 = vld [vmem:[%s1167_s1 + $0x58] sm:$0xff] (!%p133_p3)   ;;  %v941_v17 = vld [vmem:[%s1167_s1 + $0x60] sm:$0xff] (!%p133_p3)   ;;  %v945_v21 = vld [vmem:[%s1167_s1 + $0x68] sm:$0xff] (!%p133_p3)  }
   0xb   : > { %861 = vmatprep.subr.bf16.mxu1 (!%p133_p3), %v930_v6  ;;  %v938_v14 = vld [vmem:[%s1167_s1 + $0xd8] sm:$0xff] (!%p133_p3)   ;;  %v942_v18 = vld [vmem:[%s1167_s1 + $0xe0] sm:$0xff] (!%p133_p3)   ;;  %v946_v22 = vld [vmem:[%s1167_s1 + $0xe8] sm:$0xff] (!%p133_p3)  }
   0xc   : > { %v939_v15 = vld [vmem:[%s1167_s1 + $0x18] sm:$0xff] (!%p133_p3)   ;;  %v943_v19 = vld [vmem:[%s1167_s1 + $0x20] sm:$0xff] (!%p133_p3)   ;;  %v947_v23 = vld [vmem:[%s1167_s1 + $0x28] sm:$0xff] (!%p133_p3)  }
   0xd   : > { %840 = vmatpush3.bf16.msra.mxu0 (!%p133_p3), %v931_v7  ;;  %v940_v16 = vld [vmem:[%s1167_s1 + $0x98] sm:$0xff] (!%p133_p3)   ;;  %v944_v20 = vld [vmem:[%s1167_s1 + $0xa0] sm:$0xff] (!%p133_p3)   ;;  %v948_v24 = vld [vmem:[%s1167_s1 + $0xa8] sm:$0xff] (!%p133_p3)   ;;  %v649_v7 = vlaneseq (!%p133_p3) }
   0xe   : > { %862 = vmatpush3.bf16.msra.mxu1 %v932_v8  ;;  %841 = vmatprep.subr.bf16.mxu0 %v933_v9  ;;  %s1174_s9 = smov (!%p160_p4, %s984_s9), 1  ;;  %v949_v25 = vld [vmem:[%s1167_s1 + $0x70] sm:$0xff]   ;;  %v953_v29 = vld [vmem:[%s1167_s1 + $0x78] sm:$0xff]   ;;  %v963_v37 = vld [vmem:[%s1167_s1 + $0x100] sm:$0xff]  }
   0xf   : > { %863 = vmatprep.subr.bf16.mxu1 %v934_v10  ;;  %v950_v26 = vld [vmem:[%s1167_s1 + $0xf0] sm:$0xff]   ;;  %s898_s17 = smul.u32 40, %s1174_s9  ;;  %v954_v30 = vld [vmem:[%s1167_s1 + $0xf8] sm:$0xff]   ;;  %v964_v38 = vld [vmem:[%s1167_s1 + $0x108] sm:$0xff]   ;;  %v650_v8 = vshrl.u32 %v649_v7, 7 }
  0x10   : > { %v951_v27 = vld [vmem:[%s1167_s1 + $0x30] sm:$0xff]   ;;  %v955_v31 = vld [vmem:[%s1167_s1 + $0x38] sm:$0xff]   ;;  %v631_v4 = vld [vmem:[#allocation3] sm:$0x1] }
  0x11   : > { %842 = vmatpush3.bf16.msra.mxu0 %v935_v11  ;;  %v952_v28 = vld [vmem:[%s1167_s1 + $0xb0] sm:$0xff]   ;;  %s168_s28 = scalar_lea.vmem %s1166_s0, %s898_s17  ;;  %v956_v32 = vld [vmem:[%s1167_s1 + $0xb8] sm:$0xff]   ;;  %v651_v9 = vsub.s32 0, %v650_v8  ;;  %s829_s17 = sshll.u32 %s1174_s9, 3 }
  0x12   : > { %864 = vmatpush3.bf16.msra.mxu1 %v936_v12  ;;  %843 = vmatprep.subr.bf16.mxu0 %v937_v13  ;;  %v957_v33 = vld [vmem:[%s168_s28] ss:$20 sps:$4 sm:$0xff]   ;;  %v959_v34 = vld [vmem:[%s168_s28 + $0x4] ss:$20 sps:$4 sm:$0xff]   ;;  %v960_v35 = vld [vmem:[%s168_s28 + $0x8] ss:$20 sps:$4 sm:$0xff]   ;;  %s174_s20 = scalar_lea.vmem %s1168_s2, %s829_s17 }
  0x13   : > { %865 = vmatprep.subr.bf16.mxu1 %v938_v14  ;;  %v962_v36 = vld [vmem:[%s168_s28 + $0xc] ss:$20 sps:$4 sm:$0xff]   ;;  %536 = vmatprep.mubr.bf16.mxu0 %v959_v34  ;;  %v965_v39 = vld [vmem:[%s1167_s1 + $0x110] sm:$0xff]   ;;  %v966_v40 = vld [vmem:[%s1167_s1 + $0x118] sm:$0xff]  }
  0x14   : > { %577 = vmatprep.mubr.bf16.mxu1 %v962_v36  ;;  %v967_v41 = vld [vmem:[%s168_s28 + $0x10] ss:$20 sps:$4 sm:$0xff]  }
  0x15   : > { %844 = vmatpush3.bf16.msra.mxu0 %v939_v15 }
  0x16   : > { %866 = vmatpush3.bf16.msra.mxu1 %v940_v16  ;;  %845 = vmatprep.subr.bf16.mxu0 %v941_v17 }
  0x17   : > { %867 = vmatprep.subr.bf16.mxu1 %v942_v18 }
  0x19   : > { %846 = vmatpush3.bf16.msra.mxu0 %v943_v19 }
  0x1a   : > { %868 = vmatpush3.bf16.msra.mxu1 %v944_v20  ;;  %847 = vmatprep.subr.bf16.mxu0 %v945_v21 }
  0x1b   : > { %869 = vmatprep.subr.bf16.mxu1 %v946_v22 }
  0x1d   : > { %848 = vmatpush3.bf16.msra.mxu0 %v947_v23 }
  0x1e   : > { %870 = vmatpush3.bf16.msra.mxu1 %v948_v24  ;;  %849 = vmatprep.subr.bf16.mxu0 %v949_v25 }
  0x1f   : > { %871 = vmatprep.subr.bf16.mxu1 %v950_v26 }
  0x21   : > { %850 = vmatpush3.bf16.msra.mxu0 %v951_v27 }
  0x22   : > { %872 = vmatpush3.bf16.msra.mxu1 %v952_v28  ;;  %851 = vmatprep.subr.bf16.mxu0 %v953_v29 }
  0x23   : > { %873 = vmatprep.subr.bf16.mxu1 %v954_v30 }
  0x25   : > { %852 = vmatpush3.bf16.msra.mxu0 %v955_v31 }
  0x26   : > { %874 = vmatpush3.bf16.msra.mxu1 %v956_v32  ;;  %886 = vmatprep.subr.bf16.mxu0 %v994_v3 }
  0x28   : > { %537 = vmatmul.mubr.bf16.vlgmr.msra.gmra.mrb[0].mxu0 %v957_v33 }
  0x29   : > { %578 = vmatmul.mubr.bf16.vlgmr.msra.gmra.mrb[0].mxu1 %v960_v35  ;;  %887 = vmatpush3.bf16.msra.mxu0 %v963_v37 }
  0x2a   : > { %888 = vmatprep.subr.bf16.mxu0 %v994_v3  ;;  %894 = vmatprep.mubr.msk.bf16.mxu0 %vm995_vm0, %v994_v3 }
  0x2d   : > { %889 = vmatpush3.bf16.msra.mxu0 %v964_v38 }
  0x2e   : > { %890 = vmatprep.subr.bf16.mxu0 %v994_v3 }
  0x31   : > { %891 = vmatpush3.bf16.msra.mxu0 %v965_v39 }
  0x32   : > { %892 = vmatprep.subr.bf16.mxu0 %v994_v3 }
  0x35   : > { %893 = vmatpush3.bf16.msra.mxu0 %v966_v40 }
  0x38   : > { %895 = vmatmul.mubr.msk.bf16.vlgmr.msra.gmra.mrb[4].mxu0 %vm500_vm1, %v967_v41 }
  0xfb   : > { %v853_v42 = vpop.f32.mrb[0].mxu0 }
  0xfc   : > { %v875_v43 = vpop.f32.mrb[0].mxu1  ;;  %v854_v44 = vpop.f32.mrb[1].mxu0 }
  0xfd   : > { %v855_v45 = vadd.f32 %v854_v44, %v853_v42  ;;  %v876_v46 = vpop.f32.mrb[1].mxu1  ;;  %v856_v47 = vpop.f32.mrb[2].mxu0 }
  0xfe   : > { %v877_v48 = vadd.f32 %v876_v46, %v875_v43  ;;  %v878_v49 = vpop.f32.mrb[2].mxu1  ;;  %v857_v50 = vpop.f32.mrb[3].mxu0 }
  0xff   : > { %v858_v51 = vadd.f32 %v857_v50, %v856_v47  ;;  %v879_v52 = vpop.f32.mrb[3].mxu1 }
 0x100   : > { %v880_v53 = vadd.f32 %v879_v52, %v878_v49  ;;  %v580_v54 = vadd.f32 %v877_v48, %v855_v45 }
 0x102   : > { %v583_v55 = vadd.f32 %v880_v53, %v858_v51 }
 0x10b   : > { %v620_v56 = vpop.f32.mrb[4].mxu0 }
 0x10c   : > { %v621_v57 = vadd.f32 %v620_v56, %v580_v54  ;;  %v896_v58 = vpop.f32.mrb[5].mxu0 }
 0x10d   : > { %v623_v59 = vpop.f32.mrb[6].mxu0 }
 0x10e   : > { %v624_v60 = vadd.f32 %v623_v59, %v583_v55  ;;  %v897_v61 = vpop.f32.mrb[7].mxu0 }
 0x110   : > { %v632_v62 = vadd.f32 %v624_v60, %v621_v57 }
 0x112   : > { %v633_v63 = vrot.slane %v632_v62, 4 }
 0x114   : > { %v634_v0 = vadd.f32 %v633_v63, %v632_v62 }
 0x116   : > { %v635_v1 = vrot.slane %v634_v0, 2 }
 0x118   : > { %v636_v2 = vadd.f32 %v635_v1, %v634_v0 }
 0x11a   : > { %v637_v3 = vrot.slane %v636_v2, 1 }
 0x11c   : > { %v638_v5 = vadd.f32 %v637_v3, %v636_v2 }
 0x11e   : > { %v639_v6 = vadd.f32 %v638_v5, %v631_v4 }
 0x120   : > { %640 = vst [vmem:[#allocation3] sm:$0x1] %v639_v6 }
 0x127   : > { %v644_v10 = vld [vmem:[#allocation3] sm:$0x1] }
 0x128   : > { %v645_v11 = vmul.f32 0.0625, %v644_v10 }
 0x12a   : > { %v652_v12 = vrot.slane %v645_v11, %v651_v9 }
 0x12c   : > { %v654_v13 = vsub.f32 %v621_v57, %v652_v12  ;;  %v655_v14 = vsub.f32 %v624_v60, %v652_v12 }
 0x12e   : > { %v670_v15 = vmul.f32 %v654_v13, %v654_v13  ;;  %v671_v16 = vmul.f32 %v655_v14, %v655_v14 }
 0x130   : > { %v672_v17 = vadd.f32 %v671_v16, %v670_v15 }
 0x132   : > { %v673_v18 = vrot.slane %v672_v17, 4 }
 0x134   : > { %v674_v19 = vadd.f32 %v673_v18, %v672_v17 }
 0x136   : > { %v675_v20 = vrot.slane %v674_v19, 2 }
 0x138   : > { %v676_v21 = vadd.f32 %v675_v20, %v674_v19 }
 0x13a   : > { %v677_v22 = vrot.slane %v676_v21, 1 }
 0x13c   : > { %v678_v23 = vadd.f32 %v677_v22, %v676_v21 }
 0x13e   : > { %v680_v24 = vmul.f32 0.0625, %v678_v23 }
 0x140   : > { %v681_v25 = vadd.f32 1e-05, %v680_v24 }
 0x142   : > { %968 = vrsqrt.f32 %v681_v25 }
 0x14c   : > { %v969_v26 = vpop.eup %968 }
 0x14d   : > { %v683_v27 = vmul.f32 %v969_v26, %v654_v13  ;;  %v684_v28 = vmul.f32 %v969_v26, %v655_v14 }
 0x14f   : > { %vm685_vm2 = vcmp.ge.f32.partialorder %v683_v27, 0.0  ;;  %vm686_vm3 = vcmp.ge.f32.partialorder %v684_v28, 0.0  ;;  %v687_v29 = vmul.f32 0.2, %v683_v27  ;;  %v688_v30 = vmul.f32 0.2, %v684_v28 }
 0x151   : > { %v689_v31 = vsel %vm685_vm2, %v683_v27, %v687_v29  ;;  %v690_v32 = vsel %vm686_vm3, %v684_v28, %v688_v30 }
 0x152   : > { %v835_v33 = vpack.c.bf16 %v690_v32, %v689_v31 }
 0x154   : > { %836 = vst [vmem:[%s174_s20] sm:$0xff] %v835_v33  }
 0x155 PF: > { %s12_s11 = sadd.s32 1, %s992_s11   ;;  %s1169_s9 = smov %s988_s10 }
 0x156   : > { %p9_p5 = scmp.ge.s32.totalorder %s12_s11, 4   ;;  %s1170_s10 = smov %s1172_s12 }
 0x158   :  { %11 = sbr.rel (!%p9_p5) target bundleno = 2 (0x2), region = 67 }

// kernel: discriminator_forward.19
= control target key start
LH: loop header
LB: loop body
LE: loop exit
PB: predicated region body
PF: predicated region fallthrough
CT: control target
= control target key end

     0   :  { %s951_s9 = smov 0   ;;  %s953_s10 = smov 0   ;;  %s1106_s0 = inlined_call_operand.vmem [shape: bf16[2,8,576], index: 0, kind: input, shape index: {}]   ;;  %s1107_s1 = inlined_call_operand.vmem [shape: bf16[576,128], index: 1, kind: input, shape index: {}]   ;;  %s1108_s2 = inlined_call_operand.vmem [shape: bf16[2,8,128], index: 2, kind: output, shape index: {}]  }
   0x1   :  { %s955_s11 = smov 0  }
   0x2 LB: > { %s24_s12 = sadd.s32 1, %s928_s10  ;;  %p732_p0 = scmp.ge.s32.totalorder %s932_s11, 1  ;;  %s932_s11 = sphi %s955_s11, %s12_s11   ;;  %s928_s10 = sphi %s953_s10, %s1110_s10   ;;  %s924_s9 = sphi %s951_s9, %s1109_s9  }
   0x3   : > { %p26_p1 = scmp.ge.s32.totalorder %s24_s12, 2  ;;  %p130_p2 = scmp.lt.s32.totalorder %s932_s11, 3 }
   0x5   : > { %s1112_s12 = smov (%p26_p1, %s24_s12), 0  ;;  %p131_p3 = pnand %p732_p0, %p130_p2 }
   0x6   : > { %v867_v0 = vld [vmem:[%s1107_s1 + $0x40] sm:$0xff] (!%p131_p3)   ;;  %v934_v3 = vmov (!%p131_p3), 0.0   ;;  %v871_v5 = vld [vmem:[%s1107_s1 + $0x48] sm:$0xff] (!%p131_p3)   ;;  %v875_v9 = vld [vmem:[%s1107_s1 + $0x50] sm:$0xff] (!%p131_p3)   ;;  %p155_p4 = scmp.lt.s32.totalorder (!%p131_p3), %s924_s9, 1  ;;  %vm935_vm0 = vmmov (!%p131_p3), 0  }
   0x7   : > { %134 = sbr.rel (%p131_p3) target bundleno = 336 (0x150), region = 28  ;;  %v868_v1 = vld [vmem:[%s1107_s1 + $0xc0] sm:$0xff] (!%p131_p3)   ;;  %779 = vmatprep.subr.bf16.mxu0 (!%p131_p3), %v867_v0  ;;  %173 = vst [vmem:[#allocation3] sm:$0x1] (!%p131_p3), %v934_v3  ;;  %v872_v6 = vld [vmem:[%s1107_s1 + $0xc8] sm:$0xff] (!%p131_p3)   ;;  %v876_v10 = vld [vmem:[%s1107_s1 + $0xd0] sm:$0xff] (!%p131_p3)  }
   0x8   : > { %v869_v2 = vld [vmem:[%s1107_s1] sm:$0xff] (!%p131_p3)   ;;  %801 = vmatprep.subr.bf16.mxu1 (!%p131_p3), %v868_v1  ;;  %v873_v7 = vld [vmem:[%s1107_s1 + $0x8] sm:$0xff] (!%p131_p3)   ;;  %v877_v11 = vld [vmem:[%s1107_s1 + $0x10] sm:$0xff] (!%p131_p3)   ;;  %vm482_vm1 = vcmask (!%p131_p3), 523264  }
   0x9   : > { %v870_v4 = vld [vmem:[%s1107_s1 + $0x80] sm:$0xff] (!%p131_p3)   ;;  %780 = vmatpush3.bf16.msra.mxu0 (!%p131_p3), %v869_v2  ;;  %v874_v8 = vld [vmem:[%s1107_s1 + $0x88] sm:$0xff] (!%p131_p3)   ;;  %v878_v12 = vld [vmem:[%s1107_s1 + $0x90] sm:$0xff] (!%p131_p3)  }
   0xa   : > { %802 = vmatpush3.bf16.msra.mxu1 (!%p131_p3), %v870_v4  ;;  %781 = vmatprep.subr.bf16.mxu0 (!%p131_p3), %v871_v5  ;;  %v879_v13 = vld [vmem:[%s1107_s1 + $0x58] sm:$0xff] (!%p131_p3)   ;;  %v883_v17 = vld [vmem:[%s1107_s1 + $0x60] sm:$0xff] (!%p131_p3)   ;;  %v887_v21 = vld [vmem:[%s1107_s1 + $0x68] sm:$0xff] (!%p131_p3)   ;;  %v625_v4 = vlaneseq (!%p131_p3) }
   0xb   : > { %803 = vmatprep.subr.bf16.mxu1 (!%p131_p3), %v872_v6  ;;  %v880_v14 = vld [vmem:[%s1107_s1 + $0xd8] sm:$0xff] (!%p131_p3)   ;;  %v884_v18 = vld [vmem:[%s1107_s1 + $0xe0] sm:$0xff] (!%p131_p3)   ;;  %v888_v22 = vld [vmem:[%s1107_s1 + $0xe8] sm:$0xff] (!%p131_p3)  }
   0xc   : > { %v881_v15 = vld [vmem:[%s1107_s1 + $0x18] sm:$0xff] (!%p131_p3)   ;;  %v885_v19 = vld [vmem:[%s1107_s1 + $0x20] sm:$0xff] (!%p131_p3)   ;;  %v889_v23 = vld [vmem:[%s1107_s1 + $0x28] sm:$0xff] (!%p131_p3)   ;;  %v626_v5 = vshrl.u32 (!%p131_p3), %v625_v4, 7 }
   0xd   : > { %782 = vmatpush3.bf16.msra.mxu0 (!%p131_p3), %v873_v7  ;;  %v882_v16 = vld [vmem:[%s1107_s1 + $0x98] sm:$0xff] (!%p131_p3)   ;;  %v886_v20 = vld [vmem:[%s1107_s1 + $0xa0] sm:$0xff] (!%p131_p3)   ;;  %v890_v24 = vld [vmem:[%s1107_s1 + $0xa8] sm:$0xff] (!%p131_p3)  }
   0xe   : > { %804 = vmatpush3.bf16.msra.mxu1 %v874_v8  ;;  %783 = vmatprep.subr.bf16.mxu0 %v875_v9  ;;  %s1114_s9 = smov (!%p155_p4, %s924_s9), 1  ;;  %v891_v25 = vld [vmem:[%s1107_s1 + $0x70] sm:$0xff]   ;;  %v895_v29 = vld [vmem:[%s1107_s1 + $0x78] sm:$0xff]   ;;  %v904_v39 = vld [vmem:[%s1107_s1 + $0x100] sm:$0xff]   ;;  %v627_v6 = vsub.s32 0, %v626_v5  ;;  %vm635_vm2 = vcmp.lt.s32.totalorder %v626_v5, 4 }
   0xf   : > { %805 = vmatprep.subr.bf16.mxu1 %v876_v10  ;;  %v892_v26 = vld [vmem:[%s1107_s1 + $0xf0] sm:$0xff]   ;;  %s840_s17 = smul.u32 20, %s1114_s9  ;;  %v896_v30 = vld [vmem:[%s1107_s1 + $0xf8] sm:$0xff]   ;;  %v905_v40 = vld [vmem:[%s1107_s1 + $0x108] sm:$0xff]  }
  0x10   : > { %v893_v27 = vld [vmem:[%s1107_s1 + $0x30] sm:$0xff]   ;;  %v897_v31 = vld [vmem:[%s1107_s1 + $0x38] sm:$0xff]   ;;  %v609_v1 = vld [vmem:[#allocation3] sm:$0x1] }
  0x11   : > { %784 = vmatpush3.bf16.msra.mxu0 %v877_v11  ;;  %v894_v28 = vld [vmem:[%s1107_s1 + $0xb0] sm:$0xff]   ;;  %s163_s28 = scalar_lea.vmem %s1106_s0, %s840_s17  ;;  %v898_v32 = vld [vmem:[%s1107_s1 + $0xb8] sm:$0xff]   ;;  %s734_s17 = sshll.u32 %s1114_s9, 2 }
  0x12   : > { %806 = vmatpush3.bf16.msra.mxu1 %v878_v12  ;;  %785 = vmatprep.subr.bf16.mxu0 %v879_v13  ;;  %v174_v33 = vld [vmem:[%s163_s28] sm:$0xff]  ;;  %v175_v36 = vld [vmem:[%s163_s28 + $0x8] sm:$0xff]  ;;  %v906_v41 = vld [vmem:[%s1107_s1 + $0x110] sm:$0xff]   ;;  %s167_s20 = scalar_lea.vmem %s1108_s2, %s734_s17 }
  0x13   : > { %807 = vmatprep.subr.bf16.mxu1 %v880_v14  ;;  %v735_v34 = vcombine.low %v174_v33, %v174_v33  ;;  %v736_v35 = vcombine.high %v174_v33, %v174_v33  ;;  %v737_v37 = vcombine.low %v175_v36, %v175_v36  ;;  %v738_v38 = vcombine.high %v175_v36, %v175_v36  ;;  %v907_v42 = vld [vmem:[%s1107_s1 + $0x118] sm:$0xff]   ;;  %v901_v43 = vld [vmem:[%s163_s28 + $0x10] ss:$0 sps:$4 sm:$0xff]  }
  0x15   : > { %786 = vmatpush3.bf16.msra.mxu0 %v881_v15  ;;  %518 = vmatprep.mubr.bf16.mxu0 %v736_v35 }
  0x16   : > { %808 = vmatpush3.bf16.msra.mxu1 %v882_v16  ;;  %787 = vmatprep.subr.bf16.mxu0 %v883_v17 }
  0x17   : > { %809 = vmatprep.subr.bf16.mxu1 %v884_v18  ;;  %558 = vmatprep.mubr.bf16.mxu1 %v738_v38 }
  0x19   : > { %788 = vmatpush3.bf16.msra.mxu0 %v885_v19 }
  0x1a   : > { %810 = vmatpush3.bf16.msra.mxu1 %v886_v20  ;;  %789 = vmatprep.subr.bf16.mxu0 %v887_v21 }
  0x1b   : > { %811 = vmatprep.subr.bf16.mxu1 %v888_v22 }
  0x1d   : > { %790 = vmatpush3.bf16.msra.mxu0 %v889_v23 }
  0x1e   : > { %812 = vmatpush3.bf16.msra.mxu1 %v890_v24  ;;  %791 = vmatprep.subr.bf16.mxu0 %v891_v25 }
  0x1f   : > { %813 = vmatprep.subr.bf16.mxu1 %v892_v26 }
  0x21   : > { %792 = vmatpush3.bf16.msra.mxu0 %v893_v27 }
  0x22   : > { %814 = vmatpush3.bf16.msra.mxu1 %v894_v28  ;;  %793 = vmatprep.subr.bf16.mxu0 %v895_v29 }
  0x23   : > { %815 = vmatprep.subr.bf16.mxu1 %v896_v30 }
  0x25   : > { %794 = vmatpush3.bf16.msra.mxu0 %v897_v31 }
  0x26   : > { %816 = vmatpush3.bf16.msra.mxu1 %v898_v32  ;;  %828 = vmatprep.subr.bf16.mxu0 %v934_v3 }
  0x28   : > { %519 = vmatmul.mubr.bf16.vlgmr.msra.gmra.mrb[0].mxu0 %v735_v34 }
  0x29   : > { %559 = vmatmul.mubr.bf16.vlgmr.msra.gmra.mrb[0].mxu1 %v737_v37  ;;  %829 = vmatpush3.bf16.msra.mxu0 %v904_v39 }
  0x2a   : > { %830 = vmatprep.subr.bf16.mxu0 %v934_v3  ;;  %836 = vmatprep.mubr.msk.bf16.mxu0 %vm935_vm0, %v934_v3 }
  0x2d   : > { %831 = vmatpush3.bf16.msra.mxu0 %v905_v40 }
  0x2e   : > { %832 = vmatprep.subr.bf16.mxu0 %v934_v3 }
  0x31   : > { %833 = vmatpush3.bf16.msra.mxu0 %v906_v41 }
  0x32   : > { %834 = vmatprep.subr.bf16.mxu0 %v934_v3 }
  0x35   : > { %835 = vmatpush3.bf16.msra.mxu0 %v907_v42 }
  0x38   : > { %837 = vmatmul.mubr.msk.bf16.vlgmr.msra.gmra.mrb[4].mxu0 %vm482_vm1, %v901_v43 }
  0xfb   : > { %v795_v44 = vpop.f32.mrb[0].mxu0 }
  0xfc   : > { %v817_v45 = vpop.f32.mrb[0].mxu1  ;;  %v796_v46 = vpop.f32.mrb[1].mxu0 }
  0xfd   : > { %v797_v47 = vadd.f32 %v796_v46, %v795_v44  ;;  %v818_v48 = vpop.f32.mrb[1].mxu1  ;;  %v798_v49 = vpop.f32.mrb[2].mxu0 }
  0xfe   : > { %v819_v50 = vadd.f32 %v818_v48, %v817_v45  ;;  %v799_v51 = vpop.f32.mrb[3].mxu0  ;;  %v820_v52 = vpop.f32.mrb[2].mxu1 }
  0xff   : > { %v821_v53 = vpop.f32.mrb[3].mxu1 }
 0x100   : > { %v561_v54 = vadd.f32 %v819_v50, %v797_v47 }
 0x10b   : > { %v600_v55 = vpop.f32.mrb[4].mxu0 }
 0x10c   : > { %v601_v56 = vadd.f32 %v600_v55, %v561_v54  ;;  %v838_v57 = vpop.f32.mrb[5].mxu0 }
 0x10d   : > { %v603_v58 = vpop.f32.mrb[6].mxu0 }
 0x10e   : > { %v610_v59 = vrot.slane %v601_v56, 4  ;;  %v839_v60 = vpop.f32.mrb[7].mxu0 }
 0x110   : > { %v611_v61 = vadd.f32 %v610_v59, %v601_v56 }
 0x112   : > { %v612_v62 = vrot.slane %v611_v61, 2 }
 0x114   : > { %v613_v63 = vadd.f32 %v612_v62, %v611_v61 }
 0x116   : > { %v614_v0 = vrot.slane %v613_v63, 1 }
 0x118   : > { %v615_v2 = vadd.f32 %v614_v0, %v613_v63 }
 0x11a   : > { %v616_v3 = vadd.f32 %v615_v2, %v609_v1 }
 0x11c   : > { %617 = vst [vmem:[#allocation3] sm:$0x1] %v616_v3 }
 0x123   : > { %v621_v7 = vld [vmem:[#allocation3] sm:$0x1] }
 0x124   : > { %v622_v8 = vmul.f32 0.25, %v621_v7 }
 0x126   : > { %v628_v9 = vrot.slane %v622_v8, %v627_v6 }
 0x128   : > { %v630_v10 = vsub.f32 %v601_v56, %v628_v9 }
 0x12a   : > { %v638_v11 = vsel %vm635_vm2, %v630_v10, 0.0 }
 0x12b   : > { %v639_v12 = vmul.f32 %v638_v11, %v638_v11 }
 0x12d   : > { %v640_v13 = vrot.slane %v639_v12, 4 }
 0x12f   : > { %v641_v14 = vadd.f32 %v640_v13, %v639_v12 }
 0x131   : > { %v642_v15 = vrot.slane %v641_v14, 2 }
 0x133   : > { %v643_v16 = vadd.f32 %v642_v15, %v641_v14 }
 0x135   : > { %v644_v17 = vrot.slane %v643_v16, 1 }
 0x137   : > { %v645_v18 = vadd.f32 %v644_v17, %v643_v16 }
 0x139   : > { %v647_v19 = vmul.f32 0.25, %v645_v18 }
 0x13b   : > { %v648_v20 = vadd.f32 1e-05, %v647_v19 }
 0x13d   : > { %908 = vrsqrt.f32 %v648_v20 }
 0x147   : > { %v909_v21 = vpop.eup %908 }
 0x148   : > { %v650_v22 = vmul.f32 %v909_v21, %v630_v10 }
 0x14a   : > { %vm651_vm3 = vcmp.ge.f32.partialorder %v650_v22, 0.0  ;;  %v652_v23 = vmul.f32 0.2, %v650_v22 }
 0x14c   : > { %v653_v24 = vsel %vm651_vm3, %v650_v22, %v652_v23 }
 0x14d   : > { %v654_v25 = vpack.c.bf16 %v653_v24, %v653_v24 }
 0x14f   : > { %655 = vst [vmem:[%s167_s20] sm:$0xf] %v654_v25 }
 0x150 PF: > { %s12_s11 = sadd.s32 1, %s932_s11   ;;  %s1109_s9 = smov %s928_s10 }
 0x151   : > { %p9_p5 = scmp.ge.s32.totalorder %s12_s11, 4   ;;  %s1110_s10 = smov %s1112_s12 }
 0x153   :  { %11 = sbr.rel (!%p9_p5) target bundleno = 2 (0x2), region = 67 }

// kernel: discriminator_forward.21
= control target key start
LH: loop header
LB: loop body
LE: loop exit
PB: predicated region body
PF: predicated region fallthrough
CT: control target
= control target key end

     0   :  { %s425_s14 = smov 0   ;;  %s427_s15 = smov 0   ;;  %s465_s0 = inlined_call_operand.vmem [shape: bf16[2,8,576], index: 0, kind: input, shape index: {}]   ;;  %s466_s1 = inlined_call_operand.vmem [shape: f32[1,576], index: 1, kind: input, shape index: {}]   ;;  %s467_s2 = inlined_call_operand.<no memory space> [shape: f32[1,1], index: 2, kind: input, shape index: {}]   ;;  %s468_s3 = inlined_call_operand.vmem [shape: f32[2,8,1], index: 3, kind: output, shape index: {}]  }
   0x1   :  { %v8_v0 = vstv %s467_s2  ;;  %s429_s16 = smov 0  }
   0x2   :  { %9 = vst [vmem:[#allocation2] sm:$0x1] %v8_v0 }
   0x3 LB: > { %s27_s2 = sadd.s32 1, %s396_s15  ;;  %p347_p0 = scmp.ge.s32.totalorder %s400_s16, 1  ;;  %s400_s16 = sphi %s429_s16, %s15_s16   ;;  %s396_s15 = sphi %s427_s15, %s470_s15   ;;  %s392_s14 = sphi %s425_s14, %s469_s14  }
   0x4   : > { %p29_p1 = scmp.ge.s32.totalorder %s27_s2, 2  ;;  %p159_p2 = scmp.lt.s32.totalorder %s400_s16, 3 }
   0x6   : > { %s472_s2 = smov (%p29_p1, %s27_s2), 0  ;;  %p160_p3 = pnand %p347_p0, %p159_p2 }
   0x7   : > { %p189_p4 = scmp.lt.s32.totalorder (!%p160_p3), %s392_s14, 1  ;;  %v215_v1 = vlaneseq (!%p160_p3)  ;;  %v213_v3 = vld [vmem:[%s466_s1] sm:$0x1f] (!%p160_p3)  ;;  %vm248_vm0 = vcmask (!%p160_p3), 523264   ;;  %vm261_vm1 = vcmask (!%p160_p3), 7168  }
   0x8   : > { %163 = sbr.rel (%p160_p3) target bundleno = 177 (0xb1), region = 32 }
   0x9   : > { %v216_v2 = vshrl.u32 (!%p160_p3), %v215_v1, 7  ;;  %v350_v32 = vld [vmem:[#allocation2] ss:$0 sm:$0xff] (!%p160_p3) }
   0xb   : > { %v217_v4 = vsub.s32 (!%p160_p3), 0, %v216_v2  ;;  %v221_v5 = vsub.s32 (!%p160_p3), 1, %v216_v2  ;;  %v225_v6 = vsub.s32 (!%p160_p3), 2, %v216_v2  ;;  %v229_v7 = vsub.s32 (!%p160_p3), 3, %v216_v2 }
   0xc   : > { %v233_v8 = vsub.s32 (!%p160_p3), 4, %v216_v2 }
   0xd   : > { %v218_v9 = vrot.slane (!%p160_p3), %v213_v3, %v217_v4  ;;  %v222_v10 = vrot.slane (!%p160_p3), %v213_v3, %v221_v5  ;;  %v226_v11 = vrot.slane (!%p160_p3), %v213_v3, %v225_v6  ;;  %v230_v15 = vrot.slane (!%p160_p3), %v213_v3, %v229_v7 }
   0xe   : > { %v234_v16 = vrot.slane (!%p160_p3), %v213_v3, %v233_v8 }
   0xf   : > { %s474_s14 = smov (!%p189_p4, %s392_s14), 1 }
  0x10   : > { %s353_s19 = smul.u32 20, %s474_s14  ;;  %s349_s23 = sshll.u32 %s474_s14, 3 }
  0x11   : > { %s204_s26 = scalar_lea.vmem %s468_s3, %s349_s23 }
  0x12   : > { %s197_s22 = scalar_lea.vmem %s465_s0, %s353_s19 }
  0x13   : > { %v205_v12 = vld [vmem:[%s197_s22] sm:$0xff]  ;;  %v206_v13 = vld [vmem:[%s197_s22 + $0x8] sm:$0xff]  ;;  %v207_v14 = vld [vmem:[%s197_s22 + $0x10] sm:$0xf] }
  0x14   : > { %v208_v17 = vunpack.c.l.bf16 %v205_v12  ;;  %v209_v18 = vunpack.c.h.bf16 %v205_v12  ;;  %v210_v19 = vunpack.c.l.bf16 %v206_v13  ;;  %v211_v20 = vunpack.c.h.bf16 %v206_v13 }
  0x15   : > { %v212_v21 = vunpack.c.l.bf16 %v207_v14 }
  0x16   : > { %v240_v22 = vmul.f32 %v218_v9, %v208_v17  ;;  %v241_v23 = vmul.f32 %v222_v10, %v209_v18  ;;  %v242_v24 = vmul.f32 %v226_v11, %v210_v19  ;;  %v243_v26 = vmul.f32 %v230_v15, %v211_v20 }
  0x17   : > { %v244_v25 = vmul.f32 %v234_v16, %v212_v21 }
  0x18   : > { %v245_v27 = vadd.f32 %v241_v23, %v240_v22 }
  0x19   : > { %v249_v29 = vsel %vm248_vm0, %v244_v25, 0.0 }
  0x1a   : > { %v246_v28 = vadd.f32 %v245_v27, %v242_v24 }
  0x1c   : > { %v247_v30 = vadd.f32 %v246_v28, %v243_v26 }
  0x1e   : > { %v250_v31 = vadd.f32 %v249_v29, %v247_v30 }
  0x20   : > { %251 = vadd.xlane.f32.xlu0 %v250_v31 }
  0xad   : > { %v252_v33 = vpop.xlane.xlu0 %251 }
  0xae   : > { %v260_v34 = vadd.f32 %v350_v32, %v252_v33 }
  0xb0   : > { %262 = vst.msk [vmem:[%s204_s26] sm:$0xff] %vm261_vm1, %v260_v34 }
  0xb1 PF: > { %s15_s16 = sadd.s32 1, %s400_s16   ;;  %s469_s14 = smov %s396_s15 }
  0xb2   : > { %p12_p5 = scmp.ge.s32.totalorder %s15_s16, 4   ;;  %s470_s15 = smov %s472_s2 }
  0xb4   :  { %14 = sbr.rel (!%p12_p5) target bundleno = 3 (0x3), region = 62 }

</bundles_post_ra>
